<compile_context>
chip_gen: v7x
topology: tpu7x:2x2x1
jax: 0.10.0
libtpu: 0.0.40
codegen_flags: <defaults>
</compile_context>

<pallas_src>
import functools
import math

import jax
import jax.numpy as jnp
import numpy as np
from jax.experimental import pallas as pl
from jax.experimental.pallas import tpu as pltpu

NUM_CHANNELS = 12
NUM_CLASSES = 17
# (Cout, Cin) of the 5 conv layers of ChannelConvModule
LAYER_DIMS = [(8, 1), (16, 8), (32, 16), (32, 32), (64, 32)]
NUM_LAYERS = len(LAYER_DIMS)
POOL_FACTOR = 2 ** NUM_LAYERS      # 32: total length reduction of the 5 MaxPool1d(2)
BATCH_BLOCK = 8                    # sublane-aligned per-grid-step batch tile


# ---------------------------------------------------------------------------
# Fused kernel: 5 x (conv -> relu -> pool) for all channels + GAP + FC
# ---------------------------------------------------------------------------
def _fused_kernel(*refs, batch, length):
    """refs = (x, [W_l, b_l] * 5, fc_w_t, fc_b, out).

    x      : (L, BB, 12) f32 input tile (time, batch, channel)
    W_l    : (3*C*Cin_l, C*Cout_l) bf16 block-diagonal conv weights, tap-major rows
    b_l    : (1, C*Cout_l) f32 bias
    fc_w_t : (768, 17) bf16 ; fc_b : (1, 17) f32
    out    : (BB, 17) f32 logits
    """
    x_ref = refs[0]
    conv_refs = refs[1:1 + 2 * NUM_LAYERS]
    fcw_ref = refs[1 + 2 * NUM_LAYERS]
    fcb_ref = refs[2 + 2 * NUM_LAYERS]
    o_ref = refs[3 + 2 * NUM_LAYERS]

    B = batch
    # rows ordered t-major / batch-minor: row = t*B + b.  B % 8 == 0, so this
    # reshape (and every one below) is sublane-tile aligned -> free.
    a = x_ref[...].reshape(length * B, NUM_CHANNELS)

    for l in range(NUM_LAYERS):
        w_ref = conv_refs[2 * l]
        b_ref = conv_refs[2 * l + 1]
        rows = a.shape[0]
        fout = b_ref.shape[1]

        # ---- Conv1d(k=3, pad=1), all 12 channels fused ----------------------
        # Time shift of +/-1 step == row shift of +/-B rows (pltpu.roll -> XLU).
        # A narrow (rows, 1) mask implements the zero padding at t==0 / t==L-1
        # and kills the cyclic wrap of the roll.
        t_row = jax.lax.broadcasted_iota(jnp.int32, (rows, 1), 0)
        a_m1 = jnp.where(t_row >= B, pltpu.roll(a, B, axis=0), 0.0)              # x[t-1]
        a_p1 = jnp.where(t_row < rows - B, pltpu.roll(a, rows - B, axis=0), 0.0)  # x[t+1]
        a_aug = jnp.concatenate([a_m1, a, a_p1], axis=1).astype(jnp.bfloat16)

        z = jnp.dot(a_aug, w_ref[...], preferred_element_type=jnp.float32)
        y = jnp.maximum(z + b_ref[...], 0.0)                                      # bias + ReLU

        # ---- MaxPool1d(2): pair rows (2t, 2t+1); reshape is layout-free ------
        y4 = y.reshape(rows // (2 * B), 2, B, fout)
        a = jnp.maximum(y4[:, 0], y4[:, 1]).reshape(rows // 2, fout)

    # ---- AdaptiveAvgPool1d(1) + concat (columns already channel-major) -------
    rows = a.shape[0]
    fdim = a.shape[1]
    feats = jnp.mean(a.reshape(rows // B, B, fdim), axis=0)                       # (B, 768)

    # TODO(synk): nn.Dropout(p=0.3) is identity here (inference mode).
    logits = jnp.dot(feats.astype(jnp.bfloat16), fcw_ref[...],
                     preferred_element_type=jnp.float32) + fcb_ref[...]
    o_ref[...] = logits


# ---------------------------------------------------------------------------
# Host-side parameter preparation
# ---------------------------------------------------------------------------
def _prepare_conv_params(dense_convs):
    """dense (w:(C,3,Cout,Cin), b:(C,Cout)) ->
       (W:(3*C*Cin, C*Cout) bf16 block-diag tap-major rows, b:(1, C*Cout) f32)."""
    out = []
    for (w, b) in dense_convs:
        w = np.asarray(w, np.float32)
        b = np.asarray(b, np.float32)
        C, K, cout, cin = w.shape
        W = np.zeros((K * C * cin, C * cout), np.float32)
        for k in range(K):
            for c in range(C):
                r0 = (k * C + c) * cin
                W[r0:r0 + cin, c * cout:(c + 1) * cout] = w[c, k].T   # (cin, cout)
        out.append((jnp.asarray(W, jnp.bfloat16),
                    jnp.asarray(b.reshape(1, C * cout), jnp.float32)))
    return out


def prepare_params(dense):
    """Convert dense per-channel conv weights into kernel-ready bf16 block-diag form."""
    return {"convs": _prepare_conv_params(dense["convs"]),
            "fc_w_t": jnp.asarray(dense["fc_w_t"], jnp.bfloat16),
            "fc_b": jnp.asarray(dense["fc_b"], jnp.float32).reshape(1, NUM_CLASSES)}


def init_params(key):
    """Random params in the PyTorch layout (w[c,k,o,i] ~ conv.weight[o,i,k] of channel c)."""
    convs = []
    for (cout, cin) in LAYER_DIMS:
        key, kw, kb = jax.random.split(key, 3)
        scale = 1.0 / math.sqrt(cin * 3)
        w = jax.random.uniform(kw, (NUM_CHANNELS, 3, cout, cin), jnp.float32, -scale, scale)
        b = jax.random.uniform(kb, (NUM_CHANNELS, cout), jnp.float32, -scale, scale)
        convs.append((w, b))
    key, kw, kb = jax.random.split(key, 3)
    fin = 64 * NUM_CHANNELS
    fscale = 1.0 / math.sqrt(fin)
    fc_w_t = jax.random.uniform(kw, (fin, NUM_CLASSES), jnp.float32, -fscale, fscale)
    fc_b = jax.random.uniform(kb, (NUM_CLASSES,), jnp.float32, -fscale, fscale)
    return {"convs": convs, "fc_w_t": fc_w_t, "fc_b": fc_b}


# ---------------------------------------------------------------------------
# Model wrapper
# ---------------------------------------------------------------------------
def my_model_forward(x, params):
    """x: (B, 12, L) float32  ->  logits (B, 17)."""
    B, C, L = x.shape
    assert C == NUM_CHANNELS
    assert L % POOL_FACTOR == 0, "sequence length must be divisible by 32"

    BB = BATCH_BLOCK
    B_pad = ((B + BB - 1) // BB) * BB
    if B_pad != B:
        x = jnp.pad(x, ((0, B_pad - B), (0, 0), (0, 0)))
    xt = jnp.transpose(x, (2, 0, 1))             # (L, B_pad, C); fuses under jit

    inputs = [xt]
    in_specs = [pl.BlockSpec((L, BB, C), lambda g: (0, g, 0))]
    for (w, b) in params["convs"]:
        inputs += [w, b]
        in_specs += [pl.BlockSpec(w.shape, lambda g: (0, 0)),     # VMEM-resident
                     pl.BlockSpec(b.shape, lambda g: (0, 0))]
    inputs += [params["fc_w_t"], params["fc_b"]]
    in_specs += [pl.BlockSpec(params["fc_w_t"].shape, lambda g: (0, 0)),
                 pl.BlockSpec(params["fc_b"].shape, lambda g: (0, 0))]

    # ---- cost estimate / VMEM budget derived from actual buffer sizes --------
    weight_bytes = sum(int(np.prod(p.shape)) * p.dtype.itemsize
                       for p in jax.tree_util.tree_leaves(params))
    flops = 0
    act_bytes = 0
    rows = L * BB
    for (cout, cin) in LAYER_DIMS:
        fin, fo = 3 * NUM_CHANNELS * cin, NUM_CHANNELS * cout
        flops += 2 * rows * fin * fo
        act_bytes = max(act_bytes, rows * (fin * 6 + 2 * fo * 4))
        rows //= 2
    flops += 2 * BB * 64 * NUM_CHANNELS * NUM_CLASSES
    flops *= B_pad // BB
    bytes_accessed = int(L * B_pad * C * 4 + weight_bytes + B_pad * NUM_CLASSES * 4)
    vmem_limit = int(min(48 << 20,                       # v7x headroom (64 MiB phys)
                         max(16 << 20,
                             2 * weight_bytes + 2 * (L * BB * C * 4)
                             + 2 * act_bytes + (2 << 20))))

    kernel = functools.partial(_fused_kernel, batch=BB, length=L)
    out = pl.pallas_call(
        kernel,
        grid=(B_pad // BB,),
        in_specs=in_specs,
        out_specs=pl.BlockSpec((BB, NUM_CLASSES), lambda g: (g, 0)),
        out_shape=jax.ShapeDtypeStruct((B_pad, NUM_CLASSES), jnp.float32),
        compiler_params=pltpu.CompilerParams(
            dimension_semantics=("parallel",),
            vmem_limit_bytes=vmem_limit),
        cost_estimate=pl.CostEstimate(flops=flops, transcendentals=0,
                                      bytes_accessed=bytes_accessed),
    )(*inputs)
    return out[:B]


if __name__ == "__main__":
    key = jax.random.PRNGKey(0)
    kp, kx = jax.random.split(key)
    params = prepare_params(init_params(kp))

    B, L = 2, 64                                 # L divisible by 2**5 for the 5 pools
    x = jax.random.normal(kx, (B, NUM_CHANNELS, L), jnp.float32)

    out = jax.jit(my_model_forward)(x, params)
    out = jax.block_until_ready(out)
    assert out.shape == (B, NUM_CLASSES), out.shape
    assert bool(jnp.all(jnp.isfinite(out)))
    print("KERNEL_OK")
</pallas_src>

<mosaic_0001>
module attributes {stable_mosaic.version = 11 : i64} {
  func.func @_fused_kernel(%arg0: i32, %arg1: memref<64x8x12xf32, #tpu.memory_space<vmem>>, %arg2: memref<36x96xbf16, #tpu.memory_space<vmem>>, %arg3: memref<1x96xf32, #tpu.memory_space<vmem>>, %arg4: memref<288x192xbf16, #tpu.memory_space<vmem>>, %arg5: memref<1x192xf32, #tpu.memory_space<vmem>>, %arg6: memref<576x384xbf16, #tpu.memory_space<vmem>>, %arg7: memref<1x384xf32, #tpu.memory_space<vmem>>, %arg8: memref<1152x384xbf16, #tpu.memory_space<vmem>>, %arg9: memref<1x384xf32, #tpu.memory_space<vmem>>, %arg10: memref<1152x768xbf16, #tpu.memory_space<vmem>>, %arg11: memref<1x768xf32, #tpu.memory_space<vmem>>, %arg12: memref<768x17xbf16, #tpu.memory_space<vmem>>, %arg13: memref<1x17xf32, #tpu.memory_space<vmem>>, %arg14: memref<8x17xf32, #tpu.memory_space<vmem>>) attributes {dimension_semantics = [#tpu.dimension_semantics<parallel>], iteration_bounds = array<i64: 1>, scalar_prefetch = 0 : i64, scratch_operands = 0 : i64, tpu.core_type = #tpu.core_type<tc>, window_params = [{transform_indices = @transform_0, window_bounds = array<i64: 64, 8, 12>}, {pipeline_mode = #tpu.pipeline_mode<synchronous>, transform_indices = @transform_1, window_bounds = array<i64: 36, 96>}, {pipeline_mode = #tpu.pipeline_mode<synchronous>, transform_indices = @transform_2, window_bounds = array<i64: 1, 96>}, {pipeline_mode = #tpu.pipeline_mode<synchronous>, transform_indices = @transform_3, window_bounds = array<i64: 288, 192>}, {pipeline_mode = #tpu.pipeline_mode<synchronous>, transform_indices = @transform_4, window_bounds = array<i64: 1, 192>}, {pipeline_mode = #tpu.pipeline_mode<synchronous>, transform_indices = @transform_5, window_bounds = array<i64: 576, 384>}, {pipeline_mode = #tpu.pipeline_mode<synchronous>, transform_indices = @transform_6, window_bounds = array<i64: 1, 384>}, {pipeline_mode = #tpu.pipeline_mode<synchronous>, transform_indices = @transform_7, window_bounds = array<i64: 1152, 384>}, {pipeline_mode = #tpu.pipeline_mode<synchronous>, transform_indices = @transform_8, window_bounds = array<i64: 1, 384>}, {pipeline_mode = #tpu.pipeline_mode<synchronous>, transform_indices = @transform_9, window_bounds = array<i64: 1152, 768>}, {pipeline_mode = #tpu.pipeline_mode<synchronous>, transform_indices = @transform_10, window_bounds = array<i64: 1, 768>}, {pipeline_mode = #tpu.pipeline_mode<synchronous>, transform_indices = @transform_11, window_bounds = array<i64: 768, 17>}, {pipeline_mode = #tpu.pipeline_mode<synchronous>, transform_indices = @transform_12, window_bounds = array<i64: 1, 17>}, {transform_indices = @transform_13, window_bounds = array<i64: 8, 17>}]} {
    %c0 = arith.constant 0 : index
    %c0_0 = arith.constant 0 : index
    %c0_1 = arith.constant 0 : index
    %0 = vector.load %arg1[%c0, %c0_0, %c0_1] : memref<64x8x12xf32, #tpu.memory_space<vmem>>, vector<64x8x12xf32>
    %1 = vector.shape_cast %0 : vector<64x8x12xf32> to vector<512x12xf32>
    %2 = tpu.iota {dimensions = array<i32: 0>} : vector<512x1xi32>
    %c8_i32 = arith.constant 8 : i32
    %3 = vector.broadcast %c8_i32 : i32 to vector<512x1xi32>
    %4 = arith.cmpi sge, %2, %3 : vector<512x1xi32>
    %c8_i32_2 = arith.constant 8 : i32
    %5 = tpu.dynamic_rotate %1 by %c8_i32_2 dim 0 : vector<512x12xf32>, i32 -> vector<512x12xf32>
    %cst = arith.constant 0.000000e+00 : f32
    %6 = vector.shape_cast %4 : vector<512x1xi1> to vector<512x1xi1>
    %7 = vector.broadcast %6 : vector<512x1xi1> to vector<512x12xi1>
    %8 = vector.broadcast %cst : f32 to vector<512x12xf32>
    %9 = arith.select %7, %5, %8 : vector<512x12xi1>, vector<512x12xf32>
    %c504_i32 = arith.constant 504 : i32
    %10 = vector.broadcast %c504_i32 : i32 to vector<512x1xi32>
    %11 = arith.cmpi slt, %2, %10 : vector<512x1xi32>
    %c504_i32_3 = arith.constant 504 : i32
    %12 = tpu.dynamic_rotate %1 by %c504_i32_3 dim 0 : vector<512x12xf32>, i32 -> vector<512x12xf32>
    %cst_4 = arith.constant 0.000000e+00 : f32
    %13 = vector.shape_cast %11 : vector<512x1xi1> to vector<512x1xi1>
    %14 = vector.broadcast %13 : vector<512x1xi1> to vector<512x12xi1>
    %15 = vector.broadcast %cst_4 : f32 to vector<512x12xf32>
    %16 = arith.select %14, %12, %15 : vector<512x12xi1>, vector<512x12xf32>
    %17 = tpu.concatenate %9, %1, %16 in 1 : vector<512x12xf32>, vector<512x12xf32>, vector<512x12xf32> -> vector<512x36xf32>
    %18 = arith.truncf %17 : vector<512x36xf32> to vector<512x36xbf16>
    %c0_5 = arith.constant 0 : index
    %c0_6 = arith.constant 0 : index
    %19 = vector.load %arg2[%c0_5, %c0_6] : memref<36x96xbf16, #tpu.memory_space<vmem>>, vector<36x96xbf16>
    %cst_7 = arith.constant dense<0.000000e+00> : vector<512x96xf32>
    %20 = tpu.matmul %18, %19, %cst_7 {dimension_numbers = #tpu.dot_dimension_numbers<[1], [0], [0], [1], [0, 0, 1, 1], [], []>} : vector<512x36xbf16>, vector<36x96xbf16>, vector<512x96xf32> -> vector<512x96xf32>
    %c0_8 = arith.constant 0 : index
    %c0_9 = arith.constant 0 : index
    %21 = vector.load %arg3[%c0_8, %c0_9] : memref<1x96xf32, #tpu.memory_space<vmem>>, vector<1x96xf32>
    %22 = vector.broadcast %21 : vector<1x96xf32> to vector<512x96xf32>
    %23 = arith.addf %20, %22 : vector<512x96xf32>
    %cst_10 = arith.constant 0.000000e+00 : f32
    %24 = vector.broadcast %cst_10 : f32 to vector<512x96xf32>
    %25 = arith.maximumf %23, %24 : vector<512x96xf32>
    %26 = vector.shape_cast %25 : vector<512x96xf32> to vector<32x2x8x96xf32>
    %27 = vector.extract_strided_slice %26 {offsets = [0, 0, 0, 0], sizes = [32, 1, 8, 96], strides = [1, 1, 1, 1]} : vector<32x2x8x96xf32> to vector<32x1x8x96xf32>
    %28 = vector.shape_cast %27 : vector<32x1x8x96xf32> to vector<32x8x96xf32>
    %29 = vector.extract_strided_slice %26 {offsets = [0, 1, 0, 0], sizes = [32, 1, 8, 96], strides = [1, 1, 1, 1]} : vector<32x2x8x96xf32> to vector<32x1x8x96xf32>
    %30 = vector.shape_cast %29 : vector<32x1x8x96xf32> to vector<32x8x96xf32>
    %31 = arith.maximumf %28, %30 : vector<32x8x96xf32>
    %32 = vector.shape_cast %31 : vector<32x8x96xf32> to vector<256x96xf32>
    %33 = tpu.iota {dimensions = array<i32: 0>} : vector<256x1xi32>
    %c8_i32_11 = arith.constant 8 : i32
    %34 = vector.broadcast %c8_i32_11 : i32 to vector<256x1xi32>
    %35 = arith.cmpi sge, %33, %34 : vector<256x1xi32>
    %c8_i32_12 = arith.constant 8 : i32
    %36 = tpu.dynamic_rotate %32 by %c8_i32_12 dim 0 : vector<256x96xf32>, i32 -> vector<256x96xf32>
    %cst_13 = arith.constant 0.000000e+00 : f32
    %37 = vector.shape_cast %35 : vector<256x1xi1> to vector<256x1xi1>
    %38 = vector.broadcast %37 : vector<256x1xi1> to vector<256x96xi1>
    %39 = vector.broadcast %cst_13 : f32 to vector<256x96xf32>
    %40 = arith.select %38, %36, %39 : vector<256x96xi1>, vector<256x96xf32>
    %c248_i32 = arith.constant 248 : i32
    %41 = vector.broadcast %c248_i32 : i32 to vector<256x1xi32>
    %42 = arith.cmpi slt, %33, %41 : vector<256x1xi32>
    %c248_i32_14 = arith.constant 248 : i32
    %43 = tpu.dynamic_rotate %32 by %c248_i32_14 dim 0 : vector<256x96xf32>, i32 -> vector<256x96xf32>
    %cst_15 = arith.constant 0.000000e+00 : f32
    %44 = vector.shape_cast %42 : vector<256x1xi1> to vector<256x1xi1>
    %45 = vector.broadcast %44 : vector<256x1xi1> to vector<256x96xi1>
    %46 = vector.broadcast %cst_15 : f32 to vector<256x96xf32>
    %47 = arith.select %45, %43, %46 : vector<256x96xi1>, vector<256x96xf32>
    %48 = tpu.concatenate %40, %32, %47 in 1 : vector<256x96xf32>, vector<256x96xf32>, vector<256x96xf32> -> vector<256x288xf32>
    %49 = arith.truncf %48 : vector<256x288xf32> to vector<256x288xbf16>
    %c0_16 = arith.constant 0 : index
    %c0_17 = arith.constant 0 : index
    %50 = vector.load %arg4[%c0_16, %c0_17] : memref<288x192xbf16, #tpu.memory_space<vmem>>, vector<288x192xbf16>
    %cst_18 = arith.constant dense<0.000000e+00> : vector<256x192xf32>
    %51 = tpu.matmul %49, %50, %cst_18 {dimension_numbers = #tpu.dot_dimension_numbers<[1], [0], [0], [1], [0, 0, 1, 1], [], []>} : vector<256x288xbf16>, vector<288x192xbf16>, vector<256x192xf32> -> vector<256x192xf32>
    %c0_19 = arith.constant 0 : index
    %c0_20 = arith.constant 0 : index
    %52 = vector.load %arg5[%c0_19, %c0_20] : memref<1x192xf32, #tpu.memory_space<vmem>>, vector<1x192xf32>
    %53 = vector.broadcast %52 : vector<1x192xf32> to vector<256x192xf32>
    %54 = arith.addf %51, %53 : vector<256x192xf32>
    %cst_21 = arith.constant 0.000000e+00 : f32
    %55 = vector.broadcast %cst_21 : f32 to vector<256x192xf32>
    %56 = arith.maximumf %54, %55 : vector<256x192xf32>
    %57 = vector.shape_cast %56 : vector<256x192xf32> to vector<16x2x8x192xf32>
    %58 = vector.extract_strided_slice %57 {offsets = [0, 0, 0, 0], sizes = [16, 1, 8, 192], strides = [1, 1, 1, 1]} : vector<16x2x8x192xf32> to vector<16x1x8x192xf32>
    %59 = vector.shape_cast %58 : vector<16x1x8x192xf32> to vector<16x8x192xf32>
    %60 = vector.extract_strided_slice %57 {offsets = [0, 1, 0, 0], sizes = [16, 1, 8, 192], strides = [1, 1, 1, 1]} : vector<16x2x8x192xf32> to vector<16x1x8x192xf32>
    %61 = vector.shape_cast %60 : vector<16x1x8x192xf32> to vector<16x8x192xf32>
    %62 = arith.maximumf %59, %61 : vector<16x8x192xf32>
    %63 = vector.shape_cast %62 : vector<16x8x192xf32> to vector<128x192xf32>
    %64 = tpu.iota {dimensions = array<i32: 0>} : vector<128x1xi32>
    %c8_i32_22 = arith.constant 8 : i32
    %65 = vector.broadcast %c8_i32_22 : i32 to vector<128x1xi32>
    %66 = arith.cmpi sge, %64, %65 : vector<128x1xi32>
    %c8_i32_23 = arith.constant 8 : i32
    %67 = tpu.dynamic_rotate %63 by %c8_i32_23 dim 0 : vector<128x192xf32>, i32 -> vector<128x192xf32>
    %cst_24 = arith.constant 0.000000e+00 : f32
    %68 = vector.shape_cast %66 : vector<128x1xi1> to vector<128x1xi1>
    %69 = vector.broadcast %68 : vector<128x1xi1> to vector<128x192xi1>
    %70 = vector.broadcast %cst_24 : f32 to vector<128x192xf32>
    %71 = arith.select %69, %67, %70 : vector<128x192xi1>, vector<128x192xf32>
    %c120_i32 = arith.constant 120 : i32
    %72 = vector.broadcast %c120_i32 : i32 to vector<128x1xi32>
    %73 = arith.cmpi slt, %64, %72 : vector<128x1xi32>
    %c120_i32_25 = arith.constant 120 : i32
    %74 = tpu.dynamic_rotate %63 by %c120_i32_25 dim 0 : vector<128x192xf32>, i32 -> vector<128x192xf32>
    %cst_26 = arith.constant 0.000000e+00 : f32
    %75 = vector.shape_cast %73 : vector<128x1xi1> to vector<128x1xi1>
    %76 = vector.broadcast %75 : vector<128x1xi1> to vector<128x192xi1>
    %77 = vector.broadcast %cst_26 : f32 to vector<128x192xf32>
    %78 = arith.select %76, %74, %77 : vector<128x192xi1>, vector<128x192xf32>
    %79 = tpu.concatenate %71, %63, %78 in 1 : vector<128x192xf32>, vector<128x192xf32>, vector<128x192xf32> -> vector<128x576xf32>
    %80 = arith.truncf %79 : vector<128x576xf32> to vector<128x576xbf16>
    %c0_27 = arith.constant 0 : index
    %c0_28 = arith.constant 0 : index
    %81 = vector.load %arg6[%c0_27, %c0_28] : memref<576x384xbf16, #tpu.memory_space<vmem>>, vector<576x384xbf16>
    %cst_29 = arith.constant dense<0.000000e+00> : vector<128x384xf32>
    %82 = tpu.matmul %80, %81, %cst_29 {dimension_numbers = #tpu.dot_dimension_numbers<[1], [0], [0], [1], [0, 0, 1, 1], [], []>} : vector<128x576xbf16>, vector<576x384xbf16>, vector<128x384xf32> -> vector<128x384xf32>
    %c0_30 = arith.constant 0 : index
    %c0_31 = arith.constant 0 : index
    %83 = vector.load %arg7[%c0_30, %c0_31] : memref<1x384xf32, #tpu.memory_space<vmem>>, vector<1x384xf32>
    %84 = vector.broadcast %83 : vector<1x384xf32> to vector<128x384xf32>
    %85 = arith.addf %82, %84 : vector<128x384xf32>
    %cst_32 = arith.constant 0.000000e+00 : f32
    %86 = vector.broadcast %cst_32 : f32 to vector<128x384xf32>
    %87 = arith.maximumf %85, %86 : vector<128x384xf32>
    %88 = vector.shape_cast %87 : vector<128x384xf32> to vector<8x2x8x384xf32>
    %89 = vector.extract_strided_slice %88 {offsets = [0, 0, 0, 0], sizes = [8, 1, 8, 384], strides = [1, 1, 1, 1]} : vector<8x2x8x384xf32> to vector<8x1x8x384xf32>
    %90 = vector.shape_cast %89 : vector<8x1x8x384xf32> to vector<8x8x384xf32>
    %91 = vector.extract_strided_slice %88 {offsets = [0, 1, 0, 0], sizes = [8, 1, 8, 384], strides = [1, 1, 1, 1]} : vector<8x2x8x384xf32> to vector<8x1x8x384xf32>
    %92 = vector.shape_cast %91 : vector<8x1x8x384xf32> to vector<8x8x384xf32>
    %93 = arith.maximumf %90, %92 : vector<8x8x384xf32>
    %94 = vector.shape_cast %93 : vector<8x8x384xf32> to vector<64x384xf32>
    %95 = tpu.iota {dimensions = array<i32: 0>} : vector<64x1xi32>
    %c8_i32_33 = arith.constant 8 : i32
    %96 = vector.broadcast %c8_i32_33 : i32 to vector<64x1xi32>
    %97 = arith.cmpi sge, %95, %96 : vector<64x1xi32>
    %c8_i32_34 = arith.constant 8 : i32
    %98 = tpu.dynamic_rotate %94 by %c8_i32_34 dim 0 : vector<64x384xf32>, i32 -> vector<64x384xf32>
    %cst_35 = arith.constant 0.000000e+00 : f32
    %99 = vector.shape_cast %97 : vector<64x1xi1> to vector<64x1xi1>
    %100 = vector.broadcast %99 : vector<64x1xi1> to vector<64x384xi1>
    %101 = vector.broadcast %cst_35 : f32 to vector<64x384xf32>
    %102 = arith.select %100, %98, %101 : vector<64x384xi1>, vector<64x384xf32>
    %c56_i32 = arith.constant 56 : i32
    %103 = vector.broadcast %c56_i32 : i32 to vector<64x1xi32>
    %104 = arith.cmpi slt, %95, %103 : vector<64x1xi32>
    %c56_i32_36 = arith.constant 56 : i32
    %105 = tpu.dynamic_rotate %94 by %c56_i32_36 dim 0 : vector<64x384xf32>, i32 -> vector<64x384xf32>
    %cst_37 = arith.constant 0.000000e+00 : f32
    %106 = vector.shape_cast %104 : vector<64x1xi1> to vector<64x1xi1>
    %107 = vector.broadcast %106 : vector<64x1xi1> to vector<64x384xi1>
    %108 = vector.broadcast %cst_37 : f32 to vector<64x384xf32>
    %109 = arith.select %107, %105, %108 : vector<64x384xi1>, vector<64x384xf32>
    %110 = tpu.concatenate %102, %94, %109 in 1 : vector<64x384xf32>, vector<64x384xf32>, vector<64x384xf32> -> vector<64x1152xf32>
    %111 = arith.truncf %110 : vector<64x1152xf32> to vector<64x1152xbf16>
    %c0_38 = arith.constant 0 : index
    %c0_39 = arith.constant 0 : index
    %112 = vector.load %arg8[%c0_38, %c0_39] : memref<1152x384xbf16, #tpu.memory_space<vmem>>, vector<1152x384xbf16>
    %cst_40 = arith.constant dense<0.000000e+00> : vector<64x384xf32>
    %113 = tpu.matmul %111, %112, %cst_40 {dimension_numbers = #tpu.dot_dimension_numbers<[1], [0], [0], [1], [0, 0, 1, 1], [], []>} : vector<64x1152xbf16>, vector<1152x384xbf16>, vector<64x384xf32> -> vector<64x384xf32>
    %c0_41 = arith.constant 0 : index
    %c0_42 = arith.constant 0 : index
    %114 = vector.load %arg9[%c0_41, %c0_42] : memref<1x384xf32, #tpu.memory_space<vmem>>, vector<1x384xf32>
    %115 = vector.broadcast %114 : vector<1x384xf32> to vector<64x384xf32>
    %116 = arith.addf %113, %115 : vector<64x384xf32>
    %cst_43 = arith.constant 0.000000e+00 : f32
    %117 = vector.broadcast %cst_43 : f32 to vector<64x384xf32>
    %118 = arith.maximumf %116, %117 : vector<64x384xf32>
    %119 = vector.shape_cast %118 : vector<64x384xf32> to vector<4x2x8x384xf32>
    %120 = vector.extract_strided_slice %119 {offsets = [0, 0, 0, 0], sizes = [4, 1, 8, 384], strides = [1, 1, 1, 1]} : vector<4x2x8x384xf32> to vector<4x1x8x384xf32>
    %121 = vector.shape_cast %120 : vector<4x1x8x384xf32> to vector<4x8x384xf32>
    %122 = vector.extract_strided_slice %119 {offsets = [0, 1, 0, 0], sizes = [4, 1, 8, 384], strides = [1, 1, 1, 1]} : vector<4x2x8x384xf32> to vector<4x1x8x384xf32>
    %123 = vector.shape_cast %122 : vector<4x1x8x384xf32> to vector<4x8x384xf32>
    %124 = arith.maximumf %121, %123 : vector<4x8x384xf32>
    %125 = vector.shape_cast %124 : vector<4x8x384xf32> to vector<32x384xf32>
    %126 = tpu.iota {dimensions = array<i32: 0>} : vector<32x1xi32>
    %c8_i32_44 = arith.constant 8 : i32
    %127 = vector.broadcast %c8_i32_44 : i32 to vector<32x1xi32>
    %128 = arith.cmpi sge, %126, %127 : vector<32x1xi32>
    %c8_i32_45 = arith.constant 8 : i32
    %129 = tpu.dynamic_rotate %125 by %c8_i32_45 dim 0 : vector<32x384xf32>, i32 -> vector<32x384xf32>
    %cst_46 = arith.constant 0.000000e+00 : f32
    %130 = vector.shape_cast %128 : vector<32x1xi1> to vector<32x1xi1>
    %131 = vector.broadcast %130 : vector<32x1xi1> to vector<32x384xi1>
    %132 = vector.broadcast %cst_46 : f32 to vector<32x384xf32>
    %133 = arith.select %131, %129, %132 : vector<32x384xi1>, vector<32x384xf32>
    %c24_i32 = arith.constant 24 : i32
    %134 = vector.broadcast %c24_i32 : i32 to vector<32x1xi32>
    %135 = arith.cmpi slt, %126, %134 : vector<32x1xi32>
    %c24_i32_47 = arith.constant 24 : i32
    %136 = tpu.dynamic_rotate %125 by %c24_i32_47 dim 0 : vector<32x384xf32>, i32 -> vector<32x384xf32>
    %cst_48 = arith.constant 0.000000e+00 : f32
    %137 = vector.shape_cast %135 : vector<32x1xi1> to vector<32x1xi1>
    %138 = vector.broadcast %137 : vector<32x1xi1> to vector<32x384xi1>
    %139 = vector.broadcast %cst_48 : f32 to vector<32x384xf32>
    %140 = arith.select %138, %136, %139 : vector<32x384xi1>, vector<32x384xf32>
    %141 = tpu.concatenate %133, %125, %140 in 1 : vector<32x384xf32>, vector<32x384xf32>, vector<32x384xf32> -> vector<32x1152xf32>
    %142 = arith.truncf %141 : vector<32x1152xf32> to vector<32x1152xbf16>
    %c0_49 = arith.constant 0 : index
    %c0_50 = arith.constant 0 : index
    %143 = vector.load %arg10[%c0_49, %c0_50] : memref<1152x768xbf16, #tpu.memory_space<vmem>>, vector<1152x768xbf16>
    %cst_51 = arith.constant dense<0.000000e+00> : vector<32x768xf32>
    %144 = tpu.matmul %142, %143, %cst_51 {dimension_numbers = #tpu.dot_dimension_numbers<[1], [0], [0], [1], [0, 0, 1, 1], [], []>} : vector<32x1152xbf16>, vector<1152x768xbf16>, vector<32x768xf32> -> vector<32x768xf32>
    %c0_52 = arith.constant 0 : index
    %c0_53 = arith.constant 0 : index
    %145 = vector.load %arg11[%c0_52, %c0_53] : memref<1x768xf32, #tpu.memory_space<vmem>>, vector<1x768xf32>
    %146 = vector.broadcast %145 : vector<1x768xf32> to vector<32x768xf32>
    %147 = arith.addf %144, %146 : vector<32x768xf32>
    %cst_54 = arith.constant 0.000000e+00 : f32
    %148 = vector.broadcast %cst_54 : f32 to vector<32x768xf32>
    %149 = arith.maximumf %147, %148 : vector<32x768xf32>
    %150 = vector.shape_cast %149 : vector<32x768xf32> to vector<2x2x8x768xf32>
    %151 = vector.extract_strided_slice %150 {offsets = [0, 0, 0, 0], sizes = [2, 1, 8, 768], strides = [1, 1, 1, 1]} : vector<2x2x8x768xf32> to vector<2x1x8x768xf32>
    %152 = vector.shape_cast %151 : vector<2x1x8x768xf32> to vector<2x8x768xf32>
    %153 = vector.extract_strided_slice %150 {offsets = [0, 1, 0, 0], sizes = [2, 1, 8, 768], strides = [1, 1, 1, 1]} : vector<2x2x8x768xf32> to vector<2x1x8x768xf32>
    %154 = vector.shape_cast %153 : vector<2x1x8x768xf32> to vector<2x8x768xf32>
    %155 = arith.maximumf %152, %154 : vector<2x8x768xf32>
    %156 = vector.shape_cast %155 : vector<2x8x768xf32> to vector<16x768xf32>
    %157 = vector.shape_cast %156 : vector<16x768xf32> to vector<2x8x768xf32>
    %cst_55 = arith.constant dense<0.000000e+00> : vector<8x768xf32>
    %158 = vector.multi_reduction <add>, %157, %cst_55 [0] : vector<2x8x768xf32> to vector<8x768xf32>
    %cst_56 = arith.constant 2.000000e+00 : f32
    %159 = vector.broadcast %cst_56 : f32 to vector<8x768xf32>
    %160 = arith.divf %158, %159 : vector<8x768xf32>
    %161 = arith.truncf %160 : vector<8x768xf32> to vector<8x768xbf16>
    %c0_57 = arith.constant 0 : index
    %c0_58 = arith.constant 0 : index
    %162 = vector.load %arg12[%c0_57, %c0_58] : memref<768x17xbf16, #tpu.memory_space<vmem>>, vector<768x17xbf16>
    %cst_59 = arith.constant dense<0.000000e+00> : vector<8x17xf32>
    %163 = tpu.matmul %161, %162, %cst_59 {dimension_numbers = #tpu.dot_dimension_numbers<[1], [0], [0], [1], [0, 0, 1, 1], [], []>} : vector<8x768xbf16>, vector<768x17xbf16>, vector<8x17xf32> -> vector<8x17xf32>
    %c0_60 = arith.constant 0 : index
    %c0_61 = arith.constant 0 : index
    %164 = vector.load %arg13[%c0_60, %c0_61] : memref<1x17xf32, #tpu.memory_space<vmem>>, vector<1x17xf32>
    %165 = vector.broadcast %164 : vector<1x17xf32> to vector<8x17xf32>
    %166 = arith.addf %163, %165 : vector<8x17xf32>
    %c0_62 = arith.constant 0 : index
    %c0_63 = arith.constant 0 : index
    %167 = vector.load %arg14[%c0_62, %c0_63] : memref<8x17xf32, #tpu.memory_space<vmem>>, vector<8x17xf32>
    tpu.vector_store %arg14[%c0_62, %c0_63], %166 {strides = array<i32>} : memref<8x17xf32, #tpu.memory_space<vmem>>, vector<8x17xf32>,
    return
  }
  func.func @transform_0(%arg0: i32) -> (i32, i32, i32) {
    %c0_i32 = arith.constant 0 : i32
    %c0_i32_0 = arith.constant 0 : i32
    %c0_i32_1 = arith.constant 0 : i32
    return %c0_i32, %arg0, %c0_i32_0 : i32, i32, i32
  }
  func.func @transform_1(%arg0: i32) -> (i32, i32) {
    %c0_i32 = arith.constant 0 : i32
    %c0_i32_0 = arith.constant 0 : i32
    %c0_i32_1 = arith.constant 0 : i32
    return %c0_i32, %c0_i32_0 : i32, i32
  }
  func.func @transform_2(%arg0: i32) -> (i32, i32) {
    %c0_i32 = arith.constant 0 : i32
    %c0_i32_0 = arith.constant 0 : i32
    %c0_i32_1 = arith.constant 0 : i32
    return %c0_i32, %c0_i32_0 : i32, i32
  }
  func.func @transform_3(%arg0: i32) -> (i32, i32) {
    %c0_i32 = arith.constant 0 : i32
    %c0_i32_0 = arith.constant 0 : i32
    %c0_i32_1 = arith.constant 0 : i32
    return %c0_i32, %c0_i32_0 : i32, i32
  }
  func.func @transform_4(%arg0: i32) -> (i32, i32) {
    %c0_i32 = arith.constant 0 : i32
    %c0_i32_0 = arith.constant 0 : i32
    %c0_i32_1 = arith.constant 0 : i32
    return %c0_i32, %c0_i32_0 : i32, i32
  }
  func.func @transform_5(%arg0: i32) -> (i32, i32) {
    %c0_i32 = arith.constant 0 : i32
    %c0_i32_0 = arith.constant 0 : i32
    %c0_i32_1 = arith.constant 0 : i32
    return %c0_i32, %c0_i32_0 : i32, i32
  }
  func.func @transform_6(%arg0: i32) -> (i32, i32) {
    %c0_i32 = arith.constant 0 : i32
    %c0_i32_0 = arith.constant 0 : i32
    %c0_i32_1 = arith.constant 0 : i32
    return %c0_i32, %c0_i32_0 : i32, i32
  }
  func.func @transform_7(%arg0: i32) -> (i32, i32) {
    %c0_i32 = arith.constant 0 : i32
    %c0_i32_0 = arith.constant 0 : i32
    %c0_i32_1 = arith.constant 0 : i32
    return %c0_i32, %c0_i32_0 : i32, i32
  }
  func.func @transform_8(%arg0: i32) -> (i32, i32) {
    %c0_i32 = arith.constant 0 : i32
    %c0_i32_0 = arith.constant 0 : i32
    %c0_i32_1 = arith.constant 0 : i32
    return %c0_i32, %c0_i32_0 : i32, i32
  }
  func.func @transform_9(%arg0: i32) -> (i32, i32) {
    %c0_i32 = arith.constant 0 : i32
    %c0_i32_0 = arith.constant 0 : i32
    %c0_i32_1 = arith.constant 0 : i32
    return %c0_i32, %c0_i32_0 : i32, i32
  }
  func.func @transform_10(%arg0: i32) -> (i32, i32) {
    %c0_i32 = arith.constant 0 : i32
    %c0_i32_0 = arith.constant 0 : i32
    %c0_i32_1 = arith.constant 0 : i32
    return %c0_i32, %c0_i32_0 : i32, i32
  }
  func.func @transform_11(%arg0: i32) -> (i32, i32) {
    %c0_i32 = arith.constant 0 : i32
    %c0_i32_0 = arith.constant 0 : i32
    %c0_i32_1 = arith.constant 0 : i32
    return %c0_i32, %c0_i32_0 : i32, i32
  }
  func.func @transform_12(%arg0: i32) -> (i32, i32) {
    %c0_i32 = arith.constant 0 : i32
    %c0_i32_0 = arith.constant 0 : i32
    %c0_i32_1 = arith.constant 0 : i32
    return %c0_i32, %c0_i32_0 : i32, i32
  }
  func.func @transform_13(%arg0: i32) -> (i32, i32) {
    %c0_i32 = arith.constant 0 : i32
    %c0_i32_0 = arith.constant 0 : i32
    return %arg0, %c0_i32 : i32, i32
  }
}

</mosaic_0001>

<bundles_post_ra>
// kernel: my_model_forward.1
= control target key start
LH: loop header
LB: loop body
LE: loop exit
PB: predicated region body
PF: predicated region fallthrough
CT: control target
= control target key end

     0   :  { %18 = vsyncpa [#allocation3], 0  ;;  %s17692_s0 = inlined_call_operand.vmem [shape: f32[64,8,12], index: 0, kind: input, shape index: {}]   ;;  %s17693_s1 = inlined_call_operand.hbm [shape: bf16[36,96], index: 1, kind: input, shape index: {}]   ;;  %s17694_s2 = inlined_call_operand.hbm [shape: f32[1,96], index: 2, kind: input, shape index: {}]   ;;  %s17695_s3 = inlined_call_operand.hbm [shape: bf16[288,192], index: 3, kind: input, shape index: {}]   ;;  %s17696_s4 = inlined_call_operand.hbm [shape: f32[1,192], index: 4, kind: input, shape index: {}]   ;;  %s17697_s5 = inlined_call_operand.hbm [shape: bf16[576,384], index: 5, kind: input, shape index: {}]   ;;  %s17698_s6 = inlined_call_operand.hbm [shape: f32[1,384], index: 6, kind: input, shape index: {}]   ;;  %s17699_s7 = inlined_call_operand.hbm [shape: bf16[1152,384], index: 7, kind: input, shape index: {}]   ;;  %s17700_s8 = inlined_call_operand.hbm [shape: f32[1,384], index: 8, kind: input, shape index: {}]   ;;  %s17701_s9 = inlined_call_operand.hbm [shape: bf16[1152,768], index: 9, kind: input, shape index: {}]   ;;  %s17702_s10 = inlined_call_operand.hbm [shape: f32[1,768], index: 10, kind: input, shape index: {}]   ;;  %s17703_s11 = inlined_call_operand.vmem [shape: bf16[768,17], index: 11, kind: input, shape index: {}]   ;;  %s17704_s12 = inlined_call_operand.hbm [shape: f32[1,17], index: 12, kind: input, shape index: {}]   ;;  %s17705_s13 = inlined_call_operand.vmem [shape: f32[8,17], index: 13, kind: output, shape index: {}]  }
   0x1   :  { %19 = vsyncpa [#allocation5], 0 }
   0x2   :  { %20 = vsyncpa [#allocation8], 0 }
   0x3   :  { %21 = vsyncpa [#allocation11], 0 }
   0x4   :  { %22 = vsyncpa [#allocation14], 0 }
   0x5   :  { %23 = vsyncpa [#allocation17], 0  ;;  %s15377_s25 = smov [#allocation4]   ;;  %s15378_s27 = smov [#allocation7]  }
   0x6   :  { %s44_s26 = sshll.u32 %s15377_s25, 4  ;;  %s66_s28 = sshll.u32 %s15378_s27, 4  ;;  %s45_s26 = int_to_ptr.vmem [resolvable:$true] %s44_s26  ;;  %s67_s28 = int_to_ptr.vmem [resolvable:$true] %s66_s28 }
   0x7   :  { %s15123_s14 = scalar_lea.hbm %s17694_s2, 16 }
   0x8   :  { %p15124_p0 = scmp.ne.s32.totalorder %s17694_s2, %s15123_s14  ;;  %p15127_p1 = scmp.lt.u32.totalorder %s15123_s14, %s17694_s2 }
   0xa   :  { %p15129_p2 = pnand %p15127_p1, %p15124_p0 }
   0xc   :  { %15132 = shalt.err (!%p15129_p2)
}
   0xd   :  { %s15133_s19 = scalar_lea.vmem %s45_s26, 16  ;;  %s15137_s20 = scalar_lea.vmem %s45_s26, 32 }
   0xe   :  { %p15134_p3 = scmp.ne.s32.totalorder %s45_s26, %s15133_s19  ;;  %p15138_p4 = scmp.lt.s32.totalorder %s45_s26, %s45_s26 }
   0xf   :  { %p15139_p5 = scmp.lt.s32.totalorder %s15137_s20, %s15133_s19 }
  0x11   :  { %p15140_p6 = por %p15139_p5, %p15138_p4 }
  0x13   :  { %p15141_p7 = pnand %p15140_p6, %p15134_p3 }
  0x15   :  { %15144 = shalt.err (!%p15141_p7)
}
  0x16   :  { %47 = dma.hbm_to_vmem [thread:$0]  %s17694_s2, 16, %s45_s26, [#allocation5]  }
  0x17   :  { %s15145_s25 = scalar_lea.hbm %s17696_s4, 32 }
  0x18   :  { %p15146_p8 = scmp.ne.s32.totalorder %s17696_s4, %s15145_s25  ;;  %p15149_p9 = scmp.lt.u32.totalorder %s15145_s25, %s17696_s4 }
  0x1a   :  { %p15151_p10 = pnand %p15149_p9, %p15146_p8 }
  0x1c   :  { %15154 = shalt.err (!%p15151_p10)
}
  0x1d   :  { %s15155_s15 = scalar_lea.vmem %s67_s28, 32  ;;  %p15160_p12 = scmp.lt.s32.totalorder %s67_s28, %s67_s28 }
  0x1e   :  { %p15156_p11 = scmp.ne.s32.totalorder %s67_s28, %s15155_s15  ;;  %p15161_p13 = scmp.lt.s32.totalorder %s15155_s15, %s15155_s15 }
  0x20   :  { %p15162_p0 = por %p15161_p13, %p15160_p12 }
  0x22   :  { %p15163_p1 = pnand %p15162_p0, %p15156_p11 }
  0x24   :  { %15166 = shalt.err (!%p15163_p1)
}
  0x25   :  { %69 = dma.hbm_to_vmem [thread:$0]  %s17696_s4, 32, %s67_s28, [#allocation8]  }
  0x26   :  { %s15379_s16 = smov [#allocation10]   ;;  %s15380_s18 = smov [#allocation13]  }
  0x27   :  { %s88_s17 = sshll.u32 %s15379_s16, 4  ;;  %s110_s19 = sshll.u32 %s15380_s18, 4  ;;  %s89_s17 = int_to_ptr.vmem [resolvable:$true] %s88_s17  ;;  %s111_s19 = int_to_ptr.vmem [resolvable:$true] %s110_s19 }
  0x28   :  { %s15167_s22 = scalar_lea.hbm %s17698_s6, 48 }
  0x29   :  { %p15168_p2 = scmp.ne.s32.totalorder %s17698_s6, %s15167_s22  ;;  %p15171_p3 = scmp.lt.u32.totalorder %s15167_s22, %s17698_s6 }
  0x2b   :  { %p15173_p4 = pnand %p15171_p3, %p15168_p2 }
  0x2d   :  { %15176 = shalt.err (!%p15173_p4)
}
  0x2e   :  { %s15177_s4 = scalar_lea.vmem %s89_s17, 48  ;;  %s15181_s28 = scalar_lea.vmem %s89_s17, 64 }
  0x2f   :  { %p15178_p5 = scmp.ne.s32.totalorder %s89_s17, %s15177_s4  ;;  %p15182_p6 = scmp.lt.s32.totalorder %s89_s17, %s89_s17 }
  0x30   :  { %p15183_p7 = scmp.lt.s32.totalorder %s15181_s28, %s15177_s4 }
  0x32   :  { %p15184_p8 = por %p15183_p7, %p15182_p6 }
  0x34   :  { %p15185_p9 = pnand %p15184_p8, %p15178_p5 }
  0x36   :  { %15188 = shalt.err (!%p15185_p9)
}
  0x37   :  { %91 = dma.hbm_to_vmem [thread:$0]  %s17698_s6, 48, %s89_s17, [#allocation11]  }
  0x38   :  { %s15189_s2 = scalar_lea.hbm %s17700_s8, 48 }
  0x39   :  { %p15190_p10 = scmp.ne.s32.totalorder %s17700_s8, %s15189_s2  ;;  %p15193_p11 = scmp.lt.u32.totalorder %s15189_s2, %s17700_s8 }
  0x3b   :  { %p15195_p12 = pnand %p15193_p11, %p15190_p10 }
  0x3d   :  { %15198 = shalt.err (!%p15195_p12)
}
  0x3e   :  { %s15199_s21 = scalar_lea.vmem %s111_s19, 48  ;;  %s15203_s22 = scalar_lea.vmem %s111_s19, 64 }
  0x3f   :  { %p15200_p13 = scmp.ne.s32.totalorder %s111_s19, %s15199_s21  ;;  %p15204_p0 = scmp.lt.s32.totalorder %s111_s19, %s111_s19 }
  0x40   :  { %p15205_p1 = scmp.lt.s32.totalorder %s15203_s22, %s15199_s21 }
  0x42   :  { %p15206_p2 = por %p15205_p1, %p15204_p0 }
  0x44   :  { %p15207_p3 = pnand %p15206_p2, %p15200_p13 }
  0x46   :  { %15210 = shalt.err (!%p15207_p3)
}
  0x47   :  { %113 = dma.hbm_to_vmem [thread:$0]  %s17700_s8, 48, %s111_s19, [#allocation14]  }
  0x48   :  { %s15381_s23 = smov [#allocation16]   ;;  %s15382_s25 = smov [#allocation2]  }
  0x49   :  { %s132_s24 = sshll.u32 %s15381_s23, 4  ;;  %s31_s27 = sshll.u32 %s15382_s25, 4  ;;  %s133_s24 = int_to_ptr.vmem [resolvable:$true] %s132_s24  ;;  %s15518_s27 = int_to_ptr.vmem [resolvable:$true] %s31_s27 }
  0x4a   :  { %s15211_s29 = scalar_lea.hbm %s17702_s10, 96 }
  0x4b   :  { %p15212_p4 = scmp.ne.s32.totalorder %s17702_s10, %s15211_s29  ;;  %p15215_p5 = scmp.lt.u32.totalorder %s15211_s29, %s17702_s10 }
  0x4d   :  { %p15217_p6 = pnand %p15215_p5, %p15212_p4 }
  0x4f   :  { %15220 = shalt.err (!%p15217_p6)
}
  0x50   :  { %s15221_s8 = scalar_lea.vmem %s133_s24, 96  ;;  %p15226_p8 = scmp.lt.s32.totalorder %s133_s24, %s133_s24 }
  0x51   :  { %p15222_p7 = scmp.ne.s32.totalorder %s133_s24, %s15221_s8  ;;  %p15227_p9 = scmp.lt.s32.totalorder %s15221_s8, %s15221_s8 }
  0x53   :  { %p15228_p10 = por %p15227_p9, %p15226_p8 }
  0x55   :  { %p15229_p11 = pnand %p15228_p10, %p15222_p7 }
  0x57   :  { %15232 = shalt.err (!%p15229_p11)
}
  0x58   :  { %135 = dma.hbm_to_vmem [thread:$0]  %s17702_s10, 96, %s133_s24, [#allocation17]  }
  0x59   :  { %s15233_s20 = scalar_lea.hbm %s17693_s1, 320 }
  0x5a   :  { %p15234_p12 = scmp.ne.s32.totalorder %s17693_s1, %s15233_s20  ;;  %p15237_p13 = scmp.lt.u32.totalorder %s15233_s20, %s17693_s1 }
  0x5c   :  { %p15239_p0 = pnand %p15237_p13, %p15234_p12 }
  0x5e   :  { %15242 = shalt.err (!%p15239_p0)
}
  0x5f   :  { %s15243_s23 = scalar_lea.vmem %s15518_s27, 320  ;;  %p15248_p2 = scmp.lt.s32.totalorder %s15518_s27, %s15518_s27 }
  0x60   :  { %p15244_p1 = scmp.ne.s32.totalorder %s15518_s27, %s15243_s23  ;;  %p15249_p3 = scmp.lt.s32.totalorder %s15243_s23, %s15243_s23 }
  0x62   :  { %p15250_p4 = por %p15249_p3, %p15248_p2 }
  0x64   :  { %p15251_p5 = pnand %p15250_p4, %p15244_p1 }
  0x66   :  { %15254 = shalt.err (!%p15251_p5)
}
  0x67   :  { %s15383_s10 = smov 64   ;;  %s15384_s24 = smov 4  }
  0x68   :  { %37 = dma.hbm_to_vmem [thread:$0]  %s17693_s1, 320, %s15518_s27, [#allocation3], %s15383_s10, %s15383_s10, %s15384_s24  }
  0x69   :  { %s15385_s28 = smov [#allocation6]   ;;  %s15255_s15 = scalar_lea.hbm %s17695_s3, 4608 }
  0x6a   :  { %s53_s29 = sshll.u32 %s15385_s28, 4  ;;  %p15256_p6 = scmp.ne.s32.totalorder %s17695_s3, %s15255_s15  ;;  %s54_s29 = int_to_ptr.vmem [resolvable:$true] %s53_s29 }
  0x6b   :  { %p15259_p7 = scmp.lt.u32.totalorder %s15255_s15, %s17695_s3 }
  0x6d   :  { %p15261_p8 = pnand %p15259_p7, %p15256_p6 }
  0x6f   :  { %15264 = shalt.err (!%p15261_p8)
}
  0x70   :  { %s15265_s16 = scalar_lea.vmem %s54_s29, 4608  ;;  %p15270_p10 = scmp.lt.s32.totalorder %s54_s29, %s54_s29 }
  0x71   :  { %p15266_p9 = scmp.ne.s32.totalorder %s54_s29, %s15265_s16  ;;  %p15271_p11 = scmp.lt.s32.totalorder %s15265_s16, %s15265_s16 }
  0x73   :  { %p15272_p12 = por %p15271_p11, %p15270_p10 }
  0x75   :  { %p15273_p13 = pnand %p15272_p12, %p15266_p9 }
  0x77   :  { %15276 = shalt.err (!%p15273_p13)
}
  0x78   :  { %s15386_s1 = smov 128   ;;  %s15387_s27 = smov 8  }
  0x79   :  { %59 = dma.hbm_to_vmem [thread:$0]  %s17695_s3, 4608, %s54_s29, [#allocation5], %s15386_s1, %s15386_s1, %s15387_s27  }
  0x7a   :  { %s15388_s21 = smov [#allocation9]   ;;  %s15277_s23 = scalar_lea.hbm %s17697_s5, 13824 }
  0x7b   :  { %s75_s22 = sshll.u32 %s15388_s21, 4  ;;  %p15278_p0 = scmp.ne.s32.totalorder %s17697_s5, %s15277_s23  ;;  %s76_s22 = int_to_ptr.vmem [resolvable:$true] %s75_s22 }
  0x7c   :  { %p15281_p1 = scmp.lt.u32.totalorder %s15277_s23, %s17697_s5 }
  0x7e   :  { %p15283_p2 = pnand %p15281_p1, %p15278_p0 }
  0x80   :  { %15286 = shalt.err (!%p15283_p2)
}
  0x81   :  { %s15287_s30 = scalar_lea.vmem %s76_s22, 13824  ;;  %p15292_p4 = scmp.lt.s32.totalorder %s76_s22, %s76_s22 }
  0x82   :  { %p15288_p3 = scmp.ne.s32.totalorder %s76_s22, %s15287_s30  ;;  %p15293_p5 = scmp.lt.s32.totalorder %s15287_s30, %s15287_s30 }
  0x84   :  { %p15294_p6 = por %p15293_p5, %p15292_p4 }
  0x86   :  { %p15295_p7 = pnand %p15294_p6, %p15288_p3 }
  0x88   :  { %15298 = shalt.err (!%p15295_p7)
}
  0x89   :  { %s15389_s3 = smov 192   ;;  %s15390_s29 = smov 12  }
  0x8a   :  { %81 = dma.hbm_to_vmem [thread:$0]  %s17697_s5, 13824, %s76_s22, [#allocation8], %s15389_s3, %s15389_s3, %s15390_s29  }
  0x8b   :  { %s15391_s2 = smov [#allocation12]   ;;  %s15392_s19 = smov [#allocation15]  }
  0x8c   :  { %s97_s8 = sshll.u32 %s15391_s2, 4  ;;  %s119_s26 = sshll.u32 %s15392_s19, 4  ;;  %s98_s8 = int_to_ptr.vmem [resolvable:$true] %s97_s8  ;;  %s15576_s26 = int_to_ptr.vmem [resolvable:$true] %s119_s26 }
  0x8d   :  { %s15299_s27 = scalar_lea.hbm %s17699_s7, 27648 }
  0x8e   :  { %p15300_p8 = scmp.ne.s32.totalorder %s17699_s7, %s15299_s27  ;;  %p15303_p9 = scmp.lt.u32.totalorder %s15299_s27, %s17699_s7 }
  0x90   :  { %p15305_p10 = pnand %p15303_p9, %p15300_p8 }
  0x92   :  { %15308 = shalt.err (!%p15305_p10)
}
  0x93   :  { %s15309_s5 = scalar_lea.vmem %s98_s8, 27648  ;;  %p15314_p12 = scmp.lt.s32.totalorder %s98_s8, %s98_s8 }
  0x94   :  { %p15310_p11 = scmp.ne.s32.totalorder %s98_s8, %s15309_s5  ;;  %p15315_p13 = scmp.lt.s32.totalorder %s15309_s5, %s15309_s5 }
  0x96   :  { %p15316_p0 = por %p15315_p13, %p15314_p12 }
  0x98   :  { %p15317_p1 = pnand %p15316_p0, %p15310_p11 }
  0x9a   :  { %15320 = shalt.err (!%p15317_p1)
}
  0x9b   :  { %103 = dma.hbm_to_vmem [thread:$0]  %s17699_s7, 27648, %s98_s8, [#allocation11], %s15389_s3, %s15389_s3, %s15390_s29  }
  0x9c   :  { %s15321_s25 = scalar_lea.hbm %s17701_s9, 55296 }
  0x9d   :  { %p15322_p2 = scmp.ne.s32.totalorder %s17701_s9, %s15321_s25  ;;  %p15325_p3 = scmp.lt.u32.totalorder %s15321_s25, %s17701_s9 }
  0x9f   :  { %p15327_p4 = pnand %p15325_p3, %p15322_p2 }
  0xa1   :  { %15330 = shalt.err (!%p15327_p4)
}
  0xa2   :  { %s15331_s15 = scalar_lea.vmem %s15576_s26, 55296  ;;  %p15336_p6 = scmp.lt.s32.totalorder %s15576_s26, %s15576_s26 }
  0xa3   :  { %p15332_p5 = scmp.ne.s32.totalorder %s15576_s26, %s15331_s15  ;;  %p15337_p7 = scmp.lt.s32.totalorder %s15331_s15, %s15331_s15 }
  0xa5   :  { %p15338_p8 = por %p15337_p7, %p15336_p6 }
  0xa7   :  { %p15339_p9 = pnand %p15338_p8, %p15332_p5 }
  0xa9   :  { %15342 = shalt.err (!%p15339_p9)
}
  0xaa   :  { %s15393_s7 = smov 384   ;;  %s15394_s3 = smov 24  }
  0xab   :  { %125 = dma.hbm_to_vmem [thread:$0]  %s17701_s9, 55296, %s15576_s26, [#allocation14], %s15393_s7, %s15393_s7, %s15394_s3  }
  0xac   :  { %s15395_s19 = smov [#allocation18]   ;;  %s15343_s18 = scalar_lea.hbm %s17704_s12, 16 }
  0xad   :  { %s144_s16 = sshll.u32 %s15395_s19, 4  ;;  %p15344_p10 = scmp.ne.s32.totalorder %s17704_s12, %s15343_s18  ;;  %s145_s16 = int_to_ptr.vmem [resolvable:$true] %s144_s16 }
  0xae   :  { %p15347_p11 = scmp.lt.u32.totalorder %s15343_s18, %s17704_s12 }
  0xb0   :  { %p15349_p12 = pnand %p15347_p11, %p15344_p10 }
  0xb2   :  { %15352 = shalt.err (!%p15349_p12)
}
  0xb3   :  { %s15353_s22 = scalar_lea.vmem %s145_s16, 16  ;;  %s15357_s9 = scalar_lea.vmem %s145_s16, 32 }
  0xb4   :  { %p15354_p13 = scmp.ne.s32.totalorder %s145_s16, %s15353_s22  ;;  %p15358_p0 = scmp.lt.s32.totalorder %s145_s16, %s145_s16 }
  0xb5   :  { %p15359_p1 = scmp.lt.s32.totalorder %s15357_s9, %s15353_s22 }
  0xb7   :  { %p15360_p2 = por %p15359_p1, %p15358_p0 }
  0xb9   :  { %p15361_p3 = pnand %p15360_p2, %p15354_p13 }
  0xbb   :  { %15364 = shalt.err (!%p15361_p3)
}
  0xbc   :  { %147 = dma.hbm_to_vmem [thread:$0]  %s17704_s12, 16, %s145_s16, [#allocation17]  }
  0xbd   :  { %15365 = dma.done.wait [#allocation3], 320  }
  0xbe   :  { %15366 = vsyncadd [#allocation3], 4294966976 }
  0xbf   :  { %15367 = dma.done.wait [#allocation5], 4624  }
  0xc0   :  { %15368 = vsyncadd [#allocation5], 4294962672 }
  0xc1   :  { %15369 = dma.done.wait [#allocation8], 13856  }
  0xc2   :  { %15370 = vsyncadd [#allocation8], 4294953440 }
  0xc3   :  { %15371 = dma.done.wait [#allocation11], 27696  }
  0xc4   :  { %15372 = vsyncadd [#allocation11], 4294939600 }
  0xc5   :  { %15373 = dma.done.wait [#allocation14], 55344  }
  0xc6   :  { %15374 = vsyncadd [#allocation14], 4294911952 }
  0xc7   :  { %15375 = dma.done.wait [#allocation17], 112  }
  0xc8   :  { %15376 = vsyncadd [#allocation17], 4294967184  ;;  %v183_v0 = vld [vmem:[%s17692_s0 + $0x8] sm:$0xff]  ;;  %v184_v1 = vld [vmem:[%s17692_s0 + $0x10] sm:$0xff]  ;;  %vm1621_vm0 = vcmask 1041408   ;;  %vm1335_vm1 = vcmask 97280  }
  0xc9   :  { %v15630_v2 = vld [vmem:[%s17692_s0] sm:$0xff]  ;;  %v13326_v3 = vpack.i.bf16 %v184_v1, %v183_v0  ;;  %v185_v5 = vld [vmem:[%s17692_s0 + $0x18] sm:$0xff]  ;;  %v188_v9 = vld [vmem:[%s17692_s0 + $0x30] sm:$0xff]  ;;  %vm1400_vm2 = vcmask 195584   ;;  %vm1524_vm3 = vcmask 293888   ;;  %vm2426_vm4 = vcmask 785408  }
  0xca   :  { %v13316_v4 = vpack.i.bf16 %v183_v0, %v15630_v2  ;;  %v186_v6 = vld [vmem:[%s17692_s0 + $0x20] sm:$0xff]  ;;  %v13321_v8 = vpack.i.bf16 %v185_v5, %v184_v1  ;;  %v189_v10 = vld [vmem:[%s17692_s0 + $0x38] sm:$0xff]  ;;  %v187_v11 = vld [vmem:[%s17692_s0 + $0x28] sm:$0xff]  ;;  %vm2459_vm5 = vcmask 523264   ;;  %vm15398_vm7 = vmmov 1  }
  0xcb   :  { %13327 = vrot.lane.b32.xlu1 %v13326_v3, %s15394_s3  ;;  %v13331_v7 = vpack.i.bf16 %v186_v6, %v185_v5  ;;  %v13341_v12 = vpack.i.bf16 %v189_v10, %v188_v9  ;;  %v13336_v13 = vpack.i.bf16 %v187_v11, %v186_v6  ;;  %v190_v14 = vld [vmem:[%s17692_s0 + $0x40] sm:$0xff]  ;;  %v13346_v16 = vpack.i.bf16 %v188_v9, %v187_v11  ;;  %v192_v18 = vld [vmem:[%s17692_s0 + $0x50] sm:$0xff]  ;;  %v193_v19 = vld [vmem:[%s17692_s0 + $0x58] sm:$0xff] }
  0xcc   :  { %13317 = vrot.lane.b32.xlu0 %v13316_v4, %s15390_s29  ;;  %v13351_v15 = vpack.i.bf16 %v190_v14, %v189_v10  ;;  %v13876_v17 = vld [vmem:[#allocation2] sm:$0xff]   ;;  %v191_v20 = vld [vmem:[%s17692_s0 + $0x48] sm:$0xff]  ;;  %v13361_v21 = vpack.i.bf16 %v193_v19, %v192_v18  ;;  %v196_v26 = vld [vmem:[%s17692_s0 + $0x70] sm:$0xff]  ;;  %vm2768_vm9 = vcmask 261120   ;;  %vm11404_vm12 = vcmask 138240  }
  0xcd   :  { %12750 = vmatprep.subr.bf16.mxu0 %v13876_v17  ;;  %v13356_v22 = vpack.i.bf16 %v191_v20, %v190_v14  ;;  %v194_v23 = vld [vmem:[%s17692_s0 + $0x60] sm:$0xff]  ;;  %v13366_v25 = vpack.i.bf16 %v192_v18, %v191_v20  ;;  %v197_v27 = vld [vmem:[%s17692_s0 + $0x78] sm:$0xff]  ;;  %v195_v28 = vld [vmem:[%s17692_s0 + $0x68] sm:$0xff] }
  0xce   :  { %12751 = vmatpush3.bf16.msra.mxu0 %v13876_v17  ;;  %v13371_v24 = vpack.i.bf16 %v194_v23, %v193_v19  ;;  %v13877_v29 = vld [vmem:[#allocation2 + $0x8] sm:$0xff]   ;;  %v13381_v30 = vpack.i.bf16 %v197_v27, %v196_v26  ;;  %v13376_v31 = vpack.i.bf16 %v195_v28, %v194_v23  ;;  %v198_v32 = vld [vmem:[%s17692_s0 + $0x80] sm:$0xff]  ;;  %v13878_v33 = vld [vmem:[#allocation2 + $0x10] ss:$0 sps:$4 sm:$0x33]   ;;  %v13386_v39 = vpack.i.bf16 %v196_v26, %v195_v28 }
  0xcf   :  { %13332 = vrot.lane.b32.xlu1 %v13331_v7, %s15394_s3  ;;  %12752 = vmatprep.subr.bf16.mxu0 %v13877_v29  ;;  %v200_v34 = vld [vmem:[%s17692_s0 + $0x90] sm:$0xff]  ;;  %v201_v35 = vld [vmem:[%s17692_s0 + $0x98] sm:$0xff]  ;;  %v199_v36 = vld [vmem:[%s17692_s0 + $0x88] sm:$0xff]  ;;  %v1623_v37 = vsel %vm1621_vm0, %v13878_v33, 0  ;;  %v13391_v38 = vpack.i.bf16 %v198_v32, %v197_v27 }
  0xd0   :  { %13322 = vrot.lane.b32.xlu0 %v13321_v8, %s15390_s29  ;;  %v202_v40 = vld [vmem:[%s17692_s0 + $0xa0] sm:$0xff]  ;;  %v13401_v41 = vpack.i.bf16 %v201_v35, %v200_v34  ;;  %v13396_v42 = vpack.i.bf16 %v199_v36, %v198_v32  ;;  %v204_v43 = vld [vmem:[%s17692_s0 + $0xb0] sm:$0xff]  ;;  %v205_v44 = vld [vmem:[%s17692_s0 + $0xb8] sm:$0xff]  ;;  %v13406_v47 = vpack.i.bf16 %v200_v34, %v199_v36 }
  0xd1   :  { %v203_v45 = vld [vmem:[%s17692_s0 + $0xa8] sm:$0xff]  ;;  %v13411_v46 = vpack.i.bf16 %v202_v40, %v201_v35  ;;  %v206_v48 = vld [vmem:[%s17692_s0 + $0xc0] sm:$0xff]  ;;  %v13421_v49 = vpack.i.bf16 %v205_v44, %v204_v43  ;;  %v208_v51 = vld [vmem:[%s17692_s0 + $0xd0] sm:$0xff] }
  0xd2   :  { %12753 = vmatpush3.bf16.msra.mxu0 %v13877_v29  ;;  %v13416_v50 = vpack.i.bf16 %v203_v45, %v202_v40  ;;  %v209_v52 = vld [vmem:[%s17692_s0 + $0xd8] sm:$0xff]  ;;  %v207_v53 = vld [vmem:[%s17692_s0 + $0xc8] sm:$0xff]  ;;  %v13431_v54 = vpack.i.bf16 %v206_v48, %v205_v44  ;;  %v13426_v55 = vpack.i.bf16 %v204_v43, %v203_v45  ;;  %v210_v56 = vld [vmem:[%s17692_s0 + $0xe0] sm:$0xff] }
  0xd3   :  { %13342 = vrot.lane.b32.xlu1 %v13341_v12, %s15390_s29  ;;  %13292 = vmatprep.subr.msk.bf16.mxu0 %vm1621_vm0, %v13878_v33  ;;  %v13441_v57 = vpack.i.bf16 %v209_v52, %v208_v51  ;;  %v13436_v58 = vpack.i.bf16 %v207_v53, %v206_v48  ;;  %v212_v59 = vld [vmem:[%s17692_s0 + $0xf0] sm:$0xff]  ;;  %v213_v60 = vld [vmem:[%s17692_s0 + $0xf8] sm:$0xff]  ;;  %v211_v61 = vld [vmem:[%s17692_s0 + $0xe8] sm:$0xff]  ;;  %v13451_v62 = vpack.i.bf16 %v210_v56, %v209_v52 }
  0xd4   :  { %13337 = vrot.lane.b32.xlu0 %v13336_v13, %s15390_s29  ;;  %v13446_v63 = vpack.i.bf16 %v208_v51, %v207_v53  ;;  %v214_v0 = vld [vmem:[%s17692_s0 + $0x100] sm:$0xff]  ;;  %v13461_v1 = vpack.i.bf16 %v213_v60, %v212_v59  ;;  %v13456_v3 = vpack.i.bf16 %v211_v61, %v210_v56  ;;  %v216_v4 = vld [vmem:[%s17692_s0 + $0x110] sm:$0xff]  ;;  %v217_v5 = vld [vmem:[%s17692_s0 + $0x118] sm:$0xff]  ;;  %v13466_v8 = vpack.i.bf16 %v212_v59, %v211_v61 }
  0xd5   :  { %v215_v6 = vld [vmem:[%s17692_s0 + $0x108] sm:$0xff]  ;;  %v13471_v7 = vpack.i.bf16 %v214_v0, %v213_v60  ;;  %v218_v9 = vld [vmem:[%s17692_s0 + $0x120] sm:$0xff]  ;;  %v13481_v10 = vpack.i.bf16 %v217_v5, %v216_v4  ;;  %v220_v12 = vld [vmem:[%s17692_s0 + $0x130] sm:$0xff] }
  0xd6   :  { %12755 = vmatpush3.bf16.msra.mxu0 %v1623_v37  ;;  %v13476_v11 = vpack.i.bf16 %v215_v6, %v214_v0  ;;  %v221_v13 = vld [vmem:[%s17692_s0 + $0x138] sm:$0xff]  ;;  %v219_v14 = vld [vmem:[%s17692_s0 + $0x128] sm:$0xff]  ;;  %v222_v17 = vld [vmem:[%s17692_s0 + $0x140] sm:$0xff] }
  0xd7   :  { %13352 = vrot.lane.b32.xlu1 %v13351_v15, %s15394_s3  ;;  %v13491_v15 = vpack.i.bf16 %v218_v9, %v217_v5  ;;  %v13501_v18 = vpack.i.bf16 %v221_v13, %v220_v12  ;;  %v13496_v19 = vpack.i.bf16 %v219_v14, %v218_v9  ;;  %v224_v20 = vld [vmem:[%s17692_s0 + $0x150] sm:$0xff]  ;;  %v13511_v23 = vpack.i.bf16 %v222_v17, %v221_v13  ;;  %v229_v29 = vld [vmem:[%s17692_s0 + $0x178] sm:$0xff]  ;;  %v230_v33 = vld [vmem:[%s17692_s0 + $0x180] sm:$0xff] }
  0xd8   :  { %13347 = vrot.lane.b32.xlu0 %v13346_v16, %s15394_s3  ;;  %v13486_v16 = vpack.i.bf16 %v216_v4, %v215_v6  ;;  %v228_v28 = vld [vmem:[%s17692_s0 + $0x170] sm:$0xff]  ;;  %v233_v37 = vld [vmem:[%s17692_s0 + $0x198] sm:$0xff]  ;;  %vm11488_vm6 = vmneg %vm2426_vm4 }
  0xd9   :  { %v13541_v34 = vpack.i.bf16 %v229_v29, %v228_v28  ;;  %v232_v36 = vld [vmem:[%s17692_s0 + $0x190] sm:$0xff]  ;;  %v237_v45 = vld [vmem:[%s17692_s0 + $0x1b8] sm:$0xff]  ;;  %vm11489_vm8 = vmpackc.low %vm15398_vm7, %vm11488_vm6 }
  0xda   :  { %v236_v44 = vld [vmem:[%s17692_s0 + $0x1b0] sm:$0xff]  ;;  %v241_v53 = vld [vmem:[%s17692_s0 + $0x1d8] sm:$0xff]  ;;  %vm11616_vm10 = vmneg %vm2459_vm5 }
  0xdb   :  { %13362 = vrot.lane.b32.xlu1 %v13361_v21, %s15390_s29  ;;  %v225_v21 = vld [vmem:[%s17692_s0 + $0x158] sm:$0xff]  ;;  %v240_v52 = vld [vmem:[%s17692_s0 + $0x1d0] sm:$0xff]  ;;  %vm16828_vm11 = vmpackc.low %vm15398_vm7, %vm11616_vm10 }
  0xdc   :  { %13357 = vrot.lane.b32.xlu0 %v13356_v22, %s15390_s29  ;;  %v223_v22 = vld [vmem:[%s17692_s0 + $0x148] sm:$0xff]  ;;  %v13521_v26 = vpack.i.bf16 %v225_v21, %v224_v20  ;;  %v244_v60 = vld [vmem:[%s17692_s0 + $0x1f0] sm:$0xff]  ;;  %v245_v61 = vld [vmem:[%s17692_s0 + $0x1f8] sm:$0xff] }
  0xdd   :  { %v13516_v27 = vpack.i.bf16 %v223_v22, %v222_v17  ;;  %v13526_v32 = vpack.i.bf16 %v224_v20, %v223_v22 }
  0xdf   :  { %13372 = vrot.lane.b32.xlu1 %v13371_v24, %s15394_s3  ;;  %v13506_v24 = vpack.i.bf16 %v220_v12, %v219_v14 }
  0xe0   :  { %13367 = vrot.lane.b32.xlu0 %v13366_v25, %s15394_s3  ;;  %v226_v25 = vld [vmem:[%s17692_s0 + $0x160] sm:$0xff] }
  0xe3   :  { %13382 = vrot.lane.b32.xlu1 %v13381_v30, %s15390_s29  ;;  %v227_v30 = vld [vmem:[%s17692_s0 + $0x168] sm:$0xff] }
  0xe4   :  { %13377 = vrot.lane.b32.xlu0 %v13376_v31, %s15390_s29  ;;  %v13531_v31 = vpack.i.bf16 %v226_v25, %v225_v21  ;;  %v13536_v35 = vpack.i.bf16 %v227_v30, %v226_v25  ;;  %v13546_v40 = vpack.i.bf16 %v228_v28, %v227_v30  ;;  %v17708_v21 = vmov 0.0   ;;  %v15062_v25 = vld [vmem:[%s17692_s0 + $0x8] sm:$0xff] }
  0xe5   :  { %v13631_v22 = vpack.i.bf16 %v17708_v21, %v245_v61 }
  0xe7   :  { %13392 = vrot.lane.b32.xlu1 %v13391_v38, %s15394_s3  ;;  %v231_v38 = vld [vmem:[%s17692_s0 + $0x188] sm:$0xff] }
  0xe8   :  { %13387 = vrot.lane.b32.xlu0 %v13386_v39, %s15394_s3  ;;  %v13551_v39 = vpack.i.bf16 %v230_v33, %v229_v29  ;;  %v13556_v43 = vpack.i.bf16 %v231_v38, %v230_v33  ;;  %v13566_v48 = vpack.i.bf16 %v232_v36, %v231_v38 }
  0xeb   :  { %13402 = vrot.lane.b32.xlu1 %v13401_v41, %s15390_s29  ;;  %v234_v41 = vld [vmem:[%s17692_s0 + $0x1a0] sm:$0xff] }
  0xec   :  { %13397 = vrot.lane.b32.xlu0 %v13396_v42, %s15390_s29  ;;  %v13561_v42 = vpack.i.bf16 %v233_v37, %v232_v36 }
  0xef   :  { %13412 = vrot.lane.b32.xlu1 %v13411_v46, %s15394_s3  ;;  %v235_v46 = vld [vmem:[%s17692_s0 + $0x1a8] sm:$0xff] }
  0xf0   :  { %13407 = vrot.lane.b32.xlu0 %v13406_v47, %s15394_s3  ;;  %v13571_v47 = vpack.i.bf16 %v234_v41, %v233_v37  ;;  %v13576_v51 = vpack.i.bf16 %v235_v46, %v234_v41  ;;  %v13586_v56 = vpack.i.bf16 %v236_v44, %v235_v46  ;;  %v15065_v46 = vld [vmem:[%s17692_s0 + $0x20] sm:$0xff] }
  0xf3   :  { %13422 = vrot.lane.b32.xlu1 %v13421_v49, %s15390_s29  ;;  %v238_v49 = vld [vmem:[%s17692_s0 + $0x1c0] sm:$0xff] }
  0xf4   :  { %13417 = vrot.lane.b32.xlu0 %v13416_v50, %s15390_s29  ;;  %v13581_v50 = vpack.i.bf16 %v237_v45, %v236_v44  ;;  %v15064_v44 = vld [vmem:[%s17692_s0 + $0x28] sm:$0xff] }
  0xf7   :  { %13432 = vrot.lane.b32.xlu1 %v13431_v54, %s15394_s3  ;;  %v239_v54 = vld [vmem:[%s17692_s0 + $0x1c8] sm:$0xff] }
  0xf8   :  { %13427 = vrot.lane.b32.xlu0 %v13426_v55, %s15394_s3  ;;  %v13591_v55 = vpack.i.bf16 %v238_v49, %v237_v45  ;;  %v13596_v59 = vpack.i.bf16 %v239_v54, %v238_v49  ;;  %v13606_v0 = vpack.i.bf16 %v240_v52, %v239_v54 }
  0xfb   :  { %13442 = vrot.lane.b32.xlu1 %v13441_v57, %s15390_s29  ;;  %v242_v57 = vld [vmem:[%s17692_s0 + $0x1e0] sm:$0xff] }
  0xfc   :  { %13437 = vrot.lane.b32.xlu0 %v13436_v58, %s15390_s29  ;;  %v13601_v58 = vpack.i.bf16 %v241_v53, %v240_v52 }
  0xff   :  { %13452 = vrot.lane.b32.xlu1 %v13451_v62, %s15394_s3  ;;  %v243_v62 = vld [vmem:[%s17692_s0 + $0x1e8] sm:$0xff] }
 0x100   :  { %13447 = vrot.lane.b32.xlu0 %v13446_v63, %s15394_s3  ;;  %v13611_v63 = vpack.i.bf16 %v242_v57, %v241_v53  ;;  %v13616_v9 = vpack.i.bf16 %v243_v62, %v242_v57 }
 0x103   :  { %13462 = vrot.lane.b32.xlu1 %v13461_v1, %s15390_s29 }
 0x104   :  { %13457 = vrot.lane.b32.xlu0 %v13456_v3, %s15390_s29 }
 0x107   :  { %13472 = vrot.lane.b32.xlu1 %v13471_v7, %s15394_s3 }
 0x108   :  { %13467 = vrot.lane.b32.xlu0 %v13466_v8, %s15394_s3  ;;  %v13621_v8 = vpack.i.bf16 %v245_v61, %v244_v60 }
 0x10b   :  { %13482 = vrot.lane.b32.xlu1 %v13481_v10, %s15390_s29 }
 0x10c   :  { %13477 = vrot.lane.b32.xlu0 %v13476_v11, %s15390_s29 }
 0x10f   :  { %13492 = vrot.lane.b32.xlu1 %v13491_v15, %s15394_s3 }
 0x110   :  { %13487 = vrot.lane.b32.xlu0 %v13486_v16, %s15394_s3 }
 0x113   :  { %13502 = vrot.lane.b32.xlu1 %v13501_v18, %s15390_s29 }
 0x114   :  { %13497 = vrot.lane.b32.xlu0 %v13496_v19, %s15390_s29 }
 0x117   :  { %13512 = vrot.lane.b32.xlu1 %v13511_v23, %s15394_s3  ;;  %v15061_v23 = vld [vmem:[%s17692_s0 + $0x10] sm:$0xff] }
 0x118   :  { %13507 = vrot.lane.b32.xlu0 %v13506_v24, %s15394_s3 }
 0x11b   :  { %13522 = vrot.lane.b32.xlu1 %v13521_v26, %s15390_s29 }
 0x11c   :  { %13517 = vrot.lane.b32.xlu0 %v13516_v27, %s15390_s29 }
 0x11f   :  { %13532 = vrot.lane.b32.xlu1 %v13531_v31, %s15394_s3 }
 0x120   :  { %13527 = vrot.lane.b32.xlu0 %v13526_v32, %s15394_s3 }
 0x123   :  { %13542 = vrot.lane.b32.xlu1 %v13541_v34, %s15390_s29 }
 0x124   :  { %13537 = vrot.lane.b32.xlu0 %v13536_v35, %s15390_s29 }
 0x127   :  { %13552 = vrot.lane.b32.xlu1 %v13551_v39, %s15394_s3 }
 0x128   :  { %13547 = vrot.lane.b32.xlu0 %v13546_v40, %s15394_s3 }
 0x12b   :  { %13562 = vrot.lane.b32.xlu1 %v13561_v42, %s15390_s29  ;;  %v15063_v42 = vld [vmem:[%s17692_s0 + $0x30] sm:$0xff] }
 0x12c   :  { %13557 = vrot.lane.b32.xlu0 %v13556_v43, %s15390_s29 }
 0x12f   :  { %13572 = vrot.lane.b32.xlu1 %v13571_v47, %s15394_s3 }
 0x130   :  { %13567 = vrot.lane.b32.xlu0 %v13566_v48, %s15394_s3  ;;  %v15066_v48 = vld [vmem:[%s17692_s0 + $0x18] sm:$0xff] }
 0x133   :  { %13582 = vrot.lane.b32.xlu1 %v13581_v50, %s15390_s29 }
 0x134   :  { %13577 = vrot.lane.b32.xlu0 %v13576_v51, %s15390_s29 }
 0x137   :  { %13592 = vrot.lane.b32.xlu1 %v13591_v55, %s15394_s3 }
 0x138   :  { %13587 = vrot.lane.b32.xlu0 %v13586_v56, %s15394_s3 }
 0x13b   :  { %13602 = vrot.lane.b32.xlu1 %v13601_v58, %s15390_s29 }
 0x13c   :  { %13597 = vrot.lane.b32.xlu0 %v13596_v59, %s15390_s29 }
 0x13d   :  { %v13328_v1 = vpop.permute.xlu1 %13327 }
 0x13e   :  { %v13318_v3 = vpop.permute.xlu0 %13317  ;;  %v13330_v4 = vunpack.i.h.bf16 %v13328_v1  ;;  %v13329_v5 = vunpack.i.l.bf16 %v13328_v1 }
 0x13f   :  { %v13320_v6 = vunpack.i.h.bf16 %v13318_v3  ;;  %v13319_v7 = vunpack.i.l.bf16 %v13318_v3  ;;  %13612 = vrot.lane.b32.xlu1 %v13611_v63, %s15394_s3 }
 0x140   :  { %13607 = vrot.lane.b32.xlu0 %v13606_v0, %s15394_s3 }
 0x141   :  { %v1336_v10 = vsel %vm1335_vm1, 0.0, %v13319_v7  ;;  %v1337_v11 = vsel %vm1335_vm1, %v15630_v2, %v13320_v6  ;;  %v13333_v12 = vpop.permute.xlu1 %13332  ;;  %v13626_v2 = vpack.i.bf16 %v244_v60, %v243_v62  ;;  %v15068_v7 = vld [vmem:[%s17692_s0 + $0x48] sm:$0xff] }
 0x142   :  { %v13323_v13 = vpop.permute.xlu0 %13322  ;;  %v1401_v14 = vsel %vm1400_vm2, %v1336_v10, %v13329_v5  ;;  %v1402_v15 = vsel %vm1400_vm2, %v1337_v11, %v13330_v4  ;;  %v13335_v16 = vunpack.i.h.bf16 %v13333_v12  ;;  %v13334_v17 = vunpack.i.l.bf16 %v13333_v12  ;;  %v15067_v5 = vld [vmem:[%s17692_s0 + $0x50] sm:$0xff]  ;;  %v15070_v11 = vld [vmem:[%s17692_s0 + $0x38] sm:$0xff] }
 0x143   :  { %v13325_v18 = vunpack.i.h.bf16 %v13323_v13  ;;  %v13324_v19 = vunpack.i.l.bf16 %v13323_v13  ;;  %13622 = vrot.lane.b32.xlu1 %v13621_v8, %s15390_s29  ;;  %v1465_v20 = vpack.c.bf16 %v1402_v15, %v1401_v14 }
 0x144   :  { %13617 = vrot.lane.b32.xlu0 %v13616_v9, %s15390_s29  ;;  %v15069_v9 = vld [vmem:[%s17692_s0 + $0x40] sm:$0xff] }
 0x145   :  { %v1339_v24 = vsel %vm1335_vm1, %v15061_v23, %v13325_v18  ;;  %v1338_v26 = vsel %vm1335_vm1, %v15062_v25, %v13324_v19  ;;  %12756 = vmatprep.mubr.msk.bf16.mxu0 %vm1524_vm3, %v1465_v20  ;;  %v13343_v27 = vpop.permute.xlu1 %13342 }
 0x146   :  { %v13338_v28 = vpop.permute.xlu0 %13337  ;;  %v1403_v29 = vsel %vm1400_vm2, %v1338_v26, %v13334_v17  ;;  %v1404_v30 = vsel %vm1400_vm2, %v1339_v24, %v13335_v16  ;;  %v13345_v31 = vunpack.i.h.bf16 %v13343_v27  ;;  %v13344_v32 = vunpack.i.l.bf16 %v13343_v27 }
 0x147   :  { %v13340_v33 = vunpack.i.h.bf16 %v13338_v28  ;;  %v13339_v34 = vunpack.i.l.bf16 %v13338_v28  ;;  %13632 = vrot.lane.b32.xlu1 %v13631_v22, %s15394_s3  ;;  %v1466_v35 = vpack.c.bf16 %v1404_v30, %v1403_v29 }
 0x148   :  { %13627 = vrot.lane.b32.xlu0 %v13626_v2, %s15394_s3  ;;  %v1343_v43 = vsel %vm1335_vm1, %v15063_v42, %v13345_v31  ;;  %v1342_v45 = vsel %vm1335_vm1, %v15064_v44, %v13344_v32  ;;  %v15071_v31 = vld [vmem:[%s17692_s0 + $0x70] sm:$0xff] }
 0x149   :  { %12757 = vmatmul.mubr.msk.bf16.vlgmr.msra.gmra.mrb[0].mxu0 %vm1524_vm3, %v1466_v35  ;;  %v13353_v36 = vpop.permute.xlu1 %13352  ;;  %v1341_v47 = vsel %vm1335_vm1, %v15065_v46, %v13340_v33  ;;  %v1340_v49 = vsel %vm1335_vm1, %v15066_v48, %v13339_v34  ;;  %v15072_v33 = vld [vmem:[%s17692_s0 + $0x68] sm:$0xff]  ;;  %v15073_v35 = vld [vmem:[%s17692_s0 + $0x60] sm:$0xff] }
 0x14a   :  { %v13348_v37 = vpop.permute.xlu0 %13347  ;;  %v13355_v38 = vunpack.i.h.bf16 %v13353_v36  ;;  %v13354_v39 = vunpack.i.l.bf16 %v13353_v36 }
 0x14b   :  { %v13350_v40 = vunpack.i.h.bf16 %v13348_v37  ;;  %v13349_v41 = vunpack.i.l.bf16 %v13348_v37  ;;  %v15074_v37 = vld [vmem:[%s17692_s0 + $0x58] sm:$0xff] }
 0x14c   :  { %v1407_v50 = vsel %vm1400_vm2, %v1342_v45, %v13354_v39  ;;  %v1408_v51 = vsel %vm1400_vm2, %v1343_v43, %v13355_v38 }
 0x14d   :  { %v1405_v52 = vsel %vm1400_vm2, %v1340_v49, %v13349_v41  ;;  %v1406_v53 = vsel %vm1400_vm2, %v1341_v47, %v13350_v40  ;;  %v13363_v54 = vpop.permute.xlu1 %13362  ;;  %v1468_v57 = vpack.c.bf16 %v1408_v51, %v1407_v50 }
 0x14e   :  { %v13358_v55 = vpop.permute.xlu0 %13357  ;;  %v1467_v56 = vpack.c.bf16 %v1406_v53, %v1405_v52  ;;  %v13365_v58 = vunpack.i.h.bf16 %v13363_v54  ;;  %v13364_v59 = vunpack.i.l.bf16 %v13363_v54 }
 0x14f   :  { %v13360_v60 = vunpack.i.h.bf16 %v13358_v55  ;;  %v13359_v61 = vunpack.i.l.bf16 %v13358_v55 }
 0x150   :  { %12760 = vmatprep.mubr.msk.bf16.mxu0 %vm1524_vm3, %v1467_v56  ;;  %v1347_v6 = vsel %vm1335_vm1, %v15067_v5, %v13365_v58  ;;  %v1346_v8 = vsel %vm1335_vm1, %v15068_v7, %v13364_v59  ;;  %v15076_v59 = vld [vmem:[%s17692_s0 + $0x88] sm:$0xff] }
 0x151   :  { %12761 = vmatmul.mubr.msk.bf16.gmra.mrb[4].mxu0 %vm1524_vm3, %v1468_v57  ;;  %v13373_v62 = vpop.permute.xlu1 %13372  ;;  %v1345_v10 = vsel %vm1335_vm1, %v15069_v9, %v13360_v60  ;;  %v1344_v12 = vsel %vm1335_vm1, %v15070_v11, %v13359_v61  ;;  %v15075_v57 = vld [vmem:[%s17692_s0 + $0x90] sm:$0xff]  ;;  %v15077_v61 = vld [vmem:[%s17692_s0 + $0x80] sm:$0xff] }
 0x152   :  { %v13368_v63 = vpop.permute.xlu0 %13367  ;;  %v13375_v0 = vunpack.i.h.bf16 %v13373_v62  ;;  %v13374_v1 = vunpack.i.l.bf16 %v13373_v62 }
 0x153   :  { %v13370_v3 = vunpack.i.h.bf16 %v13368_v63  ;;  %v13369_v4 = vunpack.i.l.bf16 %v13368_v63  ;;  %v15078_v63 = vld [vmem:[%s17692_s0 + $0x78] sm:$0xff] }
 0x154   :  { %v1411_v13 = vsel %vm1400_vm2, %v1346_v8, %v13374_v1  ;;  %v1412_v14 = vsel %vm1400_vm2, %v1347_v6, %v13375_v0 }
 0x155   :  { %v1409_v15 = vsel %vm1400_vm2, %v1344_v12, %v13369_v4  ;;  %v1410_v16 = vsel %vm1400_vm2, %v1345_v10, %v13370_v3  ;;  %v13383_v17 = vpop.permute.xlu1 %13382  ;;  %v1470_v20 = vpack.c.bf16 %v1412_v14, %v1411_v13 }
 0x156   :  { %v13378_v18 = vpop.permute.xlu0 %13377  ;;  %v1469_v19 = vpack.c.bf16 %v1410_v16, %v1409_v15  ;;  %v13385_v22 = vunpack.i.h.bf16 %v13383_v17  ;;  %v13384_v2 = vunpack.i.l.bf16 %v13383_v17 }
 0x157   :  { %v13380_v23 = vunpack.i.h.bf16 %v13378_v18  ;;  %v13379_v24 = vunpack.i.l.bf16 %v13378_v18 }
 0x158   :  { %12764 = vmatprep.mubr.msk.bf16.mxu0 %vm1524_vm3, %v1469_v19  ;;  %v1351_v32 = vsel %vm1335_vm1, %v15071_v31, %v13385_v22  ;;  %v1350_v34 = vsel %vm1335_vm1, %v15072_v33, %v13384_v2  ;;  %v15080_v2 = vld [vmem:[%s17692_s0 + $0xa8] sm:$0xff] }
 0x159   :  { %12765 = vmatmul.mubr.msk.bf16.gmra.mrb[8].mxu0 %vm1524_vm3, %v1470_v20  ;;  %v13393_v25 = vpop.permute.xlu1 %13392  ;;  %v1349_v36 = vsel %vm1335_vm1, %v15073_v35, %v13380_v23  ;;  %v1348_v38 = vsel %vm1335_vm1, %v15074_v37, %v13379_v24  ;;  %v15079_v20 = vld [vmem:[%s17692_s0 + $0xb0] sm:$0xff]  ;;  %v15081_v24 = vld [vmem:[%s17692_s0 + $0xa0] sm:$0xff] }
 0x15a   :  { %v13388_v26 = vpop.permute.xlu0 %13387  ;;  %v13395_v27 = vunpack.i.h.bf16 %v13393_v25  ;;  %v13394_v28 = vunpack.i.l.bf16 %v13393_v25 }
 0x15b   :  { %v13390_v29 = vunpack.i.h.bf16 %v13388_v26  ;;  %v13389_v30 = vunpack.i.l.bf16 %v13388_v26  ;;  %v15082_v26 = vld [vmem:[%s17692_s0 + $0x98] sm:$0xff] }
 0x15c   :  { %v1415_v39 = vsel %vm1400_vm2, %v1350_v34, %v13394_v28  ;;  %v1416_v40 = vsel %vm1400_vm2, %v1351_v32, %v13395_v27 }
 0x15d   :  { %v1413_v41 = vsel %vm1400_vm2, %v1348_v38, %v13389_v30  ;;  %v1414_v42 = vsel %vm1400_vm2, %v1349_v36, %v13390_v29  ;;  %v1472_v43 = vpack.c.bf16 %v1416_v40, %v1415_v39  ;;  %v13403_v45 = vpop.permute.xlu1 %13402 }
 0x15e   :  { %v1471_v44 = vpack.c.bf16 %v1414_v42, %v1413_v41  ;;  %v13398_v46 = vpop.permute.xlu0 %13397  ;;  %v13405_v47 = vunpack.i.h.bf16 %v13403_v45  ;;  %v13404_v48 = vunpack.i.l.bf16 %v13403_v45 }
 0x15f   :  { %v13400_v49 = vunpack.i.h.bf16 %v13398_v46  ;;  %v13399_v50 = vunpack.i.l.bf16 %v13398_v46  ;;  %v15083_v46 = vld [vmem:[%s17692_s0 + $0xd0] sm:$0xff] }
 0x160   :  { %12768 = vmatprep.mubr.msk.bf16.mxu0 %vm1524_vm3, %v1471_v44  ;;  %v1355_v58 = vsel %vm1335_vm1, %v15075_v57, %v13405_v47  ;;  %v1354_v60 = vsel %vm1335_vm1, %v15076_v59, %v13404_v48  ;;  %v15084_v48 = vld [vmem:[%s17692_s0 + $0xc8] sm:$0xff] }
 0x161   :  { %12769 = vmatmul.mubr.msk.bf16.gmra.mrb[12].mxu0 %vm1524_vm3, %v1472_v43  ;;  %v13413_v51 = vpop.permute.xlu1 %13412  ;;  %v1353_v62 = vsel %vm1335_vm1, %v15077_v61, %v13400_v49  ;;  %v1352_v0 = vsel %vm1335_vm1, %v15078_v63, %v13399_v50  ;;  %v15085_v50 = vld [vmem:[%s17692_s0 + $0xc0] sm:$0xff] }
 0x162   :  { %v13408_v52 = vpop.permute.xlu0 %13407  ;;  %v13415_v53 = vunpack.i.h.bf16 %v13413_v51  ;;  %v13414_v54 = vunpack.i.l.bf16 %v13413_v51 }
 0x163   :  { %v13410_v55 = vunpack.i.h.bf16 %v13408_v52  ;;  %v13409_v56 = vunpack.i.l.bf16 %v13408_v52  ;;  %v15086_v52 = vld [vmem:[%s17692_s0 + $0xb8] sm:$0xff] }
 0x164   :  { %v1419_v1 = vsel %vm1400_vm2, %v1354_v60, %v13414_v54  ;;  %v1420_v3 = vsel %vm1400_vm2, %v1355_v58, %v13415_v53 }
 0x165   :  { %v1417_v4 = vsel %vm1400_vm2, %v1352_v0, %v13409_v56  ;;  %v1418_v5 = vsel %vm1400_vm2, %v1353_v62, %v13410_v55  ;;  %v1474_v6 = vpack.c.bf16 %v1420_v3, %v1419_v1  ;;  %v13423_v8 = vpop.permute.xlu1 %13422 }
 0x166   :  { %v1473_v7 = vpack.c.bf16 %v1418_v5, %v1417_v4  ;;  %v13418_v9 = vpop.permute.xlu0 %13417  ;;  %v13425_v10 = vunpack.i.h.bf16 %v13423_v8  ;;  %v13424_v11 = vunpack.i.l.bf16 %v13423_v8 }
 0x167   :  { %v13420_v12 = vunpack.i.h.bf16 %v13418_v9  ;;  %v13419_v13 = vunpack.i.l.bf16 %v13418_v9  ;;  %v15087_v9 = vld [vmem:[%s17692_s0 + $0xf0] sm:$0xff] }
 0x168   :  { %12772 = vmatprep.mubr.msk.bf16.mxu0 %vm1524_vm3, %v1473_v7  ;;  %v1359_v22 = vsel %vm1335_vm1, %v15079_v20, %v13425_v10  ;;  %v1358_v23 = vsel %vm1335_vm1, %v15080_v2, %v13424_v11  ;;  %v15088_v11 = vld [vmem:[%s17692_s0 + $0xe8] sm:$0xff] }
 0x169   :  { %12773 = vmatmul.mubr.msk.bf16.gmra.mrb[16].mxu0 %vm1524_vm3, %v1474_v6  ;;  %v13433_v14 = vpop.permute.xlu1 %13432  ;;  %v1357_v25 = vsel %vm1335_vm1, %v15081_v24, %v13420_v12  ;;  %v1356_v27 = vsel %vm1335_vm1, %v15082_v26, %v13419_v13  ;;  %v15089_v13 = vld [vmem:[%s17692_s0 + $0xe0] sm:$0xff] }
 0x16a   :  { %v13428_v15 = vpop.permute.xlu0 %13427  ;;  %v13435_v16 = vunpack.i.h.bf16 %v13433_v14  ;;  %v13434_v17 = vunpack.i.l.bf16 %v13433_v14 }
 0x16b   :  { %v13430_v18 = vunpack.i.h.bf16 %v13428_v15  ;;  %v13429_v19 = vunpack.i.l.bf16 %v13428_v15  ;;  %v15090_v15 = vld [vmem:[%s17692_s0 + $0xd8] sm:$0xff] }
 0x16c   :  { %v1423_v28 = vsel %vm1400_vm2, %v1358_v23, %v13434_v17  ;;  %v1424_v29 = vsel %vm1400_vm2, %v1359_v22, %v13435_v16 }
 0x16d   :  { %v1421_v30 = vsel %vm1400_vm2, %v1356_v27, %v13429_v19  ;;  %v1422_v31 = vsel %vm1400_vm2, %v1357_v25, %v13430_v18  ;;  %v1476_v32 = vpack.c.bf16 %v1424_v29, %v1423_v28  ;;  %v13443_v34 = vpop.permute.xlu1 %13442 }
 0x16e   :  { %v1475_v33 = vpack.c.bf16 %v1422_v31, %v1421_v30  ;;  %v13438_v35 = vpop.permute.xlu0 %13437  ;;  %v13445_v36 = vunpack.i.h.bf16 %v13443_v34  ;;  %v13444_v37 = vunpack.i.l.bf16 %v13443_v34 }
 0x16f   :  { %v13440_v38 = vunpack.i.h.bf16 %v13438_v35  ;;  %v13439_v39 = vunpack.i.l.bf16 %v13438_v35  ;;  %v15091_v35 = vld [vmem:[%s17692_s0 + $0x110] sm:$0xff] }
 0x170   :  { %12776 = vmatprep.mubr.msk.bf16.mxu0 %vm1524_vm3, %v1475_v33  ;;  %v1363_v47 = vsel %vm1335_vm1, %v15083_v46, %v13445_v36  ;;  %v1362_v49 = vsel %vm1335_vm1, %v15084_v48, %v13444_v37  ;;  %v15092_v37 = vld [vmem:[%s17692_s0 + $0x108] sm:$0xff] }
 0x171   :  { %12777 = vmatmul.mubr.msk.bf16.gmra.mrb[20].mxu0 %vm1524_vm3, %v1476_v32  ;;  %v13453_v40 = vpop.permute.xlu1 %13452  ;;  %v1361_v51 = vsel %vm1335_vm1, %v15085_v50, %v13440_v38  ;;  %v1360_v53 = vsel %vm1335_vm1, %v15086_v52, %v13439_v39  ;;  %v15093_v39 = vld [vmem:[%s17692_s0 + $0x100] sm:$0xff] }
 0x172   :  { %v13448_v41 = vpop.permute.xlu0 %13447  ;;  %v13455_v42 = vunpack.i.h.bf16 %v13453_v40  ;;  %v13454_v43 = vunpack.i.l.bf16 %v13453_v40 }
 0x173   :  { %v13450_v44 = vunpack.i.h.bf16 %v13448_v41  ;;  %v13449_v45 = vunpack.i.l.bf16 %v13448_v41  ;;  %v15094_v41 = vld [vmem:[%s17692_s0 + $0xf8] sm:$0xff] }
 0x174   :  { %v1427_v54 = vsel %vm1400_vm2, %v1362_v49, %v13454_v43  ;;  %v1428_v55 = vsel %vm1400_vm2, %v1363_v47, %v13455_v42 }
 0x175   :  { %v1425_v56 = vsel %vm1400_vm2, %v1360_v53, %v13449_v45  ;;  %v1426_v57 = vsel %vm1400_vm2, %v1361_v51, %v13450_v44  ;;  %v1478_v58 = vpack.c.bf16 %v1428_v55, %v1427_v54  ;;  %v13463_v60 = vpop.permute.xlu1 %13462 }
 0x176   :  { %v1477_v59 = vpack.c.bf16 %v1426_v57, %v1425_v56  ;;  %v13458_v61 = vpop.permute.xlu0 %13457  ;;  %v13465_v62 = vunpack.i.h.bf16 %v13463_v60  ;;  %v13464_v63 = vunpack.i.l.bf16 %v13463_v60 }
 0x177   :  { %v13460_v0 = vunpack.i.h.bf16 %v13458_v61  ;;  %v13459_v1 = vunpack.i.l.bf16 %v13458_v61  ;;  %v15095_v61 = vld [vmem:[%s17692_s0 + $0x130] sm:$0xff] }
 0x178   :  { %12780 = vmatprep.mubr.msk.bf16.mxu0 %vm1524_vm3, %v1477_v59  ;;  %v1367_v10 = vsel %vm1335_vm1, %v15087_v9, %v13465_v62  ;;  %v1366_v12 = vsel %vm1335_vm1, %v15088_v11, %v13464_v63  ;;  %v15096_v63 = vld [vmem:[%s17692_s0 + $0x128] sm:$0xff] }
 0x179   :  { %12781 = vmatmul.mubr.msk.bf16.gmra.mrb[24].mxu0 %vm1524_vm3, %v1478_v58  ;;  %v13473_v3 = vpop.permute.xlu1 %13472  ;;  %v1365_v14 = vsel %vm1335_vm1, %v15089_v13, %v13460_v0  ;;  %v1364_v16 = vsel %vm1335_vm1, %v15090_v15, %v13459_v1  ;;  %v15097_v1 = vld [vmem:[%s17692_s0 + $0x120] sm:$0xff] }
 0x17a   :  { %v13468_v4 = vpop.permute.xlu0 %13467  ;;  %v13475_v5 = vunpack.i.h.bf16 %v13473_v3  ;;  %v13474_v6 = vunpack.i.l.bf16 %v13473_v3 }
 0x17b   :  { %v13470_v7 = vunpack.i.h.bf16 %v13468_v4  ;;  %v13469_v8 = vunpack.i.l.bf16 %v13468_v4  ;;  %v15098_v4 = vld [vmem:[%s17692_s0 + $0x118] sm:$0xff] }
 0x17c   :  { %v1431_v17 = vsel %vm1400_vm2, %v1366_v12, %v13474_v6  ;;  %v1432_v18 = vsel %vm1400_vm2, %v1367_v10, %v13475_v5 }
 0x17d   :  { %v1429_v19 = vsel %vm1400_vm2, %v1364_v16, %v13469_v8  ;;  %v1430_v20 = vsel %vm1400_vm2, %v1365_v14, %v13470_v7  ;;  %v1480_v22 = vpack.c.bf16 %v1432_v18, %v1431_v17  ;;  %v13483_v23 = vpop.permute.xlu1 %13482 }
 0x17e   :  { %v1479_v2 = vpack.c.bf16 %v1430_v20, %v1429_v19  ;;  %v13478_v24 = vpop.permute.xlu0 %13477  ;;  %v13485_v25 = vunpack.i.h.bf16 %v13483_v23  ;;  %v13484_v26 = vunpack.i.l.bf16 %v13483_v23 }
 0x17f   :  { %v13480_v27 = vunpack.i.h.bf16 %v13478_v24  ;;  %v13479_v28 = vunpack.i.l.bf16 %v13478_v24  ;;  %v15099_v24 = vld [vmem:[%s17692_s0 + $0x150] sm:$0xff] }
 0x180   :  { %12784 = vmatprep.mubr.msk.bf16.mxu0 %vm1524_vm3, %v1479_v2  ;;  %v1371_v36 = vsel %vm1335_vm1, %v15091_v35, %v13485_v25  ;;  %v1370_v38 = vsel %vm1335_vm1, %v15092_v37, %v13484_v26  ;;  %v15100_v26 = vld [vmem:[%s17692_s0 + $0x148] sm:$0xff] }
 0x181   :  { %12785 = vmatmul.mubr.msk.bf16.gmra.mrb[28].mxu0 %vm1524_vm3, %v1480_v22  ;;  %v13493_v29 = vpop.permute.xlu1 %13492  ;;  %v1369_v40 = vsel %vm1335_vm1, %v15093_v39, %v13480_v27  ;;  %v1368_v42 = vsel %vm1335_vm1, %v15094_v41, %v13479_v28  ;;  %v15101_v28 = vld [vmem:[%s17692_s0 + $0x140] sm:$0xff] }
 0x182   :  { %v13488_v30 = vpop.permute.xlu0 %13487  ;;  %v13495_v31 = vunpack.i.h.bf16 %v13493_v29  ;;  %v13494_v32 = vunpack.i.l.bf16 %v13493_v29 }
 0x183   :  { %v13490_v33 = vunpack.i.h.bf16 %v13488_v30  ;;  %v13489_v34 = vunpack.i.l.bf16 %v13488_v30  ;;  %v15102_v30 = vld [vmem:[%s17692_s0 + $0x138] sm:$0xff] }
 0x184   :  { %v1435_v43 = vsel %vm1400_vm2, %v1370_v38, %v13494_v32  ;;  %v1436_v44 = vsel %vm1400_vm2, %v1371_v36, %v13495_v31 }
 0x185   :  { %v1433_v45 = vsel %vm1400_vm2, %v1368_v42, %v13489_v34  ;;  %v1434_v46 = vsel %vm1400_vm2, %v1369_v40, %v13490_v33  ;;  %v1482_v47 = vpack.c.bf16 %v1436_v44, %v1435_v43  ;;  %v13503_v49 = vpop.permute.xlu1 %13502 }
 0x186   :  { %v1481_v48 = vpack.c.bf16 %v1434_v46, %v1433_v45  ;;  %v13498_v50 = vpop.permute.xlu0 %13497  ;;  %v13505_v51 = vunpack.i.h.bf16 %v13503_v49  ;;  %v13504_v52 = vunpack.i.l.bf16 %v13503_v49 }
 0x187   :  { %v13500_v53 = vunpack.i.h.bf16 %v13498_v50  ;;  %v13499_v54 = vunpack.i.l.bf16 %v13498_v50  ;;  %v15103_v50 = vld [vmem:[%s17692_s0 + $0x170] sm:$0xff] }
 0x188   :  { %12788 = vmatprep.mubr.msk.bf16.mxu0 %vm1524_vm3, %v1481_v48  ;;  %v1375_v62 = vsel %vm1335_vm1, %v15095_v61, %v13505_v51  ;;  %v1374_v0 = vsel %vm1335_vm1, %v15096_v63, %v13504_v52  ;;  %v15104_v52 = vld [vmem:[%s17692_s0 + $0x168] sm:$0xff] }
 0x189   :  { %12789 = vmatmul.mubr.msk.bf16.gmra.mrb[32].mxu0 %vm1524_vm3, %v1482_v47  ;;  %v13513_v55 = vpop.permute.xlu1 %13512  ;;  %v1373_v3 = vsel %vm1335_vm1, %v15097_v1, %v13500_v53  ;;  %v1372_v5 = vsel %vm1335_vm1, %v15098_v4, %v13499_v54  ;;  %v15105_v54 = vld [vmem:[%s17692_s0 + $0x160] sm:$0xff] }
 0x18a   :  { %v13508_v56 = vpop.permute.xlu0 %13507  ;;  %v13515_v57 = vunpack.i.h.bf16 %v13513_v55  ;;  %v13514_v58 = vunpack.i.l.bf16 %v13513_v55 }
 0x18b   :  { %v13510_v59 = vunpack.i.h.bf16 %v13508_v56  ;;  %v13509_v60 = vunpack.i.l.bf16 %v13508_v56  ;;  %v15106_v56 = vld [vmem:[%s17692_s0 + $0x158] sm:$0xff] }
 0x18c   :  { %v1439_v6 = vsel %vm1400_vm2, %v1374_v0, %v13514_v58  ;;  %v1440_v7 = vsel %vm1400_vm2, %v1375_v62, %v13515_v57 }
 0x18d   :  { %v1437_v8 = vsel %vm1400_vm2, %v1372_v5, %v13509_v60  ;;  %v1438_v9 = vsel %vm1400_vm2, %v1373_v3, %v13510_v59  ;;  %v1484_v10 = vpack.c.bf16 %v1440_v7, %v1439_v6  ;;  %v13523_v12 = vpop.permute.xlu1 %13522 }
 0x18e   :  { %v1483_v11 = vpack.c.bf16 %v1438_v9, %v1437_v8  ;;  %v13518_v13 = vpop.permute.xlu0 %13517  ;;  %v13525_v14 = vunpack.i.h.bf16 %v13523_v12  ;;  %v13524_v15 = vunpack.i.l.bf16 %v13523_v12 }
 0x18f   :  { %v13520_v16 = vunpack.i.h.bf16 %v13518_v13  ;;  %v13519_v17 = vunpack.i.l.bf16 %v13518_v13  ;;  %v15107_v13 = vld [vmem:[%s17692_s0 + $0x190] sm:$0xff] }
 0x190   :  { %12792 = vmatprep.mubr.msk.bf16.mxu0 %vm1524_vm3, %v1483_v11  ;;  %v1379_v25 = vsel %vm1335_vm1, %v15099_v24, %v13525_v14  ;;  %v1378_v27 = vsel %vm1335_vm1, %v15100_v26, %v13524_v15  ;;  %v15108_v15 = vld [vmem:[%s17692_s0 + $0x188] sm:$0xff] }
 0x191   :  { %12793 = vmatmul.mubr.msk.bf16.gmra.mrb[36].mxu0 %vm1524_vm3, %v1484_v10  ;;  %v13533_v18 = vpop.permute.xlu1 %13532  ;;  %v1377_v29 = vsel %vm1335_vm1, %v15101_v28, %v13520_v16  ;;  %v1376_v31 = vsel %vm1335_vm1, %v15102_v30, %v13519_v17  ;;  %v15109_v17 = vld [vmem:[%s17692_s0 + $0x180] sm:$0xff] }
 0x192   :  { %v13528_v19 = vpop.permute.xlu0 %13527  ;;  %v13535_v20 = vunpack.i.h.bf16 %v13533_v18  ;;  %v13534_v22 = vunpack.i.l.bf16 %v13533_v18 }
 0x193   :  { %v13530_v2 = vunpack.i.h.bf16 %v13528_v19  ;;  %v13529_v23 = vunpack.i.l.bf16 %v13528_v19  ;;  %v15110_v19 = vld [vmem:[%s17692_s0 + $0x178] sm:$0xff] }
 0x194   :  { %v1443_v32 = vsel %vm1400_vm2, %v1378_v27, %v13534_v22  ;;  %v1444_v33 = vsel %vm1400_vm2, %v1379_v25, %v13535_v20 }
 0x195   :  { %v1441_v34 = vsel %vm1400_vm2, %v1376_v31, %v13529_v23  ;;  %v1442_v35 = vsel %vm1400_vm2, %v1377_v29, %v13530_v2  ;;  %v1486_v36 = vpack.c.bf16 %v1444_v33, %v1443_v32  ;;  %v13543_v38 = vpop.permute.xlu1 %13542 }
 0x196   :  { %v1485_v37 = vpack.c.bf16 %v1442_v35, %v1441_v34  ;;  %v13538_v39 = vpop.permute.xlu0 %13537  ;;  %v13545_v40 = vunpack.i.h.bf16 %v13543_v38  ;;  %v13544_v41 = vunpack.i.l.bf16 %v13543_v38 }
 0x197   :  { %v13540_v42 = vunpack.i.h.bf16 %v13538_v39  ;;  %v13539_v43 = vunpack.i.l.bf16 %v13538_v39  ;;  %v15111_v39 = vld [vmem:[%s17692_s0 + $0x1b0] sm:$0xff] }
 0x198   :  { %12796 = vmatprep.mubr.msk.bf16.mxu0 %vm1524_vm3, %v1485_v37  ;;  %v1383_v51 = vsel %vm1335_vm1, %v15103_v50, %v13545_v40  ;;  %v1382_v53 = vsel %vm1335_vm1, %v15104_v52, %v13544_v41  ;;  %v15112_v41 = vld [vmem:[%s17692_s0 + $0x1a8] sm:$0xff] }
 0x199   :  { %12797 = vmatmul.mubr.msk.bf16.gmra.mrb[40].mxu0 %vm1524_vm3, %v1486_v36  ;;  %v13553_v44 = vpop.permute.xlu1 %13552  ;;  %v1381_v55 = vsel %vm1335_vm1, %v15105_v54, %v13540_v42  ;;  %v1380_v57 = vsel %vm1335_vm1, %v15106_v56, %v13539_v43  ;;  %v15113_v43 = vld [vmem:[%s17692_s0 + $0x1a0] sm:$0xff] }
 0x19a   :  { %v13548_v45 = vpop.permute.xlu0 %13547  ;;  %v13555_v46 = vunpack.i.h.bf16 %v13553_v44  ;;  %v13554_v47 = vunpack.i.l.bf16 %v13553_v44 }
 0x19b   :  { %v13550_v48 = vunpack.i.h.bf16 %v13548_v45  ;;  %v13549_v49 = vunpack.i.l.bf16 %v13548_v45  ;;  %v15114_v45 = vld [vmem:[%s17692_s0 + $0x198] sm:$0xff] }
 0x19c   :  { %v1447_v58 = vsel %vm1400_vm2, %v1382_v53, %v13554_v47  ;;  %v1448_v59 = vsel %vm1400_vm2, %v1383_v51, %v13555_v46 }
 0x19d   :  { %v1445_v60 = vsel %vm1400_vm2, %v1380_v57, %v13549_v49  ;;  %v1446_v61 = vsel %vm1400_vm2, %v1381_v55, %v13550_v48  ;;  %v1488_v62 = vpack.c.bf16 %v1448_v59, %v1447_v58  ;;  %v13563_v0 = vpop.permute.xlu1 %13562 }
 0x19e   :  { %v1487_v63 = vpack.c.bf16 %v1446_v61, %v1445_v60  ;;  %v13558_v1 = vpop.permute.xlu0 %13557  ;;  %v13565_v3 = vunpack.i.h.bf16 %v13563_v0  ;;  %v13564_v4 = vunpack.i.l.bf16 %v13563_v0 }
 0x19f   :  { %v13560_v5 = vunpack.i.h.bf16 %v13558_v1  ;;  %v13559_v6 = vunpack.i.l.bf16 %v13558_v1  ;;  %v15115_v1 = vld [vmem:[%s17692_s0 + $0x1d0] sm:$0xff] }
 0x1a0   :  { %12800 = vmatprep.mubr.msk.bf16.mxu0 %vm1524_vm3, %v1487_v63  ;;  %v1387_v14 = vsel %vm1335_vm1, %v15107_v13, %v13565_v3  ;;  %v1386_v16 = vsel %vm1335_vm1, %v15108_v15, %v13564_v4  ;;  %v15116_v4 = vld [vmem:[%s17692_s0 + $0x1c8] sm:$0xff] }
 0x1a1   :  { %12801 = vmatmul.mubr.msk.bf16.gmra.mrb[44].mxu0 %vm1524_vm3, %v1488_v62  ;;  %v13573_v7 = vpop.permute.xlu1 %13572  ;;  %v1385_v18 = vsel %vm1335_vm1, %v15109_v17, %v13560_v5  ;;  %v1384_v20 = vsel %vm1335_vm1, %v15110_v19, %v13559_v6  ;;  %v15117_v6 = vld [vmem:[%s17692_s0 + $0x1c0] sm:$0xff] }
 0x1a2   :  { %v13568_v8 = vpop.permute.xlu0 %13567  ;;  %v13575_v9 = vunpack.i.h.bf16 %v13573_v7  ;;  %v13574_v10 = vunpack.i.l.bf16 %v13573_v7 }
 0x1a3   :  { %v13570_v11 = vunpack.i.h.bf16 %v13568_v8  ;;  %v13569_v12 = vunpack.i.l.bf16 %v13568_v8  ;;  %v15118_v8 = vld [vmem:[%s17692_s0 + $0x1b8] sm:$0xff] }
 0x1a4   :  { %v1451_v22 = vsel %vm1400_vm2, %v1386_v16, %v13574_v10  ;;  %v1452_v2 = vsel %vm1400_vm2, %v1387_v14, %v13575_v9 }
 0x1a5   :  { %v1449_v23 = vsel %vm1400_vm2, %v1384_v20, %v13569_v12  ;;  %v1450_v24 = vsel %vm1400_vm2, %v1385_v18, %v13570_v11  ;;  %v1490_v25 = vpack.c.bf16 %v1452_v2, %v1451_v22  ;;  %v13583_v27 = vpop.permute.xlu1 %13582 }
 0x1a6   :  { %v1489_v26 = vpack.c.bf16 %v1450_v24, %v1449_v23  ;;  %v13578_v28 = vpop.permute.xlu0 %13577  ;;  %v13585_v29 = vunpack.i.h.bf16 %v13583_v27  ;;  %v13584_v30 = vunpack.i.l.bf16 %v13583_v27 }
 0x1a7   :  { %v13580_v31 = vunpack.i.h.bf16 %v13578_v28  ;;  %v13579_v32 = vunpack.i.l.bf16 %v13578_v28  ;;  %v15119_v28 = vld [vmem:[%s17692_s0 + $0x1f0] sm:$0xff] }
 0x1a8   :  { %12804 = vmatprep.mubr.msk.bf16.mxu0 %vm1524_vm3, %v1489_v26  ;;  %v1391_v40 = vsel %vm1335_vm1, %v15111_v39, %v13585_v29  ;;  %v1390_v42 = vsel %vm1335_vm1, %v15112_v41, %v13584_v30  ;;  %v15120_v30 = vld [vmem:[%s17692_s0 + $0x1e8] sm:$0xff] }
 0x1a9   :  { %12805 = vmatmul.mubr.msk.bf16.gmra.mrb[48].mxu0 %vm1524_vm3, %v1490_v25  ;;  %v13593_v33 = vpop.permute.xlu1 %13592  ;;  %v1389_v44 = vsel %vm1335_vm1, %v15113_v43, %v13580_v31  ;;  %v1388_v46 = vsel %vm1335_vm1, %v15114_v45, %v13579_v32  ;;  %v15121_v32 = vld [vmem:[%s17692_s0 + $0x1e0] sm:$0xff] }
 0x1aa   :  { %v13588_v34 = vpop.permute.xlu0 %13587  ;;  %v13595_v35 = vunpack.i.h.bf16 %v13593_v33  ;;  %v13594_v36 = vunpack.i.l.bf16 %v13593_v33  ;;  %v13881_v43 = vld [vmem:[#allocation6] ss:$8 sps:$4 sm:$0xff]   ;;  %v13884_v45 = vld [vmem:[#allocation6 + $0x10] ss:$8 sps:$4 sm:$0xff]  }
 0x1ab   :  { %v13590_v37 = vunpack.i.h.bf16 %v13588_v34  ;;  %v13589_v38 = vunpack.i.l.bf16 %v13588_v34  ;;  %v15122_v34 = vld [vmem:[%s17692_s0 + $0x1d8] sm:$0xff]  ;;  %s15397_s0 = smov 96  }
 0x1ac   :  { %v1455_v47 = vsel %vm1400_vm2, %v1390_v42, %v13594_v36  ;;  %v1456_v48 = vsel %vm1400_vm2, %v1391_v40, %v13595_v35  ;;  %v13879_v42 = vld [vmem:[#allocation6 + $0x4] ss:$8 sps:$4 sm:$0xff]  }
 0x1ad   :  { %v1453_v49 = vsel %vm1400_vm2, %v1388_v46, %v13589_v38  ;;  %v1454_v50 = vsel %vm1400_vm2, %v1389_v44, %v13590_v37  ;;  %v1492_v51 = vpack.c.bf16 %v1456_v48, %v1455_v47  ;;  %v13603_v53 = vpop.permute.xlu1 %13602  ;;  %2817 = vmatprep.subr.bf16.mxu1 %v13879_v42  ;;  %v13882_v44 = vld [vmem:[#allocation6 + $0x14] ss:$8 sps:$4 sm:$0xff]   ;;  %v13885_v46 = vld [vmem:[#allocation6 + $0x24] ss:$8 sps:$4 sm:$0xff]   ;;  %v13887_v47 = vld [vmem:[#allocation6 + $0x20] ss:$8 sps:$4 sm:$0xff]  }
 0x1ae   :  { %v1491_v52 = vpack.c.bf16 %v1454_v50, %v1453_v49  ;;  %v13598_v54 = vpop.permute.xlu0 %13597  ;;  %v13605_v55 = vunpack.i.h.bf16 %v13603_v53  ;;  %v13604_v56 = vunpack.i.l.bf16 %v13603_v53  ;;  %2818 = vmatpush1.bf16.msra.mxu1 %v13881_v43  ;;  %v13888_v48 = vld [vmem:[#allocation6 + $0x34] ss:$8 sps:$4 sm:$0xff]   ;;  %v13890_v49 = vld [vmem:[#allocation6 + $0x30] ss:$8 sps:$4 sm:$0xff]   ;;  %v13891_v50 = vld [vmem:[#allocation6 + $0x44] ss:$8 sps:$4 sm:$0xff]  }
 0x1af   :  { %v13600_v57 = vunpack.i.h.bf16 %v13598_v54  ;;  %v13599_v58 = vunpack.i.l.bf16 %v13598_v54  ;;  %2819 = vmatprep.subr.bf16.mxu1 %v13882_v44  ;;  %v13896_v53 = vld [vmem:[#allocation6 + $0x50] ss:$8 sps:$4 sm:$0xff]   ;;  %v13897_v54 = vld [vmem:[#allocation6 + $0x64] ss:$8 sps:$4 sm:$0xff]  }
 0x1b0   :  { %12808 = vmatprep.mubr.msk.bf16.mxu0 %vm1524_vm3, %v1491_v52  ;;  %v1395_v3 = vsel %vm1335_vm1, %v15115_v1, %v13605_v55  ;;  %v1394_v5 = vsel %vm1335_vm1, %v15116_v4, %v13604_v56  ;;  %v13894_v52 = vld [vmem:[#allocation6 + $0x54] ss:$8 sps:$4 sm:$0xff]   ;;  %v13899_v55 = vld [vmem:[#allocation6 + $0x60] ss:$8 sps:$4 sm:$0xff]   ;;  %v13914_v1 = vld [vmem:[#allocation6 + $0xb0] ss:$8 sps:$4 sm:$0xff]  }
 0x1b1   :  { %12809 = vmatmul.mubr.msk.bf16.gmra.mrb[52].mxu0 %vm1524_vm3, %v1492_v51  ;;  %v13613_v59 = vpop.permute.xlu1 %13612  ;;  %v1393_v7 = vsel %vm1335_vm1, %v15117_v6, %v13600_v57  ;;  %v1392_v9 = vsel %vm1335_vm1, %v15118_v8, %v13599_v58  ;;  %v13893_v51 = vld [vmem:[#allocation6 + $0x40] ss:$8 sps:$4 sm:$0xff]   ;;  %v13900_v56 = vld [vmem:[#allocation6 + $0x74] ss:$8 sps:$4 sm:$0xff]   ;;  %v13902_v57 = vld [vmem:[#allocation6 + $0x70] ss:$8 sps:$4 sm:$0xff]  }
 0x1b2   :  { %v13608_v60 = vpop.permute.xlu0 %13607  ;;  %v13615_v61 = vunpack.i.h.bf16 %v13613_v59  ;;  %v13614_v62 = vunpack.i.l.bf16 %v13613_v59  ;;  %2820 = vmatpush1.bf16.msra.mxu1 %v13884_v45  ;;  %v13903_v58 = vld [vmem:[#allocation6 + $0x84] ss:$8 sps:$4 sm:$0xff]   ;;  %v13905_v59 = vld [vmem:[#allocation6 + $0x80] ss:$8 sps:$4 sm:$0xff]   ;;  %v16228_v4 = vld [vmem:[#allocation4] ss:$0 sm:$0xff] }
 0x1b3   :  { %v13610_v63 = vunpack.i.h.bf16 %v13608_v60  ;;  %v13609_v0 = vunpack.i.l.bf16 %v13608_v60  ;;  %2821 = vmatprep.subr.bf16.mxu1 %v13885_v46  ;;  %v13906_v60 = vld [vmem:[#allocation6 + $0x94] ss:$8 sps:$4 sm:$0xff]   ;;  %v13920_v8 = vld [vmem:[#allocation6 + $0xd0] ss:$8 sps:$4 sm:$0xff]  }
 0x1b4   :  { %v1459_v10 = vsel %vm1400_vm2, %v1394_v5, %v13614_v62  ;;  %v1460_v11 = vsel %vm1400_vm2, %v1395_v3, %v13615_v61  ;;  %v13908_v61 = vld [vmem:[#allocation6 + $0x90] ss:$8 sps:$4 sm:$0xff]   ;;  %v13909_v62 = vld [vmem:[#allocation6 + $0xa4] ss:$8 sps:$4 sm:$0xff]   ;;  %v13917_v5 = vld [vmem:[#allocation6 + $0xc0] ss:$8 sps:$4 sm:$0xff]  }
 0x1b5   :  { %v1457_v12 = vsel %vm1400_vm2, %v1392_v9, %v13609_v0  ;;  %v1458_v13 = vsel %vm1400_vm2, %v1393_v7, %v13610_v63  ;;  %v1494_v14 = vpack.c.bf16 %v1460_v11, %v1459_v10  ;;  %v13623_v16 = vpop.permute.xlu1 %13622  ;;  %v13911_v63 = vld [vmem:[#allocation6 + $0xa0] ss:$8 sps:$4 sm:$0xff]   ;;  %v13912_v0 = vld [vmem:[#allocation6 + $0xb4] ss:$8 sps:$4 sm:$0xff]   ;;  %v13915_v3 = vld [vmem:[#allocation6 + $0xc4] ss:$8 sps:$4 sm:$0xff]  }
 0x1b6   :  { %v1493_v15 = vpack.c.bf16 %v1458_v13, %v1457_v12  ;;  %v13618_v17 = vpop.permute.xlu0 %13617  ;;  %v13625_v18 = vunpack.i.h.bf16 %v13623_v16  ;;  %v13624_v19 = vunpack.i.l.bf16 %v13623_v16  ;;  %2822 = vmatpush1.bf16.msra.mxu1 %v13887_v47  ;;  %v13918_v6 = vld [vmem:[#allocation6 + $0xd4] ss:$8 sps:$4 sm:$0xff]   ;;  %v13921_v16 = vld [vmem:[#allocation6 + $0xe4] ss:$8 sps:$4 sm:$0xff]  }
 0x1b7   :  { %v13620_v20 = vunpack.i.h.bf16 %v13618_v17  ;;  %v13619_v22 = vunpack.i.l.bf16 %v13618_v17  ;;  %2823 = vmatprep.subr.bf16.mxu1 %v13888_v48 }
 0x1b8   :  { %12812 = vmatprep.mubr.msk.bf16.mxu0 %vm1524_vm3, %v1493_v15  ;;  %v1399_v29 = vsel %vm1335_vm1, %v15119_v28, %v13625_v18  ;;  %v1398_v31 = vsel %vm1335_vm1, %v15120_v30, %v13624_v19  ;;  %v13923_v19 = vld [vmem:[#allocation6 + $0xe0] ss:$8 sps:$4 sm:$0xff]  }
 0x1b9   :  { %12813 = vmatmul.mubr.msk.bf16.gmra.mrb[56].mxu0 %vm1524_vm3, %v1494_v14  ;;  %v13633_v2 = vpop.permute.xlu1 %13632  ;;  %v1397_v33 = vsel %vm1335_vm1, %v15121_v32, %v13620_v20  ;;  %v1396_v35 = vsel %vm1335_vm1, %v15122_v34, %v13619_v22 }
 0x1ba   :  { %v13628_v23 = vpop.permute.xlu0 %13627  ;;  %v13635_v24 = vunpack.i.h.bf16 %v13633_v2  ;;  %v13634_v25 = vunpack.i.l.bf16 %v13633_v2  ;;  %2824 = vmatpush1.bf16.msra.mxu1 %v13890_v49 }
 0x1bb   :  { %v13630_v26 = vunpack.i.h.bf16 %v13628_v23  ;;  %v13629_v27 = vunpack.i.l.bf16 %v13628_v23  ;;  %2825 = vmatprep.subr.bf16.mxu1 %v13891_v50  ;;  %v13924_v23 = vld [vmem:[#allocation6 + $0xf4] ss:$8 sps:$4 sm:$0xff]  }
 0x1bc   :  { %v1463_v36 = vsel %vm1400_vm2, %v1398_v31, %v13634_v25  ;;  %v1464_v37 = vsel %vm1400_vm2, %v1399_v29, %v13635_v24 }
 0x1bd   :  { %v1461_v38 = vsel %vm1400_vm2, %v1396_v35, %v13629_v27  ;;  %v1462_v39 = vsel %vm1400_vm2, %v1397_v33, %v13630_v26  ;;  %v1496_v40 = vpack.c.bf16 %v1464_v37, %v1463_v36  ;;  %v13926_v26 = vld [vmem:[#allocation6 + $0xf0] ss:$8 sps:$4 sm:$0xff]  }
 0x1be   :  { %v1495_v41 = vpack.c.bf16 %v1462_v39, %v1461_v38  ;;  %2826 = vmatpush1.bf16.msra.mxu1 %v13893_v51  ;;  %v13929_v38 = vld [vmem:[#allocation6 + $0x104] ss:$8 sps:$4 sm:$0xff]  }
 0x1bf   :  { %2827 = vmatprep.subr.bf16.mxu1 %v13894_v52 }
 0x1c0   :  { %12816 = vmatprep.mubr.msk.bf16.mxu0 %vm1524_vm3, %v1495_v41 }
 0x1c1   :  { %12817 = vmatmul.mubr.msk.bf16.gmra.mrb[60].mxu0 %vm1524_vm3, %v1496_v40 }
 0x1c2   :  { %2828 = vmatpush1.bf16.msra.mxu1 %v13896_v53 }
 0x1c3   :  { %2829 = vmatprep.subr.bf16.mxu1 %v13897_v54 }
 0x1c6   :  { %2830 = vmatpush1.bf16.msra.mxu1 %v13899_v55 }
 0x1c7   :  { %2831 = vmatprep.subr.bf16.mxu1 %v13900_v56 }
 0x1ca   :  { %2832 = vmatpush1.bf16.msra.mxu1 %v13902_v57 }
 0x1cb   :  { %2833 = vmatprep.subr.bf16.mxu1 %v13903_v58 }
 0x1ce   :  { %2834 = vmatpush1.bf16.msra.mxu1 %v13905_v59 }
 0x1cf   :  { %2835 = vmatprep.subr.bf16.mxu1 %v13906_v60 }
 0x1d2   :  { %2836 = vmatpush1.bf16.msra.mxu1 %v13908_v61 }
 0x1d3   :  { %2837 = vmatprep.subr.bf16.mxu1 %v13909_v62 }
 0x1d6   :  { %2838 = vmatpush1.bf16.msra.mxu1 %v13911_v63 }
 0x1d7   :  { %2839 = vmatprep.subr.bf16.mxu1 %v13912_v0 }
 0x1da   :  { %2840 = vmatpush1.bf16.msra.mxu1 %v13914_v1 }
 0x1db   :  { %2841 = vmatprep.subr.bf16.mxu1 %v13915_v3 }
 0x1de   :  { %2842 = vmatpush1.bf16.msra.mxu1 %v13917_v5 }
 0x1df   :  { %2843 = vmatprep.subr.bf16.mxu1 %v13918_v6 }
 0x1e2   :  { %2844 = vmatpush1.bf16.msra.mxu1 %v13920_v8 }
 0x1e3   :  { %2845 = vmatprep.subr.bf16.mxu1 %v13921_v16 }
 0x1e6   :  { %2846 = vmatpush1.bf16.msra.mxu1 %v13923_v19 }
 0x1e7   :  { %2847 = vmatprep.subr.bf16.mxu1 %v13924_v23 }
 0x1ea   :  { %2848 = vmatpush1.bf16.msra.mxu1 %v13926_v26 }
 0x1eb   :  { %3010 = vmatprep.subr.bf16.mxu1 %v13929_v38 }
 0x21c   :  { %v12758_v7 = vpop.f32.mrb[0].mxu0 }
 0x21d   :  { %v1668_v9 = vadd.f32 %v12758_v7, %v16228_v4  ;;  %v1659_v10 = vpop.f32.mrb[1].mxu0 }
 0x21e   :  { %v1660_v11 = vadd.f32 %v16228_v4, %v1659_v10  ;;  %v12759_v12 = vpop.f32.mrb[2].mxu0 }
 0x21f   :  { %v1916_v13 = vmax.f32 %v1668_v9, 0.0  ;;  %v1671_v14 = vadd.f32 %v12759_v12, %v16228_v4  ;;  %v1662_v15 = vpop.f32.mrb[3].mxu0 }
 0x220   :  { %v1914_v17 = vmax.f32 %v1660_v11, 0.0  ;;  %v1663_v18 = vadd.f32 %v16228_v4, %v1662_v15 }
 0x221   :  { %v1917_v20 = vmax.f32 %v1671_v14, 0.0 }
 0x222   :  { %v1915_v22 = vmax.f32 %v1663_v18, 0.0 }
 0x223   :  { %v16234_v2 = vmax.f32 %v1916_v13, %v1917_v20 }
 0x224   :  { %v16236_v24 = vmax.f32 %v1914_v17, %v1915_v22  ;;  %v12762_v25 = vpop.f32.mrb[4].mxu0 }
 0x225   :  { %v1684_v27 = vadd.f32 %v12762_v25, %v16228_v4  ;;  %v1675_v28 = vpop.f32.mrb[5].mxu0 }
 0x226   :  { %v1676_v29 = vadd.f32 %v16228_v4, %v1675_v28  ;;  %v12763_v30 = vpop.f32.mrb[6].mxu0  ;;  %v13636_v31 = vpack.i.bf16 %v16234_v2, %v16236_v24 }
 0x227   :  { %v1687_v32 = vadd.f32 %v12763_v30, %v16228_v4  ;;  %v1678_v33 = vpop.f32.mrb[7].mxu0  ;;  %v1920_v35 = vmax.f32 %v1684_v27, 0.0 }
 0x228   :  { %v1679_v34 = vadd.f32 %v16228_v4, %v1678_v33  ;;  %13637 = vrot.lane.b32.xlu0 %v13636_v31, %s15397_s0  ;;  %v1918_v36 = vmax.f32 %v1676_v29, 0.0 }
 0x229   :  { %v1921_v37 = vmax.f32 %v1687_v32, 0.0 }
 0x22a   :  { %v1919_v39 = vmax.f32 %v1679_v34, 0.0 }
 0x22b   :  { %v16245_v40 = vmax.f32 %v1920_v35, %v1921_v37 }
 0x22c   :  { %v16247_v41 = vmax.f32 %v1918_v36, %v1919_v39  ;;  %v12766_v42 = vpop.f32.mrb[8].mxu0 }
 0x22d   :  { %v1700_v43 = vadd.f32 %v12766_v42, %v16228_v4  ;;  %v1691_v44 = vpop.f32.mrb[9].mxu0 }
 0x22e   :  { %v1692_v45 = vadd.f32 %v16228_v4, %v1691_v44  ;;  %v12767_v46 = vpop.f32.mrb[10].mxu0  ;;  %v13641_v47 = vpack.i.bf16 %v16247_v41, %v16234_v2  ;;  %v13646_v48 = vpack.i.bf16 %v16245_v40, %v16247_v41 }
 0x22f   :  { %v1703_v49 = vadd.f32 %v12767_v46, %v16228_v4  ;;  %v1694_v50 = vpop.f32.mrb[11].mxu0  ;;  %v1924_v52 = vmax.f32 %v1700_v43, 0.0 }
 0x230   :  { %v1695_v51 = vadd.f32 %v16228_v4, %v1694_v50  ;;  %13642 = vrot.lane.b32.xlu1 %v13641_v47, %s15383_s10  ;;  %13647 = vrot.lane.b32.xlu0 %v13646_v48, %s15397_s0  ;;  %v1922_v54 = vmax.f32 %v1692_v45, 0.0 }
 0x231   :  { %v1925_v53 = vmax.f32 %v1703_v49, 0.0 }
 0x232   :  { %v1923_v55 = vmax.f32 %v1695_v51, 0.0 }
 0x233   :  { %v16259_v56 = vmax.f32 %v1924_v52, %v1925_v53 }
 0x234   :  { %v16261_v57 = vmax.f32 %v1922_v54, %v1923_v55  ;;  %v12770_v58 = vpop.f32.mrb[12].mxu0 }
 0x235   :  { %v1716_v59 = vadd.f32 %v12770_v58, %v16228_v4  ;;  %v1707_v60 = vpop.f32.mrb[13].mxu0 }
 0x236   :  { %v1708_v61 = vadd.f32 %v16228_v4, %v1707_v60  ;;  %v12771_v62 = vpop.f32.mrb[14].mxu0  ;;  %v13651_v63 = vpack.i.bf16 %v16261_v57, %v16245_v40  ;;  %v13656_v0 = vpack.i.bf16 %v16259_v56, %v16261_v57 }
 0x237   :  { %v1719_v1 = vadd.f32 %v12771_v62, %v16228_v4  ;;  %v1710_v3 = vpop.f32.mrb[15].mxu0  ;;  %v1928_v6 = vmax.f32 %v1716_v59, 0.0 }
 0x238   :  { %v1711_v5 = vadd.f32 %v16228_v4, %v1710_v3  ;;  %13652 = vrot.lane.b32.xlu1 %v13651_v63, %s15383_s10  ;;  %13657 = vrot.lane.b32.xlu0 %v13656_v0, %s15397_s0  ;;  %v1926_v8 = vmax.f32 %v1708_v61, 0.0 }
 0x239   :  { %v1929_v7 = vmax.f32 %v1719_v1, 0.0 }
 0x23a   :  { %v1927_v9 = vmax.f32 %v1711_v5, 0.0 }
 0x23b   :  { %v16273_v10 = vmax.f32 %v1928_v6, %v1929_v7 }
 0x23c   :  { %v16275_v11 = vmax.f32 %v1926_v8, %v1927_v9  ;;  %v12774_v12 = vpop.f32.mrb[16].mxu0 }
 0x23d   :  { %v1732_v13 = vadd.f32 %v12774_v12, %v16228_v4  ;;  %v1723_v14 = vpop.f32.mrb[17].mxu0 }
 0x23e   :  { %v1724_v15 = vadd.f32 %v16228_v4, %v1723_v14  ;;  %v12775_v16 = vpop.f32.mrb[18].mxu0  ;;  %v13661_v17 = vpack.i.bf16 %v16275_v11, %v16259_v56  ;;  %v13666_v18 = vpack.i.bf16 %v16273_v10, %v16275_v11 }
 0x23f   :  { %v1735_v19 = vadd.f32 %v12775_v16, %v16228_v4  ;;  %v1726_v20 = vpop.f32.mrb[19].mxu0  ;;  %v1932_v23 = vmax.f32 %v1732_v13, 0.0 }
 0x240   :  { %v1727_v22 = vadd.f32 %v16228_v4, %v1726_v20  ;;  %13662 = vrot.lane.b32.xlu1 %v13661_v17, %s15383_s10  ;;  %13667 = vrot.lane.b32.xlu0 %v13666_v18, %s15397_s0  ;;  %v1930_v26 = vmax.f32 %v1724_v15, 0.0 }
 0x241   :  { %v1933_v25 = vmax.f32 %v1735_v19, 0.0 }
 0x242   :  { %v1931_v27 = vmax.f32 %v1727_v22, 0.0 }
 0x243   :  { %v16287_v28 = vmax.f32 %v1932_v23, %v1933_v25 }
 0x244   :  { %v16289_v29 = vmax.f32 %v1930_v26, %v1931_v27  ;;  %v12778_v30 = vpop.f32.mrb[20].mxu0 }
 0x245   :  { %v1748_v31 = vadd.f32 %v12778_v30, %v16228_v4  ;;  %v1739_v32 = vpop.f32.mrb[21].mxu0 }
 0x246   :  { %v1740_v33 = vadd.f32 %v16228_v4, %v1739_v32  ;;  %v12779_v34 = vpop.f32.mrb[22].mxu0  ;;  %v13671_v35 = vpack.i.bf16 %v16289_v29, %v16273_v10  ;;  %v13676_v36 = vpack.i.bf16 %v16287_v28, %v16289_v29 }
 0x247   :  { %v1751_v37 = vadd.f32 %v12779_v34, %v16228_v4  ;;  %v1742_v38 = vpop.f32.mrb[23].mxu0  ;;  %v1936_v42 = vmax.f32 %v1748_v31, 0.0 }
 0x248   :  { %v1743_v39 = vadd.f32 %v16228_v4, %v1742_v38  ;;  %13672 = vrot.lane.b32.xlu1 %v13671_v35, %s15383_s10  ;;  %13677 = vrot.lane.b32.xlu0 %v13676_v36, %s15397_s0  ;;  %v1934_v44 = vmax.f32 %v1740_v33, 0.0 }
 0x249   :  { %v1937_v43 = vmax.f32 %v1751_v37, 0.0 }
 0x24a   :  { %v1935_v45 = vmax.f32 %v1743_v39, 0.0 }
 0x24b   :  { %v16301_v46 = vmax.f32 %v1936_v42, %v1937_v43 }
 0x24c   :  { %v16303_v47 = vmax.f32 %v1934_v44, %v1935_v45  ;;  %v12782_v48 = vpop.f32.mrb[24].mxu0 }
 0x24d   :  { %v1764_v49 = vadd.f32 %v12782_v48, %v16228_v4  ;;  %v1755_v50 = vpop.f32.mrb[25].mxu0 }
 0x24e   :  { %v1756_v51 = vadd.f32 %v16228_v4, %v1755_v50  ;;  %v12783_v52 = vpop.f32.mrb[26].mxu0  ;;  %v13681_v53 = vpack.i.bf16 %v16303_v47, %v16287_v28  ;;  %v13686_v54 = vpack.i.bf16 %v16301_v46, %v16303_v47 }
 0x24f   :  { %v1767_v55 = vadd.f32 %v12783_v52, %v16228_v4  ;;  %v1758_v58 = vpop.f32.mrb[27].mxu0  ;;  %v1940_v60 = vmax.f32 %v1764_v49, 0.0 }
 0x250   :  { %v1759_v59 = vadd.f32 %v16228_v4, %v1758_v58  ;;  %13682 = vrot.lane.b32.xlu1 %v13681_v53, %s15383_s10  ;;  %13687 = vrot.lane.b32.xlu0 %v13686_v54, %s15397_s0  ;;  %v1938_v62 = vmax.f32 %v1756_v51, 0.0 }
 0x251   :  { %v1941_v61 = vmax.f32 %v1767_v55, 0.0 }
 0x252   :  { %v1939_v63 = vmax.f32 %v1759_v59, 0.0 }
 0x253   :  { %v16315_v0 = vmax.f32 %v1940_v60, %v1941_v61 }
 0x254   :  { %v16317_v1 = vmax.f32 %v1938_v62, %v1939_v63  ;;  %v12786_v3 = vpop.f32.mrb[28].mxu0 }
 0x255   :  { %v1780_v5 = vadd.f32 %v12786_v3, %v16228_v4  ;;  %v1771_v6 = vpop.f32.mrb[29].mxu0 }
 0x256   :  { %v1772_v7 = vadd.f32 %v16228_v4, %v1771_v6  ;;  %v12787_v8 = vpop.f32.mrb[30].mxu0  ;;  %v13691_v9 = vpack.i.bf16 %v16317_v1, %v16301_v46  ;;  %v13696_v12 = vpack.i.bf16 %v16315_v0, %v16317_v1 }
 0x257   :  { %v1783_v13 = vadd.f32 %v12787_v8, %v16228_v4  ;;  %v1774_v14 = vpop.f32.mrb[31].mxu0  ;;  %v1944_v16 = vmax.f32 %v1780_v5, 0.0 }
 0x258   :  { %v1775_v15 = vadd.f32 %v16228_v4, %v1774_v14  ;;  %13692 = vrot.lane.b32.xlu1 %v13691_v9, %s15383_s10  ;;  %13697 = vrot.lane.b32.xlu0 %v13696_v12, %s15397_s0  ;;  %v1942_v18 = vmax.f32 %v1772_v7, 0.0 }
 0x259   :  { %v1945_v17 = vmax.f32 %v1783_v13, 0.0 }
 0x25a   :  { %v1943_v19 = vmax.f32 %v1775_v15, 0.0 }
 0x25b   :  { %v16329_v20 = vmax.f32 %v1944_v16, %v1945_v17 }
 0x25c   :  { %v16331_v22 = vmax.f32 %v1942_v18, %v1943_v19  ;;  %v12790_v23 = vpop.f32.mrb[32].mxu0 }
 0x25d   :  { %v1796_v25 = vadd.f32 %v12790_v23, %v16228_v4  ;;  %v1787_v26 = vpop.f32.mrb[33].mxu0 }
 0x25e   :  { %v1788_v27 = vadd.f32 %v16228_v4, %v1787_v26  ;;  %v12791_v30 = vpop.f32.mrb[34].mxu0  ;;  %v13701_v31 = vpack.i.bf16 %v16331_v22, %v16315_v0  ;;  %v13706_v32 = vpack.i.bf16 %v16329_v20, %v16331_v22 }
 0x25f   :  { %v1799_v33 = vadd.f32 %v12791_v30, %v16228_v4  ;;  %v1790_v34 = vpop.f32.mrb[35].mxu0  ;;  %v1948_v36 = vmax.f32 %v1796_v25, 0.0 }
 0x260   :  { %v1791_v35 = vadd.f32 %v16228_v4, %v1790_v34  ;;  %13702 = vrot.lane.b32.xlu1 %v13701_v31, %s15383_s10  ;;  %13707 = vrot.lane.b32.xlu0 %v13706_v32, %s15397_s0  ;;  %v1946_v38 = vmax.f32 %v1788_v27, 0.0 }
 0x261   :  { %v1949_v37 = vmax.f32 %v1799_v33, 0.0 }
 0x262   :  { %v1947_v39 = vmax.f32 %v1791_v35, 0.0 }
 0x263   :  { %v16343_v42 = vmax.f32 %v1948_v36, %v1949_v37 }
 0x264   :  { %v16345_v43 = vmax.f32 %v1946_v38, %v1947_v39  ;;  %v12794_v44 = vpop.f32.mrb[36].mxu0 }
 0x265   :  { %v1812_v45 = vadd.f32 %v12794_v44, %v16228_v4  ;;  %v1803_v48 = vpop.f32.mrb[37].mxu0 }
 0x266   :  { %v1804_v49 = vadd.f32 %v16228_v4, %v1803_v48  ;;  %v12795_v50 = vpop.f32.mrb[38].mxu0  ;;  %v13711_v51 = vpack.i.bf16 %v16345_v43, %v16329_v20  ;;  %v13716_v52 = vpack.i.bf16 %v16343_v42, %v16345_v43 }
 0x267   :  { %v1815_v53 = vadd.f32 %v12795_v50, %v16228_v4  ;;  %v1806_v54 = vpop.f32.mrb[39].mxu0  ;;  %v1952_v58 = vmax.f32 %v1812_v45, 0.0 }
 0x268   :  { %v1807_v55 = vadd.f32 %v16228_v4, %v1806_v54  ;;  %13712 = vrot.lane.b32.xlu1 %v13711_v51, %s15383_s10  ;;  %13717 = vrot.lane.b32.xlu0 %v13716_v52, %s15397_s0  ;;  %v1950_v60 = vmax.f32 %v1804_v49, 0.0 }
 0x269   :  { %v1953_v59 = vmax.f32 %v1815_v53, 0.0 }
 0x26a   :  { %v1951_v61 = vmax.f32 %v1807_v55, 0.0 }
 0x26b   :  { %v16357_v62 = vmax.f32 %v1952_v58, %v1953_v59 }
 0x26c   :  { %v16359_v63 = vmax.f32 %v1950_v60, %v1951_v61  ;;  %v12798_v3 = vpop.f32.mrb[40].mxu0 }
 0x26d   :  { %v1828_v5 = vadd.f32 %v12798_v3, %v16228_v4  ;;  %v1819_v6 = vpop.f32.mrb[41].mxu0 }
 0x26e   :  { %v1820_v7 = vadd.f32 %v16228_v4, %v1819_v6  ;;  %v12799_v8 = vpop.f32.mrb[42].mxu0  ;;  %v13721_v9 = vpack.i.bf16 %v16359_v63, %v16343_v42  ;;  %v13726_v12 = vpack.i.bf16 %v16357_v62, %v16359_v63 }
 0x26f   :  { %v1831_v13 = vadd.f32 %v12799_v8, %v16228_v4  ;;  %v1822_v14 = vpop.f32.mrb[43].mxu0  ;;  %v1956_v16 = vmax.f32 %v1828_v5, 0.0 }
 0x270   :  { %v1823_v15 = vadd.f32 %v16228_v4, %v1822_v14  ;;  %13722 = vrot.lane.b32.xlu1 %v13721_v9, %s15383_s10  ;;  %13727 = vrot.lane.b32.xlu0 %v13726_v12, %s15397_s0  ;;  %v1954_v18 = vmax.f32 %v1820_v7, 0.0 }
 0x271   :  { %v1957_v17 = vmax.f32 %v1831_v13, 0.0 }
 0x272   :  { %v1955_v19 = vmax.f32 %v1823_v15, 0.0 }
 0x273   :  { %v16371_v23 = vmax.f32 %v1956_v16, %v1957_v17 }
 0x274   :  { %v16373_v25 = vmax.f32 %v1954_v18, %v1955_v19  ;;  %v12802_v26 = vpop.f32.mrb[44].mxu0 }
 0x275   :  { %v1844_v27 = vadd.f32 %v12802_v26, %v16228_v4  ;;  %v1835_v30 = vpop.f32.mrb[45].mxu0 }
 0x276   :  { %v1836_v31 = vadd.f32 %v16228_v4, %v1835_v30  ;;  %v12803_v32 = vpop.f32.mrb[46].mxu0  ;;  %v13731_v33 = vpack.i.bf16 %v16373_v25, %v16357_v62  ;;  %v13736_v34 = vpack.i.bf16 %v16371_v23, %v16373_v25 }
 0x277   :  { %v1847_v35 = vadd.f32 %v12803_v32, %v16228_v4  ;;  %v1838_v36 = vpop.f32.mrb[47].mxu0  ;;  %v1960_v38 = vmax.f32 %v1844_v27, 0.0 }
 0x278   :  { %v1839_v37 = vadd.f32 %v16228_v4, %v1838_v36  ;;  %13732 = vrot.lane.b32.xlu1 %v13731_v33, %s15383_s10  ;;  %13737 = vrot.lane.b32.xlu0 %v13736_v34, %s15397_s0  ;;  %v1958_v44 = vmax.f32 %v1836_v31, 0.0 }
 0x279   :  { %v1961_v39 = vmax.f32 %v1847_v35, 0.0 }
 0x27a   :  { %v1959_v45 = vmax.f32 %v1839_v37, 0.0 }
 0x27b   :  { %v16385_v48 = vmax.f32 %v1960_v38, %v1961_v39 }
 0x27c   :  { %v16387_v49 = vmax.f32 %v1958_v44, %v1959_v45  ;;  %v12806_v50 = vpop.f32.mrb[48].mxu0 }
 0x27d   :  { %v1860_v51 = vadd.f32 %v12806_v50, %v16228_v4  ;;  %v1851_v52 = vpop.f32.mrb[49].mxu0 }
 0x27e   :  { %v1852_v53 = vadd.f32 %v16228_v4, %v1851_v52  ;;  %v12807_v54 = vpop.f32.mrb[50].mxu0  ;;  %v13741_v55 = vpack.i.bf16 %v16387_v49, %v16371_v23  ;;  %v13746_v58 = vpack.i.bf16 %v16385_v48, %v16387_v49 }
 0x27f   :  { %v1863_v59 = vadd.f32 %v12807_v54, %v16228_v4  ;;  %v1854_v60 = vpop.f32.mrb[51].mxu0  ;;  %v1964_v3 = vmax.f32 %v1860_v51, 0.0 }
 0x280   :  { %v1855_v61 = vadd.f32 %v16228_v4, %v1854_v60  ;;  %13742 = vrot.lane.b32.xlu1 %v13741_v55, %s15383_s10  ;;  %13747 = vrot.lane.b32.xlu0 %v13746_v58, %s15397_s0  ;;  %v1962_v6 = vmax.f32 %v1852_v53, 0.0 }
 0x281   :  { %v1965_v5 = vmax.f32 %v1863_v59, 0.0 }
 0x282   :  { %v1963_v7 = vmax.f32 %v1855_v61, 0.0 }
 0x283   :  { %v16399_v8 = vmax.f32 %v1964_v3, %v1965_v5 }
 0x284   :  { %v16401_v9 = vmax.f32 %v1962_v6, %v1963_v7  ;;  %v12810_v12 = vpop.f32.mrb[52].mxu0 }
 0x285   :  { %v1876_v13 = vadd.f32 %v12810_v12, %v16228_v4  ;;  %v1867_v14 = vpop.f32.mrb[53].mxu0 }
 0x286   :  { %v1868_v15 = vadd.f32 %v16228_v4, %v1867_v14  ;;  %v12811_v16 = vpop.f32.mrb[54].mxu0  ;;  %v13751_v17 = vpack.i.bf16 %v16401_v9, %v16385_v48  ;;  %v13756_v18 = vpack.i.bf16 %v16399_v8, %v16401_v9 }
 0x287   :  { %v1879_v19 = vadd.f32 %v12811_v16, %v16228_v4  ;;  %v1870_v26 = vpop.f32.mrb[55].mxu0  ;;  %v1968_v30 = vmax.f32 %v1876_v13, 0.0 }
 0x288   :  { %v1871_v27 = vadd.f32 %v16228_v4, %v1870_v26  ;;  %13752 = vrot.lane.b32.xlu1 %v13751_v17, %s15383_s10  ;;  %13757 = vrot.lane.b32.xlu0 %v13756_v18, %s15397_s0  ;;  %v1966_v32 = vmax.f32 %v1868_v15, 0.0 }
 0x289   :  { %v1969_v31 = vmax.f32 %v1879_v19, 0.0 }
 0x28a   :  { %v1967_v33 = vmax.f32 %v1871_v27, 0.0 }
 0x28b   :  { %v16413_v34 = vmax.f32 %v1968_v30, %v1969_v31 }
 0x28c   :  { %v16415_v35 = vmax.f32 %v1966_v32, %v1967_v33  ;;  %v12814_v36 = vpop.f32.mrb[56].mxu0 }
 0x28d   :  { %v1892_v37 = vadd.f32 %v12814_v36, %v16228_v4  ;;  %v1883_v38 = vpop.f32.mrb[57].mxu0 }
 0x28e   :  { %v1884_v39 = vadd.f32 %v16228_v4, %v1883_v38  ;;  %v12815_v44 = vpop.f32.mrb[58].mxu0  ;;  %v13761_v45 = vpack.i.bf16 %v16415_v35, %v16399_v8  ;;  %v13766_v50 = vpack.i.bf16 %v16413_v34, %v16415_v35 }
 0x28f   :  { %v1895_v51 = vadd.f32 %v12815_v44, %v16228_v4  ;;  %v1886_v52 = vpop.f32.mrb[59].mxu0  ;;  %v1972_v54 = vmax.f32 %v1892_v37, 0.0 }
 0x290   :  { %v1887_v53 = vadd.f32 %v16228_v4, %v1886_v52  ;;  %13762 = vrot.lane.b32.xlu1 %v13761_v45, %s15383_s10  ;;  %13767 = vrot.lane.b32.xlu0 %v13766_v50, %s15397_s0  ;;  %v1970_v58 = vmax.f32 %v1884_v39, 0.0 }
 0x291   :  { %v1973_v55 = vmax.f32 %v1895_v51, 0.0 }
 0x292   :  { %v1971_v59 = vmax.f32 %v1887_v53, 0.0 }
 0x293   :  { %v16427_v60 = vmax.f32 %v1972_v54, %v1973_v55 }
 0x294   :  { %v16429_v61 = vmax.f32 %v1970_v58, %v1971_v59  ;;  %v12818_v3 = vpop.f32.mrb[60].mxu0  ;;  %v13927_v58 = vld [vmem:[#allocation6 + $0x100] ss:$8 sps:$4 sm:$0xff]  }
 0x295   :  { %v1908_v5 = vadd.f32 %v12818_v3, %v16228_v4  ;;  %v1899_v6 = vpop.f32.mrb[61].mxu0  ;;  %v13932_v3 = vld [vmem:[#allocation6 + $0x114] ss:$8 sps:$4 sm:$0xff]  }
 0x296   :  { %v1900_v7 = vadd.f32 %v16228_v4, %v1899_v6  ;;  %v12819_v12 = vpop.f32.mrb[62].mxu0  ;;  %v13771_v13 = vpack.i.bf16 %v16429_v61, %v16413_v34  ;;  %v13776_v14 = vpack.i.bf16 %v16427_v60, %v16429_v61 }
 0x297   :  { %v1911_v15 = vadd.f32 %v12819_v12, %v16228_v4  ;;  %v1902_v16 = vpop.f32.mrb[63].mxu0  ;;  %v1976_v18 = vmax.f32 %v1908_v5, 0.0 }
 0x298   :  { %v1903_v17 = vadd.f32 %v16228_v4, %v1902_v16  ;;  %13772 = vrot.lane.b32.xlu1 %v13771_v13, %s15383_s10  ;;  %13777 = vrot.lane.b32.xlu0 %v13776_v14, %s15397_s0  ;;  %v1974_v26 = vmax.f32 %v1900_v7, 0.0  ;;  %v13930_v7 = vld [vmem:[#allocation6 + $0x110] ss:$8 sps:$4 sm:$0xff]  }
 0x299   :  { %v1977_v19 = vmax.f32 %v1911_v15, 0.0 }
 0x29a   :  { %v1975_v27 = vmax.f32 %v1903_v17, 0.0  ;;  %v13638_v32 = vpop.permute.xlu0 %13637 }
 0x29b   :  { %v2009_v30 = vmax.f32 %v1976_v18, %v1977_v19  ;;  %v13640_v37 = vunpack.i.h.bf16 %v13638_v32  ;;  %v13639_v39 = vunpack.i.l.bf16 %v13638_v32 }
 0x29c   :  { %v16441_v31 = vmax.f32 %v1974_v26, %v1975_v27 }
 0x29d   :  { %v13791_v38 = vpack.i.bf16 %v17708_v21, %v2009_v30  ;;  %v2428_v50 = vsel %vm2426_vm4, %v16236_v24, %v13640_v37 }
 0x29e   :  { %v13781_v33 = vpack.i.bf16 %v16441_v31, %v16427_v60  ;;  %v13786_v36 = vpack.i.bf16 %v2009_v30, %v16441_v31  ;;  %v11490_v59 = vpack.c.bf16 %v2428_v50, %v13639_v39 }
 0x2a0   :  { %13782 = vrot.lane.b32.xlu1 %v13781_v33, %s15383_s10  ;;  %13787 = vrot.lane.b32.xlu0 %v13786_v36, %s15397_s0 }
 0x2a2   :  { %v13643_v4 = vpop.permute.xlu1 %13642  ;;  %v13648_v52 = vpop.permute.xlu0 %13647 }
 0x2a3   :  { %v13645_v44 = vunpack.i.h.bf16 %v13643_v4  ;;  %v13644_v45 = vunpack.i.l.bf16 %v13643_v4  ;;  %v13650_v5 = vunpack.i.h.bf16 %v13648_v52  ;;  %v13649_v6 = vunpack.i.l.bf16 %v13648_v52 }
 0x2a4   :  { %13792 = vrot.lane.b32.xlu1 %v13791_v38, %s15383_s10 }
 0x2a5   :  { %v16453_v51 = vpack.c.bf16 %v13645_v44, %v13644_v45  ;;  %v2460_v53 = vsel %vm2459_vm5, %v13639_v39, %v13644_v45  ;;  %v2461_v54 = vsel %vm2459_vm5, %v13640_v37, %v13645_v44  ;;  %v2429_v14 = vsel %vm2426_vm4, %v16234_v2, %v13649_v6 }
 0x2a6   :  { %v2493_v55 = vpack.c.bf16 %v2461_v54, %v2460_v53  ;;  %v2430_v15 = vsel %vm2426_vm4, %v16247_v41, %v13650_v5 }
 0x2a7   :  { %v2495_v27 = vpack.c.bf16 %v2430_v15, %v2429_v14 }
 0x2a8   :  { %2849 = vmatprep.mubr.bf16.mxu1 %v2493_v55 }
 0x2a9   :  { %11491 = vmatmul.mubr.msk.bf16.vlgmr.msra.gmra.mrb[0].mxu1 %vm11489_vm8, %v11490_v59 }
 0x2aa   :  { %v13653_v24 = vpop.permute.xlu1 %13652  ;;  %3011 = vmatpush1.bf16.msra.mxu1 %v13927_v58  ;;  %v13658_v17 = vpop.permute.xlu0 %13657 }
 0x2ab   :  { %v13655_v12 = vunpack.i.h.bf16 %v13653_v24  ;;  %v13654_v13 = vunpack.i.l.bf16 %v13653_v24  ;;  %3012 = vmatprep.subr.bf16.mxu1 %v13932_v3  ;;  %v13660_v30 = vunpack.i.h.bf16 %v13658_v17  ;;  %v13659_v32 = vunpack.i.l.bf16 %v13658_v17 }
 0x2ad   :  { %v16462_v16 = vpack.c.bf16 %v13655_v12, %v13654_v13  ;;  %v2462_v18 = vsel %vm2459_vm5, %v13649_v6, %v13654_v13  ;;  %v2463_v19 = vsel %vm2459_vm5, %v13650_v5, %v13655_v12  ;;  %v2431_v41 = vsel %vm2426_vm4, %v16245_v40, %v13659_v32 }
 0x2ae   :  { %v2496_v26 = vpack.c.bf16 %v2463_v19, %v2462_v18  ;;  %3013 = vmatpush1.bf16.msra.mxu1 %v13930_v7  ;;  %v2432_v37 = vsel %vm2426_vm4, %v16261_v57, %v13660_v30 }
 0x2af   :  { %v2498_v50 = vpack.c.bf16 %v2432_v37, %v2431_v41 }
 0x2b0   :  { %2859 = vmatprep.mubr.bf16.mxu1 %v2496_v26 }
 0x2b1   :  { %2860 = vmatmul.mubr.bf16.gmra.mrb[4].mxu1 %v2495_v27 }
 0x2b2   :  { %v13663_v33 = vpop.permute.xlu1 %13662  ;;  %v13668_v38 = vpop.permute.xlu0 %13667 }
 0x2b3   :  { %v13665_v36 = vunpack.i.h.bf16 %v13663_v33  ;;  %v13664_v2 = vunpack.i.l.bf16 %v13663_v33  ;;  %v13670_v52 = vunpack.i.h.bf16 %v13668_v38  ;;  %v13669_v53 = vunpack.i.l.bf16 %v13668_v38 }
 0x2b5   :  { %v16470_v4 = vpack.c.bf16 %v13665_v36, %v13664_v2  ;;  %v2464_v39 = vsel %vm2459_vm5, %v13659_v32, %v13664_v2  ;;  %v2465_v44 = vsel %vm2459_vm5, %v13660_v30, %v13665_v36  ;;  %v2433_v40 = vsel %vm2426_vm4, %v16259_v56, %v13669_v53 }
 0x2b6   :  { %v2499_v45 = vpack.c.bf16 %v2465_v44, %v2464_v39  ;;  %v2434_v57 = vsel %vm2426_vm4, %v16275_v11, %v13670_v52 }
 0x2b7   :  { %v2501_v7 = vpack.c.bf16 %v2434_v57, %v2433_v40 }
 0x2b8   :  { %2869 = vmatprep.mubr.bf16.mxu1 %v2499_v45 }
 0x2b9   :  { %2870 = vmatmul.mubr.bf16.gmra.mrb[8].mxu1 %v2498_v50 }
 0x2ba   :  { %v13673_v54 = vpop.permute.xlu1 %13672  ;;  %v13678_v3 = vpop.permute.xlu0 %13677 }
 0x2bb   :  { %v13675_v55 = vunpack.i.h.bf16 %v13673_v54  ;;  %v13674_v58 = vunpack.i.l.bf16 %v13673_v54  ;;  %v13680_v12 = vunpack.i.h.bf16 %v13678_v3  ;;  %v13679_v13 = vunpack.i.l.bf16 %v13678_v3 }
 0x2bd   :  { %v16478_v59 = vpack.c.bf16 %v13675_v55, %v13674_v58  ;;  %v2466_v5 = vsel %vm2459_vm5, %v13669_v53, %v13674_v58  ;;  %v2467_v6 = vsel %vm2459_vm5, %v13670_v52, %v13675_v55  ;;  %v2435_v56 = vsel %vm2426_vm4, %v16273_v10, %v13679_v13 }
 0x2be   :  { %v2502_v24 = vpack.c.bf16 %v2467_v6, %v2466_v5  ;;  %v2436_v11 = vsel %vm2426_vm4, %v16289_v29, %v13680_v12 }
 0x2bf   :  { %v2504_v32 = vpack.c.bf16 %v2436_v11, %v2435_v56 }
 0x2c0   :  { %2879 = vmatprep.mubr.bf16.mxu1 %v2502_v24 }
 0x2c1   :  { %2880 = vmatmul.mubr.bf16.gmra.mrb[12].mxu1 %v2501_v7 }
 0x2c2   :  { %v13683_v14 = vpop.permute.xlu1 %13682  ;;  %v13688_v19 = vpop.permute.xlu0 %13687 }
 0x2c3   :  { %v13685_v15 = vunpack.i.h.bf16 %v13683_v14  ;;  %v13684_v17 = vunpack.i.l.bf16 %v13683_v14  ;;  %v13690_v33 = vunpack.i.h.bf16 %v13688_v19  ;;  %v13689_v36 = vunpack.i.l.bf16 %v13688_v19 }
 0x2c5   :  { %v16486_v18 = vpack.c.bf16 %v13685_v15, %v13684_v17  ;;  %v2468_v26 = vsel %vm2459_vm5, %v13679_v13, %v13684_v17  ;;  %v2469_v27 = vsel %vm2459_vm5, %v13680_v12, %v13685_v15  ;;  %v2437_v10 = vsel %vm2426_vm4, %v16287_v28, %v13689_v36 }
 0x2c6   :  { %v2505_v30 = vpack.c.bf16 %v2469_v27, %v2468_v26  ;;  %v2438_v29 = vsel %vm2426_vm4, %v16303_v47, %v13690_v33 }
 0x2c7   :  { %v2507_v52 = vpack.c.bf16 %v2438_v29, %v2437_v10 }
 0x2c8   :  { %2889 = vmatprep.mubr.bf16.mxu1 %v2505_v30 }
 0x2c9   :  { %2890 = vmatmul.mubr.bf16.gmra.mrb[16].mxu1 %v2504_v32 }
 0x2ca   :  { %v13693_v2 = vpop.permute.xlu1 %13692  ;;  %v13698_v39 = vpop.permute.xlu0 %13697 }
 0x2cb   :  { %v13695_v41 = vunpack.i.h.bf16 %v13693_v2  ;;  %v13694_v37 = vunpack.i.l.bf16 %v13693_v2  ;;  %v13700_v53 = vunpack.i.h.bf16 %v13698_v39  ;;  %v13699_v54 = vunpack.i.l.bf16 %v13698_v39 }
 0x2cd   :  { %v16494_v38 = vpack.c.bf16 %v13695_v41, %v13694_v37  ;;  %v2470_v44 = vsel %vm2459_vm5, %v13689_v36, %v13694_v37  ;;  %v2471_v45 = vsel %vm2459_vm5, %v13690_v33, %v13695_v41  ;;  %v2439_v28 = vsel %vm2426_vm4, %v16301_v46, %v13699_v54 }
 0x2ce   :  { %v2508_v50 = vpack.c.bf16 %v2471_v45, %v2470_v44  ;;  %v2440_v47 = vsel %vm2426_vm4, %v16317_v1, %v13700_v53 }
 0x2cf   :  { %v2510_v7 = vpack.c.bf16 %v2440_v47, %v2439_v28 }
 0x2d0   :  { %2899 = vmatprep.mubr.bf16.mxu1 %v2508_v50 }
 0x2d1   :  { %2900 = vmatmul.mubr.bf16.gmra.mrb[20].mxu1 %v2507_v52 }
 0x2d2   :  { %v13703_v55 = vpop.permute.xlu1 %13702  ;;  %v13708_v3 = vpop.permute.xlu0 %13707 }
 0x2d3   :  { %v13705_v58 = vunpack.i.h.bf16 %v13703_v55  ;;  %v13704_v40 = vunpack.i.l.bf16 %v13703_v55  ;;  %v13710_v12 = vunpack.i.h.bf16 %v13708_v3  ;;  %v13709_v13 = vunpack.i.l.bf16 %v13708_v3 }
 0x2d5   :  { %v16502_v57 = vpack.c.bf16 %v13705_v58, %v13704_v40  ;;  %v2472_v5 = vsel %vm2459_vm5, %v13699_v54, %v13704_v40  ;;  %v2473_v6 = vsel %vm2459_vm5, %v13700_v53, %v13705_v58  ;;  %v2441_v46 = vsel %vm2426_vm4, %v16315_v0, %v13709_v13 }
 0x2d6   :  { %v2511_v24 = vpack.c.bf16 %v2473_v6, %v2472_v5  ;;  %v2442_v1 = vsel %vm2426_vm4, %v16331_v22, %v13710_v12 }
 0x2d7   :  { %v2513_v30 = vpack.c.bf16 %v2442_v1, %v2441_v46 }
 0x2d8   :  { %2909 = vmatprep.mubr.bf16.mxu1 %v2511_v24 }
 0x2d9   :  { %2910 = vmatmul.mubr.bf16.gmra.mrb[24].mxu1 %v2510_v7 }
 0x2da   :  { %v13713_v14 = vpop.permute.xlu1 %13712  ;;  %v13718_v11 = vpop.permute.xlu0 %13717 }
 0x2db   :  { %v13715_v15 = vunpack.i.h.bf16 %v13713_v14  ;;  %v13714_v17 = vunpack.i.l.bf16 %v13713_v14  ;;  %v13720_v32 = vunpack.i.h.bf16 %v13718_v11  ;;  %v13719_v33 = vunpack.i.l.bf16 %v13718_v11 }
 0x2dd   :  { %v16510_v56 = vpack.c.bf16 %v13715_v15, %v13714_v17  ;;  %v2474_v19 = vsel %vm2459_vm5, %v13709_v13, %v13714_v17  ;;  %v2475_v26 = vsel %vm2459_vm5, %v13710_v12, %v13715_v15  ;;  %v2443_v0 = vsel %vm2426_vm4, %v16329_v20, %v13719_v33 }
 0x2de   :  { %v2514_v27 = vpack.c.bf16 %v2475_v26, %v2474_v19  ;;  %v2444_v22 = vsel %vm2426_vm4, %v16345_v43, %v13720_v32 }
 0x2df   :  { %v2516_v45 = vpack.c.bf16 %v2444_v22, %v2443_v0 }
 0x2e0   :  { %2919 = vmatprep.mubr.bf16.mxu1 %v2514_v27 }
 0x2e1   :  { %2920 = vmatmul.mubr.bf16.gmra.mrb[28].mxu1 %v2513_v30 }
 0x2e2   :  { %v13723_v36 = vpop.permute.xlu1 %13722  ;;  %v13728_v10 = vpop.permute.xlu0 %13727 }
 0x2e3   :  { %v13725_v2 = vunpack.i.h.bf16 %v13723_v36  ;;  %v13724_v41 = vunpack.i.l.bf16 %v13723_v36  ;;  %v13730_v50 = vunpack.i.h.bf16 %v13728_v10  ;;  %v13729_v52 = vunpack.i.l.bf16 %v13728_v10 }
 0x2e5   :  { %v16518_v37 = vpack.c.bf16 %v13725_v2, %v13724_v41  ;;  %v2476_v29 = vsel %vm2459_vm5, %v13719_v33, %v13724_v41  ;;  %v2477_v39 = vsel %vm2459_vm5, %v13720_v32, %v13725_v2  ;;  %v2445_v20 = vsel %vm2426_vm4, %v16343_v42, %v13729_v52 }
 0x2e6   :  { %v2517_v44 = vpack.c.bf16 %v2477_v39, %v2476_v29  ;;  %v2446_v43 = vsel %vm2426_vm4, %v16359_v63, %v13730_v50 }
 0x2e7   :  { %v2519_v5 = vpack.c.bf16 %v2446_v43, %v2445_v20 }
 0x2e8   :  { %2929 = vmatprep.mubr.bf16.mxu1 %v2517_v44 }
 0x2e9   :  { %2930 = vmatmul.mubr.bf16.gmra.mrb[32].mxu1 %v2516_v45 }
 0x2ea   :  { %v13733_v53 = vpop.permute.xlu1 %13732  ;;  %v13738_v40 = vpop.permute.xlu0 %13737 }
 0x2eb   :  { %v13735_v54 = vunpack.i.h.bf16 %v13733_v53  ;;  %v13734_v55 = vunpack.i.l.bf16 %v13733_v53  ;;  %v13740_v6 = vunpack.i.h.bf16 %v13738_v40  ;;  %v13739_v24 = vunpack.i.l.bf16 %v13738_v40 }
 0x2ed   :  { %v16526_v58 = vpack.c.bf16 %v13735_v54, %v13734_v55  ;;  %v2478_v28 = vsel %vm2459_vm5, %v13729_v52, %v13734_v55  ;;  %v2479_v47 = vsel %vm2459_vm5, %v13730_v50, %v13735_v54  ;;  %v2447_v42 = vsel %vm2426_vm4, %v16357_v62, %v13739_v24 }
 0x2ee   :  { %v2520_v3 = vpack.c.bf16 %v2479_v47, %v2478_v28  ;;  %v2448_v63 = vsel %vm2426_vm4, %v16373_v25, %v13740_v6 }
 0x2ef   :  { %v2522_v11 = vpack.c.bf16 %v2448_v63, %v2447_v42 }
 0x2f0   :  { %2939 = vmatprep.mubr.bf16.mxu1 %v2520_v3 }
 0x2f1   :  { %2940 = vmatmul.mubr.bf16.gmra.mrb[36].mxu1 %v2519_v5 }
 0x2f2   :  { %v13743_v7 = vpop.permute.xlu1 %13742  ;;  %v13748_v15 = vpop.permute.xlu0 %13747 }
 0x2f3   :  { %v13745_v12 = vunpack.i.h.bf16 %v13743_v7  ;;  %v13744_v13 = vunpack.i.l.bf16 %v13743_v7  ;;  %v13750_v19 = vunpack.i.h.bf16 %v13748_v15  ;;  %v13749_v26 = vunpack.i.l.bf16 %v13748_v15 }
 0x2f5   :  { %v16534_v14 = vpack.c.bf16 %v13745_v12, %v13744_v13  ;;  %v2480_v17 = vsel %vm2459_vm5, %v13739_v24, %v13744_v13  ;;  %v2481_v46 = vsel %vm2459_vm5, %v13740_v6, %v13745_v12  ;;  %v2449_v62 = vsel %vm2426_vm4, %v16371_v23, %v13749_v26 }
 0x2f6   :  { %v2523_v1 = vpack.c.bf16 %v2481_v46, %v2480_v17  ;;  %v2450_v25 = vsel %vm2426_vm4, %v16387_v49, %v13750_v19 }
 0x2f7   :  { %v2525_v22 = vpack.c.bf16 %v2450_v25, %v2449_v62 }
 0x2f8   :  { %2949 = vmatprep.mubr.bf16.mxu1 %v2523_v1 }
 0x2f9   :  { %2950 = vmatmul.mubr.bf16.gmra.mrb[40].mxu1 %v2522_v11 }
 0x2fa   :  { %v13753_v27 = vpop.permute.xlu1 %13752  ;;  %v13758_v36 = vpop.permute.xlu0 %13757 }
 0x2fb   :  { %v13755_v30 = vunpack.i.h.bf16 %v13753_v27  ;;  %v13754_v32 = vunpack.i.l.bf16 %v13753_v27  ;;  %v13760_v10 = vunpack.i.h.bf16 %v13758_v36  ;;  %v13759_v29 = vunpack.i.l.bf16 %v13758_v36 }
 0x2fd   :  { %v16542_v33 = vpack.c.bf16 %v13755_v30, %v13754_v32  ;;  %v2482_v2 = vsel %vm2459_vm5, %v13749_v26, %v13754_v32  ;;  %v2483_v41 = vsel %vm2459_vm5, %v13750_v19, %v13755_v30  ;;  %v2451_v23 = vsel %vm2426_vm4, %v16385_v48, %v13759_v29 }
 0x2fe   :  { %v2526_v0 = vpack.c.bf16 %v2483_v41, %v2482_v2  ;;  %v2452_v49 = vsel %vm2426_vm4, %v16401_v9, %v13760_v10 }
 0x2ff   :  { %v2528_v20 = vpack.c.bf16 %v2452_v49, %v2451_v23  ;;  %v13957_v23 = vld [vmem:[#allocation9 + $0x94] ss:$12 sps:$4 sm:$0xff]   ;;  %v13955_v49 = vld [vmem:[#allocation9 + $0x90] ss:$12 sps:$4 sm:$0xff]  }
 0x300   :  { %2959 = vmatprep.mubr.bf16.mxu1 %v2526_v0 }
 0x301   :  { %2960 = vmatmul.mubr.bf16.gmra.mrb[44].mxu1 %v2525_v22 }
 0x302   :  { %v13763_v39 = vpop.permute.xlu1 %13762  ;;  %v13768_v52 = vpop.permute.xlu0 %13767 }
 0x303   :  { %v13765_v44 = vunpack.i.h.bf16 %v13763_v39  ;;  %v13764_v45 = vunpack.i.l.bf16 %v13763_v39  ;;  %v13770_v43 = vunpack.i.h.bf16 %v13768_v52  ;;  %v13769_v40 = vunpack.i.l.bf16 %v13768_v52  ;;  %v13958_v52 = vld [vmem:[#allocation9 + $0xa8] ss:$12 sps:$4 sm:$0xff]  }
 0x304   :  { %v17706_v39 = vmov 0  }
 0x305   :  { %v16550_v50 = vpack.c.bf16 %v13765_v44, %v13764_v45  ;;  %v2484_v53 = vsel %vm2459_vm5, %v13759_v29, %v13764_v45  ;;  %v2485_v54 = vsel %vm2459_vm5, %v13760_v10, %v13765_v44  ;;  %v2453_v9 = vsel %vm2426_vm4, %v16399_v8, %v13769_v40  ;;  %v13954_v44 = vld [vmem:[#allocation9 + $0x7c] ss:$12 sps:$4 sm:$0xff]   ;;  %v13952_v45 = vld [vmem:[#allocation9 + $0x78] ss:$12 sps:$4 sm:$0xff]  }
 0x306   :  { %v2529_v55 = vpack.c.bf16 %v2485_v54, %v2484_v53  ;;  %v2454_v5 = vsel %vm2426_vm4, %v16415_v35, %v13770_v43  ;;  %v13963_v53 = vld [vmem:[#allocation9 + $0xc4] ss:$12 sps:$4 sm:$0xff]   ;;  %v13961_v54 = vld [vmem:[#allocation9 + $0xc0] ss:$12 sps:$4 sm:$0xff]  }
 0x307   :  { %v2531_v63 = vpack.c.bf16 %v2454_v5, %v2453_v9  ;;  %v2576_v5 = vld [vmem:[#allocation7] sm:$0x3] }
 0x308   :  { %2969 = vmatprep.mubr.bf16.mxu1 %v2529_v55  ;;  %v13966_v55 = vld [vmem:[#allocation9 + $0xdc] ss:$12 sps:$4 sm:$0xff]  }
 0x309   :  { %2970 = vmatmul.mubr.bf16.gmra.mrb[48].mxu1 %v2528_v20  ;;  %v13964_v20 = vld [vmem:[#allocation9 + $0xd8] ss:$12 sps:$4 sm:$0xff]  }
 0x30a   :  { %v13773_v28 = vpop.permute.xlu1 %13772  ;;  %v13778_v48 = vpop.permute.xlu0 %13777 }
 0x30b   :  { %v13775_v47 = vunpack.i.h.bf16 %v13773_v28  ;;  %v13774_v3 = vunpack.i.l.bf16 %v13773_v28  ;;  %v13780_v13 = vunpack.i.h.bf16 %v13778_v48  ;;  %v13779_v42 = vunpack.i.l.bf16 %v13778_v48  ;;  %v13967_v28 = vld [vmem:[#allocation9 + $0xf0] ss:$12 sps:$4 sm:$0xff]   ;;  %v13970_v48 = vld [vmem:[#allocation9 + $0x108] ss:$12 sps:$4 sm:$0xff]  }
 0x30d   :  { %v16558_v6 = vpack.c.bf16 %v13775_v47, %v13774_v3  ;;  %v2486_v24 = vsel %vm2459_vm5, %v13769_v40, %v13774_v3  ;;  %v2487_v7 = vsel %vm2459_vm5, %v13770_v43, %v13775_v47  ;;  %v2455_v8 = vsel %vm2426_vm4, %v16413_v34, %v13779_v42  ;;  %v13969_v40 = vld [vmem:[#allocation9 + $0xf4] ss:$12 sps:$4 sm:$0xff]   ;;  %v13972_v3 = vld [vmem:[#allocation9 + $0x10c] ss:$12 sps:$4 sm:$0xff]  }
 0x30e   :  { %v2532_v12 = vpack.c.bf16 %v2487_v7, %v2486_v24  ;;  %v2456_v35 = vsel %vm2426_vm4, %v16429_v61, %v13780_v13  ;;  %v2578_v43 = vlaneseq  ;;  %v13975_v24 = vld [vmem:[#allocation9 + $0x124] ss:$12 sps:$4 sm:$0xff]   ;;  %v13973_v7 = vld [vmem:[#allocation9 + $0x120] ss:$12 sps:$4 sm:$0xff]  }
 0x30f   :  { %v2534_v32 = vpack.c.bf16 %v2456_v35, %v2455_v8 }
 0x310   :  { %2979 = vmatprep.mubr.bf16.mxu1 %v2532_v12  ;;  %v16620_v47 = vshrl.u32 %v2578_v43, 7 }
 0x311   :  { %2980 = vmatmul.mubr.bf16.gmra.mrb[52].mxu1 %v2531_v63 }
 0x312   :  { %v13783_v15 = vpop.permute.xlu1 %13782  ;;  %v13788_v1 = vpop.permute.xlu0 %13787  ;;  %17727 = vst [vmem:[#allocation25_spill] sm:$0xff] %v16620_v47  ;;  %v16623_v9 = vsub.s32 0, %v16620_v47 }
 0x313   :  { %v13785_v17 = vunpack.i.h.bf16 %v13783_v15  ;;  %v13784_v46 = vunpack.i.l.bf16 %v13783_v15  ;;  %v13790_v62 = vunpack.i.h.bf16 %v13788_v1  ;;  %v13789_v25 = vunpack.i.l.bf16 %v13788_v1  ;;  %v13976_v15 = vld [vmem:[#allocation9 + $0x138] ss:$12 sps:$4 sm:$0xff]  }
 0x314   :  { %17728 = vst [vmem:[#allocation26_spill] sm:$0xff] %v16623_v9  ;;  %v16629_v12 = vrot.slane %v2576_v5, %v16623_v9 }
 0x315   :  { %v2536_v11 = vpack.c.bf16 %v13785_v17, %v13784_v46  ;;  %v2488_v19 = vsel %vm2459_vm5, %v13779_v42, %v13784_v46  ;;  %v2489_v26 = vsel %vm2459_vm5, %v13780_v13, %v13785_v17  ;;  %v2457_v22 = vsel %vm2426_vm4, %v16427_v60, %v13789_v25  ;;  %v13933_v60 = vld [vmem:[#allocation9 + $0x308] ss:$12 sps:$4 sm:$0xff]  }
 0x316   :  { %v13793_v27 = vpop.permute.xlu1 %13792  ;;  %v2535_v30 = vpack.c.bf16 %v2489_v26, %v2488_v19  ;;  %v2458_v10 = vsel %vm2426_vm4, %v16441_v31, %v13790_v62  ;;  %12820 = vmatprep.subr.bf16.mxu1 %v13933_v60  ;;  %v13934_v31 = vld [vmem:[#allocation9 + $0x320] ss:$12 sps:$4 sm:$0xff]   ;;  %v13978_v42 = vld [vmem:[#allocation9 + $0x13c] ss:$12 sps:$4 sm:$0xff]  }
 0x317   :  { %v13795_v36 = vunpack.i.h.bf16 %v13793_v27  ;;  %v13794_v2 = vunpack.i.l.bf16 %v13793_v27  ;;  %v2537_v29 = vpack.c.bf16 %v2458_v10, %v2457_v22  ;;  %v13979_v19 = vld [vmem:[#allocation9 + $0x150] ss:$12 sps:$4 sm:$0xff]   ;;  %v13981_v26 = vld [vmem:[#allocation9 + $0x154] ss:$12 sps:$4 sm:$0xff]  }
 0x318   :  { %2989 = vmatprep.mubr.bf16.mxu1 %v2535_v30 }
 0x319   :  { %v2539_v41 = vpack.c.bf16 %v13795_v36, %v13794_v2  ;;  %2990 = vmatmul.mubr.bf16.gmra.mrb[56].mxu1 %v2534_v32  ;;  %v2490_v34 = vsel %vm2459_vm5, %v13789_v25, %v13794_v2  ;;  %v2491_v61 = vsel %vm2459_vm5, %v13790_v62, %v13795_v36  ;;  %v13984_v2 = vld [vmem:[#allocation9 + $0x16c] ss:$12 sps:$4 sm:$0xff]  }
 0x31a   :  { %v2538_v0 = vpack.c.bf16 %v2491_v61, %v2490_v34  ;;  %v13982_v61 = vld [vmem:[#allocation9 + $0x168] ss:$12 sps:$4 sm:$0xff]  }
 0x31c   :  { %2999 = vmatprep.mubr.bf16.mxu1 %v2538_v0 }
 0x321   :  { %3000 = vmatmul.mubr.bf16.gmra.mrb[60].mxu1 %v2537_v29 }
 0x322   :  { %3042 = vmatprep.mubr.bf16.mxu1 %v17706_v39 }
 0x329   :  { %11492 = vmatmul.mubr.msk.bf16.vlgmr.msra.gmra.mrb[0].mxu1 %vm2768_vm9, %v16453_v51  ;;  %v13935_v51 = vld [vmem:[#allocation9 + $0x338] ss:$12 sps:$4 sm:$0xff]  }
 0x32a   :  { %3052 = vmatprep.mubr.bf16.mxu1 %v17706_v39  ;;  %12821 = vmatpush3.bf16.msra.mxu1 %v13933_v60 }
 0x32b   :  { %12822 = vmatprep.subr.bf16.mxu1 %v13934_v31 }
 0x32e   :  { %12823 = vmatpush3.bf16.msra.mxu1 %v13934_v31 }
 0x32f   :  { %12824 = vmatprep.subr.bf16.mxu1 %v13935_v51 }
 0x331   :  { %11493 = vmatmul.mubr.msk.bf16.gmra.mrb[4].mxu1 %vm2768_vm9, %v16462_v16  ;;  %v13936_v16 = vld [vmem:[#allocation9 + $0x350] ss:$12 sps:$4 sm:$0xff]  }
 0x332   :  { %3062 = vmatprep.mubr.bf16.mxu1 %v17706_v39  ;;  %12825 = vmatpush3.bf16.msra.mxu1 %v13935_v51 }
 0x333   :  { %12826 = vmatprep.subr.bf16.mxu1 %v13936_v16 }
 0x336   :  { %12827 = vmatpush3.bf16.msra.mxu1 %v13936_v16 }
 0x339   :  { %11494 = vmatmul.mubr.msk.bf16.gmra.mrb[8].mxu1 %vm2768_vm9, %v16470_v4  ;;  %v13937_v4 = vld [vmem:[#allocation9] ss:$12 sps:$4 sm:$0xff]  }
 0x33a   :  { %3072 = vmatprep.mubr.bf16.mxu1 %v17706_v39 }
 0x341   :  { %11495 = vmatmul.mubr.msk.bf16.gmra.mrb[12].mxu1 %vm2768_vm9, %v16478_v59  ;;  %v13939_v59 = vld [vmem:[#allocation9 + $0x4] ss:$12 sps:$4 sm:$0xff]  }
 0x342   :  { %3082 = vmatprep.mubr.bf16.mxu1 %v17706_v39  ;;  %4372 = vmatprep.subr.bf16.mxu0 %v13939_v59 }
 0x343   :  { %4373 = vmatpush1.bf16.msra.mxu0 %v13937_v4 }
 0x349   :  { %11496 = vmatmul.mubr.msk.bf16.gmra.mrb[16].mxu1 %vm2768_vm9, %v16486_v18  ;;  %v13942_v18 = vld [vmem:[#allocation9 + $0x1c] ss:$12 sps:$4 sm:$0xff]  }
 0x34a   :  { %3092 = vmatprep.mubr.bf16.mxu1 %v17706_v39  ;;  %4374 = vmatprep.subr.bf16.mxu0 %v13942_v18 }
 0x351   :  { %11497 = vmatmul.mubr.msk.bf16.gmra.mrb[20].mxu1 %vm2768_vm9, %v16494_v38  ;;  %v13940_v38 = vld [vmem:[#allocation9 + $0x18] ss:$12 sps:$4 sm:$0xff]  }
 0x352   :  { %3102 = vmatprep.mubr.bf16.mxu1 %v17706_v39  ;;  %4375 = vmatpush1.bf16.msra.mxu0 %v13940_v38 }
 0x359   :  { %11498 = vmatmul.mubr.msk.bf16.gmra.mrb[24].mxu1 %vm2768_vm9, %v16502_v57  ;;  %v13945_v57 = vld [vmem:[#allocation9 + $0x34] ss:$12 sps:$4 sm:$0xff]  }
 0x35a   :  { %3112 = vmatprep.mubr.bf16.mxu1 %v17706_v39  ;;  %4376 = vmatprep.subr.bf16.mxu0 %v13945_v57 }
 0x361   :  { %11499 = vmatmul.mubr.msk.bf16.gmra.mrb[28].mxu1 %vm2768_vm9, %v16510_v56  ;;  %v13943_v56 = vld [vmem:[#allocation9 + $0x30] ss:$12 sps:$4 sm:$0xff]  }
 0x362   :  { %3122 = vmatprep.mubr.bf16.mxu1 %v17706_v39  ;;  %4377 = vmatpush1.bf16.msra.mxu0 %v13943_v56 }
 0x369   :  { %11500 = vmatmul.mubr.msk.bf16.gmra.mrb[32].mxu1 %vm2768_vm9, %v16518_v37  ;;  %v13948_v37 = vld [vmem:[#allocation9 + $0x4c] ss:$12 sps:$4 sm:$0xff]  }
 0x36a   :  { %3132 = vmatprep.mubr.bf16.mxu1 %v17706_v39  ;;  %4378 = vmatprep.subr.bf16.mxu0 %v13948_v37 }
 0x371   :  { %11501 = vmatmul.mubr.msk.bf16.gmra.mrb[36].mxu1 %vm2768_vm9, %v16526_v58  ;;  %v13946_v58 = vld [vmem:[#allocation9 + $0x48] ss:$12 sps:$4 sm:$0xff]  }
 0x372   :  { %3142 = vmatprep.mubr.bf16.mxu1 %v17706_v39  ;;  %4379 = vmatpush1.bf16.msra.mxu0 %v13946_v58 }
 0x379   :  { %11502 = vmatmul.mubr.msk.bf16.gmra.mrb[40].mxu1 %vm2768_vm9, %v16534_v14  ;;  %v13951_v14 = vld [vmem:[#allocation9 + $0x64] ss:$12 sps:$4 sm:$0xff]  }
 0x37a   :  { %3152 = vmatprep.mubr.bf16.mxu1 %v17706_v39  ;;  %4380 = vmatprep.subr.bf16.mxu0 %v13951_v14 }
 0x381   :  { %11503 = vmatmul.mubr.msk.bf16.gmra.mrb[44].mxu1 %vm2768_vm9, %v16542_v33  ;;  %v13949_v33 = vld [vmem:[#allocation9 + $0x60] ss:$12 sps:$4 sm:$0xff]  }
 0x382   :  { %3162 = vmatprep.mubr.bf16.mxu1 %v17706_v39  ;;  %4381 = vmatpush1.bf16.msra.mxu0 %v13949_v33 }
 0x383   :  { %4382 = vmatprep.subr.bf16.mxu0 %v13954_v44 }
 0x386   :  { %4383 = vmatpush1.bf16.msra.mxu0 %v13952_v45 }
 0x387   :  { %4384 = vmatprep.subr.bf16.mxu0 %v13957_v23 }
 0x389   :  { %11504 = vmatmul.mubr.msk.bf16.gmra.mrb[48].mxu1 %vm2768_vm9, %v16550_v50  ;;  %v13960_v50 = vld [vmem:[#allocation9 + $0xac] ss:$12 sps:$4 sm:$0xff]  }
 0x38a   :  { %3172 = vmatprep.mubr.bf16.mxu1 %v17706_v39  ;;  %4385 = vmatpush1.bf16.msra.mxu0 %v13955_v49 }
 0x38b   :  { %4386 = vmatprep.subr.bf16.mxu0 %v13960_v50 }
 0x38e   :  { %4387 = vmatpush1.bf16.msra.mxu0 %v13958_v52 }
 0x38f   :  { %4388 = vmatprep.subr.bf16.mxu0 %v13963_v53 }
 0x391   :  { %11505 = vmatmul.mubr.msk.bf16.gmra.mrb[52].mxu1 %vm2768_vm9, %v16558_v6  ;;  %v16626_v6 = vsub.s32 1, %v16620_v47 }
 0x392   :  { %3182 = vmatprep.mubr.bf16.mxu1 %v17706_v39  ;;  %4389 = vmatpush1.bf16.msra.mxu0 %v13961_v54 }
 0x393   :  { %4390 = vmatprep.subr.bf16.mxu0 %v13966_v55  ;;  %17729 = vst [vmem:[#allocation27_spill] sm:$0xff] %v16626_v6  ;;  %v16632_v13 = vrot.slane %v2576_v5, %v16626_v6 }
 0x396   :  { %4391 = vmatpush1.bf16.msra.mxu0 %v13964_v20 }
 0x397   :  { %4392 = vmatprep.subr.bf16.mxu0 %v13969_v40 }
 0x399   :  { %11506 = vmatmul.mubr.msk.bf16.gmra.mrb[56].mxu1 %vm2768_vm9, %v2536_v11 }
 0x39a   :  { %3192 = vmatprep.mubr.bf16.mxu1 %v17706_v39  ;;  %4393 = vmatpush1.bf16.msra.mxu0 %v13967_v28 }
 0x39b   :  { %4394 = vmatprep.subr.bf16.mxu0 %v13972_v3 }
 0x39e   :  { %4395 = vmatpush1.bf16.msra.mxu0 %v13970_v48 }
 0x39f   :  { %4396 = vmatprep.subr.bf16.mxu0 %v13975_v24 }
 0x3a1   :  { %11507 = vmatmul.mubr.msk.bf16.gmra.mrb[60].mxu1 %vm2768_vm9, %v2539_v41 }
 0x3a2   :  { %4397 = vmatpush1.bf16.msra.mxu0 %v13973_v7 }
 0x3a3   :  { %4398 = vmatprep.subr.bf16.mxu0 %v13978_v42 }
 0x3a6   :  { %4399 = vmatpush1.bf16.msra.mxu0 %v13976_v15 }
 0x3a7   :  { %4400 = vmatprep.subr.bf16.mxu0 %v13981_v26 }
 0x3aa   :  { %4401 = vmatpush1.bf16.msra.mxu0 %v13979_v19 }
 0x3ab   :  { %4402 = vmatprep.subr.bf16.mxu0 %v13984_v2 }
 0x3ae   :  { %4403 = vmatpush1.bf16.msra.mxu0 %v13982_v61 }
 0x3fc   :  { %v3044_v63 = vpop.f32.mrb[0].mxu1 }
 0x3fd   :  { %v12868_v17 = vadd.f32 %v3044_v63, %v16629_v12  ;;  %v3046_v46 = vpop.f32.mrb[1].mxu1 }
 0x3fe   :  { %v12869_v8 = vadd.f32 %v3046_v46, %v16632_v13  ;;  %v3048_v35 = vpop.f32.mrb[2].mxu1 }
 0x3ff   :  { %v12870_v1 = vadd.f32 %v3048_v35, %v16629_v12  ;;  %v3050_v11 = vpop.f32.mrb[3].mxu1  ;;  %v3203_v30 = vmax.f32 %v12868_v17, 0.0 }
 0x400   :  { %v12871_v27 = vadd.f32 %v3050_v11, %v16632_v13  ;;  %v3204_v62 = vmax.f32 %v12869_v8, 0.0 }
 0x401   :  { %v3205_v32 = vmax.f32 %v12870_v1, 0.0 }
 0x402   :  { %v3206_v25 = vmax.f32 %v12871_v27, 0.0 }
 0x403   :  { %v16638_v36 = vmax.f32 %v3203_v30, %v3205_v32 }
 0x404   :  { %v16640_v41 = vmax.f32 %v3204_v62, %v3206_v25  ;;  %v3054_v34 = vpop.f32.mrb[4].mxu1 }
 0x405   :  { %v12872_v0 = vadd.f32 %v3054_v34, %v16629_v12  ;;  %v3056_v22 = vpop.f32.mrb[5].mxu1 }
 0x406   :  { %v12873_v10 = vadd.f32 %v3056_v22, %v16632_v13  ;;  %v3058_v29 = vpop.f32.mrb[6].mxu1 }
 0x407   :  { %v12874_v60 = vadd.f32 %v3058_v29, %v16629_v12  ;;  %v3060_v31 = vpop.f32.mrb[7].mxu1  ;;  %v3207_v16 = vmax.f32 %v12872_v0, 0.0 }
 0x408   :  { %v12875_v51 = vadd.f32 %v3060_v31, %v16632_v13  ;;  %v3208_v59 = vmax.f32 %v12873_v10, 0.0 }
 0x409   :  { %v3209_v4 = vmax.f32 %v12874_v60, 0.0 }
 0x40a   :  { %v3210_v18 = vmax.f32 %v12875_v51, 0.0 }
 0x40b   :  { %v3269_v38 = vmax.f32 %v3207_v16, %v3209_v4 }
 0x40c   :  { %v16646_v57 = vmax.f32 %v3208_v59, %v3210_v18  ;;  %v3064_v56 = vpop.f32.mrb[8].mxu1 }
 0x40d   :  { %v12876_v37 = vadd.f32 %v3064_v56, %v16629_v12  ;;  %v3066_v58 = vpop.f32.mrb[9].mxu1  ;;  %v13796_v14 = vpack.i.bf16 %v16638_v36, %v3269_v38 }
 0x40e   :  { %v12877_v33 = vadd.f32 %v3066_v58, %v16632_v13  ;;  %v3068_v44 = vpop.f32.mrb[10].mxu1 }
 0x40f   :  { %v12878_v45 = vadd.f32 %v3068_v44, %v16629_v12  ;;  %v3070_v23 = vpop.f32.mrb[11].mxu1  ;;  %13797 = vrot.lane.b32.xlu0 %v13796_v14, %s15383_s10  ;;  %v3211_v50 = vmax.f32 %v12876_v37, 0.0 }
 0x410   :  { %v12879_v49 = vadd.f32 %v3070_v23, %v16632_v13  ;;  %v3212_v53 = vmax.f32 %v12877_v33, 0.0 }
 0x411   :  { %v3213_v52 = vmax.f32 %v12878_v45, 0.0 }
 0x412   :  { %v3214_v54 = vmax.f32 %v12879_v49, 0.0 }
 0x413   :  { %v3271_v55 = vmax.f32 %v3211_v50, %v3213_v52 }
 0x414   :  { %v16654_v20 = vmax.f32 %v3212_v53, %v3214_v54  ;;  %v3074_v43 = vpop.f32.mrb[12].mxu1 }
 0x415   :  { %v16656_v40 = vpack.c.bf16 %v3271_v55, %v3269_v38  ;;  %v12880_v28 = vadd.f32 %v3074_v43, %v16629_v12  ;;  %v3076_v3 = vpop.f32.mrb[13].mxu1 }
 0x416   :  { %v12881_v48 = vadd.f32 %v3076_v3, %v16632_v13  ;;  %v3078_v5 = vpop.f32.mrb[14].mxu1  ;;  %v16662_v24 = vpack.c.bf16 %v16654_v20, %v16646_v57 }
 0x417   :  { %v12882_v7 = vadd.f32 %v3078_v5, %v16629_v12  ;;  %v3080_v42 = vpop.f32.mrb[15].mxu1  ;;  %v3215_v15 = vmax.f32 %v12880_v28, 0.0 }
 0x418   :  { %v12883_v63 = vadd.f32 %v3080_v42, %v16632_v13  ;;  %12828 = vmatprep.mubr.msk.bf16.mxu1 %vm2459_vm5, %v16662_v24  ;;  %v3216_v46 = vmax.f32 %v12881_v48, 0.0 }
 0x419   :  { %v3217_v17 = vmax.f32 %v12882_v7, 0.0 }
 0x41a   :  { %v3218_v8 = vmax.f32 %v12883_v63, 0.0 }
 0x41b   :  { %v3273_v35 = vmax.f32 %v3215_v15, %v3217_v17 }
 0x41c   :  { %v16668_v1 = vmax.f32 %v3216_v46, %v3218_v8  ;;  %v3084_v11 = vpop.f32.mrb[16].mxu1 }
 0x41d   :  { %v12884_v19 = vadd.f32 %v3084_v11, %v16629_v12  ;;  %v3086_v26 = vpop.f32.mrb[17].mxu1  ;;  %v13801_v27 = vpack.i.bf16 %v3273_v35, %v3271_v55 }
 0x41e   :  { %v12885_v30 = vadd.f32 %v3086_v26, %v16632_v13  ;;  %v3088_v32 = vpop.f32.mrb[18].mxu1 }
 0x41f   :  { %v12886_v62 = vadd.f32 %v3088_v32, %v16629_v12  ;;  %v3090_v25 = vpop.f32.mrb[19].mxu1  ;;  %13802 = vrot.lane.b32.xlu1 %v13801_v27, %s15383_s10  ;;  %v3219_v34 = vmax.f32 %v12884_v19, 0.0 }
 0x420   :  { %v12887_v2 = vadd.f32 %v3090_v25, %v16632_v13  ;;  %v3220_v0 = vmax.f32 %v12885_v30, 0.0 }
 0x421   :  { %v3221_v61 = vmax.f32 %v12886_v62, 0.0  ;;  %v13987_v62 = vld [vmem:[#allocation9 + $0x184] ss:$12 sps:$4 sm:$0xff]  }
 0x422   :  { %v3222_v22 = vmax.f32 %v12887_v2, 0.0  ;;  %4485 = vmatprep.subr.bf16.mxu0 %v13987_v62 }
 0x423   :  { %v3275_v10 = vmax.f32 %v3219_v34, %v3221_v61 }
 0x424   :  { %v16675_v29 = vmax.f32 %v3220_v0, %v3222_v22  ;;  %v3094_v60 = vpop.f32.mrb[20].mxu1 }
 0x425   :  { %v16677_v31 = vpack.c.bf16 %v3275_v10, %v3273_v35  ;;  %v12888_v51 = vadd.f32 %v3094_v60, %v16629_v12  ;;  %v3096_v16 = vpop.f32.mrb[21].mxu1 }
 0x426   :  { %v16682_v4 = vpack.c.bf16 %v16675_v29, %v16668_v1  ;;  %v12889_v59 = vadd.f32 %v3096_v16, %v16632_v13  ;;  %v3098_v18 = vpop.f32.mrb[22].mxu1 }
 0x427   :  { %v12890_v38 = vadd.f32 %v3098_v18, %v16629_v12  ;;  %v3100_v56 = vpop.f32.mrb[23].mxu1  ;;  %v3223_v58 = vmax.f32 %v12888_v51, 0.0 }
 0x428   :  { %v12891_v37 = vadd.f32 %v3100_v56, %v16632_v13  ;;  %12829 = vmatmul.mubr.msk.bf16.vlgmr.msra.gmra.mrb[64].mxu1 %vm2459_vm5, %v16682_v4  ;;  %v3224_v33 = vmax.f32 %v12889_v59, 0.0 }
 0x429   :  { %v3225_v14 = vmax.f32 %v12890_v38, 0.0 }
 0x42a   :  { %v3226_v44 = vmax.f32 %v12891_v37, 0.0 }
 0x42b   :  { %v3277_v45 = vmax.f32 %v3223_v58, %v3225_v14 }
 0x42c   :  { %v16689_v23 = vmax.f32 %v3224_v33, %v3226_v44  ;;  %v3104_v49 = vpop.f32.mrb[24].mxu1 }
 0x42d   :  { %v12892_v50 = vadd.f32 %v3104_v49, %v16629_v12  ;;  %v3106_v52 = vpop.f32.mrb[25].mxu1  ;;  %v13806_v53 = vpack.i.bf16 %v3277_v45, %v3275_v10 }
 0x42e   :  { %v12893_v54 = vadd.f32 %v3106_v52, %v16632_v13  ;;  %v3108_v55 = vpop.f32.mrb[26].mxu1 }
 0x42f   :  { %v12894_v43 = vadd.f32 %v3108_v55, %v16629_v12  ;;  %v3110_v28 = vpop.f32.mrb[27].mxu1  ;;  %13807 = vrot.lane.b32.xlu0 %v13806_v53, %s15383_s10  ;;  %v3227_v48 = vmax.f32 %v12892_v50, 0.0 }
 0x430   :  { %v12895_v3 = vadd.f32 %v3110_v28, %v16632_v13  ;;  %v3228_v7 = vmax.f32 %v12893_v54, 0.0 }
 0x431   :  { %v3229_v5 = vmax.f32 %v12894_v43, 0.0 }
 0x432   :  { %v3230_v42 = vmax.f32 %v12895_v3, 0.0 }
 0x433   :  { %v3279_v63 = vmax.f32 %v3227_v48, %v3229_v5 }
 0x434   :  { %v16696_v15 = vmax.f32 %v3228_v7, %v3230_v42  ;;  %v3114_v17 = vpop.f32.mrb[28].mxu1 }
 0x435   :  { %v16698_v46 = vpack.c.bf16 %v3279_v63, %v3277_v45  ;;  %v12896_v8 = vadd.f32 %v3114_v17, %v16629_v12  ;;  %v3116_v35 = vpop.f32.mrb[29].mxu1 }
 0x436   :  { %v12897_v11 = vadd.f32 %v3116_v35, %v16632_v13  ;;  %v3118_v19 = vpop.f32.mrb[30].mxu1  ;;  %v16704_v26 = vpack.c.bf16 %v16696_v15, %v16689_v23 }
 0x437   :  { %v12898_v27 = vadd.f32 %v3118_v19, %v16629_v12  ;;  %v3120_v30 = vpop.f32.mrb[31].mxu1  ;;  %v3231_v25 = vmax.f32 %v12896_v8, 0.0 }
 0x438   :  { %v12899_v32 = vadd.f32 %v3120_v30, %v16632_v13  ;;  %12832 = vmatprep.mubr.msk.bf16.mxu1 %vm2459_vm5, %v16704_v26  ;;  %v3232_v34 = vmax.f32 %v12897_v11, 0.0 }
 0x439   :  { %v3233_v2 = vmax.f32 %v12898_v27, 0.0 }
 0x43a   :  { %v3234_v61 = vmax.f32 %v12899_v32, 0.0 }
 0x43b   :  { %v3281_v0 = vmax.f32 %v3231_v25, %v3233_v2 }
 0x43c   :  { %v16710_v22 = vmax.f32 %v3232_v34, %v3234_v61  ;;  %v3124_v10 = vpop.f32.mrb[32].mxu1 }
 0x43d   :  { %v12900_v60 = vadd.f32 %v3124_v10, %v16629_v12  ;;  %v3126_v51 = vpop.f32.mrb[33].mxu1  ;;  %v13811_v16 = vpack.i.bf16 %v3281_v0, %v3279_v63 }
 0x43e   :  { %v12901_v59 = vadd.f32 %v3126_v51, %v16632_v13  ;;  %v3128_v18 = vpop.f32.mrb[34].mxu1 }
 0x43f   :  { %v12902_v38 = vadd.f32 %v3128_v18, %v16629_v12  ;;  %v3130_v56 = vpop.f32.mrb[35].mxu1  ;;  %13812 = vrot.lane.b32.xlu1 %v13811_v16, %s15383_s10  ;;  %v3235_v58 = vmax.f32 %v12900_v60, 0.0 }
 0x440   :  { %v12903_v37 = vadd.f32 %v3130_v56, %v16632_v13  ;;  %v3236_v33 = vmax.f32 %v12901_v59, 0.0 }
 0x441   :  { %v3237_v14 = vmax.f32 %v12902_v38, 0.0 }
 0x442   :  { %v3238_v44 = vmax.f32 %v12903_v37, 0.0 }
 0x443   :  { %v3283_v45 = vmax.f32 %v3235_v58, %v3237_v14 }
 0x444   :  { %v16717_v49 = vmax.f32 %v3236_v33, %v3238_v44  ;;  %v3134_v50 = vpop.f32.mrb[36].mxu1 }
 0x445   :  { %v16719_v52 = vpack.c.bf16 %v3283_v45, %v3281_v0  ;;  %v12904_v53 = vadd.f32 %v3134_v50, %v16629_v12  ;;  %v3136_v54 = vpop.f32.mrb[37].mxu1 }
 0x446   :  { %v12905_v55 = vadd.f32 %v3136_v54, %v16632_v13  ;;  %v3138_v43 = vpop.f32.mrb[38].mxu1  ;;  %v16725_v28 = vpack.c.bf16 %v16717_v49, %v16710_v22 }
 0x447   :  { %v12906_v3 = vadd.f32 %v3138_v43, %v16629_v12  ;;  %v3140_v48 = vpop.f32.mrb[39].mxu1  ;;  %v3239_v7 = vmax.f32 %v12904_v53, 0.0 }
 0x448   :  { %v12907_v5 = vadd.f32 %v3140_v48, %v16632_v13  ;;  %12833 = vmatmul.mubr.msk.bf16.gmra.mrb[68].mxu1 %vm2459_vm5, %v16725_v28  ;;  %v3240_v63 = vmax.f32 %v12905_v55, 0.0 }
 0x449   :  { %v3241_v42 = vmax.f32 %v12906_v3, 0.0 }
 0x44a   :  { %v3242_v17 = vmax.f32 %v12907_v5, 0.0 }
 0x44b   :  { %v3285_v8 = vmax.f32 %v3239_v7, %v3241_v42 }
 0x44c   :  { %v16731_v35 = vmax.f32 %v3240_v63, %v3242_v17  ;;  %v3144_v11 = vpop.f32.mrb[40].mxu1 }
 0x44d   :  { %v12908_v19 = vadd.f32 %v3144_v11, %v16629_v12  ;;  %v3146_v27 = vpop.f32.mrb[41].mxu1  ;;  %v13816_v30 = vpack.i.bf16 %v3285_v8, %v3283_v45 }
 0x44e   :  { %v12909_v32 = vadd.f32 %v3146_v27, %v16632_v13  ;;  %v3148_v62 = vpop.f32.mrb[42].mxu1 }
 0x44f   :  { %v12910_v25 = vadd.f32 %v3148_v62, %v16629_v12  ;;  %v3150_v2 = vpop.f32.mrb[43].mxu1  ;;  %13817 = vrot.lane.b32.xlu0 %v13816_v30, %s15383_s10  ;;  %v3243_v61 = vmax.f32 %v12908_v19, 0.0 }
 0x450   :  { %v12911_v34 = vadd.f32 %v3150_v2, %v16632_v13  ;;  %v3244_v10 = vmax.f32 %v12909_v32, 0.0 }
 0x451   :  { %v3245_v0 = vmax.f32 %v12910_v25, 0.0 }
 0x452   :  { %v3246_v60 = vmax.f32 %v12911_v34, 0.0 }
 0x453   :  { %v3287_v51 = vmax.f32 %v3243_v61, %v3245_v0 }
 0x454   :  { %v16738_v16 = vmax.f32 %v3244_v10, %v3246_v60  ;;  %v3154_v59 = vpop.f32.mrb[44].mxu1 }
 0x455   :  { %v16740_v18 = vpack.c.bf16 %v3287_v51, %v3285_v8  ;;  %v12912_v38 = vadd.f32 %v3154_v59, %v16629_v12  ;;  %v3156_v56 = vpop.f32.mrb[45].mxu1 }
 0x456   :  { %v12913_v37 = vadd.f32 %v3156_v56, %v16632_v13  ;;  %v3158_v58 = vpop.f32.mrb[46].mxu1  ;;  %v16746_v14 = vpack.c.bf16 %v16738_v16, %v16731_v35 }
 0x457   :  { %v12914_v33 = vadd.f32 %v3158_v58, %v16629_v12  ;;  %v3160_v44 = vpop.f32.mrb[47].mxu1  ;;  %v3247_v50 = vmax.f32 %v12912_v38, 0.0 }
 0x458   :  { %v12915_v45 = vadd.f32 %v3160_v44, %v16632_v13  ;;  %12836 = vmatprep.mubr.msk.bf16.mxu1 %vm2459_vm5, %v16746_v14  ;;  %v3248_v54 = vmax.f32 %v12913_v37, 0.0 }
 0x459   :  { %v3249_v53 = vmax.f32 %v12914_v33, 0.0 }
 0x45a   :  { %v3250_v55 = vmax.f32 %v12915_v45, 0.0 }
 0x45b   :  { %v3289_v43 = vmax.f32 %v3247_v50, %v3249_v53 }
 0x45c   :  { %v16752_v3 = vmax.f32 %v3248_v54, %v3250_v55  ;;  %v3164_v48 = vpop.f32.mrb[48].mxu1 }
 0x45d   :  { %v12916_v5 = vadd.f32 %v3164_v48, %v16629_v12  ;;  %v3166_v7 = vpop.f32.mrb[49].mxu1  ;;  %v13821_v42 = vpack.i.bf16 %v3289_v43, %v3287_v51 }
 0x45e   :  { %v12917_v63 = vadd.f32 %v3166_v7, %v16632_v13  ;;  %v3168_v17 = vpop.f32.mrb[50].mxu1 }
 0x45f   :  { %v12918_v8 = vadd.f32 %v3168_v17, %v16629_v12  ;;  %v3170_v11 = vpop.f32.mrb[51].mxu1  ;;  %13822 = vrot.lane.b32.xlu1 %v13821_v42, %s15383_s10  ;;  %v3251_v27 = vmax.f32 %v12916_v5, 0.0 }
 0x460   :  { %v12919_v19 = vadd.f32 %v3170_v11, %v16632_v13  ;;  %v3252_v32 = vmax.f32 %v12917_v63, 0.0 }
 0x461   :  { %v3253_v30 = vmax.f32 %v12918_v8, 0.0 }
 0x462   :  { %v3254_v62 = vmax.f32 %v12919_v19, 0.0  ;;  %v13836_v19 = vpack.i.bf16 %v16646_v57, %v16640_v41 }
 0x463   :  { %v3291_v25 = vmax.f32 %v3251_v27, %v3253_v30 }
 0x464   :  { %v16759_v2 = vmax.f32 %v3252_v32, %v3254_v62  ;;  %v3174_v34 = vpop.f32.mrb[52].mxu1 }
 0x465   :  { %v16761_v61 = vpack.c.bf16 %v3291_v25, %v3289_v43  ;;  %v12920_v0 = vadd.f32 %v3174_v34, %v16629_v12  ;;  %v3176_v10 = vpop.f32.mrb[53].mxu1 }
 0x466   :  { %v12921_v60 = vadd.f32 %v3176_v10, %v16632_v13  ;;  %v3178_v51 = vpop.f32.mrb[54].mxu1  ;;  %v16767_v59 = vpack.c.bf16 %v16759_v2, %v16752_v3 }
 0x467   :  { %v12922_v38 = vadd.f32 %v3178_v51, %v16629_v12  ;;  %v3180_v56 = vpop.f32.mrb[55].mxu1  ;;  %v3255_v58 = vmax.f32 %v12920_v0, 0.0 }
 0x468   :  { %v12923_v37 = vadd.f32 %v3180_v56, %v16632_v13  ;;  %12837 = vmatmul.mubr.msk.bf16.gmra.mrb[72].mxu1 %vm2459_vm5, %v16767_v59  ;;  %v3256_v44 = vmax.f32 %v12921_v60, 0.0  ;;  %v13846_v60 = vpack.i.bf16 %v16689_v23, %v16675_v29 }
 0x469   :  { %v3257_v33 = vmax.f32 %v12922_v38, 0.0 }
 0x46a   :  { %v3258_v45 = vmax.f32 %v12923_v37, 0.0 }
 0x46b   :  { %v3293_v50 = vmax.f32 %v3255_v58, %v3257_v33 }
 0x46c   :  { %v16773_v53 = vmax.f32 %v3256_v44, %v3258_v45  ;;  %v3184_v54 = vpop.f32.mrb[56].mxu1 }
 0x46d   :  { %v12924_v55 = vadd.f32 %v3184_v54, %v16629_v12  ;;  %v3186_v43 = vpop.f32.mrb[57].mxu1  ;;  %v13826_v48 = vpack.i.bf16 %v3293_v50, %v3291_v25 }
 0x46e   :  { %v12925_v5 = vadd.f32 %v3186_v43, %v16632_v13  ;;  %v3188_v7 = vpop.f32.mrb[58].mxu1 }
 0x46f   :  { %v12926_v42 = vadd.f32 %v3188_v7, %v16629_v12  ;;  %v3190_v63 = vpop.f32.mrb[59].mxu1  ;;  %13827 = vrot.lane.b32.xlu0 %v13826_v48, %s15383_s10  ;;  %v3259_v8 = vmax.f32 %v12924_v55, 0.0 }
 0x470   :  { %v12927_v17 = vadd.f32 %v3190_v63, %v16632_v13  ;;  %v3260_v27 = vmax.f32 %v12925_v5, 0.0 }
 0x471   :  { %v3261_v11 = vmax.f32 %v12926_v42, 0.0  ;;  %v13841_v42 = vpack.i.bf16 %v16668_v1, %v16654_v20 }
 0x472   :  { %v3262_v30 = vmax.f32 %v12927_v17, 0.0 }
 0x473   :  { %v3295_v32 = vmax.f32 %v3259_v8, %v3261_v11  ;;  %13837 = vrot.lane.b32.xlu0 %v13836_v19, %s15383_s10  ;;  %v14119_v11 = vld [vmem:[#allocation12 + $0x110] ss:$12 sps:$4 sm:$0xff]  }
 0x474   :  { %v16783_v62 = vmax.f32 %v3260_v27, %v3262_v30  ;;  %v3194_v25 = vpop.f32.mrb[60].mxu1  ;;  %v13851_v27 = vpack.i.bf16 %v16710_v22, %v16696_v15  ;;  %v13985_v30 = vld [vmem:[#allocation9 + $0x180] ss:$12 sps:$4 sm:$0xff]  }
 0x475   :  { %v16785_v34 = vpack.c.bf16 %v3295_v32, %v3293_v50  ;;  %v12928_v0 = vadd.f32 %v3194_v25, %v16629_v12  ;;  %v3196_v10 = vpop.f32.mrb[61].mxu1  ;;  %v13856_v50 = vpack.i.bf16 %v16731_v35, %v16717_v49  ;;  %v13990_v25 = vld [vmem:[#allocation9 + $0x19c] ss:$12 sps:$4 sm:$0xff]  }
 0x476   :  { %v12929_v51 = vadd.f32 %v3196_v10, %v16632_v13  ;;  %v3198_v38 = vpop.f32.mrb[62].mxu1  ;;  %v16793_v56 = vpack.c.bf16 %v16783_v62, %v16773_v53  ;;  %v13993_v10 = vld [vmem:[#allocation9 + $0x1b4] ss:$12 sps:$4 sm:$0xff]  }
 0x477   :  { %v12930_v37 = vadd.f32 %v3198_v38, %v16629_v12  ;;  %v3200_v58 = vpop.f32.mrb[63].mxu1  ;;  %13847 = vrot.lane.b32.xlu0 %v13846_v60, %s15383_s10  ;;  %v3263_v44 = vmax.f32 %v12928_v0, 0.0  ;;  %v13988_v0 = vld [vmem:[#allocation9 + $0x198] ss:$12 sps:$4 sm:$0xff]   ;;  %v13991_v60 = vld [vmem:[#allocation9 + $0x1b0] ss:$12 sps:$4 sm:$0xff]  }
 0x478   :  { %v12931_v33 = vadd.f32 %v3200_v58, %v16632_v13  ;;  %12840 = vmatprep.mubr.msk.bf16.mxu1 %vm2459_vm5, %v16793_v56  ;;  %v3264_v54 = vmax.f32 %v12929_v51, 0.0  ;;  %v13866_v13 = vpack.i.bf16 %v16773_v53, %v16759_v2  ;;  %v13996_v51 = vld [vmem:[#allocation9 + $0x1cc] ss:$12 sps:$4 sm:$0xff]  }
 0x479   :  { %v3265_v45 = vmax.f32 %v12930_v37, 0.0  ;;  %v13994_v37 = vld [vmem:[#allocation9 + $0x1c8] ss:$12 sps:$4 sm:$0xff]  }
 0x47a   :  { %v3266_v55 = vmax.f32 %v12931_v33, 0.0 }
 0x47b   :  { %v16802_v43 = vmax.f32 %v3263_v44, %v3265_v45  ;;  %13857 = vrot.lane.b32.xlu0 %v13856_v50, %s15383_s10  ;;  %v13999_v44 = vld [vmem:[#allocation9 + $0x1e4] ss:$12 sps:$4 sm:$0xff]  }
 0x47c   :  { %v3298_v12 = vmax.f32 %v3264_v54, %v3266_v55  ;;  %v13997_v55 = vld [vmem:[#allocation9 + $0x1e0] ss:$12 sps:$4 sm:$0xff]  }
 0x47d   :  { %v13831_v48 = vpack.i.bf16 %v16802_v43, %v3295_v32  ;;  %v16840_v32 = vpack.c.bf16 %v16638_v36, %v17708_v21 }
 0x47e   :  { %v16809_v5 = vpack.c.bf16 %v17708_v21, %v3298_v12  ;;  %v13871_v36 = vpack.i.bf16 %v3298_v12, %v16783_v62  ;;  %v14002_v12 = vld [vmem:[#allocation9 + $0x1fc] ss:$12 sps:$4 sm:$0xff]  }
 0x47f   :  { %13832 = vrot.lane.b32.xlu1 %v13831_v48, %s15383_s10  ;;  %13867 = vrot.lane.b32.xlu0 %v13866_v13, %s15383_s10  ;;  %v14000_v48 = vld [vmem:[#allocation9 + $0x1f8] ss:$12 sps:$4 sm:$0xff]   ;;  %v14005_v13 = vld [vmem:[#allocation9 + $0x214] ss:$12 sps:$4 sm:$0xff]  }
 0x480   :  { %12841 = vmatmul.mubr.msk.bf16.gmra.mrb[76].mxu1 %vm2459_vm5, %v16809_v5 }
 0x481   :  { %v16815_v7 = vpop.permute.xlu0 %13797 }
 0x482   :  { %v13800_v63 = vunpack.i.h.bf16 %v16815_v7  ;;  %v13799_v17 = vunpack.i.l.bf16 %v16815_v7 }
 0x483   :  { %13842 = vrot.lane.b32.xlu1 %v13841_v42, %s15383_s10  ;;  %v14008_v42 = vld [vmem:[#allocation9 + $0x22c] ss:$12 sps:$4 sm:$0xff]  }
 0x484   :  { %v3556_v8 = vsel %vm2459_vm5, %v16640_v41, %v13799_v17  ;;  %v13861_v41 = vpack.i.bf16 %v16752_v3, %v16738_v16 }
 0x485   :  { %v16834_v19 = vpack.c.bf16 %v3556_v8, %v13800_v63 }
 0x487   :  { %13852 = vrot.lane.b32.xlu1 %v13851_v27, %s15383_s10  ;;  %11619 = vmatprep.mubr.msk.bf16.mxu0 %vm16828_vm11, %v16834_v19 }
 0x488   :  { %4405 = vmatmul.mubr.bf16.vlgmr.msra.gmra.mrb[64].mxu0 %v16840_v32 }
 0x489   :  { %4486 = vmatpush1.bf16.msra.mxu0 %v13985_v30 }
 0x48a   :  { %4487 = vmatprep.subr.bf16.mxu0 %v13990_v25  ;;  %v14011_v25 = vld [vmem:[#allocation9 + $0x244] ss:$12 sps:$4 sm:$0xff]  }
 0x48b   :  { %13862 = vrot.lane.b32.xlu1 %v13861_v41, %s15383_s10 }
 0x48d   :  { %4488 = vmatpush1.bf16.msra.mxu0 %v13988_v0 }
 0x48e   :  { %4489 = vmatprep.subr.bf16.mxu0 %v13993_v10 }
 0x48f   :  { %13872 = vrot.lane.b32.xlu1 %v13871_v36, %s15383_s10  ;;  %v14009_v36 = vld [vmem:[#allocation9 + $0x240] ss:$12 sps:$4 sm:$0xff]  }
 0x491   :  { %v16852_v38 = vpop.permute.xlu1 %13802  ;;  %4490 = vmatpush1.bf16.msra.mxu0 %v13991_v60  ;;  %v14014_v60 = vld [vmem:[#allocation9 + $0x25c] ss:$12 sps:$4 sm:$0xff]  }
 0x492   :  { %v13805_v58 = vunpack.i.h.bf16 %v16852_v38  ;;  %v13804_v33 = vunpack.i.l.bf16 %v16852_v38  ;;  %4491 = vmatprep.subr.bf16.mxu0 %v13996_v51  ;;  %v14012_v51 = vld [vmem:[#allocation9 + $0x258] ss:$12 sps:$4 sm:$0xff]   ;;  %v14042_v38 = vld [vmem:[#allocation9 + $0x348] ss:$12 sps:$4 sm:$0xff]  }
 0x494   :  { %v3557_v45 = vsel %vm2459_vm5, %v16646_v57, %v13804_v33  ;;  %v3558_v50 = vsel %vm2459_vm5, %v16654_v20, %v13805_v58  ;;  %v14003_v57 = vld [vmem:[#allocation9 + $0x210] ss:$12 sps:$4 sm:$0xff]   ;;  %v14006_v20 = vld [vmem:[#allocation9 + $0x228] ss:$12 sps:$4 sm:$0xff]  }
 0x495   :  { %v16864_v54 = vpack.c.bf16 %v3558_v50, %v3557_v45  ;;  %4492 = vmatpush1.bf16.msra.mxu0 %v13994_v37  ;;  %v14017_v37 = vld [vmem:[#allocation9 + $0x274] ss:$12 sps:$4 sm:$0xff]  }
 0x496   :  { %4493 = vmatprep.subr.bf16.mxu0 %v13999_v44  ;;  %v14020_v44 = vld [vmem:[#allocation9 + $0x28c] ss:$12 sps:$4 sm:$0xff]  }
 0x497   :  { %4414 = vmatprep.mubr.bf16.mxu0 %v16864_v54 }
 0x498   :  { %4415 = vmatmul.mubr.bf16.gmra.mrb[68].mxu0 %v16656_v40 }
 0x499   :  { %4494 = vmatpush1.bf16.msra.mxu0 %v13997_v55 }
 0x49a   :  { %4495 = vmatprep.subr.bf16.mxu0 %v14002_v12  ;;  %v14023_v12 = vld [vmem:[#allocation9 + $0x2a4] ss:$12 sps:$4 sm:$0xff]  }
 0x49d   :  { %4496 = vmatpush1.bf16.msra.mxu0 %v14000_v48 }
 0x49e   :  { %4497 = vmatprep.subr.bf16.mxu0 %v14005_v13 }
 0x4a1   :  { %v16868_v8 = vpop.permute.xlu0 %13807  ;;  %4498 = vmatpush1.bf16.msra.mxu0 %v14003_v57 }
 0x4a2   :  { %v13810_v27 = vunpack.i.h.bf16 %v16868_v8  ;;  %v13809_v30 = vunpack.i.l.bf16 %v16868_v8  ;;  %4499 = vmatprep.subr.bf16.mxu0 %v14008_v42  ;;  %v14021_v42 = vld [vmem:[#allocation9 + $0x2a0] ss:$12 sps:$4 sm:$0xff]  }
 0x4a4   :  { %v3559_v41 = vsel %vm2459_vm5, %v16668_v1, %v13809_v30  ;;  %v3560_v0 = vsel %vm2459_vm5, %v16675_v29, %v13810_v27  ;;  %v14015_v1 = vld [vmem:[#allocation9 + $0x270] ss:$12 sps:$4 sm:$0xff]   ;;  %v14018_v29 = vld [vmem:[#allocation9 + $0x288] ss:$12 sps:$4 sm:$0xff]  }
 0x4a5   :  { %v16880_v10 = vpack.c.bf16 %v3560_v0, %v3559_v41  ;;  %4500 = vmatpush1.bf16.msra.mxu0 %v14006_v20  ;;  %v14026_v20 = vld [vmem:[#allocation9 + $0x2bc] ss:$12 sps:$4 sm:$0xff]   ;;  %v14029_v41 = vld [vmem:[#allocation9 + $0x2d4] ss:$12 sps:$4 sm:$0xff]   ;;  %v14032_v0 = vld [vmem:[#allocation9 + $0x2ec] ss:$12 sps:$4 sm:$0xff]  }
 0x4a6   :  { %4501 = vmatprep.subr.bf16.mxu0 %v14011_v25  ;;  %v14024_v25 = vld [vmem:[#allocation9 + $0x2b8] ss:$12 sps:$4 sm:$0xff]  }
 0x4a7   :  { %4424 = vmatprep.mubr.bf16.mxu0 %v16880_v10 }
 0x4a8   :  { %4425 = vmatmul.mubr.bf16.gmra.mrb[72].mxu0 %v16677_v31 }
 0x4a9   :  { %4502 = vmatpush1.bf16.msra.mxu0 %v14009_v36 }
 0x4aa   :  { %4503 = vmatprep.subr.bf16.mxu0 %v14014_v60 }
 0x4ad   :  { %4504 = vmatpush1.bf16.msra.mxu0 %v14012_v51 }
 0x4ae   :  { %4505 = vmatprep.subr.bf16.mxu0 %v14017_v37  ;;  %v14035_v37 = vld [vmem:[#allocation9 + $0x304] ss:$12 sps:$4 sm:$0xff]  }
 0x4b1   :  { %v16884_v45 = vpop.permute.xlu1 %13812  ;;  %4506 = vmatpush1.bf16.msra.mxu0 %v14015_v1 }
 0x4b2   :  { %v17710_v50 = vunpack.i.h.bf16 %v16884_v45  ;;  %v17711_v55 = vunpack.i.l.bf16 %v16884_v45  ;;  %4507 = vmatprep.subr.bf16.mxu0 %v14020_v44 }
 0x4b4   :  { %v3561_v48 = vsel %vm2459_vm5, %v16689_v23, %v17711_v55  ;;  %v3562_v13 = vsel %vm2459_vm5, %v16696_v15, %v17710_v50  ;;  %v14027_v23 = vld [vmem:[#allocation9 + $0x2d0] ss:$12 sps:$4 sm:$0xff]   ;;  %v14030_v15 = vld [vmem:[#allocation9 + $0x2e8] ss:$12 sps:$4 sm:$0xff]   ;;  %v14036_v50 = vld [vmem:[#allocation9 + $0x318] ss:$12 sps:$4 sm:$0xff]  }
 0x4b5   :  { %v16896_v57 = vpack.c.bf16 %v3562_v13, %v3561_v48  ;;  %4508 = vmatpush1.bf16.msra.mxu0 %v14018_v29  ;;  %v14041_v55 = vld [vmem:[#allocation9 + $0x334] ss:$12 sps:$4 sm:$0xff]  }
 0x4b6   :  { %4509 = vmatprep.subr.bf16.mxu0 %v14023_v12 }
 0x4b7   :  { %4434 = vmatprep.mubr.bf16.mxu0 %v16896_v57 }
 0x4b8   :  { %4435 = vmatmul.mubr.bf16.gmra.mrb[76].mxu0 %v16698_v46 }
 0x4b9   :  { %4510 = vmatpush1.bf16.msra.mxu0 %v14021_v42 }
 0x4ba   :  { %4511 = vmatprep.subr.bf16.mxu0 %v14026_v20 }
 0x4bd   :  { %4512 = vmatpush1.bf16.msra.mxu0 %v14024_v25 }
 0x4be   :  { %4513 = vmatprep.subr.bf16.mxu0 %v14029_v41 }
 0x4c1   :  { %v13818_v36 = vpop.permute.xlu0 %13817  ;;  %4514 = vmatpush1.bf16.msra.mxu0 %v14027_v23 }
 0x4c2   :  { %v13820_v60 = vunpack.i.h.bf16 %v13818_v36  ;;  %v13819_v51 = vunpack.i.l.bf16 %v13818_v36  ;;  %4515 = vmatprep.subr.bf16.mxu0 %v14032_v0 }
 0x4c4   :  { %v3563_v1 = vsel %vm2459_vm5, %v16710_v22, %v13819_v51  ;;  %v3564_v44 = vsel %vm2459_vm5, %v16717_v49, %v13820_v60 }
 0x4c5   :  { %v16904_v29 = vpack.c.bf16 %v3564_v44, %v3563_v1  ;;  %4516 = vmatpush1.bf16.msra.mxu0 %v14030_v15 }
 0x4c6   :  { %4598 = vmatprep.subr.bf16.mxu0 %v14035_v37 }
 0x4c7   :  { %4444 = vmatprep.mubr.bf16.mxu0 %v16904_v29 }
 0x4c8   :  { %4445 = vmatmul.mubr.bf16.gmra.mrb[80].mxu0 %v16719_v52 }
 0x4d1   :  { %v13823_v12 = vpop.permute.xlu1 %13822 }
 0x4d2   :  { %v13825_v48 = vunpack.i.h.bf16 %v13823_v12  ;;  %v13824_v13 = vunpack.i.l.bf16 %v13823_v12 }
 0x4d4   :  { %v3565_v42 = vsel %vm2459_vm5, %v16731_v35, %v13824_v13  ;;  %v3566_v22 = vsel %vm2459_vm5, %v16738_v16, %v13825_v48 }
 0x4d5   :  { %v16912_v20 = vpack.c.bf16 %v3566_v22, %v3565_v42 }
 0x4d7   :  { %4454 = vmatprep.mubr.bf16.mxu0 %v16912_v20 }
 0x4d8   :  { %4455 = vmatmul.mubr.bf16.gmra.mrb[84].mxu0 %v16740_v18 }
 0x4e1   :  { %v13828_v49 = vpop.permute.xlu0 %13827 }
 0x4e2   :  { %v13830_v25 = vunpack.i.h.bf16 %v13828_v49  ;;  %v13829_v41 = vunpack.i.l.bf16 %v13828_v49 }
 0x4e4   :  { %v3567_v23 = vsel %vm2459_vm5, %v16752_v3, %v13829_v41  ;;  %v3568_v0 = vsel %vm2459_vm5, %v16759_v2, %v13830_v25 }
 0x4e5   :  { %v13838_v36 = vpop.permute.xlu0 %13837  ;;  %v16920_v35 = vpack.c.bf16 %v3568_v0, %v3567_v23 }
 0x4e7   :  { %4464 = vmatprep.mubr.bf16.mxu0 %v16920_v35 }
 0x4e8   :  { %4465 = vmatmul.mubr.bf16.gmra.mrb[88].mxu0 %v16761_v61 }
 0x4e9   :  { %v16924_v16 = vpop.permute.xlu0 %13847 }
 0x4ed   :  { %v13858_v15 = vpop.permute.xlu0 %13857 }
 0x4ee   :  { %v13860_v37 = vunpack.i.h.bf16 %v13858_v15  ;;  %v13859_v1 = vunpack.i.l.bf16 %v13858_v15 }
 0x4f0   :  { %v3515_v44 = vsel %vm2459_vm5, %v13819_v51, %v13859_v1  ;;  %v3516_v12 = vsel %vm2459_vm5, %v13820_v60, %v13860_v37 }
 0x4f1   :  { %v13833_v3 = vpop.permute.xlu1 %13832  ;;  %v13868_v42 = vpop.permute.xlu0 %13867  ;;  %v16928_v22 = vpack.c.bf16 %v3516_v12, %v3515_v44  ;;  %v13840_v44 = vunpack.i.h.bf16 %v13838_v36  ;;  %v13839_v12 = vunpack.i.l.bf16 %v13838_v36  ;;  %v14033_v36 = vld [vmem:[#allocation9 + $0x300] ss:$12 sps:$4 sm:$0xff]  }
 0x4f2   :  { %v13835_v2 = vunpack.i.h.bf16 %v13833_v3  ;;  %v13834_v49 = vunpack.i.l.bf16 %v13833_v3  ;;  %v13870_v23 = vunpack.i.h.bf16 %v13868_v42  ;;  %v13869_v0 = vunpack.i.l.bf16 %v13868_v42 }
 0x4f4   :  { %v3569_v39 = vsel %vm2459_vm5, %v16773_v53, %v13834_v49  ;;  %v3570_v21 = vsel %vm2459_vm5, %v16783_v62, %v13835_v2  ;;  %v3519_v15 = vsel %vm2459_vm5, %v13829_v41, %v13869_v0  ;;  %v3520_v51 = vsel %vm2459_vm5, %v13830_v25, %v13870_v23 }
 0x4f5   :  { %v13843_v1 = vpop.permute.xlu1 %13842  ;;  %v16936_v60 = vpack.c.bf16 %v3570_v21, %v3569_v39  ;;  %v16938_v37 = vpack.c.bf16 %v3520_v51, %v3519_v15  ;;  %v3507_v53 = vsel %vm2459_vm5, %v13800_v63, %v13839_v12  ;;  %v3508_v21 = vsel %vm2459_vm5, %v13799_v17, %v13840_v44  ;;  %v14038_v51 = vld [vmem:[#allocation9 + $0x31c] ss:$12 sps:$4 sm:$0xff]  }
 0x4f6   :  { %v16955_v42 = vpack.c.bf16 %v3508_v21, %v3507_v53  ;;  %v13845_v63 = vunpack.i.h.bf16 %v13843_v1  ;;  %v13844_v12 = vunpack.i.l.bf16 %v13843_v1 }
 0x4f7   :  { %4474 = vmatprep.mubr.bf16.mxu0 %v16936_v60 }
 0x4f8   :  { %4475 = vmatmul.mubr.bf16.gmra.mrb[92].mxu0 %v16785_v34  ;;  %v3509_v1 = vsel %vm2459_vm5, %v13804_v33, %v13844_v12  ;;  %v13849_v33 = vunpack.i.l.bf16 %v16924_v16 }
 0x4f9   :  { %v13853_v3 = vpop.permute.xlu1 %13852  ;;  %4517 = vmatprep.mubr.bf16.mxu0 %v16656_v40 }
 0x4fb   :  { %v16949_v39 = vpop.f32.mrb[64].mxu1 }
 0x4fc   :  { %v16951_v62 = vpop.f32.mrb[65].mxu1 }
 0x4fd   :  { %v13863_v25 = vpop.permute.xlu1 %13862  ;;  %v16953_v41 = vpop.f32.mrb[66].mxu1 }
 0x4fe   :  { %v13865_v23 = vunpack.i.h.bf16 %v13863_v25  ;;  %v13864_v0 = vunpack.i.l.bf16 %v13863_v25  ;;  %v16957_v15 = vpop.f32.mrb[67].mxu1 }
 0x500   :  { %4518 = vmatmul.mubr.bf16.vlgmr.msra.gmra.mrb[64].mxu0 %v16955_v42  ;;  %v3517_v7 = vsel %vm2459_vm5, %v13824_v13, %v13864_v0  ;;  %v3518_v17 = vsel %vm2459_vm5, %v13825_v48, %v13865_v23  ;;  %v3510_v13 = vsel %vm2459_vm5, %v13805_v58, %v13845_v63  ;;  %v14045_v58 = vld [vmem:[#allocation9 + $0xc8] ss:$12 sps:$4 sm:$0xff]   ;;  %v17732_v63 = vunpack.i.l.bf16 %v16884_v45 }
 0x501   :  { %v13873_v44 = vpop.permute.xlu1 %13872  ;;  %4527 = vmatprep.mubr.bf16.mxu0 %v16677_v31  ;;  %4599 = vmatpush1.bf16.msra.mxu0 %v14033_v36  ;;  %v16963_v53 = vpack.c.bf16 %v3518_v17, %v3517_v7  ;;  %v14039_v36 = vld [vmem:[#allocation9 + $0x330] ss:$12 sps:$4 sm:$0xff]   ;;  %v16975_v7 = vpack.c.bf16 %v3510_v13, %v3509_v1  ;;  %v13850_v17 = vunpack.i.h.bf16 %v16924_v16  ;;  %v13855_v16 = vunpack.i.h.bf16 %v13853_v3 }
 0x502   :  { %v13875_v21 = vunpack.i.h.bf16 %v13873_v44  ;;  %v13874_v25 = vunpack.i.l.bf16 %v13873_v44  ;;  %4600 = vmatprep.subr.bf16.mxu0 %v14038_v51  ;;  %v14044_v51 = vld [vmem:[#allocation9 + $0x34c] ss:$12 sps:$4 sm:$0xff]   ;;  %v17735_v13 = vmov 0  }
 0x504   :  { %v3521_v48 = vsel %vm2459_vm5, %v13834_v49, %v13874_v25  ;;  %v3522_v23 = vsel %vm2459_vm5, %v13835_v2, %v13875_v21  ;;  %v13854_v49 = vunpack.i.l.bf16 %v13853_v3 }
 0x505   :  { %4601 = vmatpush1.bf16.msra.mxu0 %v14036_v50  ;;  %v16973_v0 = vpack.c.bf16 %v3522_v23, %v3521_v48  ;;  %v3511_v50 = vsel %vm2459_vm5, %v13809_v30, %v13849_v33  ;;  %v17733_v30 = vunpack.i.h.bf16 %v16884_v45  ;;  %v17734_v45 = vmov 0.0   ;;  %v14047_v33 = vld [vmem:[#allocation9 + $0xe0] ss:$12 sps:$4 sm:$0xff]  }
 0x506   :  { %4602 = vmatprep.subr.bf16.mxu0 %v14041_v55  ;;  %v3512_v55 = vsel %vm2459_vm5, %v13810_v27, %v13850_v17  ;;  %v3513_v12 = vsel %vm2459_vm5, %v17732_v63, %v13854_v49  ;;  %v17015_v1 = vpack.c.bf16 %v17734_v45, %v16802_v43  ;;  %v14048_v43 = vld [vmem:[#allocation9 + $0x20] ss:$12 sps:$4 sm:$0xff]  }
 0x507   :  { %v16987_v2 = vpack.c.bf16 %v3512_v55, %v3511_v50  ;;  %v3514_v8 = vsel %vm2459_vm5, %v17733_v30, %v13855_v16  ;;  %v14051_v50 = vld [vmem:[#allocation9 + $0x110] ss:$12 sps:$4 sm:$0xff]   ;;  %v14053_v16 = vld [vmem:[#allocation9 + $0x128] ss:$12 sps:$4 sm:$0xff]   ;;  %v14055_v49 = vld [vmem:[#allocation9 + $0x140] ss:$12 sps:$4 sm:$0xff]  }
 0x508   :  { %4528 = vmatmul.mubr.bf16.gmra.mrb[68].mxu0 %v16975_v7  ;;  %v16997_v44 = vpack.c.bf16 %v3514_v8, %v3513_v12  ;;  %v14052_v55 = vld [vmem:[#allocation9 + $0x50] ss:$12 sps:$4 sm:$0xff]   ;;  %v14056_v63 = vld [vmem:[#allocation9 + $0x80] ss:$12 sps:$4 sm:$0xff]   ;;  %v14057_v12 = vld [vmem:[#allocation9 + $0x158] ss:$12 sps:$4 sm:$0xff]  }
 0x509   :  { %4537 = vmatprep.mubr.bf16.mxu0 %v16698_v46  ;;  %4603 = vmatpush1.bf16.msra.mxu0 %v14039_v36 }
 0x50a   :  { %4604 = vmatprep.subr.bf16.mxu0 %v14044_v51  ;;  %v14046_v51 = vld [vmem:[#allocation9 + $0x8] ss:$12 sps:$4 sm:$0xff]  }
 0x50d   :  { %4605 = vmatpush1.bf16.msra.mxu0 %v14042_v38  ;;  %v14049_v38 = vld [vmem:[#allocation9 + $0xf8] ss:$12 sps:$4 sm:$0xff]  }
 0x50e   :  { %12372 = vmatprep.subr.bf16.mxu0 %v14045_v58  ;;  %v14050_v58 = vld [vmem:[#allocation9 + $0x38] ss:$12 sps:$4 sm:$0xff]  }
 0x510   :  { %4538 = vmatmul.mubr.bf16.gmra.mrb[72].mxu0 %v16987_v2 }
 0x511   :  { %4547 = vmatprep.mubr.bf16.mxu0 %v16719_v52 }
 0x518   :  { %4548 = vmatmul.mubr.bf16.gmra.mrb[76].mxu0 %v16997_v44 }
 0x519   :  { %4557 = vmatprep.mubr.bf16.mxu0 %v16740_v18 }
 0x51b   :  { %v17001_v27 = vpop.f32.mrb[68].mxu1 }
 0x51c   :  { %v17003_v3 = vpop.f32.mrb[69].mxu1 }
 0x51d   :  { %v17005_v21 = vpop.f32.mrb[70].mxu1 }
 0x51e   :  { %v17007_v25 = vpop.f32.mrb[71].mxu1 }
 0x520   :  { %4558 = vmatmul.mubr.bf16.gmra.mrb[80].mxu0 %v16928_v22 }
 0x521   :  { %4567 = vmatprep.mubr.bf16.mxu0 %v16761_v61 }
 0x528   :  { %4568 = vmatmul.mubr.bf16.gmra.mrb[84].mxu0 %v16963_v53 }
 0x529   :  { %4577 = vmatprep.mubr.bf16.mxu0 %v16785_v34 }
 0x530   :  { %4578 = vmatmul.mubr.bf16.gmra.mrb[88].mxu0 %v16938_v37 }
 0x531   :  { %4587 = vmatprep.mubr.bf16.mxu0 %v17015_v1 }
 0x538   :  { %4588 = vmatmul.mubr.bf16.gmra.mrb[92].mxu0 %v16973_v0 }
 0x539   :  { %4630 = vmatprep.mubr.bf16.mxu0 %v17735_v13 }
 0x53b   :  { %v17021_v48 = vpop.f32.mrb[72].mxu1 }
 0x53c   :  { %v17023_v23 = vpop.f32.mrb[73].mxu1 }
 0x53d   :  { %v17025_v36 = vpop.f32.mrb[74].mxu1 }
 0x53e   :  { %v17027_v17 = vpop.f32.mrb[75].mxu1 }
 0x540   :  { %11620 = vmatmul.mubr.msk.bf16.vlgmr.msra.gmra.mrb[64].mxu0 %vm2459_vm5, %v16662_v24  ;;  %v14054_v24 = vld [vmem:[#allocation9 + $0x68] ss:$12 sps:$4 sm:$0xff]  }
 0x541   :  { %12373 = vmatpush3.bf16.msra.mxu0 %v14046_v51  ;;  %4640 = vmatprep.mubr.bf16.mxu0 %v17735_v13  ;;  %v14058_v51 = vld [vmem:[#allocation9 + $0x98] ss:$12 sps:$4 sm:$0xff]  }
 0x542   :  { %12374 = vmatprep.subr.bf16.mxu0 %v14047_v33 }
 0x545   :  { %12375 = vmatpush3.bf16.msra.mxu0 %v14048_v43  ;;  %v14059_v43 = vld [vmem:[#allocation9 + $0x170] ss:$12 sps:$4 sm:$0xff]  }
 0x546   :  { %12376 = vmatprep.subr.bf16.mxu0 %v14049_v38  ;;  %v14061_v38 = vld [vmem:[#allocation9 + $0x248] ss:$12 sps:$4 sm:$0xff]  }
 0x548   :  { %11621 = vmatmul.mubr.msk.bf16.gmra.mrb[68].mxu0 %vm2459_vm5, %v16682_v4 }
 0x549   :  { %4650 = vmatprep.mubr.bf16.mxu0 %v17735_v13  ;;  %12377 = vmatpush3.bf16.msra.mxu0 %v14050_v58  ;;  %v14109_v58 = vld [vmem:[#allocation12 + $0xe0] ss:$12 sps:$4 sm:$0xff]  }
 0x54a   :  { %12378 = vmatprep.subr.bf16.mxu0 %v14051_v50  ;;  %v14062_v50 = vld [vmem:[#allocation9 + $0x188] ss:$12 sps:$4 sm:$0xff]  }
 0x54d   :  { %12379 = vmatpush3.bf16.msra.mxu0 %v14052_v55  ;;  %v14063_v55 = vld [vmem:[#allocation9 + $0x260] ss:$12 sps:$4 sm:$0xff]  }
 0x54e   :  { %12380 = vmatprep.subr.bf16.mxu0 %v14053_v16  ;;  %v14114_v16 = vld [vmem:[#allocation12 + $0xf8] ss:$12 sps:$4 sm:$0xff]  }
 0x550   :  { %11622 = vmatmul.mubr.msk.bf16.gmra.mrb[72].mxu0 %vm2459_vm5, %v16704_v26  ;;  %v14060_v26 = vld [vmem:[#allocation9 + $0xb0] ss:$12 sps:$4 sm:$0xff]  }
 0x551   :  { %4660 = vmatprep.mubr.bf16.mxu0 %v17735_v13  ;;  %12381 = vmatpush3.bf16.msra.mxu0 %v14054_v24  ;;  %v14120_v24 = vld [vmem:[#allocation12 + $0x50] ss:$12 sps:$4 sm:$0xff]  }
 0x552   :  { %12382 = vmatprep.subr.bf16.mxu0 %v14055_v49  ;;  %v14066_v49 = vld [vmem:[#allocation9 + $0x1b8] ss:$12 sps:$4 sm:$0xff]  }
 0x553   :  { %v17038_v4 = vpop.f32.mrb[76].mxu1 }
 0x554   :  { %v17040_v30 = vpop.f32.mrb[77].mxu1 }
 0x555   :  { %v17042_v8 = vpop.f32.mrb[78].mxu1  ;;  %12383 = vmatpush3.bf16.msra.mxu0 %v14056_v63  ;;  %v14067_v63 = vld [vmem:[#allocation9 + $0x290] ss:$12 sps:$4 sm:$0xff]  }
 0x556   :  { %v17044_v33 = vpop.f32.mrb[79].mxu1  ;;  %12384 = vmatprep.subr.bf16.mxu0 %v14057_v12  ;;  %v14124_v12 = vld [vmem:[#allocation12 + $0x128] ss:$12 sps:$4 sm:$0xff]  }
 0x558   :  { %11623 = vmatmul.mubr.msk.bf16.gmra.mrb[76].mxu0 %vm2459_vm5, %v16725_v28  ;;  %v14104_v28 = vld [vmem:[#allocation12 + $0xc8] ss:$12 sps:$4 sm:$0xff]  }
 0x559   :  { %4670 = vmatprep.mubr.bf16.mxu0 %v17735_v13  ;;  %12385 = vmatpush3.bf16.msra.mxu0 %v14058_v51  ;;  %v14069_v51 = vld [vmem:[#allocation9 + $0x2a8] ss:$12 sps:$4 sm:$0xff]  }
 0x55a   :  { %12386 = vmatprep.subr.bf16.mxu0 %v14059_v43  ;;  %12512 = vmatprep.subr.bf16.mxu1 %v14104_v28  ;;  %v14070_v43 = vld [vmem:[#allocation9 + $0x1e8] ss:$12 sps:$4 sm:$0xff]   ;;  %v14073_v28 = vld [vmem:[#allocation9 + $0x2d8] ss:$12 sps:$4 sm:$0xff]  }
 0x55d   :  { %12387 = vmatpush3.bf16.msra.mxu0 %v14060_v26  ;;  %v14071_v26 = vld [vmem:[#allocation9 + $0x2c0] ss:$12 sps:$4 sm:$0xff]  }
 0x55e   :  { %12436 = vmatprep.subr.bf16.mxu0 %v14061_v38  ;;  %v14072_v38 = vld [vmem:[#allocation9 + $0x200] ss:$12 sps:$4 sm:$0xff]  }
 0x560   :  { %11624 = vmatmul.mubr.msk.bf16.gmra.mrb[80].mxu0 %vm2459_vm5, %v16746_v14  ;;  %v14105_v14 = vld [vmem:[#allocation12 + $0x8] ss:$12 sps:$4 sm:$0xff]  }
 0x561   :  { %4680 = vmatprep.mubr.bf16.mxu0 %v17735_v13  ;;  %12513 = vmatpush3.bf16.msra.mxu1 %v14105_v14  ;;  %v14129_v14 = vld [vmem:[#allocation12 + $0x140] ss:$12 sps:$4 sm:$0xff]  }
 0x562   :  { %12514 = vmatprep.subr.bf16.mxu1 %v14109_v58  ;;  %v14074_v58 = vld [vmem:[#allocation9 + $0x218] ss:$12 sps:$4 sm:$0xff]  }
 0x568   :  { %11625 = vmatmul.mubr.msk.bf16.gmra.mrb[84].mxu0 %vm2459_vm5, %v16767_v59  ;;  %v14110_v59 = vld [vmem:[#allocation12 + $0x20] ss:$12 sps:$4 sm:$0xff]  }
 0x569   :  { %4690 = vmatprep.mubr.bf16.mxu0 %v17735_v13  ;;  %12515 = vmatpush3.bf16.msra.mxu1 %v14110_v59  ;;  %v14075_v59 = vld [vmem:[#allocation9 + $0x2f0] ss:$12 sps:$4 sm:$0xff]  }
 0x56a   :  { %12516 = vmatprep.subr.bf16.mxu1 %v14114_v16  ;;  %v14079_v16 = vld [vmem:[#allocation12 + $0x4] ss:$12 sps:$4 sm:$0xff]  }
 0x570   :  { %11626 = vmatmul.mubr.msk.bf16.gmra.mrb[88].mxu0 %vm2459_vm5, %v16793_v56  ;;  %v14115_v56 = vld [vmem:[#allocation12 + $0x38] ss:$12 sps:$4 sm:$0xff]  }
 0x571   :  { %4700 = vmatprep.mubr.bf16.mxu0 %v17735_v13  ;;  %12517 = vmatpush3.bf16.msra.mxu1 %v14115_v56  ;;  %v14139_v56 = vld [vmem:[#allocation12 + $0x170] ss:$12 sps:$4 sm:$0xff]  }
 0x572   :  { %12518 = vmatprep.subr.bf16.mxu1 %v14119_v11  ;;  %v14082_v11 = vld [vmem:[#allocation12 + $0x1c] ss:$12 sps:$4 sm:$0xff]  }
 0x575   :  { %12519 = vmatpush3.bf16.msra.mxu1 %v14120_v24  ;;  %v14088_v24 = vld [vmem:[#allocation12 + $0x4c] ss:$12 sps:$4 sm:$0xff]  }
 0x576   :  { %12520 = vmatprep.subr.bf16.mxu1 %v14124_v12  ;;  %v14098_v12 = vld [vmem:[#allocation12 + $0xa8] ss:$12 sps:$4 sm:$0xff]  }
 0x578   :  { %11627 = vmatmul.mubr.msk.bf16.gmra.mrb[92].mxu0 %vm2459_vm5, %v16809_v5  ;;  %v14064_v5 = vld [vmem:[#allocation9 + $0x1a0] ss:$12 sps:$4 sm:$0xff]  }
 0x579   :  { %11631 = vmatprep.mubr.msk.bf16.mxu0 %vm16828_vm11, %v16834_v19  ;;  %v14065_v19 = vld [vmem:[#allocation9 + $0x278] ss:$12 sps:$4 sm:$0xff]  }
 0x580   :  { %4744 = vmatmul.mubr.bf16.vlgmr.msra.gmra.mrb[96].mxu0 %v16840_v32  ;;  %v14125_v32 = vld [vmem:[#allocation12 + $0x68] ss:$12 sps:$4 sm:$0xff]  }
 0x581   :  { %4751 = vmatprep.mubr.bf16.mxu0 %v16864_v54  ;;  %12437 = vmatpush3.bf16.msra.mxu0 %v14062_v50  ;;  %v14068_v54 = vld [vmem:[#allocation9 + $0x1d0] ss:$12 sps:$4 sm:$0xff]  }
 0x582   :  { %12438 = vmatprep.subr.bf16.mxu0 %v14063_v55  ;;  %12521 = vmatpush3.bf16.msra.mxu1 %v14125_v32  ;;  %v14134_v50 = vld [vmem:[#allocation12 + $0x158] ss:$12 sps:$4 sm:$0xff]  }
 0x583   :  { %12522 = vmatprep.subr.bf16.mxu1 %v14129_v14  ;;  %v14135_v55 = vld [vmem:[#allocation12 + $0x98] ss:$12 sps:$4 sm:$0xff]   ;;  %v14136_v14 = vld [vmem:[#allocation12 + $0x168] ss:$12 sps:$4 sm:$0xff]  }
 0x584   :  { %v14103_v32 = vld [vmem:[#allocation12 + $0xc4] ss:$12 sps:$4 sm:$0xff]  }
 0x585   :  { %12439 = vmatpush3.bf16.msra.mxu0 %v14064_v5  ;;  %v14140_v5 = vld [vmem:[#allocation12 + $0xb0] ss:$12 sps:$4 sm:$0xff]  }
 0x586   :  { %12440 = vmatprep.subr.bf16.mxu0 %v14065_v19  ;;  %v14085_v19 = vld [vmem:[#allocation12 + $0x34] ss:$12 sps:$4 sm:$0xff]  }
 0x588   :  { %4752 = vmatmul.mubr.bf16.gmra.mrb[100].mxu0 %v16656_v40 }
 0x589   :  { %4759 = vmatprep.mubr.bf16.mxu0 %v16880_v10  ;;  %12441 = vmatpush3.bf16.msra.mxu0 %v14066_v49  ;;  %v14130_v10 = vld [vmem:[#allocation12 + $0x80] ss:$12 sps:$4 sm:$0xff]   ;;  %v14092_v49 = vld [vmem:[#allocation12 + $0x78] ss:$12 sps:$4 sm:$0xff]  }
 0x58a   :  { %12442 = vmatprep.subr.bf16.mxu0 %v14067_v63  ;;  %12523 = vmatpush3.bf16.msra.mxu1 %v14130_v10  ;;  %v14097_v63 = vld [vmem:[#allocation12 + $0x94] ss:$12 sps:$4 sm:$0xff]   ;;  %v14143_v10 = vld [vmem:[#allocation12 + $0x184] ss:$12 sps:$4 sm:$0xff]  }
 0x58b   :  { %12524 = vmatprep.subr.bf16.mxu1 %v14134_v50 }
 0x58d   :  { %12443 = vmatpush3.bf16.msra.mxu0 %v14068_v54  ;;  %v14106_v54 = vld [vmem:[#allocation12 + $0xd8] ss:$12 sps:$4 sm:$0xff]  }
 0x58e   :  { %12444 = vmatprep.subr.bf16.mxu0 %v14069_v51  ;;  %12525 = vmatpush3.bf16.msra.mxu1 %v14135_v55  ;;  %v14113_v51 = vld [vmem:[#allocation12 + $0xf4] ss:$12 sps:$4 sm:$0xff]  }
 0x58f   :  { %12526 = vmatprep.subr.bf16.mxu1 %v14139_v56 }
 0x590   :  { %4760 = vmatmul.mubr.bf16.gmra.mrb[104].mxu0 %v16677_v31 }
 0x591   :  { %4767 = vmatprep.mubr.bf16.mxu0 %v16896_v57  ;;  %12445 = vmatpush3.bf16.msra.mxu0 %v14070_v43  ;;  %v14076_v57 = vld [vmem:[#allocation9 + $0x230] ss:$12 sps:$4 sm:$0xff]   ;;  %v14116_v43 = vld [vmem:[#allocation12 + $0x108] ss:$12 sps:$4 sm:$0xff]  }
 0x592   :  { %12446 = vmatprep.subr.bf16.mxu0 %v14071_v26  ;;  %12527 = vmatpush3.bf16.msra.mxu1 %v14140_v5  ;;  %v14123_v26 = vld [vmem:[#allocation12 + $0x124] ss:$12 sps:$4 sm:$0xff]  }
 0x595   :  { %12447 = vmatpush3.bf16.msra.mxu0 %v14072_v38  ;;  %v14126_v38 = vld [vmem:[#allocation12 + $0x138] ss:$12 sps:$4 sm:$0xff]  }
 0x596   :  { %12448 = vmatprep.subr.bf16.mxu0 %v14073_v28  ;;  %v14133_v28 = vld [vmem:[#allocation12 + $0x154] ss:$12 sps:$4 sm:$0xff]  }
 0x598   :  { %4768 = vmatmul.mubr.bf16.gmra.mrb[108].mxu0 %v16698_v46 }
 0x599   :  { %4775 = vmatprep.mubr.bf16.mxu0 %v16904_v29  ;;  %12449 = vmatpush3.bf16.msra.mxu0 %v14074_v58  ;;  %v14077_v29 = vld [vmem:[#allocation12] ss:$12 sps:$4 sm:$0xff]   ;;  %v14168_v58 = vld [vmem:[#allocation12 + $0x248] ss:$12 sps:$4 sm:$0xff]  }
 0x59a   :  { %12450 = vmatprep.subr.bf16.mxu0 %v14075_v59  ;;  %12552 = vmatprep.subr.bf16.mxu1 %v14168_v58 }
 0x59d   :  { %12451 = vmatpush3.bf16.msra.mxu0 %v14076_v57 }
 0x59e   :  { %6639 = vmatprep.subr.bf16.mxu0 %v14079_v16 }
 0x5a0   :  { %4776 = vmatmul.mubr.bf16.gmra.mrb[112].mxu0 %v16719_v52 }
 0x5a1   :  { %4783 = vmatprep.mubr.bf16.mxu0 %v16912_v20  ;;  %v14080_v20 = vld [vmem:[#allocation12 + $0x18] ss:$12 sps:$4 sm:$0xff]  }
 0x5a8   :  { %4784 = vmatmul.mubr.bf16.gmra.mrb[116].mxu0 %v16740_v18 }
 0x5a9   :  { %4791 = vmatprep.mubr.bf16.mxu0 %v16920_v35  ;;  %v14083_v35 = vld [vmem:[#allocation12 + $0x30] ss:$12 sps:$4 sm:$0xff]  }
 0x5b0   :  { %4792 = vmatmul.mubr.bf16.gmra.mrb[120].mxu0 %v16761_v61 }
 0x5b1   :  { %4799 = vmatprep.mubr.bf16.mxu0 %v16936_v60  ;;  %v14091_v60 = vld [vmem:[#allocation12 + $0x64] ss:$12 sps:$4 sm:$0xff]  }
 0x5b8   :  { %4800 = vmatmul.mubr.bf16.gmra.mrb[124].mxu0 %v16785_v34 }
 0x5b9   :  { %4840 = vmatprep.mubr.bf16.mxu0 %v16656_v40  ;;  %v14086_v40 = vld [vmem:[#allocation12 + $0x48] ss:$12 sps:$4 sm:$0xff]  }
 0x5c0   :  { %4841 = vmatmul.mubr.bf16.vlgmr.msra.gmra.mrb[128].mxu0 %v16955_v42  ;;  %v14089_v42 = vld [vmem:[#allocation12 + $0x60] ss:$12 sps:$4 sm:$0xff]  }
 0x5c1   :  { %4848 = vmatprep.mubr.bf16.mxu0 %v16677_v31  ;;  %6640 = vmatpush1.bf16.msra.mxu0 %v14077_v29  ;;  %v14094_v31 = vld [vmem:[#allocation12 + $0x7c] ss:$12 sps:$4 sm:$0xff]  }
 0x5c2   :  { %6641 = vmatprep.subr.bf16.mxu0 %v14082_v11 }
 0x5c5   :  { %6642 = vmatpush1.bf16.msra.mxu0 %v14080_v20 }
 0x5c6   :  { %6643 = vmatprep.subr.bf16.mxu0 %v14085_v19 }
 0x5c8   :  { %4849 = vmatmul.mubr.bf16.gmra.mrb[132].mxu0 %v16975_v7  ;;  %v14095_v7 = vld [vmem:[#allocation12 + $0x90] ss:$12 sps:$4 sm:$0xff]  }
 0x5c9   :  { %4856 = vmatprep.mubr.bf16.mxu0 %v16698_v46  ;;  %6644 = vmatpush1.bf16.msra.mxu0 %v14083_v35  ;;  %v14100_v46 = vld [vmem:[#allocation12 + $0xac] ss:$12 sps:$4 sm:$0xff]  }
 0x5ca   :  { %6645 = vmatprep.subr.bf16.mxu0 %v14088_v24 }
 0x5cd   :  { %6646 = vmatpush1.bf16.msra.mxu0 %v14086_v40 }
 0x5ce   :  { %6647 = vmatprep.subr.bf16.mxu0 %v14091_v60 }
 0x5d0   :  { %4857 = vmatmul.mubr.bf16.gmra.mrb[136].mxu0 %v16987_v2  ;;  %v14101_v2 = vld [vmem:[#allocation12 + $0xc0] ss:$12 sps:$4 sm:$0xff]  }
 0x5d1   :  { %4864 = vmatprep.mubr.bf16.mxu0 %v16719_v52  ;;  %6648 = vmatpush1.bf16.msra.mxu0 %v14089_v42  ;;  %v14108_v52 = vld [vmem:[#allocation12 + $0xdc] ss:$12 sps:$4 sm:$0xff]  }
 0x5d2   :  { %6649 = vmatprep.subr.bf16.mxu0 %v14094_v31 }
 0x5d5   :  { %6650 = vmatpush1.bf16.msra.mxu0 %v14092_v49 }
 0x5d6   :  { %6651 = vmatprep.subr.bf16.mxu0 %v14097_v63 }
 0x5d8   :  { %4865 = vmatmul.mubr.bf16.gmra.mrb[140].mxu0 %v16997_v44  ;;  %v14111_v44 = vld [vmem:[#allocation12 + $0xf0] ss:$12 sps:$4 sm:$0xff]  }
 0x5d9   :  { %4872 = vmatprep.mubr.bf16.mxu0 %v16740_v18  ;;  %6652 = vmatpush1.bf16.msra.mxu0 %v14095_v7  ;;  %v14118_v18 = vld [vmem:[#allocation12 + $0x10c] ss:$12 sps:$4 sm:$0xff]  }
 0x5da   :  { %6653 = vmatprep.subr.bf16.mxu0 %v14100_v46  ;;  %v14141_v46 = vld [vmem:[#allocation12 + $0x180] ss:$12 sps:$4 sm:$0xff]  }
 0x5dd   :  { %6654 = vmatpush1.bf16.msra.mxu0 %v14098_v12  ;;  %v14169_v12 = vld [vmem:[#allocation12 + $0x188] ss:$12 sps:$4 sm:$0xff]  }
 0x5de   :  { %6655 = vmatprep.subr.bf16.mxu0 %v14103_v32 }
 0x5e0   :  { %4873 = vmatmul.mubr.bf16.gmra.mrb[144].mxu0 %v16928_v22  ;;  %v14121_v22 = vld [vmem:[#allocation12 + $0x120] ss:$12 sps:$4 sm:$0xff]  }
 0x5e1   :  { %4880 = vmatprep.mubr.bf16.mxu0 %v16761_v61  ;;  %6656 = vmatpush1.bf16.msra.mxu0 %v14101_v2  ;;  %v14128_v61 = vld [vmem:[#allocation12 + $0x13c] ss:$12 sps:$4 sm:$0xff]  }
 0x5e2   :  { %6657 = vmatprep.subr.bf16.mxu0 %v14108_v52 }
 0x5e5   :  { %6658 = vmatpush1.bf16.msra.mxu0 %v14106_v54  ;;  %v14146_v54 = vld [vmem:[#allocation12 + $0x19c] ss:$12 sps:$4 sm:$0xff]  }
 0x5e6   :  { %6659 = vmatprep.subr.bf16.mxu0 %v14113_v51  ;;  %v14173_v51 = vld [vmem:[#allocation12 + $0x260] ss:$12 sps:$4 sm:$0xff]  }
 0x5e8   :  { %4881 = vmatmul.mubr.bf16.gmra.mrb[148].mxu0 %v16963_v53  ;;  %v14131_v53 = vld [vmem:[#allocation12 + $0x150] ss:$12 sps:$4 sm:$0xff]  }
 0x5e9   :  { %4888 = vmatprep.mubr.bf16.mxu0 %v16785_v34  ;;  %6660 = vmatpush1.bf16.msra.mxu0 %v14111_v44  ;;  %v14138_v34 = vld [vmem:[#allocation12 + $0x16c] ss:$12 sps:$4 sm:$0xff]  }
 0x5ea   :  { %6661 = vmatprep.subr.bf16.mxu0 %v14118_v18 }
 0x5ed   :  { %6662 = vmatpush1.bf16.msra.mxu0 %v14116_v43 }
 0x5ee   :  { %6663 = vmatprep.subr.bf16.mxu0 %v14123_v26 }
 0x5f0   :  { %4889 = vmatmul.mubr.bf16.gmra.mrb[152].mxu0 %v16938_v37  ;;  %v17094_v37 = vld [vmem:[#allocation10] sm:$0x7] }
 0x5f1   :  { %4896 = vmatprep.mubr.bf16.mxu0 %v17015_v1  ;;  %6664 = vmatpush1.bf16.msra.mxu0 %v14121_v22  ;;  %v17098_v1 = vrot.slane %v17094_v37, %v16623_v9  ;;  %v17102_v59 = vrot.slane %v17094_v37, %v16626_v6 }
 0x5f2   :  { %6665 = vmatprep.subr.bf16.mxu0 %v14128_v61  ;;  %v14144_v61 = vld [vmem:[#allocation12 + $0x198] ss:$12 sps:$4 sm:$0xff]  }
 0x5f5   :  { %6666 = vmatpush1.bf16.msra.mxu0 %v14126_v38  ;;  %v14174_v38 = vld [vmem:[#allocation12 + $0x1a0] ss:$12 sps:$4 sm:$0xff]  }
 0x5f6   :  { %6667 = vmatprep.subr.bf16.mxu0 %v14133_v28 }
 0x5f8   :  { %4897 = vmatmul.mubr.bf16.gmra.mrb[156].mxu0 %v16973_v0 }
 0x5f9   :  { %6668 = vmatpush1.bf16.msra.mxu0 %v14131_v53  ;;  %v14149_v53 = vld [vmem:[#allocation12 + $0x1b4] ss:$12 sps:$4 sm:$0xff]  }
 0x5fa   :  { %6669 = vmatprep.subr.bf16.mxu0 %v14138_v34  ;;  %v14178_v34 = vld [vmem:[#allocation12 + $0x278] ss:$12 sps:$4 sm:$0xff]  }
 0x5fd   :  { %6670 = vmatpush1.bf16.msra.mxu0 %v14136_v14 }
 0x5fe   :  { %6712 = vmatprep.subr.bf16.mxu0 %v14143_v10 }
 0x613   :  { %v4632_v50 = vpop.f32.mrb[64].mxu0 }
 0x614   :  { %v12932_v0 = vadd.f32 %v4632_v50, %v17098_v1  ;;  %v4634_v55 = vpop.f32.mrb[65].mxu0 }
 0x615   :  { %v12933_v57 = vadd.f32 %v4634_v55, %v17102_v59  ;;  %v4636_v16 = vpop.f32.mrb[66].mxu0 }
 0x616   :  { %v12934_v56 = vadd.f32 %v4636_v16, %v17098_v1  ;;  %v4638_v5 = vpop.f32.mrb[67].mxu0  ;;  %v5002_v11 = vmax.f32 %v12932_v0, 0.0 }
 0x617   :  { %v12935_v29 = vadd.f32 %v4638_v5, %v17102_v59  ;;  %v5003_v19 = vmax.f32 %v12933_v57, 0.0  ;;  %v14179_v5 = vld [vmem:[#allocation12 + $0x1b8] ss:$12 sps:$4 sm:$0xff]  }
 0x618   :  { %v5005_v20 = vmax.f32 %v12934_v56, 0.0  ;;  %v14147_v56 = vld [vmem:[#allocation12 + $0x1b0] ss:$12 sps:$4 sm:$0xff]  }
 0x619   :  { %v5006_v35 = vmax.f32 %v12935_v29, 0.0 }
 0x61a   :  { %v5050_v24 = vmax.f32 %v5002_v11, %v5005_v20  ;;  %v14152_v20 = vld [vmem:[#allocation12 + $0x1cc] ss:$12 sps:$4 sm:$0xff]  }
 0x61b   :  { %v5051_v40 = vmax.f32 %v5003_v19, %v5006_v35  ;;  %v4642_v60 = vpop.f32.mrb[68].mxu0  ;;  %v14183_v19 = vld [vmem:[#allocation12 + $0x290] ss:$12 sps:$4 sm:$0xff]  }
 0x61c   :  { %v12936_v42 = vadd.f32 %v4642_v60, %v17098_v1  ;;  %v4644_v31 = vpop.f32.mrb[69].mxu0  ;;  %v5146_v32 = vpack.c.bf16 %v5050_v24, %v17734_v45 }
 0x61d   :  { %v12937_v49 = vadd.f32 %v4644_v31, %v17102_v59  ;;  %v4646_v63 = vpop.f32.mrb[70].mxu0  ;;  %v5147_v7 = vpack.c.bf16 %v5051_v40, %v17734_v45  ;;  %v14150_v31 = vld [vmem:[#allocation12 + $0x1c8] ss:$12 sps:$4 sm:$0xff]  }
 0x61e   :  { %v12938_v2 = vadd.f32 %v4646_v63, %v17098_v1  ;;  %v4648_v52 = vpop.f32.mrb[71].mxu0  ;;  %v5008_v18 = vmax.f32 %v12936_v42, 0.0 }
 0x61f   :  { %v12939_v44 = vadd.f32 %v4648_v52, %v17102_v59  ;;  %6671 = vmatprep.mubr.bf16.mxu0 %v5147_v7  ;;  %7036 = vmatprep.mubr.bf16.mxu1 %v5147_v7  ;;  %v5009_v26 = vmax.f32 %v12937_v49, 0.0  ;;  %v14184_v49 = vld [vmem:[#allocation12 + $0x1d0] ss:$12 sps:$4 sm:$0xff]  }
 0x620   :  { %v5011_v43 = vmax.f32 %v12938_v2, 0.0  ;;  %6672 = vmatmul.mubr.bf16.vlgmr.msra.gmra.mrb[160].mxu0 %v5146_v32  ;;  %7037 = vmatmul.mubr.bf16.vlgmr.msra.gmra.mrb[80].mxu1 %v5146_v32  ;;  %v14155_v7 = vld [vmem:[#allocation12 + $0x1e4] ss:$12 sps:$4 sm:$0xff]  }
 0x621   :  { %v5012_v22 = vmax.f32 %v12939_v44, 0.0  ;;  %6713 = vmatpush1.bf16.msra.mxu0 %v14141_v46  ;;  %12553 = vmatpush3.bf16.msra.mxu1 %v14169_v12  ;;  %v14188_v46 = vld [vmem:[#allocation12 + $0x2a8] ss:$12 sps:$4 sm:$0xff]  }
 0x622   :  { %v5053_v28 = vmax.f32 %v5008_v18, %v5011_v43  ;;  %6714 = vmatprep.subr.bf16.mxu0 %v14146_v54  ;;  %12554 = vmatprep.subr.bf16.mxu1 %v14173_v51  ;;  %v14153_v43 = vld [vmem:[#allocation12 + $0x1e0] ss:$12 sps:$4 sm:$0xff]  }
 0x623   :  { %v5054_v14 = vmax.f32 %v5009_v26, %v5012_v22  ;;  %v4652_v10 = vpop.f32.mrb[72].mxu0  ;;  %v14189_v26 = vld [vmem:[#allocation12 + $0x1e8] ss:$12 sps:$4 sm:$0xff]  }
 0x624   :  { %v12940_v58 = vadd.f32 %v4652_v10, %v17098_v1  ;;  %v4654_v50 = vpop.f32.mrb[73].mxu0  ;;  %v17115_v0 = vpack.c.bf16 %v5053_v28, %v5050_v24 }
 0x625   :  { %v17117_v55 = vpack.c.bf16 %v5054_v14, %v5051_v40  ;;  %v12941_v57 = vadd.f32 %v4654_v50, %v17102_v59  ;;  %v4656_v16 = vpop.f32.mrb[74].mxu0  ;;  %6715 = vmatpush1.bf16.msra.mxu0 %v14144_v61  ;;  %12555 = vmatpush3.bf16.msra.mxu1 %v14174_v38  ;;  %v14158_v38 = vld [vmem:[#allocation12 + $0x1fc] ss:$12 sps:$4 sm:$0xff]   ;;  %v14156_v50 = vld [vmem:[#allocation12 + $0x1f8] ss:$12 sps:$4 sm:$0xff]  }
 0x626   :  { %v12942_v29 = vadd.f32 %v4656_v16, %v17098_v1  ;;  %v4658_v11 = vpop.f32.mrb[75].mxu0  ;;  %6716 = vmatprep.subr.bf16.mxu0 %v14149_v53  ;;  %12556 = vmatprep.subr.bf16.mxu1 %v14178_v34  ;;  %v5014_v24 = vmax.f32 %v12940_v58, 0.0 }
 0x627   :  { %v12943_v35 = vadd.f32 %v4658_v11, %v17102_v59  ;;  %v5015_v40 = vmax.f32 %v12941_v57, 0.0  ;;  %v14194_v57 = vld [vmem:[#allocation12 + $0x200] ss:$12 sps:$4 sm:$0xff]  }
 0x628   :  { %v5017_v60 = vmax.f32 %v12942_v29, 0.0 }
 0x629   :  { %v5018_v42 = vmax.f32 %v12943_v35, 0.0  ;;  %6717 = vmatpush1.bf16.msra.mxu0 %v14147_v56  ;;  %12557 = vmatpush3.bf16.msra.mxu1 %v14179_v5  ;;  %v14161_v56 = vld [vmem:[#allocation12 + $0x214] ss:$12 sps:$4 sm:$0xff]   ;;  %v14198_v5 = vld [vmem:[#allocation12 + $0x2d8] ss:$12 sps:$4 sm:$0xff]  }
 0x62a   :  { %v5056_v63 = vmax.f32 %v5014_v24, %v5017_v60  ;;  %6718 = vmatprep.subr.bf16.mxu0 %v14152_v20  ;;  %12558 = vmatprep.subr.bf16.mxu1 %v14183_v19 }
 0x62b   :  { %v5057_v12 = vmax.f32 %v5015_v40, %v5018_v42  ;;  %v4662_v32 = vpop.f32.mrb[76].mxu0  ;;  %v14159_v40 = vld [vmem:[#allocation12 + $0x210] ss:$12 sps:$4 sm:$0xff]   ;;  %v14199_v42 = vld [vmem:[#allocation12 + $0x218] ss:$12 sps:$4 sm:$0xff]  }
 0x62c   :  { %v17122_v2 = vpack.c.bf16 %v5056_v63, %v5053_v28  ;;  %v12944_v52 = vadd.f32 %v4662_v32, %v17098_v1  ;;  %v4664_v54 = vpop.f32.mrb[77].mxu0  ;;  %v14193_v28 = vld [vmem:[#allocation12 + $0x2c0] ss:$12 sps:$4 sm:$0xff]   ;;  %v14203_v32 = vld [vmem:[#allocation12 + $0x2f0] ss:$12 sps:$4 sm:$0xff]  }
 0x62d   :  { %v17125_v51 = vpack.c.bf16 %v5057_v12, %v5054_v14  ;;  %v12945_v44 = vadd.f32 %v4664_v54, %v17102_v59  ;;  %v4666_v18 = vpop.f32.mrb[78].mxu0  ;;  %6719 = vmatpush1.bf16.msra.mxu0 %v14150_v31  ;;  %12559 = vmatpush3.bf16.msra.mxu1 %v14184_v49 }
 0x62e   :  { %v12946_v22 = vadd.f32 %v4666_v18, %v17098_v1  ;;  %v4668_v61 = vpop.f32.mrb[79].mxu0  ;;  %6720 = vmatprep.subr.bf16.mxu0 %v14155_v7  ;;  %12560 = vmatprep.subr.bf16.mxu1 %v14188_v46  ;;  %v5020_v34 = vmax.f32 %v12944_v52, 0.0  ;;  %v14164_v46 = vld [vmem:[#allocation12 + $0x22c] ss:$12 sps:$4 sm:$0xff]  }
 0x62f   :  { %v12947_v53 = vadd.f32 %v4668_v61, %v17102_v59  ;;  %6681 = vmatprep.mubr.bf16.mxu0 %v17125_v51  ;;  %7044 = vmatprep.mubr.bf16.mxu1 %v17125_v51  ;;  %v5021_v10 = vmax.f32 %v12945_v44, 0.0  ;;  %v14226_v61 = vld [vmem:[#allocation12 + $0x3c8] ss:$12 sps:$4 sm:$0xff]  }
 0x630   :  { %v5023_v14 = vmax.f32 %v12946_v22, 0.0  ;;  %6682 = vmatmul.mubr.bf16.gmra.mrb[164].mxu0 %v17122_v2  ;;  %7045 = vmatmul.mubr.bf16.gmra.mrb[84].mxu1 %v17122_v2 }
 0x631   :  { %v5024_v58 = vmax.f32 %v12947_v53, 0.0  ;;  %6721 = vmatpush1.bf16.msra.mxu0 %v14153_v43  ;;  %12561 = vmatpush3.bf16.msra.mxu1 %v14189_v26  ;;  %v14162_v43 = vld [vmem:[#allocation12 + $0x228] ss:$12 sps:$4 sm:$0xff]   ;;  %v14204_v26 = vld [vmem:[#allocation12 + $0x230] ss:$12 sps:$4 sm:$0xff]  }
 0x632   :  { %v5059_v16 = vmax.f32 %v5020_v34, %v5023_v14  ;;  %6722 = vmatprep.subr.bf16.mxu0 %v14158_v38  ;;  %12562 = vmatprep.subr.bf16.mxu1 %v14193_v28 }
 0x633   :  { %v5060_v29 = vmax.f32 %v5021_v10, %v5024_v58  ;;  %v4672_v11 = vpop.f32.mrb[80].mxu0 }
 0x634   :  { %v12948_v20 = vadd.f32 %v4672_v11, %v17098_v1  ;;  %v4674_v19 = vpop.f32.mrb[81].mxu0  ;;  %v17135_v35 = vpack.c.bf16 %v5059_v16, %v5056_v63  ;;  %v14172_v11 = vld [vmem:[#allocation12 + $0x25c] ss:$12 sps:$4 sm:$0xff]  }
 0x635   :  { %v12949_v24 = vadd.f32 %v4674_v19, %v17102_v59  ;;  %v4676_v60 = vpop.f32.mrb[82].mxu0  ;;  %6723 = vmatpush1.bf16.msra.mxu0 %v14156_v50  ;;  %12563 = vmatpush3.bf16.msra.mxu1 %v14194_v57  ;;  %v17138_v31 = vpack.c.bf16 %v5060_v29, %v5057_v12  ;;  %v14167_v12 = vld [vmem:[#allocation12 + $0x244] ss:$12 sps:$4 sm:$0xff]   ;;  %v14165_v57 = vld [vmem:[#allocation12 + $0x240] ss:$12 sps:$4 sm:$0xff]  }
 0x636   :  { %v12950_v49 = vadd.f32 %v4676_v60, %v17098_v1  ;;  %v4678_v7 = vpop.f32.mrb[83].mxu0  ;;  %6724 = vmatprep.subr.bf16.mxu0 %v14161_v56  ;;  %12564 = vmatprep.subr.bf16.mxu1 %v14198_v5  ;;  %v5026_v63 = vmax.f32 %v12948_v20, 0.0  ;;  %v14170_v60 = vld [vmem:[#allocation12 + $0x258] ss:$12 sps:$4 sm:$0xff]  }
 0x637   :  { %v12951_v52 = vadd.f32 %v4678_v7, %v17102_v59  ;;  %v5027_v44 = vmax.f32 %v12949_v24, 0.0 }
 0x638   :  { %v5029_v54 = vmax.f32 %v12950_v49, 0.0 }
 0x639   :  { %v5030_v18 = vmax.f32 %v12951_v52, 0.0  ;;  %6725 = vmatpush1.bf16.msra.mxu0 %v14159_v40  ;;  %12565 = vmatpush3.bf16.msra.mxu1 %v14199_v42  ;;  %v14177_v42 = vld [vmem:[#allocation12 + $0x274] ss:$12 sps:$4 sm:$0xff]  }
 0x63a   :  { %v5062_v22 = vmax.f32 %v5026_v63, %v5029_v54  ;;  %6726 = vmatprep.subr.bf16.mxu0 %v14164_v46  ;;  %12566 = vmatprep.subr.bf16.mxu1 %v14203_v32 }
 0x63b   :  { %v5063_v38 = vmax.f32 %v5027_v44, %v5030_v18  ;;  %v4682_v28 = vpop.f32.mrb[84].mxu0  ;;  %v14175_v44 = vld [vmem:[#allocation12 + $0x270] ss:$12 sps:$4 sm:$0xff]  }
 0x63c   :  { %v17142_v53 = vpack.c.bf16 %v5062_v22, %v5059_v16  ;;  %v12952_v34 = vadd.f32 %v4682_v28, %v17098_v1  ;;  %v4684_v14 = vpop.f32.mrb[85].mxu0 }
 0x63d   :  { %v17145_v10 = vpack.c.bf16 %v5063_v38, %v5060_v29  ;;  %v12953_v58 = vadd.f32 %v4684_v14, %v17102_v59  ;;  %v4686_v50 = vpop.f32.mrb[86].mxu0  ;;  %6727 = vmatpush1.bf16.msra.mxu0 %v14162_v43  ;;  %12567 = vmatpush3.bf16.msra.mxu1 %v14204_v26 }
 0x63e   :  { %v12954_v56 = vadd.f32 %v4686_v50, %v17098_v1  ;;  %v4688_v5 = vpop.f32.mrb[87].mxu0  ;;  %6728 = vmatprep.subr.bf16.mxu0 %v14167_v12  ;;  %12592 = vmatprep.subr.bf16.mxu1 %v14226_v61  ;;  %v5032_v29 = vmax.f32 %v12952_v34, 0.0  ;;  %v14182_v12 = vld [vmem:[#allocation12 + $0x28c] ss:$12 sps:$4 sm:$0xff]  }
 0x63f   :  { %v12955_v16 = vadd.f32 %v4688_v5, %v17102_v59  ;;  %6691 = vmatprep.mubr.bf16.mxu0 %v17145_v10  ;;  %7052 = vmatprep.mubr.bf16.mxu1 %v17145_v10  ;;  %v5033_v19 = vmax.f32 %v12953_v58, 0.0 }
 0x640   :  { %v5035_v20 = vmax.f32 %v12954_v56, 0.0  ;;  %6692 = vmatmul.mubr.bf16.gmra.mrb[168].mxu0 %v17142_v53  ;;  %7053 = vmatmul.mubr.bf16.gmra.mrb[88].mxu1 %v17142_v53 }
 0x641   :  { %v5036_v24 = vmax.f32 %v12955_v16, 0.0  ;;  %6729 = vmatpush1.bf16.msra.mxu0 %v14165_v57  ;;  %v14187_v57 = vld [vmem:[#allocation12 + $0x2a4] ss:$12 sps:$4 sm:$0xff]  }
 0x642   :  { %v5065_v40 = vmax.f32 %v5032_v29, %v5035_v20  ;;  %6730 = vmatprep.subr.bf16.mxu0 %v14172_v11 }
 0x643   :  { %v5066_v49 = vmax.f32 %v5033_v19, %v5036_v24  ;;  %v4692_v7 = vpop.f32.mrb[88].mxu0 }
 0x644   :  { %v12956_v46 = vadd.f32 %v4692_v7, %v17098_v1  ;;  %v4694_v32 = vpop.f32.mrb[89].mxu0  ;;  %v17155_v52 = vpack.c.bf16 %v5065_v40, %v5062_v22  ;;  %v14180_v22 = vld [vmem:[#allocation12 + $0x288] ss:$12 sps:$4 sm:$0xff]  }
 0x645   :  { %v12957_v63 = vadd.f32 %v4694_v32, %v17102_v59  ;;  %v4696_v54 = vpop.f32.mrb[90].mxu0  ;;  %6731 = vmatpush1.bf16.msra.mxu0 %v14170_v60  ;;  %v17158_v18 = vpack.c.bf16 %v5066_v49, %v5063_v38 }
 0x646   :  { %v12958_v43 = vadd.f32 %v4696_v54, %v17098_v1  ;;  %v4698_v26 = vpop.f32.mrb[91].mxu0  ;;  %6732 = vmatprep.subr.bf16.mxu0 %v14177_v42  ;;  %v5038_v28 = vmax.f32 %v12956_v46, 0.0  ;;  %v14185_v42 = vld [vmem:[#allocation12 + $0x2a0] ss:$12 sps:$4 sm:$0xff]  }
 0x647   :  { %v12959_v61 = vadd.f32 %v4698_v26, %v17102_v59  ;;  %v5039_v14 = vmax.f32 %v12957_v63, 0.0 }
 0x648   :  { %v5041_v34 = vmax.f32 %v12958_v43, 0.0  ;;  %v14197_v43 = vld [vmem:[#allocation12 + $0x2d4] ss:$12 sps:$4 sm:$0xff]  }
 0x649   :  { %v5042_v58 = vmax.f32 %v12959_v61, 0.0  ;;  %6733 = vmatpush1.bf16.msra.mxu0 %v14175_v44 }
 0x64a   :  { %v5068_v50 = vmax.f32 %v5038_v28, %v5041_v34  ;;  %6734 = vmatprep.subr.bf16.mxu0 %v14182_v12 }
 0x64b   :  { %v5069_v56 = vmax.f32 %v5039_v14, %v5042_v58  ;;  %v4702_v5 = vpop.f32.mrb[92].mxu0  ;;  %v14195_v14 = vld [vmem:[#allocation12 + $0x2d0] ss:$12 sps:$4 sm:$0xff]  }
 0x64c   :  { %v17162_v38 = vpack.c.bf16 %v5068_v50, %v5065_v40  ;;  %v12960_v11 = vadd.f32 %v4702_v5, %v17098_v1  ;;  %v4704_v16 = vpop.f32.mrb[93].mxu0  ;;  %v14192_v40 = vld [vmem:[#allocation12 + $0x2bc] ss:$12 sps:$4 sm:$0xff]  }
 0x64d   :  { %v17165_v29 = vpack.c.bf16 %v5069_v56, %v5066_v49  ;;  %v12961_v20 = vadd.f32 %v4704_v16, %v17102_v59  ;;  %v4706_v19 = vpop.f32.mrb[94].mxu0  ;;  %6735 = vmatpush1.bf16.msra.mxu0 %v14180_v22  ;;  %v14202_v22 = vld [vmem:[#allocation12 + $0x2ec] ss:$12 sps:$4 sm:$0xff]  }
 0x64e   :  { %17736 = vst [vmem:[#allocation28_spill] sm:$0xff] %v17162_v38  ;;  %v12962_v24 = vadd.f32 %v4706_v19, %v17098_v1  ;;  %v4708_v60 = vpop.f32.mrb[95].mxu0  ;;  %6736 = vmatprep.subr.bf16.mxu0 %v14187_v57  ;;  %v5044_v46 = vmax.f32 %v12960_v11, 0.0  ;;  %v14200_v57 = vld [vmem:[#allocation12 + $0x2e8] ss:$12 sps:$4 sm:$0xff]  }
 0x64f   :  { %17737 = vst [vmem:[#allocation29_spill] sm:$0xff] %v17165_v29  ;;  %v12963_v7 = vadd.f32 %v4708_v60, %v17102_v59  ;;  %6701 = vmatprep.mubr.bf16.mxu0 %v17165_v29  ;;  %7060 = vmatprep.mubr.bf16.mxu1 %v17165_v29  ;;  %v5045_v49 = vmax.f32 %v12961_v20, 0.0  ;;  %v14190_v59 = vld [vmem:[#allocation12 + $0x2b8] ss:$12 sps:$4 sm:$0xff]  }
 0x650   :  { %v5047_v32 = vmax.f32 %v12962_v24, 0.0  ;;  %6702 = vmatmul.mubr.bf16.gmra.mrb[172].mxu0 %v17162_v38  ;;  %7061 = vmatmul.mubr.bf16.gmra.mrb[92].mxu1 %v17162_v38  ;;  %v14207_v11 = vld [vmem:[#allocation12 + $0x304] ss:$12 sps:$4 sm:$0xff]  }
 0x651   :  { %v5048_v63 = vmax.f32 %v12963_v7, 0.0  ;;  %6744 = vmatprep.mubr.bf16.mxu0 %v17115_v0  ;;  %7101 = vmatprep.mubr.bf16.mxu1 %v17115_v0 }
 0x652   :  { %v17176_v1 = vmax.f32 %v5044_v46, %v5047_v32  ;;  %6737 = vmatpush1.bf16.msra.mxu0 %v14185_v42 }
 0x653   :  { %v17178_v54 = vmax.f32 %v5045_v49, %v5048_v63  ;;  %v12388_v44 = vpop.f32.mrb[96].mxu0  ;;  %6738 = vmatprep.subr.bf16.mxu0 %v14192_v40 }
 0x654   :  { %17738 = vst [vmem:[#allocation30_spill] sm:$0xff] %v17176_v1  ;;  %v12389_v26 = vpop.f32.mrb[97].mxu0  ;;  %v17181_v12 = vpack.c.bf16 %v17176_v1, %v5068_v50 }
 0x655   :  { %17739 = vst [vmem:[#allocation31_spill] sm:$0xff] %v17178_v54  ;;  %v17183_v61 = vadd.f32 %v12389_v26, %v12388_v44  ;;  %v12391_v28 = vpop.f32.mrb[98].mxu0  ;;  %v17186_v34 = vpack.c.bf16 %v17178_v54, %v5069_v56 }
 0x656   :  { %v12392_v0 = vpop.f32.mrb[99].mxu0  ;;  %6739 = vmatpush1.bf16.msra.mxu0 %v14190_v59 }
 0x657   :  { %v12393_v58 = vadd.f32 %v12392_v0, %v12391_v28  ;;  %6740 = vmatprep.subr.bf16.mxu0 %v14197_v43 }
 0x65a   :  { %6741 = vmatpush1.bf16.msra.mxu0 %v14195_v14 }
 0x65b   :  { %v12394_v5 = vpop.f32.mrb[100].mxu0  ;;  %6742 = vmatprep.subr.bf16.mxu0 %v14202_v22 }
 0x65c   :  { %v12395_v16 = vpop.f32.mrb[101].mxu0 }
 0x65d   :  { %v12396_v50 = vadd.f32 %v12395_v16, %v12394_v5  ;;  %v12397_v20 = vpop.f32.mrb[102].mxu0 }
 0x65e   :  { %v12398_v19 = vpop.f32.mrb[103].mxu0  ;;  %6743 = vmatpush1.bf16.msra.mxu0 %v14200_v57 }
 0x65f   :  { %v12399_v24 = vadd.f32 %v12398_v19, %v12397_v20  ;;  %6785 = vmatprep.subr.bf16.mxu0 %v14207_v11 }
 0x663   :  { %v12400_v56 = vpop.f32.mrb[104].mxu0 }
 0x664   :  { %v12401_v60 = vpop.f32.mrb[105].mxu0 }
 0x665   :  { %v17188_v42 = vadd.f32 %v12401_v60, %v12400_v56  ;;  %v12403_v7 = vpop.f32.mrb[106].mxu0 }
 0x666   :  { %v12404_v40 = vpop.f32.mrb[107].mxu0 }
 0x667   :  { %v17190_v46 = vadd.f32 %v12404_v40, %v12403_v7 }
 0x66b   :  { %v12406_v32 = vpop.f32.mrb[108].mxu0 }
 0x66c   :  { %v12407_v49 = vpop.f32.mrb[109].mxu0 }
 0x66d   :  { %v17192_v63 = vadd.f32 %v12407_v49, %v12406_v32  ;;  %v12409_v59 = vpop.f32.mrb[110].mxu0 }
 0x66e   :  { %v12410_v44 = vpop.f32.mrb[111].mxu0 }
 0x66f   :  { %v17194_v43 = vadd.f32 %v12410_v44, %v12409_v59  ;;  %v17209_v44 = vsub.s32 2, %v16620_v47 }
 0x671   :  { %17740 = vst [vmem:[#allocation32_spill] sm:$0xff] %v17209_v44 }
 0x673   :  { %v12412_v26 = vpop.f32.mrb[112].mxu0 }
 0x674   :  { %v12413_v28 = vpop.f32.mrb[113].mxu0 }
 0x675   :  { %v17196_v0 = vadd.f32 %v12413_v28, %v12412_v26  ;;  %v12415_v14 = vpop.f32.mrb[114].mxu0 }
 0x676   :  { %v12416_v22 = vpop.f32.mrb[115].mxu0 }
 0x677   :  { %v17198_v57 = vadd.f32 %v12416_v22, %v12415_v14  ;;  %v17213_v14 = vrot.slane %v17094_v37, %v17209_v44 }
 0x679   :  { %v4749_v37 = vadd.f32 %v12393_v58, %v17213_v14  ;;  %v4754_v44 = vadd.f32 %v12396_v50, %v17213_v14 }
 0x67b   :  { %v12418_v5 = vpop.f32.mrb[116].mxu0 }
 0x67c   :  { %v12419_v11 = vpop.f32.mrb[117].mxu0 }
 0x67d   :  { %v17200_v16 = vadd.f32 %v12419_v11, %v12418_v5  ;;  %v12421_v20 = vpop.f32.mrb[118].mxu0 }
 0x67e   :  { %v12422_v19 = vpop.f32.mrb[119].mxu0 }
 0x67f   :  { %v17202_v56 = vadd.f32 %v12422_v19, %v12421_v20 }
 0x683   :  { %v12424_v60 = vpop.f32.mrb[120].mxu0 }
 0x684   :  { %v12425_v7 = vpop.f32.mrb[121].mxu0 }
 0x685   :  { %v17204_v40 = vadd.f32 %v12425_v7, %v12424_v60  ;;  %v12427_v32 = vpop.f32.mrb[122].mxu0 }
 0x686   :  { %v12428_v49 = vpop.f32.mrb[123].mxu0 }
 0x687   :  { %v17206_v59 = vadd.f32 %v12428_v49, %v12427_v32  ;;  %v4746_v49 = vadd.f32 %v17183_v61, %v17213_v14 }
 0x68b   :  { %v12430_v26 = vpop.f32.mrb[124].mxu0 }
 0x68c   :  { %v12431_v28 = vpop.f32.mrb[125].mxu0 }
 0x68d   :  { %v12432_v22 = vadd.f32 %v12431_v28, %v12430_v26  ;;  %v12433_v5 = vpop.f32.mrb[126].mxu0 }
 0x68e   :  { %v12434_v11 = vpop.f32.mrb[127].mxu0 }
 0x68f   :  { %v17216_v20 = vadd.f32 %v12432_v22, %v17213_v14  ;;  %v12435_v19 = vadd.f32 %v12434_v11, %v12433_v5 }
 0x691   :  { %v17219_v60 = vadd.f32 %v12435_v19, %v17213_v14 }
 0x693   :  { %v12452_v7 = vpop.f32.mrb[128].mxu0 }
 0x694   :  { %v12453_v32 = vpop.f32.mrb[129].mxu0 }
 0x695   :  { %v12454_v47 = vadd.f32 %v12453_v32, %v12452_v7  ;;  %v12455_v6 = vpop.f32.mrb[130].mxu0  ;;  %v4757_v32 = vadd.f32 %v12399_v24, %v17213_v14 }
 0x696   :  { %v12456_v9 = vpop.f32.mrb[131].mxu0 }
 0x697   :  { %v4843_v26 = vadd.f32 %v12454_v47, %v4746_v49  ;;  %v12457_v28 = vadd.f32 %v12456_v9, %v12455_v6  ;;  %v14205_v9 = vld [vmem:[#allocation12 + $0x300] ss:$12 sps:$4 sm:$0xff]   ;;  %v14210_v49 = vld [vmem:[#allocation12 + $0x31c] ss:$12 sps:$4 sm:$0xff]  }
 0x699   :  { %v4940_v13 = vadd.f32 %v16951_v62, %v4843_v26  ;;  %v4846_v22 = vadd.f32 %v12457_v28, %v4749_v37  ;;  %v14227_v37 = vld [vmem:[#allocation12 + $0x308] ss:$12 sps:$4 sm:$0xff]   ;;  %v14231_v26 = vld [vmem:[#allocation12 + $0x3e0] ss:$12 sps:$4 sm:$0xff]  }
 0x69b   :  { %v4943_v5 = vadd.f32 %v16957_v15, %v4846_v22  ;;  %v12458_v11 = vpop.f32.mrb[132].mxu0  ;;  %v5004_v1 = vmax.f32 %v4940_v13, 0.0 }
 0x69c   :  { %v12459_v19 = vpop.f32.mrb[133].mxu0 }
 0x69d   :  { %v5007_v38 = vmax.f32 %v4943_v5, 0.0  ;;  %v12460_v54 = vadd.f32 %v12459_v19, %v12458_v11  ;;  %v12461_v61 = vpop.f32.mrb[134].mxu0  ;;  %v14232_v5 = vld [vmem:[#allocation12 + $0x320] ss:$12 sps:$4 sm:$0xff]   ;;  %v4765_v11 = vadd.f32 %v17190_v46, %v17213_v14  ;;  %v14241_v46 = vld [vmem:[#allocation12 + $0x410] ss:$12 sps:$4 sm:$0xff]  }
 0x69e   :  { %v12462_v7 = vpop.f32.mrb[135].mxu0 }
 0x69f   :  { %v5052_v29 = vmax.f32 %v5004_v1, %v5007_v38  ;;  %v4851_v58 = vadd.f32 %v12460_v54, %v4754_v44  ;;  %v12463_v47 = vadd.f32 %v12462_v7, %v12461_v61  ;;  %v14208_v38 = vld [vmem:[#allocation12 + $0x318] ss:$12 sps:$4 sm:$0xff]   ;;  %v4762_v1 = vadd.f32 %v17188_v42, %v17213_v14  ;;  %v14211_v42 = vld [vmem:[#allocation12 + $0x330] ss:$12 sps:$4 sm:$0xff]  }
 0x6a1   :  { %v5148_v6 = vpack.c.bf16 %v5052_v29, %v17734_v45  ;;  %v4948_v62 = vadd.f32 %v16949_v39, %v4851_v58  ;;  %v4854_v15 = vadd.f32 %v12463_v47, %v4757_v32  ;;  %v14236_v32 = vld [vmem:[#allocation12 + $0x3f8] ss:$12 sps:$4 sm:$0xff]  }
 0x6a3   :  { %v4951_v50 = vadd.f32 %v16953_v41, %v4854_v15  ;;  %v12464_v13 = vpop.f32.mrb[136].mxu0  ;;  %6745 = vmatmul.mubr.bf16.vlgmr.msra.gmra.mrb[160].mxu0 %v5148_v6  ;;  %7102 = vmatmul.mubr.bf16.vlgmr.msra.gmra.mrb[96].mxu1 %v5148_v6  ;;  %v5010_v54 = vmax.f32 %v4948_v62, 0.0  ;;  %v14213_v41 = vld [vmem:[#allocation12 + $0x334] ss:$12 sps:$4 sm:$0xff]   ;;  %v14237_v6 = vld [vmem:[#allocation12 + $0x338] ss:$12 sps:$4 sm:$0xff]  }
 0x6a4   :  { %6786 = vmatpush1.bf16.msra.mxu0 %v14205_v9  ;;  %v12465_v28 = vpop.f32.mrb[137].mxu0  ;;  %6754 = vmatprep.mubr.bf16.mxu0 %v17135_v35 }
 0x6a5   :  { %v5013_v24 = vmax.f32 %v4951_v50, 0.0  ;;  %v12466_v39 = vadd.f32 %v12465_v28, %v12464_v13  ;;  %7109 = vmatprep.mubr.bf16.mxu1 %v17135_v35  ;;  %v12467_v44 = vpop.f32.mrb[138].mxu0  ;;  %6787 = vmatprep.subr.bf16.mxu0 %v14210_v49  ;;  %v14216_v35 = vld [vmem:[#allocation12 + $0x34c] ss:$12 sps:$4 sm:$0xff]   ;;  %v4770_v50 = vadd.f32 %v17192_v63, %v17213_v14 }
 0x6a6   :  { %v12468_v22 = vpop.f32.mrb[139].mxu0  ;;  %12593 = vmatpush3.bf16.msra.mxu1 %v14227_v37  ;;  %v14214_v37 = vld [vmem:[#allocation12 + $0x348] ss:$12 sps:$4 sm:$0xff]  }
 0x6a7   :  { %v5055_v19 = vmax.f32 %v5010_v54, %v5013_v24  ;;  %v4859_v61 = vadd.f32 %v12466_v39, %v4762_v1  ;;  %v12469_v7 = vadd.f32 %v12468_v22, %v12467_v44  ;;  %12594 = vmatprep.subr.bf16.mxu1 %v14231_v26  ;;  %v14242_v1 = vld [vmem:[#allocation12 + $0x350] ss:$12 sps:$4 sm:$0xff]   ;;  %v14217_v44 = vld [vmem:[#allocation12 + $0x360] ss:$12 sps:$4 sm:$0xff]  }
 0x6a8   :  { %6788 = vmatpush1.bf16.msra.mxu0 %v14208_v38 }
 0x6a9   :  { %v4956_v58 = vadd.f32 %v17003_v3, %v4859_v61  ;;  %v4862_v47 = vadd.f32 %v12469_v7, %v4765_v11  ;;  %6789 = vmatprep.subr.bf16.mxu0 %v14213_v41  ;;  %v17238_v9 = vpack.c.bf16 %v5055_v19, %v5052_v29  ;;  %v14219_v29 = vld [vmem:[#allocation12 + $0x364] ss:$12 sps:$4 sm:$0xff]   ;;  %v14246_v11 = vld [vmem:[#allocation12 + $0x428] ss:$12 sps:$4 sm:$0xff]  }
 0x6aa   :  { %12595 = vmatpush3.bf16.msra.mxu1 %v14232_v5  ;;  %v14222_v5 = vld [vmem:[#allocation12 + $0x37c] ss:$12 sps:$4 sm:$0xff]  }
 0x6ab   :  { %v4959_v62 = vadd.f32 %v17007_v25, %v4862_v47  ;;  %v12470_v15 = vpop.f32.mrb[140].mxu0  ;;  %12596 = vmatprep.subr.bf16.mxu1 %v14236_v32  ;;  %v5016_v13 = vmax.f32 %v4956_v58, 0.0  ;;  %v4773_v25 = vadd.f32 %v17194_v43, %v17213_v14  ;;  %v14247_v43 = vld [vmem:[#allocation12 + $0x368] ss:$12 sps:$4 sm:$0xff]  }
 0x6ac   :  { %6790 = vmatpush1.bf16.msra.mxu0 %v14211_v42  ;;  %v12471_v49 = vpop.f32.mrb[141].mxu0  ;;  %v14251_v42 = vld [vmem:[#allocation12 + $0x440] ss:$12 sps:$4 sm:$0xff]  }
 0x6ad   :  { %v5019_v3 = vmax.f32 %v4959_v62, 0.0  ;;  %v12472_v26 = vadd.f32 %v12471_v49, %v12470_v15  ;;  %v12473_v28 = vpop.f32.mrb[142].mxu0  ;;  %6791 = vmatprep.subr.bf16.mxu0 %v14216_v35  ;;  %v4781_v15 = vadd.f32 %v17198_v57, %v17213_v14  ;;  %v14257_v57 = vld [vmem:[#allocation12 + $0x398] ss:$12 sps:$4 sm:$0xff]  }
 0x6ae   :  { %v12474_v38 = vpop.f32.mrb[143].mxu0  ;;  %12597 = vmatpush3.bf16.msra.mxu1 %v14237_v6  ;;  %v14225_v6 = vld [vmem:[#allocation12 + $0x394] ss:$12 sps:$4 sm:$0xff]  }
 0x6af   :  { %v5058_v54 = vmax.f32 %v5016_v13, %v5019_v3  ;;  %v4867_v24 = vadd.f32 %v12472_v26, %v4770_v50  ;;  %v12475_v39 = vadd.f32 %v12474_v38, %v12473_v28  ;;  %12598 = vmatprep.subr.bf16.mxu1 %v14241_v46  ;;  %v14252_v50 = vld [vmem:[#allocation12 + $0x380] ss:$12 sps:$4 sm:$0xff]   ;;  %v14256_v13 = vld [vmem:[#allocation12 + $0x458] ss:$12 sps:$4 sm:$0xff]  }
 0x6b0   :  { %6792 = vmatpush1.bf16.msra.mxu0 %v14214_v37  ;;  %v14230_v26 = vld [vmem:[#allocation12 + $0x3ac] ss:$12 sps:$4 sm:$0xff]  }
 0x6b1   :  { %v4964_v63 = vadd.f32 %v17001_v27, %v4867_v24  ;;  %v4870_v41 = vadd.f32 %v12475_v39, %v4773_v25  ;;  %6793 = vmatprep.subr.bf16.mxu0 %v14219_v29  ;;  %v17246_v22 = vpack.c.bf16 %v5058_v54, %v5055_v19  ;;  %v14220_v27 = vld [vmem:[#allocation12 + $0x378] ss:$12 sps:$4 sm:$0xff]   ;;  %v4778_v19 = vadd.f32 %v17196_v0, %v17213_v14  ;;  %v14223_v0 = vld [vmem:[#allocation12 + $0x390] ss:$12 sps:$4 sm:$0xff]   ;;  %v14228_v25 = vld [vmem:[#allocation12 + $0x3a8] ss:$12 sps:$4 sm:$0xff]  }
 0x6b2   :  { %12599 = vmatpush3.bf16.msra.mxu1 %v14242_v1  ;;  %v14261_v24 = vld [vmem:[#allocation12 + $0x470] ss:$12 sps:$4 sm:$0xff]   ;;  %v4786_v39 = vadd.f32 %v17200_v16, %v17213_v14 }
 0x6b3   :  { %v4967_v61 = vadd.f32 %v17005_v21, %v4870_v41  ;;  %v12476_v7 = vpop.f32.mrb[144].mxu0  ;;  %6755 = vmatmul.mubr.bf16.gmra.mrb[164].mxu0 %v17246_v22  ;;  %7110 = vmatmul.mubr.bf16.gmra.mrb[100].mxu1 %v17246_v22  ;;  %v5022_v58 = vmax.f32 %v4964_v63, 0.0 }
 0x6b4   :  { %6794 = vmatpush1.bf16.msra.mxu0 %v14217_v44  ;;  %v12477_v32 = vpop.f32.mrb[145].mxu0  ;;  %6764 = vmatprep.mubr.bf16.mxu0 %v17155_v52 }
 0x6b5   :  { %v5025_v47 = vmax.f32 %v4967_v61, 0.0  ;;  %v12478_v35 = vadd.f32 %v12477_v32, %v12476_v7  ;;  %7117 = vmatprep.mubr.bf16.mxu1 %v17155_v52  ;;  %v12479_v21 = vpop.f32.mrb[146].mxu0  ;;  %6795 = vmatprep.subr.bf16.mxu0 %v14222_v5 }
 0x6b6   :  { %v12480_v62 = vpop.f32.mrb[147].mxu0  ;;  %12600 = vmatprep.subr.bf16.mxu1 %v14246_v11 }
 0x6b7   :  { %v5061_v46 = vmax.f32 %v5022_v58, %v5025_v47  ;;  %v4875_v49 = vadd.f32 %v12478_v35, %v4778_v19  ;;  %v12481_v37 = vadd.f32 %v12480_v62, %v12479_v21  ;;  %12601 = vmatpush3.bf16.msra.mxu1 %v14247_v43  ;;  %v14233_v43 = vld [vmem:[#allocation12 + $0x3c0] ss:$12 sps:$4 sm:$0xff]   ;;  %v14262_v19 = vld [vmem:[#allocation12 + $0x3b0] ss:$12 sps:$4 sm:$0xff]   ;;  %v14238_v21 = vld [vmem:[#allocation12 + $0x3d8] ss:$12 sps:$4 sm:$0xff]  }
 0x6b8   :  { %6796 = vmatpush1.bf16.msra.mxu0 %v14220_v27  ;;  %12602 = vmatprep.subr.bf16.mxu1 %v14251_v42  ;;  %v14240_v42 = vld [vmem:[#allocation12 + $0x3dc] ss:$12 sps:$4 sm:$0xff]  }
 0x6b9   :  { %v4972_v3 = vadd.f32 %v17023_v23, %v4875_v49  ;;  %v4878_v52 = vadd.f32 %v12481_v37, %v4781_v15  ;;  %6797 = vmatprep.subr.bf16.mxu0 %v14225_v6  ;;  %v17258_v28 = vpack.c.bf16 %v5061_v46, %v5058_v54  ;;  %v14235_v54 = vld [vmem:[#allocation12 + $0x3c4] ss:$12 sps:$4 sm:$0xff]   ;;  %v4797_v37 = vadd.f32 %v17206_v59, %v17213_v14 }
 0x6bb   :  { %v4975_v29 = vadd.f32 %v17027_v17, %v4878_v52  ;;  %v12482_v38 = vpop.f32.mrb[148].mxu0  ;;  %12603 = vmatpush3.bf16.msra.mxu1 %v14252_v50  ;;  %v5028_v44 = vmax.f32 %v4972_v3, 0.0  ;;  %v4789_v17 = vadd.f32 %v17202_v56, %v17213_v14  ;;  %v14266_v56 = vld [vmem:[#allocation12 + $0x548] ss:$12 sps:$4 sm:$0xff]   ;;  %v14243_v3 = vld [vmem:[#allocation12 + $0x3f0] ss:$12 sps:$4 sm:$0xff]  }
 0x6bc   :  { %6798 = vmatpush1.bf16.msra.mxu0 %v14223_v0  ;;  %v12483_v1 = vpop.f32.mrb[149].mxu0  ;;  %12604 = vmatprep.subr.bf16.mxu1 %v14256_v13 }
 0x6bd   :  { %v5031_v23 = vmax.f32 %v4975_v29, 0.0  ;;  %v12484_v63 = vadd.f32 %v12483_v1, %v12482_v38  ;;  %v12485_v41 = vpop.f32.mrb[150].mxu0  ;;  %6799 = vmatprep.subr.bf16.mxu0 %v14230_v26  ;;  %v14250_v26 = vld [vmem:[#allocation12 + $0x40c] ss:$12 sps:$4 sm:$0xff]   ;;  %v14248_v1 = vld [vmem:[#allocation12 + $0x408] ss:$12 sps:$4 sm:$0xff]  }
 0x6be   :  { %v12486_v5 = vpop.f32.mrb[151].mxu0 }
 0x6bf   :  { %v5064_v11 = vmax.f32 %v5028_v44, %v5031_v23  ;;  %v4883_v61 = vadd.f32 %v12484_v63, %v4786_v39  ;;  %v12487_v7 = vadd.f32 %v12486_v5, %v12485_v41  ;;  %12605 = vmatpush3.bf16.msra.mxu1 %v14257_v57  ;;  %v14255_v39 = vld [vmem:[#allocation12 + $0x424] ss:$12 sps:$4 sm:$0xff]   ;;  %v14253_v41 = vld [vmem:[#allocation12 + $0x420] ss:$12 sps:$4 sm:$0xff]  }
 0x6c0   :  { %6800 = vmatpush1.bf16.msra.mxu0 %v14228_v25  ;;  %12606 = vmatprep.subr.bf16.mxu1 %v14261_v24 }
 0x6c1   :  { %v4980_v32 = vadd.f32 %v17021_v48, %v4883_v61  ;;  %v4886_v16 = vadd.f32 %v12487_v7, %v4789_v17  ;;  %6801 = vmatprep.subr.bf16.mxu0 %v14235_v54  ;;  %v17266_v27 = vpack.c.bf16 %v5064_v11, %v5061_v46  ;;  %v4794_v48 = vadd.f32 %v17204_v40, %v17213_v14  ;;  %v14245_v46 = vld [vmem:[#allocation12 + $0x3f4] ss:$12 sps:$4 sm:$0xff]   ;;  %v14260_v17 = vld [vmem:[#allocation12 + $0x43c] ss:$12 sps:$4 sm:$0xff]  }
 0x6c3   :  { %v4983_v58 = vadd.f32 %v17025_v36, %v4886_v16  ;;  %v12488_v47 = vpop.f32.mrb[152].mxu0  ;;  %6765 = vmatmul.mubr.bf16.gmra.mrb[168].mxu0 %v17266_v27  ;;  %7118 = vmatmul.mubr.bf16.gmra.mrb[104].mxu1 %v17266_v27  ;;  %v5034_v6 = vmax.f32 %v4980_v32, 0.0  ;;  %v14270_v32 = vld [vmem:[#allocation12 + $0x46c] ss:$12 sps:$4 sm:$0xff]  }
 0x6c4   :  { %6802 = vmatpush1.bf16.msra.mxu0 %v14233_v43  ;;  %v12489_v35 = vpop.f32.mrb[153].mxu0  ;;  %6774 = vmatprep.mubr.bf16.mxu0 %v17181_v12  ;;  %v14263_v43 = vld [vmem:[#allocation12 + $0x450] ss:$12 sps:$4 sm:$0xff]  }
 0x6c5   :  { %v5037_v62 = vmax.f32 %v4983_v58, 0.0  ;;  %v12490_v15 = vadd.f32 %v12489_v35, %v12488_v47  ;;  %7125 = vmatprep.mubr.bf16.mxu1 %v17181_v12  ;;  %v12491_v36 = vpop.f32.mrb[154].mxu0  ;;  %6803 = vmatprep.subr.bf16.mxu0 %v14240_v42  ;;  %v14271_v42 = vld [vmem:[#allocation12 + $0x560] ss:$12 sps:$4 sm:$0xff]   ;;  %v14275_v58 = vld [vmem:[#allocation12 + $0x484] ss:$12 sps:$4 sm:$0xff]  }
 0x6c6   :  { %v12492_v49 = vpop.f32.mrb[155].mxu0  ;;  %12607 = vmatpush3.bf16.msra.mxu1 %v14262_v19  ;;  %v14268_v19 = vld [vmem:[#allocation12 + $0x468] ss:$12 sps:$4 sm:$0xff]   ;;  %v14276_v47 = vld [vmem:[#allocation12 + $0x578] ss:$12 sps:$4 sm:$0xff]  }
 0x6c7   :  { %v5067_v50 = vmax.f32 %v5034_v6, %v5037_v62  ;;  %v4891_v0 = vadd.f32 %v12490_v15, %v4794_v48  ;;  %v12493_v13 = vadd.f32 %v12492_v49, %v12491_v36  ;;  %12632 = vmatprep.subr.bf16.mxu1 %v14266_v56  ;;  %v14273_v56 = vld [vmem:[#allocation12 + $0x480] ss:$12 sps:$4 sm:$0xff]   ;;  %v14277_v35 = vld [vmem:[#allocation12 + $0x4b8] ss:$12 sps:$4 sm:$0xff]   ;;  %v14281_v48 = vld [vmem:[#allocation12 + $0x590] ss:$12 sps:$4 sm:$0xff]  }
 0x6c8   :  { %6804 = vmatpush1.bf16.msra.mxu0 %v14238_v21  ;;  %v14280_v21 = vld [vmem:[#allocation12 + $0x49c] ss:$12 sps:$4 sm:$0xff]   ;;  %v14278_v6 = vld [vmem:[#allocation12 + $0x498] ss:$12 sps:$4 sm:$0xff]   ;;  %v14285_v15 = vld [vmem:[#allocation12 + $0x4b4] ss:$12 sps:$4 sm:$0xff]  }
 0x6c9   :  { %v4988_v40 = vadd.f32 %v17040_v30, %v4891_v0  ;;  %v4894_v52 = vadd.f32 %v12493_v13, %v4797_v37  ;;  %6805 = vmatprep.subr.bf16.mxu0 %v14245_v46  ;;  %v17278_v12 = vpack.c.bf16 %v5067_v50, %v5064_v11  ;;  %v14282_v62 = vld [vmem:[#allocation12 + $0x4d0] ss:$12 sps:$4 sm:$0xff]   ;;  %v14286_v36 = vld [vmem:[#allocation12 + $0x5a8] ss:$12 sps:$4 sm:$0xff]   ;;  %v14291_v37 = vld [vmem:[#allocation12 + $0x5c0] ss:$12 sps:$4 sm:$0xff]  }
 0x6ca   :  { %v14283_v46 = vld [vmem:[#allocation12 + $0x4b0] ss:$12 sps:$4 sm:$0xff]   ;;  %v14287_v49 = vld [vmem:[#allocation12 + $0x4e8] ss:$12 sps:$4 sm:$0xff]   ;;  %v14296_v13 = vld [vmem:[#allocation12 + $0x5d8] ss:$12 sps:$4 sm:$0xff]  }
 0x6cb   :  { %v4991_v29 = vadd.f32 %v17044_v33, %v4894_v52  ;;  %v12494_v38 = vpop.f32.mrb[156].mxu0  ;;  %v5040_v59 = vmax.f32 %v4988_v40, 0.0  ;;  %v14295_v0 = vld [vmem:[#allocation12 + $0x4e4] ss:$12 sps:$4 sm:$0xff]  }
 0x6cc   :  { %6806 = vmatpush1.bf16.msra.mxu0 %v14243_v3  ;;  %v12495_v57 = vpop.f32.mrb[157].mxu0  ;;  %v14293_v3 = vld [vmem:[#allocation12 + $0x4e0] ss:$12 sps:$4 sm:$0xff]   ;;  %v14297_v40 = vld [vmem:[#allocation12 + $0x518] ss:$12 sps:$4 sm:$0xff]  }
 0x6cd   :  { %v5043_v14 = vmax.f32 %v4991_v29, 0.0  ;;  %v12496_v25 = vadd.f32 %v12495_v57, %v12494_v38  ;;  %v12497_v24 = vpop.f32.mrb[158].mxu0  ;;  %6807 = vmatprep.subr.bf16.mxu0 %v14250_v26  ;;  %v14301_v52 = vld [vmem:[#allocation12 + $0x5f0] ss:$12 sps:$4 sm:$0xff]   ;;  %v14298_v29 = vld [vmem:[#allocation12 + $0x4f8] ss:$12 sps:$4 sm:$0xff]  }
 0x6ce   :  { %v12498_v44 = vpop.f32.mrb[159].mxu0 }
 0x6cf   :  { %v5070_v23 = vmax.f32 %v5040_v59, %v5043_v14  ;;  %v4899_v30 = vadd.f32 %v12496_v25, %v17216_v20  ;;  %v12499_v63 = vadd.f32 %v12498_v44, %v12497_v24  ;;  %v14258_v20 = vld [vmem:[#allocation12 + $0x438] ss:$12 sps:$4 sm:$0xff]   ;;  %v14305_v59 = vld [vmem:[#allocation12 + $0x514] ss:$12 sps:$4 sm:$0xff]   ;;  %v14303_v24 = vld [vmem:[#allocation12 + $0x510] ss:$12 sps:$4 sm:$0xff]  }
 0x6d0   :  { %6808 = vmatpush1.bf16.msra.mxu0 %v14248_v1  ;;  %v14302_v1 = vld [vmem:[#allocation12 + $0x530] ss:$12 sps:$4 sm:$0xff]   ;;  %v14306_v25 = vld [vmem:[#allocation12 + $0x608] ss:$12 sps:$4 sm:$0xff]   ;;  %v14310_v44 = vld [vmem:[#allocation12 + $0x620] ss:$12 sps:$4 sm:$0xff]  }
 0x6d1   :  { %v4996_v54 = vadd.f32 %v17038_v4, %v4899_v30  ;;  %v4902_v33 = vadd.f32 %v12499_v63, %v17219_v60  ;;  %6809 = vmatprep.subr.bf16.mxu0 %v14255_v39  ;;  %v17284_v5 = vpack.c.bf16 %v5070_v23, %v5067_v50  ;;  %v14265_v4 = vld [vmem:[#allocation12 + $0x454] ss:$12 sps:$4 sm:$0xff]   ;;  %v14309_v39 = vld [vmem:[#allocation12 + $0x52c] ss:$12 sps:$4 sm:$0xff]   ;;  %v14313_v30 = vld [vmem:[#allocation12 + $0x544] ss:$12 sps:$4 sm:$0xff]  }
 0x6d2   :  { %v14292_v50 = vld [vmem:[#allocation12 + $0x500] ss:$12 sps:$4 sm:$0xff]   ;;  %v14314_v63 = vld [vmem:[#allocation12 + $0x638] ss:$12 sps:$4 sm:$0xff]  }
 0x6d3   :  { %v4999_v11 = vadd.f32 %v17042_v8, %v4902_v33  ;;  %6775 = vmatmul.mubr.bf16.gmra.mrb[172].mxu0 %v17284_v5  ;;  %7126 = vmatmul.mubr.bf16.gmra.mrb[108].mxu1 %v17284_v5  ;;  %v5046_v61 = vmax.f32 %v4996_v54, 0.0  ;;  %v14267_v8 = vld [vmem:[#allocation12 + $0x488] ss:$12 sps:$4 sm:$0xff]   ;;  %v14318_v33 = vld [vmem:[#allocation12 + $0x650] ss:$12 sps:$4 sm:$0xff]  }
 0x6d4   :  { %6810 = vmatpush1.bf16.msra.mxu0 %v14253_v41  ;;  %6817 = vmatprep.mubr.bf16.mxu0 %v17238_v9  ;;  %v14311_v41 = vld [vmem:[#allocation12 + $0x540] ss:$12 sps:$4 sm:$0xff]   ;;  %v14317_v54 = vld [vmem:[#allocation12 + $0x55c] ss:$12 sps:$4 sm:$0xff]  }
 0x6d5   :  { %v5049_v7 = vmax.f32 %v4999_v11, 0.0  ;;  %7166 = vmatprep.mubr.bf16.mxu1 %v17238_v9  ;;  %6811 = vmatprep.subr.bf16.mxu0 %v14260_v17  ;;  %v14272_v9 = vld [vmem:[#allocation12 + $0x4a0] ss:$12 sps:$4 sm:$0xff]   ;;  %v14315_v17 = vld [vmem:[#allocation12 + $0x558] ss:$12 sps:$4 sm:$0xff]  }
 0x6d7   :  { %v17291_v60 = vmax.f32 %v5046_v61, %v5049_v7  ;;  %v14321_v61 = vld [vmem:[#allocation12 + $0x574] ss:$12 sps:$4 sm:$0xff]   ;;  %v17741_v7 = vld [vmem:[#allocation29_spill] sm:$0xff] }
 0x6d8   :  { %6812 = vmatpush1.bf16.msra.mxu0 %v14258_v20 }
 0x6d9   :  { %6813 = vmatprep.subr.bf16.mxu0 %v14265_v4  ;;  %v5178_v16 = vpack.c.bf16 %v17291_v60, %v5070_v23  ;;  %v14307_v23 = vld [vmem:[#allocation12 + $0x528] ss:$12 sps:$4 sm:$0xff]  }
 0x6db   :  { %7167 = vmatmul.mubr.bf16.vlgmr.msra.gmra.mrb[112].mxu1 %v17117_v55 }
 0x6dc   :  { %6814 = vmatpush1.bf16.msra.mxu0 %v14263_v43  ;;  %7174 = vmatprep.mubr.bf16.mxu1 %v17258_v28 }
 0x6dd   :  { %12633 = vmatpush3.bf16.msra.mxu1 %v14267_v8  ;;  %6815 = vmatprep.subr.bf16.mxu0 %v14270_v32  ;;  %v14322_v8 = vld [vmem:[#allocation12 + $0x668] ss:$12 sps:$4 sm:$0xff]   ;;  %v14319_v32 = vld [vmem:[#allocation12 + $0x570] ss:$12 sps:$4 sm:$0xff]  }
 0x6de   :  { %12634 = vmatprep.subr.bf16.mxu1 %v14271_v42  ;;  %v14326_v42 = vld [vmem:[#allocation12 + $0x680] ss:$12 sps:$4 sm:$0xff]  }
 0x6e0   :  { %6816 = vmatpush1.bf16.msra.mxu0 %v14268_v19  ;;  %v17742_v19 = vld [vmem:[#allocation31_spill] sm:$0xff] }
 0x6e1   :  { %12635 = vmatpush3.bf16.msra.mxu1 %v14272_v9  ;;  %6858 = vmatprep.subr.bf16.mxu0 %v14275_v58  ;;  %v17322_v9 = vpack.c.bf16 %v17734_v45, %v17742_v19  ;;  %v14323_v58 = vld [vmem:[#allocation12 + $0x588] ss:$12 sps:$4 sm:$0xff]  }
 0x6e2   :  { %12636 = vmatprep.subr.bf16.mxu1 %v14276_v47  ;;  %v17743_v47 = vld [vmem:[#allocation28_spill] sm:$0xff]  ;;  %v14374_v19 = vld [vmem:[#allocation15 + $0x38] ss:$24 sps:$4 sm:$0xff]  }
 0x6e3   :  { %6818 = vmatmul.mubr.bf16.vlgmr.msra.gmra.mrb[160].mxu0 %v17117_v55  ;;  %7175 = vmatmul.mubr.bf16.gmra.mrb[116].mxu1 %v17138_v31  ;;  %v14290_v55 = vld [vmem:[#allocation12 + $0x4cc] ss:$12 sps:$4 sm:$0xff]  }
 0x6e4   :  { %6827 = vmatprep.mubr.bf16.mxu0 %v17258_v28  ;;  %6859 = vmatpush1.bf16.msra.mxu0 %v14273_v56  ;;  %v14288_v28 = vld [vmem:[#allocation12 + $0x4c8] ss:$12 sps:$4 sm:$0xff]   ;;  %v14329_v56 = vld [vmem:[#allocation12 + $0x5a4] ss:$12 sps:$4 sm:$0xff]  }
 0x6e5   :  { %7182 = vmatprep.mubr.bf16.mxu1 %v17278_v12  ;;  %12637 = vmatpush3.bf16.msra.mxu1 %v14277_v35  ;;  %v14330_v35 = vld [vmem:[#allocation12 + $0x698] ss:$12 sps:$4 sm:$0xff]  }
 0x6e6   :  { %6860 = vmatprep.subr.bf16.mxu0 %v14280_v21  ;;  %12638 = vmatprep.subr.bf16.mxu1 %v14281_v48  ;;  %v14327_v21 = vld [vmem:[#allocation12 + $0x5a0] ss:$12 sps:$4 sm:$0xff]   ;;  %v14333_v48 = vld [vmem:[#allocation12 + $0x5bc] ss:$12 sps:$4 sm:$0xff]  }
 0x6e8   :  { %6861 = vmatpush1.bf16.msra.mxu0 %v14278_v6 }
 0x6e9   :  { %12639 = vmatpush3.bf16.msra.mxu1 %v14282_v62  ;;  %6862 = vmatprep.subr.bf16.mxu0 %v14285_v15  ;;  %v17744_v62 = vld [vmem:[#allocation30_spill] sm:$0xff] }
 0x6ea   :  { %12640 = vmatprep.subr.bf16.mxu1 %v14286_v36  ;;  %v17328_v15 = vpack.c.bf16 %v17734_v45, %v17744_v62  ;;  %v14334_v36 = vld [vmem:[#allocation12 + $0x6b0] ss:$12 sps:$4 sm:$0xff]  }
 0x6eb   :  { %6828 = vmatmul.mubr.bf16.gmra.mrb[164].mxu0 %v17138_v31  ;;  %7183 = vmatmul.mubr.bf16.gmra.mrb[120].mxu1 %v17158_v18  ;;  %v14300_v31 = vld [vmem:[#allocation12 + $0x4fc] ss:$12 sps:$4 sm:$0xff]  }
 0x6ec   :  { %6837 = vmatprep.mubr.bf16.mxu0 %v17278_v12  ;;  %6863 = vmatpush1.bf16.msra.mxu0 %v14283_v46  ;;  %v14394_v62 = vld [vmem:[#allocation15 + $0xcc] ss:$24 sps:$4 sm:$0xff]  }
 0x6ed   :  { %7190 = vmatprep.mubr.bf16.mxu1 %v5178_v16  ;;  %12641 = vmatpush3.bf16.msra.mxu1 %v14287_v49  ;;  %v14331_v49 = vld [vmem:[#allocation12 + $0x5b8] ss:$12 sps:$4 sm:$0xff]  }
 0x6ee   :  { %6864 = vmatprep.subr.bf16.mxu0 %v14290_v55  ;;  %12642 = vmatprep.subr.bf16.mxu1 %v14291_v37 }
 0x6f0   :  { %6865 = vmatpush1.bf16.msra.mxu0 %v14288_v28  ;;  %v14337_v28 = vld [vmem:[#allocation12 + $0x5d4] ss:$12 sps:$4 sm:$0xff]  }
 0x6f1   :  { %12643 = vmatpush3.bf16.msra.mxu1 %v14292_v50  ;;  %6866 = vmatprep.subr.bf16.mxu0 %v14295_v0 }
 0x6f2   :  { %12644 = vmatprep.subr.bf16.mxu1 %v14296_v13  ;;  %v14335_v13 = vld [vmem:[#allocation12 + $0x5d0] ss:$12 sps:$4 sm:$0xff]  }
 0x6f3   :  { %6838 = vmatmul.mubr.bf16.gmra.mrb[168].mxu0 %v17158_v18  ;;  %v12528_v26 = vpop.f32.mrb[80].mxu1  ;;  %7191 = vmatmul.mubr.bf16.gmra.mrb[124].mxu1 %v17186_v34 }
 0x6f4   :  { %6847 = vmatprep.mubr.bf16.mxu0 %v5178_v16  ;;  %6867 = vmatpush1.bf16.msra.mxu0 %v14293_v3  ;;  %v12529_v12 = vpop.f32.mrb[81].mxu1  ;;  %v14325_v16 = vld [vmem:[#allocation12 + $0x58c] ss:$12 sps:$4 sm:$0xff]  }
 0x6f5   :  { %v17305_v38 = vadd.f32 %v12529_v12, %v12528_v26  ;;  %12645 = vmatpush3.bf16.msra.mxu1 %v14297_v40  ;;  %7231 = vmatprep.mubr.bf16.mxu1 %v17125_v51  ;;  %v12531_v57 = vpop.f32.mrb[82].mxu1  ;;  %v14340_v3 = vld [vmem:[#allocation12 + $0x5ec] ss:$12 sps:$4 sm:$0xff]   ;;  %v14338_v40 = vld [vmem:[#allocation12 + $0x5e8] ss:$12 sps:$4 sm:$0xff]  }
 0x6f6   :  { %6868 = vmatprep.subr.bf16.mxu0 %v14300_v31  ;;  %v12532_v14 = vpop.f32.mrb[83].mxu1  ;;  %12646 = vmatprep.subr.bf16.mxu1 %v14301_v52  ;;  %v14343_v31 = vld [vmem:[#allocation12 + $0x604] ss:$12 sps:$4 sm:$0xff]   ;;  %v14341_v52 = vld [vmem:[#allocation12 + $0x600] ss:$12 sps:$4 sm:$0xff]  }
 0x6f7   :  { %v17308_v18 = vadd.f32 %v12532_v14, %v12531_v57  ;;  %v14346_v26 = vld [vmem:[#allocation12 + $0x61c] ss:$12 sps:$4 sm:$0xff]   ;;  %v17338_v12 = vld [vmem:[#allocation13] sm:$0x7]  ;;  %v5181_v57 = vpack.c.bf16 %v17734_v45, %v17291_v60 }
 0x6f8   :  { %6869 = vmatpush1.bf16.msra.mxu0 %v14298_v29  ;;  %v17745_v14 = vld [vmem:[#allocation32_spill] sm:$0xff]  ;;  %v14347_v60 = vld [vmem:[#allocation12 + $0x630] ss:$12 sps:$4 sm:$0xff]  }
 0x6f9   :  { %12647 = vmatpush3.bf16.msra.mxu1 %v14302_v1  ;;  %6870 = vmatprep.subr.bf16.mxu0 %v14305_v59  ;;  %v14344_v59 = vld [vmem:[#allocation12 + $0x618] ss:$12 sps:$4 sm:$0xff]  }
 0x6fa   :  { %12844 = vmatprep.subr.bf16.mxu1 %v14306_v25 }
 0x6fb   :  { %6848 = vmatmul.mubr.bf16.gmra.mrb[172].mxu0 %v17186_v34 }
 0x6fc   :  { %6871 = vmatpush1.bf16.msra.mxu0 %v14303_v24  ;;  %6890 = vmatprep.mubr.bf16.mxu0 %v17125_v51 }
 0x6fd   :  { %7232 = vmatmul.mubr.bf16.vlgmr.msra.gmra.mrb[128].mxu1 %v17122_v2  ;;  %6872 = vmatprep.subr.bf16.mxu0 %v14309_v39 }
 0x6fe   :  { %7239 = vmatprep.mubr.bf16.mxu1 %v17145_v10  ;;  %12845 = vmatpush3.bf16.msra.mxu1 %v14306_v25  ;;  %v17346_v25 = vrot.slane %v17338_v12, %v17745_v14 }
 0x6ff   :  { %12846 = vmatprep.subr.bf16.mxu1 %v14310_v44 }
 0x700   :  { %6873 = vmatpush1.bf16.msra.mxu0 %v14307_v23 }
 0x701   :  { %6874 = vmatprep.subr.bf16.mxu0 %v14313_v30 }
 0x702   :  { %12847 = vmatpush3.bf16.msra.mxu1 %v14310_v44  ;;  %v14349_v44 = vld [vmem:[#allocation12 + $0x634] ss:$12 sps:$4 sm:$0xff]  }
 0x703   :  { %v12534_v34 = vpop.f32.mrb[84].mxu1  ;;  %12848 = vmatprep.subr.bf16.mxu1 %v14314_v63 }
 0x704   :  { %6875 = vmatpush1.bf16.msra.mxu0 %v14311_v41  ;;  %v12535_v51 = vpop.f32.mrb[85].mxu1  ;;  %v14350_v41 = vld [vmem:[#allocation12 + $0x648] ss:$12 sps:$4 sm:$0xff]  }
 0x705   :  { %7240 = vmatmul.mubr.bf16.gmra.mrb[132].mxu1 %v17142_v53  ;;  %v17315_v11 = vadd.f32 %v12535_v51, %v12534_v34  ;;  %v12537_v20 = vpop.f32.mrb[86].mxu1  ;;  %6876 = vmatprep.subr.bf16.mxu0 %v14317_v54  ;;  %v14355_v54 = vld [vmem:[#allocation12 + $0x664] ss:$12 sps:$4 sm:$0xff]   ;;  %v14353_v34 = vld [vmem:[#allocation12 + $0x660] ss:$12 sps:$4 sm:$0xff]  }
 0x706   :  { %7247 = vmatprep.mubr.bf16.mxu1 %v17741_v7  ;;  %12849 = vmatpush3.bf16.msra.mxu1 %v14314_v63  ;;  %v12538_v4 = vpop.f32.mrb[87].mxu1  ;;  %v14352_v63 = vld [vmem:[#allocation12 + $0x64c] ss:$12 sps:$4 sm:$0xff]  }
 0x707   :  { %v17318_v43 = vadd.f32 %v12538_v4, %v12537_v20  ;;  %12850 = vmatprep.subr.bf16.mxu1 %v14318_v33  ;;  %v14356_v51 = vld [vmem:[#allocation12 + $0x678] ss:$12 sps:$4 sm:$0xff]   ;;  %v14367_v4 = vld [vmem:[#allocation15 + $0x4] ss:$24 sps:$4 sm:$0xff]  }
 0x708   :  { %6877 = vmatpush1.bf16.msra.mxu0 %v14315_v17  ;;  %v14361_v17 = vld [vmem:[#allocation12 + $0x694] ss:$12 sps:$4 sm:$0xff]   ;;  %v14364_v20 = vld [vmem:[#allocation12 + $0x6ac] ss:$12 sps:$4 sm:$0xff]  }
 0x709   :  { %6878 = vmatprep.subr.bf16.mxu0 %v14321_v61  ;;  %v14362_v61 = vld [vmem:[#allocation12 + $0x6a8] ss:$12 sps:$4 sm:$0xff]  }
 0x70a   :  { %12851 = vmatpush3.bf16.msra.mxu1 %v14318_v33  ;;  %v14358_v33 = vld [vmem:[#allocation12 + $0x67c] ss:$12 sps:$4 sm:$0xff]  }
 0x70b   :  { %12852 = vmatprep.subr.bf16.mxu1 %v14322_v8 }
 0x70c   :  { %6879 = vmatpush1.bf16.msra.mxu0 %v14319_v32  ;;  %v14365_v32 = vld [vmem:[#allocation15] ss:$24 sps:$4 sm:$0xff]  }
 0x70d   :  { %7248 = vmatmul.mubr.bf16.gmra.mrb[136].mxu1 %v17743_v47  ;;  %6880 = vmatprep.subr.bf16.mxu0 %v14325_v16  ;;  %v14368_v16 = vld [vmem:[#allocation15 + $0x8] ss:$24 sps:$4 sm:$0xff]  }
 0x70e   :  { %7255 = vmatprep.mubr.bf16.mxu1 %v17322_v9  ;;  %12853 = vmatpush3.bf16.msra.mxu1 %v14322_v8  ;;  %v14370_v8 = vld [vmem:[#allocation15 + $0xc] ss:$24 sps:$4 sm:$0xff]  }
 0x70f   :  { %12854 = vmatprep.subr.bf16.mxu1 %v14326_v42 }
 0x710   :  { %6881 = vmatpush1.bf16.msra.mxu0 %v14323_v58  ;;  %v14377_v58 = vld [vmem:[#allocation15 + $0x60] ss:$24 sps:$4 sm:$0xff]  }
 0x711   :  { %6882 = vmatprep.subr.bf16.mxu0 %v14329_v56  ;;  %v14383_v56 = vld [vmem:[#allocation15 + $0x90] ss:$24 sps:$4 sm:$0xff]  }
 0x712   :  { %12855 = vmatpush3.bf16.msra.mxu1 %v14326_v42  ;;  %v14373_v42 = vld [vmem:[#allocation15 + $0x34] ss:$24 sps:$4 sm:$0xff]  }
 0x713   :  { %v12540_v6 = vpop.f32.mrb[88].mxu1  ;;  %12856 = vmatprep.subr.bf16.mxu1 %v14330_v35 }
 0x714   :  { %6883 = vmatpush1.bf16.msra.mxu0 %v14327_v21  ;;  %v12541_v46 = vpop.f32.mrb[89].mxu1  ;;  %v14386_v21 = vld [vmem:[#allocation15 + $0x98] ss:$24 sps:$4 sm:$0xff]  }
 0x715   :  { %7256 = vmatmul.mubr.bf16.gmra.mrb[140].mxu1 %v17328_v15  ;;  %v17331_v55 = vadd.f32 %v12541_v46, %v12540_v6  ;;  %v12543_v37 = vpop.f32.mrb[90].mxu1  ;;  %6884 = vmatprep.subr.bf16.mxu0 %v14333_v48  ;;  %v14388_v48 = vld [vmem:[#allocation15 + $0x9c] ss:$24 sps:$4 sm:$0xff]  }
 0x716   :  { %12857 = vmatpush3.bf16.msra.mxu1 %v14330_v35  ;;  %12860 = vmatprep.mubr.bf16.mxu1 %v17246_v22  ;;  %v12544_v50 = vpop.f32.mrb[91].mxu1  ;;  %v14385_v35 = vld [vmem:[#allocation15 + $0x94] ss:$24 sps:$4 sm:$0xff]   ;;  %v14391_v6 = vld [vmem:[#allocation15 + $0xc4] ss:$24 sps:$4 sm:$0xff]  }
 0x717   :  { %v17334_v0 = vadd.f32 %v12544_v50, %v12543_v37  ;;  %12858 = vmatprep.subr.bf16.mxu1 %v14334_v36  ;;  %v14397_v46 = vld [vmem:[#allocation15 + $0xf4] ss:$24 sps:$4 sm:$0xff]   ;;  %v14398_v50 = vld [vmem:[#allocation15 + $0xf8] ss:$24 sps:$4 sm:$0xff]  }
 0x718   :  { %6885 = vmatpush1.bf16.msra.mxu0 %v14331_v49  ;;  %v14400_v49 = vld [vmem:[#allocation15 + $0xfc] ss:$24 sps:$4 sm:$0xff]  }
 0x719   :  { %6886 = vmatprep.subr.bf16.mxu0 %v14337_v28  ;;  %v14395_v28 = vld [vmem:[#allocation15 + $0xf0] ss:$24 sps:$4 sm:$0xff]  }
 0x71a   :  { %12859 = vmatpush3.bf16.msra.mxu1 %v14334_v36  ;;  %v14392_v36 = vld [vmem:[#allocation15 + $0xc8] ss:$24 sps:$4 sm:$0xff]  }
 0x71b   :  { %10043 = vmatprep.subr.bf16.mxu1 %v14367_v4 }
 0x71c   :  { %6887 = vmatpush1.bf16.msra.mxu0 %v14335_v13 }
 0x71d   :  { %12861 = vmatmul.mubr.bf16.vlgmr.msra.gmra.mrb[144].mxu1 %v17266_v27  ;;  %6888 = vmatprep.subr.bf16.mxu0 %v14340_v3  ;;  %v7039_v3 = vadd.f32 %v17305_v38, %v17346_v25  ;;  %v14409_v38 = vld [vmem:[#allocation15 + $0x154] ss:$24 sps:$4 sm:$0xff]  }
 0x71e   :  { %12864 = vmatprep.mubr.bf16.mxu1 %v17284_v5  ;;  %10044 = vmatpush1.bf16.msra.mxu1 %v14365_v32 }
 0x71f   :  { %10045 = vmatprep.subr.bf16.mxu1 %v14373_v42  ;;  %v14428_v42 = vld [vmem:[#allocation15 + $0x1e8] ss:$24 sps:$4 sm:$0xff]  }
 0x720   :  { %6889 = vmatpush1.bf16.msra.mxu0 %v14338_v40 }
 0x721   :  { %6931 = vmatprep.subr.bf16.mxu0 %v14343_v31 }
 0x723   :  { %6891 = vmatmul.mubr.bf16.vlgmr.msra.gmra.mrb[160].mxu0 %v17122_v2  ;;  %v12546_v29 = vpop.f32.mrb[92].mxu1 }
 0x724   :  { %6900 = vmatprep.mubr.bf16.mxu0 %v17145_v10  ;;  %6932 = vmatpush1.bf16.msra.mxu0 %v14341_v52  ;;  %v12547_v1 = vpop.f32.mrb[93].mxu1 }
 0x725   :  { %12865 = vmatmul.mubr.bf16.gmra.mrb[148].mxu1 %v5181_v57  ;;  %v12548_v24 = vadd.f32 %v12547_v1, %v12546_v29  ;;  %v12549_v39 = vpop.f32.mrb[94].mxu1  ;;  %6933 = vmatprep.subr.bf16.mxu0 %v14346_v26  ;;  %v14403_v26 = vld [vmem:[#allocation15 + $0x124] ss:$24 sps:$4 sm:$0xff]  }
 0x726   :  { %v12550_v23 = vpop.f32.mrb[95].mxu1  ;;  %v14406_v29 = vld [vmem:[#allocation15 + $0x12c] ss:$24 sps:$4 sm:$0xff]  }
 0x727   :  { %v17349_v2 = vadd.f32 %v12548_v24, %v17346_v25  ;;  %v12551_v30 = vadd.f32 %v12550_v23, %v12549_v39  ;;  %v14401_v24 = vld [vmem:[#allocation15 + $0x120] ss:$24 sps:$4 sm:$0xff]   ;;  %v14412_v23 = vld [vmem:[#allocation15 + $0x15c] ss:$24 sps:$4 sm:$0xff]  }
 0x728   :  { %6934 = vmatpush1.bf16.msra.mxu0 %v14344_v59  ;;  %v14404_v39 = vld [vmem:[#allocation15 + $0x128] ss:$24 sps:$4 sm:$0xff]  }
 0x729   :  { %v17352_v10 = vadd.f32 %v12551_v30, %v17346_v25  ;;  %6935 = vmatprep.subr.bf16.mxu0 %v14349_v44  ;;  %v14407_v30 = vld [vmem:[#allocation15 + $0x150] ss:$24 sps:$4 sm:$0xff]  }
 0x72b   :  { %6901 = vmatmul.mubr.bf16.gmra.mrb[164].mxu0 %v17142_v53  ;;  %v14359_v53 = vld [vmem:[#allocation12 + $0x690] ss:$12 sps:$4 sm:$0xff]  }
 0x72c   :  { %6910 = vmatprep.mubr.bf16.mxu0 %v17741_v7  ;;  %6936 = vmatpush1.bf16.msra.mxu0 %v14347_v60  ;;  %v17746_v7 = vmov 0   ;;  %v14410_v60 = vld [vmem:[#allocation15 + $0x158] ss:$24 sps:$4 sm:$0xff]  }
 0x72d   :  { %6937 = vmatprep.subr.bf16.mxu0 %v14352_v63  ;;  %v14418_v63 = vld [vmem:[#allocation15 + $0x18c] ss:$24 sps:$4 sm:$0xff]  }
 0x730   :  { %6938 = vmatpush1.bf16.msra.mxu0 %v14350_v41  ;;  %v14413_v41 = vld [vmem:[#allocation15 + $0x180] ss:$24 sps:$4 sm:$0xff]  }
 0x731   :  { %6939 = vmatprep.subr.bf16.mxu0 %v14355_v54  ;;  %v14416_v54 = vld [vmem:[#allocation15 + $0x188] ss:$24 sps:$4 sm:$0xff]  }
 0x733   :  { %6911 = vmatmul.mubr.bf16.gmra.mrb[168].mxu0 %v17743_v47  ;;  %v14380_v47 = vld [vmem:[#allocation15 + $0x68] ss:$24 sps:$4 sm:$0xff]  }
 0x734   :  { %6920 = vmatprep.mubr.bf16.mxu0 %v17322_v9  ;;  %6940 = vmatpush1.bf16.msra.mxu0 %v14353_v34  ;;  %v14376_v9 = vld [vmem:[#allocation15 + $0x3c] ss:$24 sps:$4 sm:$0xff]  }
 0x735   :  { %6941 = vmatprep.subr.bf16.mxu0 %v14358_v33  ;;  %v14421_v34 = vld [vmem:[#allocation15 + $0x1b4] ss:$24 sps:$4 sm:$0xff]  }
 0x736   :  { %v14424_v33 = vld [vmem:[#allocation15 + $0x1bc] ss:$24 sps:$4 sm:$0xff]  }
 0x738   :  { %6942 = vmatpush1.bf16.msra.mxu0 %v14356_v51  ;;  %v14419_v51 = vld [vmem:[#allocation15 + $0x1b0] ss:$24 sps:$4 sm:$0xff]  }
 0x739   :  { %6943 = vmatprep.subr.bf16.mxu0 %v14361_v17  ;;  %v14422_v17 = vld [vmem:[#allocation15 + $0x1b8] ss:$24 sps:$4 sm:$0xff]  }
 0x73b   :  { %6921 = vmatmul.mubr.bf16.gmra.mrb[172].mxu0 %v17328_v15  ;;  %v14389_v15 = vld [vmem:[#allocation15 + $0xc0] ss:$24 sps:$4 sm:$0xff]  }
 0x73c   :  { %6944 = vmatpush1.bf16.msra.mxu0 %v14359_v53  ;;  %6963 = vmatprep.mubr.bf16.mxu0 %v17746_v7  ;;  %v14427_v53 = vld [vmem:[#allocation15 + $0x1e4] ss:$24 sps:$4 sm:$0xff]  }
 0x73d   :  { %6945 = vmatprep.subr.bf16.mxu0 %v14364_v20  ;;  %v14430_v20 = vld [vmem:[#allocation15 + $0x1ec] ss:$24 sps:$4 sm:$0xff]  }
 0x740   :  { %6946 = vmatpush1.bf16.msra.mxu0 %v14362_v61 }
 0x741   :  { %10308 = vmatprep.subr.bf16.mxu0 %v14370_v8  ;;  %v7047_v8 = vadd.f32 %v17315_v11, %v17346_v25  ;;  %v14431_v11 = vld [vmem:[#allocation15 + $0x210] ss:$24 sps:$4 sm:$0xff]  }
 0x743   :  { %6964 = vmatmul.mubr.bf16.vlgmr.msra.gmra.mrb[160].mxu0 %v17246_v22  ;;  %v14371_v22 = vld [vmem:[#allocation15 + $0x30] ss:$24 sps:$4 sm:$0xff]  }
 0x744   :  { %6973 = vmatprep.mubr.bf16.mxu0 %v17746_v7  ;;  %10309 = vmatpush1.bf16.msra.mxu0 %v14368_v16 }
 0x745   :  { %10310 = vmatprep.subr.bf16.mxu0 %v14376_v9  ;;  %10046 = vmatpush1.bf16.msra.mxu1 %v14371_v22  ;;  %v14425_v22 = vld [vmem:[#allocation15 + $0x1e0] ss:$24 sps:$4 sm:$0xff]   ;;  %v14433_v9 = vld [vmem:[#allocation15 + $0x214] ss:$24 sps:$4 sm:$0xff]  }
 0x748   :  { %10311 = vmatpush1.bf16.msra.mxu0 %v14374_v19 }
 0x74b   :  { %6974 = vmatmul.mubr.bf16.gmra.mrb[164].mxu0 %v17266_v27  ;;  %v14379_v27 = vld [vmem:[#allocation15 + $0x64] ss:$24 sps:$4 sm:$0xff]  }
 0x74c   :  { %6983 = vmatprep.mubr.bf16.mxu0 %v17746_v7  ;;  %10047 = vmatprep.subr.bf16.mxu1 %v14379_v27  ;;  %v14436_v27 = vld [vmem:[#allocation15 + $0x21c] ss:$24 sps:$4 sm:$0xff]  }
 0x74d   :  { %10048 = vmatpush1.bf16.msra.mxu1 %v14377_v58 }
 0x74e   :  { %10049 = vmatprep.subr.bf16.mxu1 %v14385_v35  ;;  %v14434_v35 = vld [vmem:[#allocation15 + $0x218] ss:$24 sps:$4 sm:$0xff]  }
 0x751   :  { %10050 = vmatpush1.bf16.msra.mxu1 %v14383_v56 }
 0x752   :  { %10051 = vmatprep.subr.bf16.mxu1 %v14391_v6  ;;  %v14437_v6 = vld [vmem:[#allocation15 + $0x240] ss:$24 sps:$4 sm:$0xff]  }
 0x753   :  { %6984 = vmatmul.mubr.bf16.gmra.mrb[168].mxu0 %v17284_v5  ;;  %v14382_v5 = vld [vmem:[#allocation15 + $0x6c] ss:$24 sps:$4 sm:$0xff]  }
 0x754   :  { %6993 = vmatprep.mubr.bf16.mxu0 %v17746_v7  ;;  %10312 = vmatprep.subr.bf16.mxu0 %v14382_v5  ;;  %v7050_v5 = vadd.f32 %v17318_v43, %v17346_v25  ;;  %v14445_v43 = vld [vmem:[#allocation15 + $0x274] ss:$24 sps:$4 sm:$0xff]  }
 0x755   :  { %10313 = vmatpush1.bf16.msra.mxu0 %v14380_v47  ;;  %10052 = vmatpush1.bf16.msra.mxu1 %v14389_v15  ;;  %v14448_v15 = vld [vmem:[#allocation15 + $0x27c] ss:$24 sps:$4 sm:$0xff]  }
 0x756   :  { %10314 = vmatprep.subr.bf16.mxu0 %v14388_v48  ;;  %10053 = vmatprep.subr.bf16.mxu1 %v14397_v46  ;;  %v14442_v48 = vld [vmem:[#allocation15 + $0x24c] ss:$24 sps:$4 sm:$0xff]   ;;  %v14443_v46 = vld [vmem:[#allocation15 + $0x270] ss:$24 sps:$4 sm:$0xff]  }
 0x759   :  { %10315 = vmatpush1.bf16.msra.mxu0 %v14386_v21  ;;  %10054 = vmatpush1.bf16.msra.mxu1 %v14395_v28  ;;  %v14439_v21 = vld [vmem:[#allocation15 + $0x244] ss:$24 sps:$4 sm:$0xff]   ;;  %v7055_v28 = vadd.f32 %v17331_v55, %v17346_v25  ;;  %v14457_v55 = vld [vmem:[#allocation15 + $0x2d4] ss:$24 sps:$4 sm:$0xff]  }
 0x75a   :  { %10316 = vmatprep.subr.bf16.mxu0 %v14394_v62  ;;  %10055 = vmatprep.subr.bf16.mxu1 %v14403_v26  ;;  %v14440_v62 = vld [vmem:[#allocation15 + $0x248] ss:$24 sps:$4 sm:$0xff]  }
 0x75b   :  { %6994 = vmatmul.mubr.bf16.gmra.mrb[172].mxu0 %v5181_v57  ;;  %v7042_v57 = vadd.f32 %v17308_v18, %v17346_v25  ;;  %v14415_v18 = vld [vmem:[#allocation15 + $0x184] ss:$24 sps:$4 sm:$0xff]  }
 0x75d   :  { %10317 = vmatpush1.bf16.msra.mxu0 %v14392_v36  ;;  %10056 = vmatpush1.bf16.msra.mxu1 %v14401_v24 }
 0x75e   :  { %10318 = vmatprep.subr.bf16.mxu0 %v14400_v49  ;;  %10057 = vmatprep.subr.bf16.mxu1 %v14409_v38  ;;  %v14446_v49 = vld [vmem:[#allocation15 + $0x278] ss:$24 sps:$4 sm:$0xff]  }
 0x75f   :  { %v14455_v38 = vld [vmem:[#allocation15 + $0x2d0] ss:$24 sps:$4 sm:$0xff]  }
 0x761   :  { %10319 = vmatpush1.bf16.msra.mxu0 %v14398_v50  ;;  %10058 = vmatpush1.bf16.msra.mxu1 %v14407_v30  ;;  %v14463_v30 = vld [vmem:[#allocation15 + $0x304] ss:$24 sps:$4 sm:$0xff]  }
 0x762   :  { %10320 = vmatprep.subr.bf16.mxu0 %v14406_v29  ;;  %10059 = vmatprep.subr.bf16.mxu1 %v14415_v18 }
 0x765   :  { %10321 = vmatpush1.bf16.msra.mxu0 %v14404_v39  ;;  %10060 = vmatpush1.bf16.msra.mxu1 %v14413_v41  ;;  %v14460_v39 = vld [vmem:[#allocation15 + $0x2dc] ss:$24 sps:$4 sm:$0xff]  }
 0x766   :  { %10322 = vmatprep.subr.bf16.mxu0 %v14412_v23  ;;  %10061 = vmatprep.subr.bf16.mxu1 %v14421_v34  ;;  %v14458_v23 = vld [vmem:[#allocation15 + $0x2d8] ss:$24 sps:$4 sm:$0xff]  }
 0x769   :  { %10323 = vmatpush1.bf16.msra.mxu0 %v14410_v60  ;;  %10062 = vmatpush1.bf16.msra.mxu1 %v14419_v51  ;;  %v14466_v60 = vld [vmem:[#allocation15 + $0x30c] ss:$24 sps:$4 sm:$0xff]  }
 0x76a   :  { %10324 = vmatprep.subr.bf16.mxu0 %v14418_v63  ;;  %10063 = vmatprep.subr.bf16.mxu1 %v14427_v53 }
 0x76d   :  { %10325 = vmatpush1.bf16.msra.mxu0 %v14416_v54  ;;  %10064 = vmatpush1.bf16.msra.mxu1 %v14425_v22 }
 0x76e   :  { %10326 = vmatprep.subr.bf16.mxu0 %v14424_v33  ;;  %10065 = vmatprep.subr.bf16.mxu1 %v14433_v9 }
 0x771   :  { %10327 = vmatpush1.bf16.msra.mxu0 %v14422_v17  ;;  %10066 = vmatpush1.bf16.msra.mxu1 %v14431_v11 }
 0x772   :  { %10328 = vmatprep.subr.bf16.mxu0 %v14430_v20  ;;  %10067 = vmatprep.subr.bf16.mxu1 %v14439_v21 }
 0x775   :  { %10329 = vmatpush1.bf16.msra.mxu0 %v14428_v42  ;;  %10068 = vmatpush1.bf16.msra.mxu1 %v14437_v6 }
 0x776   :  { %v12568_v37 = vpop.f32.mrb[96].mxu1  ;;  %10330 = vmatprep.subr.bf16.mxu0 %v14436_v27  ;;  %10069 = vmatprep.subr.bf16.mxu1 %v14445_v43 }
 0x777   :  { %v12569_v13 = vpop.f32.mrb[97].mxu1 }
 0x778   :  { %v12570_v40 = vadd.f32 %v12569_v13, %v12568_v37  ;;  %v12571_v31 = vpop.f32.mrb[98].mxu1 }
 0x779   :  { %v12572_v52 = vpop.f32.mrb[99].mxu1  ;;  %10331 = vmatpush1.bf16.msra.mxu0 %v14434_v35  ;;  %10070 = vmatpush1.bf16.msra.mxu1 %v14443_v46 }
 0x77a   :  { %v17370_v1 = vadd.f32 %v12570_v40, %v7039_v3  ;;  %v12573_v59 = vadd.f32 %v12572_v52, %v12571_v31  ;;  %10332 = vmatprep.subr.bf16.mxu0 %v14442_v48  ;;  %v14451_v40 = vld [vmem:[#allocation15 + $0x2a4] ss:$24 sps:$4 sm:$0xff]   ;;  %v7058_v52 = vadd.f32 %v17334_v0, %v17346_v25 }
 0x77b   :  { %v14454_v31 = vld [vmem:[#allocation15 + $0x2ac] ss:$24 sps:$4 sm:$0xff]   ;;  %10071 = vmatprep.subr.bf16.mxu1 %v14451_v40 }
 0x77c   :  { %v17372_v44 = vadd.f32 %v12573_v59, %v7042_v57  ;;  %v14449_v57 = vld [vmem:[#allocation15 + $0x2a0] ss:$24 sps:$4 sm:$0xff]  }
 0x77d   :  { %10333 = vmatpush1.bf16.msra.mxu0 %v14440_v62  ;;  %v14452_v59 = vld [vmem:[#allocation15 + $0x2a8] ss:$24 sps:$4 sm:$0xff]   ;;  %10072 = vmatpush1.bf16.msra.mxu1 %v14449_v57 }
 0x77e   :  { %10334 = vmatprep.subr.bf16.mxu0 %v14448_v15  ;;  %10073 = vmatprep.subr.bf16.mxu1 %v14457_v55 }
 0x781   :  { %10335 = vmatpush1.bf16.msra.mxu0 %v14446_v49  ;;  %10074 = vmatpush1.bf16.msra.mxu1 %v14455_v38 }
 0x782   :  { %10336 = vmatprep.subr.bf16.mxu0 %v14454_v31  ;;  %10096 = vmatprep.subr.bf16.mxu1 %v14463_v30 }
 0x785   :  { %10337 = vmatpush1.bf16.msra.mxu0 %v14452_v59 }
 0x786   :  { %v12574_v61 = vpop.f32.mrb[100].mxu1  ;;  %10338 = vmatprep.subr.bf16.mxu0 %v14460_v39 }
 0x787   :  { %v12575_v4 = vpop.f32.mrb[101].mxu1 }
 0x788   :  { %v12576_v32 = vadd.f32 %v12575_v4, %v12574_v61  ;;  %v12577_v16 = vpop.f32.mrb[102].mxu1 }
 0x789   :  { %v12578_v19 = vpop.f32.mrb[103].mxu1  ;;  %10339 = vmatpush1.bf16.msra.mxu0 %v14458_v23 }
 0x78a   :  { %v17378_v58 = vadd.f32 %v12576_v32, %v7047_v8  ;;  %v12579_v47 = vadd.f32 %v12578_v19, %v12577_v16  ;;  %10361 = vmatprep.subr.bf16.mxu0 %v14466_v60 }
 0x78c   :  { %v17380_v56 = vadd.f32 %v12579_v47, %v7050_v5 }
 0x796   :  { %v12580_v36 = vpop.f32.mrb[104].mxu1 }
 0x797   :  { %v12581_v37 = vpop.f32.mrb[105].mxu1 }
 0x798   :  { %v12582_v50 = vadd.f32 %v12581_v37, %v12580_v36  ;;  %v12583_v13 = vpop.f32.mrb[106].mxu1 }
 0x799   :  { %v12584_v3 = vpop.f32.mrb[107].mxu1 }
 0x79a   :  { %v7120_v26 = vadd.f32 %v12582_v50, %v7055_v28  ;;  %v12585_v29 = vadd.f32 %v12584_v3, %v12583_v13 }
 0x79c   :  { %v7123_v24 = vadd.f32 %v12585_v29, %v7058_v52 }
 0x7a6   :  { %v12586_v0 = vpop.f32.mrb[108].mxu1 }
 0x7a7   :  { %v12587_v25 = vpop.f32.mrb[109].mxu1 }
 0x7a8   :  { %v12588_v18 = vadd.f32 %v12587_v25, %v12586_v0  ;;  %v12589_v63 = vpop.f32.mrb[110].mxu1 }
 0x7a9   :  { %v12590_v41 = vpop.f32.mrb[111].mxu1 }
 0x7aa   :  { %v7128_v54 = vadd.f32 %v12588_v18, %v17349_v2  ;;  %v12591_v34 = vadd.f32 %v12590_v41, %v12589_v63 }
 0x7ac   :  { %v7131_v33 = vadd.f32 %v12591_v34, %v17352_v10 }
 0x7ae   :  { %v12608_v51 = vpop.f32.mrb[112].mxu1 }
 0x7af   :  { %v12609_v17 = vpop.f32.mrb[113].mxu1 }
 0x7b0   :  { %v12610_v53 = vadd.f32 %v12609_v17, %v12608_v51  ;;  %v12611_v20 = vpop.f32.mrb[114].mxu1 }
 0x7b1   :  { %v12612_v61 = vpop.f32.mrb[115].mxu1 }
 0x7b2   :  { %v7169_v4 = vadd.f32 %v12610_v53, %v17370_v1  ;;  %v12613_v8 = vadd.f32 %v12612_v61, %v12611_v20 }
 0x7b4   :  { %v7172_v32 = vadd.f32 %v12613_v8, %v17372_v44 }
 0x7b6   :  { %v12614_v16 = vpop.f32.mrb[116].mxu1 }
 0x7b7   :  { %v12615_v22 = vpop.f32.mrb[117].mxu1 }
 0x7b8   :  { %v12616_v42 = vadd.f32 %v12615_v22, %v12614_v16  ;;  %v12617_v19 = vpop.f32.mrb[118].mxu1 }
 0x7b9   :  { %v12618_v9 = vpop.f32.mrb[119].mxu1 }
 0x7ba   :  { %v7177_v2 = vadd.f32 %v12616_v42, %v17378_v58  ;;  %v12619_v27 = vadd.f32 %v12618_v9, %v12617_v19 }
 0x7bc   :  { %v7180_v10 = vadd.f32 %v12619_v27, %v17380_v56 }
 0x7be   :  { %v12620_v5 = vpop.f32.mrb[120].mxu1 }
 0x7bf   :  { %v12621_v47 = vpop.f32.mrb[121].mxu1 }
 0x7c0   :  { %v12622_v11 = vadd.f32 %v12621_v47, %v12620_v5  ;;  %v12623_v35 = vpop.f32.mrb[122].mxu1 }
 0x7c1   :  { %v12624_v21 = vpop.f32.mrb[123].mxu1 }
 0x7c2   :  { %v7185_v48 = vadd.f32 %v12622_v11, %v7120_v26  ;;  %v12625_v1 = vadd.f32 %v12624_v21, %v12623_v35 }
 0x7c4   :  { %v7188_v6 = vadd.f32 %v12625_v1, %v7123_v24 }
 0x7c6   :  { %v12626_v62 = vpop.f32.mrb[124].mxu1 }
 0x7c7   :  { %v12627_v44 = vpop.f32.mrb[125].mxu1 }
 0x7c8   :  { %v12628_v43 = vadd.f32 %v12627_v44, %v12626_v62  ;;  %v12629_v15 = vpop.f32.mrb[126].mxu1 }
 0x7c9   :  { %v12630_v36 = vpop.f32.mrb[127].mxu1 }
 0x7ca   :  { %v7193_v46 = vadd.f32 %v12628_v43, %v7128_v54  ;;  %v12631_v49 = vadd.f32 %v12630_v36, %v12629_v15 }
 0x7cc   :  { %v7196_v37 = vadd.f32 %v12631_v49, %v7131_v33 }
 0x7d0   :  { %v12648_v58 = vpop.f32.mrb[128].mxu1 }
 0x7d1   :  { %v12649_v28 = vpop.f32.mrb[129].mxu1 }
 0x7d2   :  { %v12650_v50 = vadd.f32 %v12649_v28, %v12648_v58  ;;  %v12651_v56 = vpop.f32.mrb[130].mxu1 }
 0x7d3   :  { %v12652_v13 = vpop.f32.mrb[131].mxu1 }
 0x7d4   :  { %v12653_v3 = vadd.f32 %v12652_v13, %v12651_v56  ;;  %v7234_v40 = vadd.f32 %v12650_v50, %v7169_v4  ;;  %v17747_v56 = vld [vmem:[#allocation26_spill] sm:$0xff] }
 0x7d5   :  { %v17406_v13 = vrot.slane %v17338_v12, %v17747_v56 }
 0x7d6   :  { %v7237_v31 = vadd.f32 %v12653_v3, %v7172_v32  ;;  %v17748_v3 = vld [vmem:[#allocation27_spill] sm:$0xff] }
 0x7d8   :  { %v12654_v52 = vpop.f32.mrb[132].mxu1 }
 0x7d9   :  { %v12655_v26 = vpop.f32.mrb[133].mxu1 }
 0x7da   :  { %v12656_v29 = vadd.f32 %v12655_v26, %v12654_v52  ;;  %v12657_v57 = vpop.f32.mrb[134].mxu1 }
 0x7db   :  { %v12658_v59 = vpop.f32.mrb[135].mxu1 }
 0x7dc   :  { %v12659_v24 = vadd.f32 %v12658_v59, %v12657_v57  ;;  %v7242_v55 = vadd.f32 %v12656_v29, %v7177_v2 }
 0x7de   :  { %v7245_v39 = vadd.f32 %v12659_v24, %v7180_v10 }
 0x7e0   :  { %v12660_v38 = vpop.f32.mrb[136].mxu1 }
 0x7e1   :  { %v12661_v23 = vpop.f32.mrb[137].mxu1 }
 0x7e2   :  { %v12662_v30 = vadd.f32 %v12661_v23, %v12660_v38  ;;  %v12663_v60 = vpop.f32.mrb[138].mxu1 }
 0x7e3   :  { %v12664_v0 = vpop.f32.mrb[139].mxu1 }
 0x7e4   :  { %v12665_v25 = vadd.f32 %v12664_v0, %v12663_v60  ;;  %v7250_v18 = vadd.f32 %v12662_v30, %v7185_v48 }
 0x7e6   :  { %v7253_v63 = vadd.f32 %v12665_v25, %v7188_v6 }
 0x7e8   :  { %v12666_v41 = vpop.f32.mrb[140].mxu1 }
 0x7e9   :  { %v12667_v54 = vpop.f32.mrb[141].mxu1 }
 0x7ea   :  { %v12668_v34 = vadd.f32 %v12667_v54, %v12666_v41  ;;  %v12669_v33 = vpop.f32.mrb[142].mxu1 }
 0x7eb   :  { %v12670_v51 = vpop.f32.mrb[143].mxu1 }
 0x7ec   :  { %v12671_v17 = vadd.f32 %v12670_v51, %v12669_v33  ;;  %v7258_v53 = vadd.f32 %v12668_v34, %v7193_v46  ;;  %v14461_v34 = vld [vmem:[#allocation15 + $0x300] ss:$24 sps:$4 sm:$0xff]  }
 0x7ed   :  { %v14464_v33 = vld [vmem:[#allocation15 + $0x308] ss:$24 sps:$4 sm:$0xff]  }
 0x7ee   :  { %v7261_v20 = vadd.f32 %v12671_v17, %v7196_v37 }
 0x7f0   :  { %v12862_v61 = vpop.f32.mrb[144].mxu1 }
 0x7f1   :  { %v7307_v4 = vadd.f32 %v12862_v61, %v7242_v55  ;;  %v7298_v8 = vpop.f32.mrb[145].mxu1  ;;  %v14472_v61 = vld [vmem:[#allocation15 + $0x33c] ss:$24 sps:$4 sm:$0xff]  }
 0x7f2   :  { %v7299_v32 = vadd.f32 %v7298_v8, %v7234_v40  ;;  %v12863_v16 = vpop.f32.mrb[146].mxu1  ;;  %v17410_v40 = vrot.slane %v17338_v12, %v17748_v3 }
 0x7f3   :  { %v7310_v22 = vadd.f32 %v12863_v16, %v7245_v39  ;;  %v7301_v42 = vpop.f32.mrb[147].mxu1  ;;  %v7337_v9 = vmax.f32 %v7307_v4, 0.0 }
 0x7f4   :  { %v7302_v19 = vadd.f32 %v7301_v42, %v7237_v31  ;;  %v7331_v27 = vmax.f32 %v7299_v32, 0.0  ;;  %v14467_v42 = vld [vmem:[#allocation15 + $0x330] ss:$24 sps:$4 sm:$0xff]  }
 0x7f5   :  { %v7340_v2 = vmax.f32 %v7310_v22, 0.0 }
 0x7f6   :  { %v7334_v10 = vmax.f32 %v7302_v19, 0.0  ;;  %v14470_v19 = vld [vmem:[#allocation15 + $0x338] ss:$24 sps:$4 sm:$0xff]  }
 0x7f7   :  { %v7358_v5 = vmax.f32 %v7337_v9, %v7340_v2  ;;  %v14475_v2 = vld [vmem:[#allocation15 + $0x364] ss:$24 sps:$4 sm:$0xff]  }
 0x7f8   :  { %v17392_v47 = vmax.f32 %v7331_v27, %v7334_v10  ;;  %v12866_v11 = vpop.f32.mrb[148].mxu1  ;;  %v14478_v27 = vld [vmem:[#allocation15 + $0x36c] ss:$24 sps:$4 sm:$0xff]  }
 0x7f9   :  { %v7323_v35 = vadd.f32 %v12866_v11, %v7258_v53  ;;  %v7314_v21 = vpop.f32.mrb[149].mxu1 }
 0x7fa   :  { %v7315_v48 = vadd.f32 %v7314_v21, %v7250_v18  ;;  %v12867_v1 = vpop.f32.mrb[150].mxu1  ;;  %v17395_v6 = vpack.c.bf16 %v7358_v5, %v17392_v47 }
 0x7fb   :  { %v7326_v62 = vadd.f32 %v12867_v1, %v7261_v20  ;;  %v7317_v44 = vpop.f32.mrb[151].mxu1  ;;  %v7349_v15 = vmax.f32 %v7323_v35, 0.0  ;;  %v14469_v20 = vld [vmem:[#allocation15 + $0x334] ss:$24 sps:$4 sm:$0xff]  }
 0x7fc   :  { %v7318_v43 = vadd.f32 %v7317_v44, %v7253_v63  ;;  %v7343_v46 = vmax.f32 %v7315_v48, 0.0  ;;  %v14473_v44 = vld [vmem:[#allocation15 + $0x360] ss:$24 sps:$4 sm:$0xff]  }
 0x7fd   :  { %v7352_v36 = vmax.f32 %v7326_v62, 0.0 }
 0x7fe   :  { %v7346_v49 = vmax.f32 %v7318_v43, 0.0  ;;  %v14476_v43 = vld [vmem:[#allocation15 + $0x368] ss:$24 sps:$4 sm:$0xff]  }
 0x7ff   :  { %v17397_v37 = vmax.f32 %v7349_v15, %v7352_v36 }
 0x800   :  { %v7361_v58 = vmax.f32 %v7343_v46, %v7346_v49  ;;  %v14481_v46 = vld [vmem:[#allocation15 + $0x394] ss:$24 sps:$4 sm:$0xff]  }
 0x801   :  { %v14484_v49 = vld [vmem:[#allocation15 + $0x39c] ss:$24 sps:$4 sm:$0xff]  }
 0x802   :  { %v17399_v28 = vpack.c.bf16 %v7361_v58, %v7358_v5  ;;  %v17402_v50 = vpack.c.bf16 %v17397_v37, %v7361_v58 }
 0x816   :  { %v6965_v31 = vpop.f32.mrb[160].mxu0 }
 0x817   :  { %v12964_v52 = vadd.f32 %v6965_v31, %v17406_v13  ;;  %v6967_v26 = vpop.f32.mrb[161].mxu0 }
 0x818   :  { %v12965_v29 = vadd.f32 %v6967_v26, %v17410_v40  ;;  %v6969_v57 = vpop.f32.mrb[162].mxu0 }
 0x819   :  { %v12966_v59 = vadd.f32 %v6969_v57, %v17406_v13  ;;  %v6971_v24 = vpop.f32.mrb[163].mxu0  ;;  %v7329_v39 = vmax.f32 %v12964_v52, 0.0  ;;  %v14479_v57 = vld [vmem:[#allocation15 + $0x390] ss:$24 sps:$4 sm:$0xff]  }
 0x81a   :  { %v12967_v55 = vadd.f32 %v6971_v24, %v17410_v40  ;;  %v7330_v23 = vmax.f32 %v12965_v29, 0.0 }
 0x81b   :  { %v7332_v38 = vmax.f32 %v12966_v59, 0.0  ;;  %v14482_v59 = vld [vmem:[#allocation15 + $0x398] ss:$24 sps:$4 sm:$0xff]  }
 0x81c   :  { %v7333_v30 = vmax.f32 %v12967_v55, 0.0  ;;  %v14487_v55 = vld [vmem:[#allocation15 + $0x3c4] ss:$24 sps:$4 sm:$0xff]  }
 0x81d   :  { %v7353_v60 = vmax.f32 %v7329_v39, %v7332_v38  ;;  %v14490_v39 = vld [vmem:[#allocation15 + $0x3cc] ss:$24 sps:$4 sm:$0xff]  }
 0x81e   :  { %v7354_v0 = vmax.f32 %v7330_v23, %v7333_v30  ;;  %v6975_v12 = vpop.f32.mrb[164].mxu0 }
 0x81f   :  { %v12968_v25 = vadd.f32 %v6975_v12, %v17406_v13  ;;  %v6977_v18 = vpop.f32.mrb[165].mxu0  ;;  %v17422_v51 = vpack.c.bf16 %v7353_v60, %v17734_v45 }
 0x820   :  { %v12969_v63 = vadd.f32 %v6977_v18, %v17410_v40  ;;  %v6979_v41 = vpop.f32.mrb[166].mxu0  ;;  %v17419_v54 = vpack.c.bf16 %v7354_v0, %v17734_v45 }
 0x821   :  { %v12970_v17 = vadd.f32 %v6979_v41, %v17406_v13  ;;  %v6981_v53 = vpop.f32.mrb[167].mxu0  ;;  %v7335_v8 = vmax.f32 %v12968_v25, 0.0  ;;  %v14488_v41 = vld [vmem:[#allocation15 + $0x3c8] ss:$24 sps:$4 sm:$0xff]  }
 0x822   :  { %v12971_v4 = vadd.f32 %v6981_v53, %v17410_v40  ;;  %10075 = vmatprep.mubr.bf16.mxu1 %v17419_v54  ;;  %10340 = vmatprep.mubr.bf16.mxu0 %v17419_v54  ;;  %v7336_v16 = vmax.f32 %v12969_v63, 0.0  ;;  %v14485_v63 = vld [vmem:[#allocation15 + $0x3c0] ss:$24 sps:$4 sm:$0xff]   ;;  %v14493_v53 = vld [vmem:[#allocation15 + $0x3f4] ss:$24 sps:$4 sm:$0xff]  }
 0x823   :  { %v7338_v32 = vmax.f32 %v12970_v17, 0.0  ;;  %10076 = vmatmul.mubr.bf16.vlgmr.msra.gmra.mrb[152].mxu1 %v17422_v51  ;;  %10341 = vmatmul.mubr.bf16.vlgmr.msra.gmra.mrb[176].mxu0 %v17422_v51 }
 0x824   :  { %v7339_v22 = vmax.f32 %v12971_v4, 0.0  ;;  %10097 = vmatpush1.bf16.msra.mxu1 %v14461_v34  ;;  %10362 = vmatpush1.bf16.msra.mxu0 %v14464_v33 }
 0x825   :  { %v7356_v9 = vmax.f32 %v7335_v8, %v7338_v32  ;;  %10098 = vmatprep.subr.bf16.mxu1 %v14469_v20  ;;  %10363 = vmatprep.subr.bf16.mxu0 %v14472_v61  ;;  %v14496_v20 = vld [vmem:[#allocation15 + $0x3fc] ss:$24 sps:$4 sm:$0xff]  }
 0x826   :  { %v7357_v10 = vmax.f32 %v7336_v16, %v7339_v22  ;;  %v6985_v5 = vpop.f32.mrb[168].mxu0  ;;  %v14494_v16 = vld [vmem:[#allocation15 + $0x3f8] ss:$24 sps:$4 sm:$0xff]  }
 0x827   :  { %v12972_v11 = vadd.f32 %v6985_v5, %v17406_v13  ;;  %v6987_v35 = vpop.f32.mrb[169].mxu0  ;;  %v17431_v21 = vpack.c.bf16 %v7356_v9, %v7353_v60  ;;  %v14505_v5 = vld [vmem:[#allocation15 + $0x454] ss:$24 sps:$4 sm:$0xff]  }
 0x828   :  { %v17433_v48 = vpack.c.bf16 %v7357_v10, %v7354_v0  ;;  %v12973_v1 = vadd.f32 %v6987_v35, %v17410_v40  ;;  %10099 = vmatpush1.bf16.msra.mxu1 %v14467_v42  ;;  %10364 = vmatpush1.bf16.msra.mxu0 %v14470_v19  ;;  %v6989_v62 = vpop.f32.mrb[170].mxu0  ;;  %v14502_v42 = vld [vmem:[#allocation15 + $0x42c] ss:$24 sps:$4 sm:$0xff]   ;;  %v14503_v35 = vld [vmem:[#allocation15 + $0x450] ss:$24 sps:$4 sm:$0xff]  }
 0x829   :  { %v12974_v15 = vadd.f32 %v6989_v62, %v17406_v13  ;;  %v6991_v36 = vpop.f32.mrb[171].mxu0  ;;  %10100 = vmatprep.subr.bf16.mxu1 %v14475_v2  ;;  %10365 = vmatprep.subr.bf16.mxu0 %v14478_v27  ;;  %v7341_v31 = vmax.f32 %v12972_v11, 0.0  ;;  %v14497_v2 = vld [vmem:[#allocation15 + $0x420] ss:$24 sps:$4 sm:$0xff]   ;;  %v14508_v11 = vld [vmem:[#allocation15 + $0x45c] ss:$24 sps:$4 sm:$0xff]  }
 0x82a   :  { %v12975_v58 = vadd.f32 %v6991_v36, %v17410_v40  ;;  %v7342_v26 = vmax.f32 %v12973_v1, 0.0  ;;  %v14500_v27 = vld [vmem:[#allocation15 + $0x428] ss:$24 sps:$4 sm:$0xff]   ;;  %v14506_v1 = vld [vmem:[#allocation15 + $0x458] ss:$24 sps:$4 sm:$0xff]  }
 0x82b   :  { %v7344_v52 = vmax.f32 %v12974_v15, 0.0  ;;  %v14511_v62 = vld [vmem:[#allocation15 + $0x484] ss:$24 sps:$4 sm:$0xff]   ;;  %v14512_v15 = vld [vmem:[#allocation15 + $0x488] ss:$24 sps:$4 sm:$0xff]  }
 0x82c   :  { %v7345_v29 = vmax.f32 %v12975_v58, 0.0  ;;  %10101 = vmatpush1.bf16.msra.mxu1 %v14473_v44  ;;  %10366 = vmatpush1.bf16.msra.mxu0 %v14476_v43  ;;  %v14514_v44 = vld [vmem:[#allocation15 + $0x48c] ss:$24 sps:$4 sm:$0xff]   ;;  %v14509_v43 = vld [vmem:[#allocation15 + $0x480] ss:$24 sps:$4 sm:$0xff]  }
 0x82d   :  { %v7359_v24 = vmax.f32 %v7341_v31, %v7344_v52  ;;  %10102 = vmatprep.subr.bf16.mxu1 %v14481_v46  ;;  %10367 = vmatprep.subr.bf16.mxu0 %v14484_v49  ;;  %v14517_v36 = vld [vmem:[#allocation15 + $0x4b4] ss:$24 sps:$4 sm:$0xff]   ;;  %v14515_v49 = vld [vmem:[#allocation15 + $0x4b0] ss:$24 sps:$4 sm:$0xff]   ;;  %v14523_v31 = vld [vmem:[#allocation15 + $0x4e4] ss:$24 sps:$4 sm:$0xff]  }
 0x82e   :  { %v7360_v38 = vmax.f32 %v7342_v26, %v7345_v29  ;;  %v6995_v23 = vpop.f32.mrb[172].mxu0  ;;  %v14520_v46 = vld [vmem:[#allocation15 + $0x4bc] ss:$24 sps:$4 sm:$0xff]   ;;  %v14518_v58 = vld [vmem:[#allocation15 + $0x4b8] ss:$24 sps:$4 sm:$0xff]  }
 0x82f   :  { %v17438_v30 = vpack.c.bf16 %v7359_v24, %v7356_v9  ;;  %v12976_v60 = vadd.f32 %v6995_v23, %v17406_v13  ;;  %v6997_v0 = vpop.f32.mrb[173].mxu0  ;;  %v14526_v52 = vld [vmem:[#allocation15 + $0x4ec] ss:$24 sps:$4 sm:$0xff]   ;;  %v14521_v26 = vld [vmem:[#allocation15 + $0x4e0] ss:$24 sps:$4 sm:$0xff]  }
 0x830   :  { %v17441_v12 = vpack.c.bf16 %v7360_v38, %v7357_v10  ;;  %v12977_v25 = vadd.f32 %v6997_v0, %v17410_v40  ;;  %10103 = vmatpush1.bf16.msra.mxu1 %v14479_v57  ;;  %10368 = vmatpush1.bf16.msra.mxu0 %v14482_v59  ;;  %v6999_v18 = vpop.f32.mrb[174].mxu0  ;;  %v14524_v29 = vld [vmem:[#allocation15 + $0x4e8] ss:$24 sps:$4 sm:$0xff]   ;;  %v14529_v57 = vld [vmem:[#allocation15 + $0x514] ss:$24 sps:$4 sm:$0xff]  }
 0x831   :  { %v12978_v34 = vadd.f32 %v6999_v18, %v17406_v13  ;;  %v7001_v33 = vpop.f32.mrb[175].mxu0  ;;  %10104 = vmatprep.subr.bf16.mxu1 %v14487_v55  ;;  %10369 = vmatprep.subr.bf16.mxu0 %v14490_v39  ;;  %v7347_v61 = vmax.f32 %v12976_v60, 0.0  ;;  %v14491_v13 = vld [vmem:[#allocation15 + $0x3f0] ss:$24 sps:$4 sm:$0xff]   ;;  %v14532_v59 = vld [vmem:[#allocation15 + $0x51c] ss:$24 sps:$4 sm:$0xff]  }
 0x832   :  { %v12979_v17 = vadd.f32 %v7001_v33, %v17410_v40  ;;  %10085 = vmatprep.mubr.bf16.mxu1 %v17441_v12  ;;  %10350 = vmatprep.mubr.bf16.mxu0 %v17441_v12  ;;  %v7348_v8 = vmax.f32 %v12977_v25, 0.0  ;;  %v14499_v40 = vld [vmem:[#allocation15 + $0x424] ss:$24 sps:$4 sm:$0xff]   ;;  %v14530_v55 = vld [vmem:[#allocation15 + $0x518] ss:$24 sps:$4 sm:$0xff]  }
 0x833   :  { %v7350_v4 = vmax.f32 %v12978_v34, 0.0  ;;  %10086 = vmatmul.mubr.bf16.gmra.mrb[156].mxu1 %v17438_v30  ;;  %10351 = vmatmul.mubr.bf16.gmra.mrb[180].mxu0 %v17438_v30  ;;  %v14535_v39 = vld [vmem:[#allocation15 + $0x544] ss:$24 sps:$4 sm:$0xff]   ;;  %v14533_v23 = vld [vmem:[#allocation15 + $0x540] ss:$24 sps:$4 sm:$0xff]  }
 0x834   :  { %v7351_v32 = vmax.f32 %v12979_v17, 0.0  ;;  %10105 = vmatpush1.bf16.msra.mxu1 %v14485_v63  ;;  %10370 = vmatpush1.bf16.msra.mxu0 %v14488_v41  ;;  %v14536_v60 = vld [vmem:[#allocation15 + $0x548] ss:$24 sps:$4 sm:$0xff]   ;;  %v14541_v0 = vld [vmem:[#allocation15 + $0x574] ss:$24 sps:$4 sm:$0xff]  }
 0x835   :  { %v17450_v22 = vmax.f32 %v7347_v61, %v7350_v4  ;;  %10128 = vmatprep.mubr.bf16.mxu1 %v17431_v21  ;;  %10393 = vmatprep.mubr.bf16.mxu0 %v17431_v21  ;;  %v14544_v25 = vld [vmem:[#allocation15 + $0x57c] ss:$24 sps:$4 sm:$0xff]   ;;  %v14539_v18 = vld [vmem:[#allocation15 + $0x570] ss:$24 sps:$4 sm:$0xff]   ;;  %v14550_v34 = vld [vmem:[#allocation15 + $0x5ac] ss:$24 sps:$4 sm:$0xff]  }
 0x836   :  { %v17454_v19 = vmax.f32 %v7348_v8, %v7351_v32  ;;  %10106 = vmatprep.subr.bf16.mxu1 %v14493_v53  ;;  %10371 = vmatprep.subr.bf16.mxu0 %v14496_v20  ;;  %v14542_v63 = vld [vmem:[#allocation15 + $0x578] ss:$24 sps:$4 sm:$0xff]   ;;  %v14547_v41 = vld [vmem:[#allocation15 + $0x5a4] ss:$24 sps:$4 sm:$0xff]   ;;  %v14548_v17 = vld [vmem:[#allocation15 + $0x5a8] ss:$24 sps:$4 sm:$0xff]  }
 0x837   :  { %v17457_v9 = vpack.c.bf16 %v17450_v22, %v7359_v24  ;;  %v14527_v24 = vld [vmem:[#allocation15 + $0x510] ss:$24 sps:$4 sm:$0xff]   ;;  %v14545_v33 = vld [vmem:[#allocation15 + $0x5a0] ss:$24 sps:$4 sm:$0xff]   ;;  %v14553_v53 = vld [vmem:[#allocation15 + $0x5d4] ss:$24 sps:$4 sm:$0xff]  }
 0x838   :  { %10107 = vmatpush1.bf16.msra.mxu1 %v14491_v13  ;;  %10372 = vmatpush1.bf16.msra.mxu0 %v14494_v16  ;;  %v17460_v10 = vpack.c.bf16 %v17454_v19, %v7360_v38  ;;  %v14538_v38 = vld [vmem:[#allocation15 + $0x54c] ss:$24 sps:$4 sm:$0xff]   ;;  %v14556_v20 = vld [vmem:[#allocation15 + $0x5dc] ss:$24 sps:$4 sm:$0xff]   ;;  %v14551_v61 = vld [vmem:[#allocation15 + $0x5d0] ss:$24 sps:$4 sm:$0xff]   ;;  %v17464_v16 = vpack.c.bf16 %v17392_v47, %v17734_v45 }
 0x839   :  { %10108 = vmatprep.subr.bf16.mxu1 %v14499_v40  ;;  %10373 = vmatprep.subr.bf16.mxu0 %v14502_v42  ;;  %v14554_v4 = vld [vmem:[#allocation15 + $0x5d8] ss:$24 sps:$4 sm:$0xff]   ;;  %v14559_v8 = vld [vmem:[#allocation15 + $0x604] ss:$24 sps:$4 sm:$0xff]   ;;  %v14560_v40 = vld [vmem:[#allocation15 + $0x608] ss:$24 sps:$4 sm:$0xff]  }
 0x83a   :  { %v14562_v32 = vld [vmem:[#allocation15 + $0x60c] ss:$24 sps:$4 sm:$0xff]   ;;  %v14557_v13 = vld [vmem:[#allocation15 + $0x600] ss:$24 sps:$4 sm:$0xff]  }
 0x83b   :  { %v14565_v42 = vld [vmem:[#allocation15 + $0x634] ss:$24 sps:$4 sm:$0xff]  }
 0x83c   :  { %10109 = vmatpush1.bf16.msra.mxu1 %v14497_v2  ;;  %10374 = vmatpush1.bf16.msra.mxu0 %v14500_v27  ;;  %v14568_v2 = vld [vmem:[#allocation15 + $0x63c] ss:$24 sps:$4 sm:$0xff]   ;;  %v14563_v27 = vld [vmem:[#allocation15 + $0x630] ss:$24 sps:$4 sm:$0xff]   ;;  %v14574_v47 = vld [vmem:[#allocation15 + $0x66c] ss:$24 sps:$4 sm:$0xff]  }
 0x83d   :  { %10110 = vmatprep.subr.bf16.mxu1 %v14505_v5  ;;  %10375 = vmatprep.subr.bf16.mxu0 %v14508_v11  ;;  %v14566_v5 = vld [vmem:[#allocation15 + $0x638] ss:$24 sps:$4 sm:$0xff]   ;;  %v14571_v11 = vld [vmem:[#allocation15 + $0x664] ss:$24 sps:$4 sm:$0xff]  }
 0x840   :  { %10111 = vmatpush1.bf16.msra.mxu1 %v14503_v35  ;;  %10376 = vmatpush1.bf16.msra.mxu0 %v14506_v1  ;;  %v14569_v35 = vld [vmem:[#allocation15 + $0x660] ss:$24 sps:$4 sm:$0xff]  }
 0x841   :  { %10112 = vmatprep.subr.bf16.mxu1 %v14511_v62  ;;  %10377 = vmatprep.subr.bf16.mxu0 %v14514_v44  ;;  %v14572_v1 = vld [vmem:[#allocation15 + $0x668] ss:$24 sps:$4 sm:$0xff]   ;;  %v14577_v62 = vld [vmem:[#allocation15 + $0x694] ss:$24 sps:$4 sm:$0xff]  }
 0x842   :  { %v14580_v44 = vld [vmem:[#allocation15 + $0x69c] ss:$24 sps:$4 sm:$0xff]  }
 0x844   :  { %10113 = vmatpush1.bf16.msra.mxu1 %v14509_v43  ;;  %10378 = vmatpush1.bf16.msra.mxu0 %v14512_v15  ;;  %v14575_v43 = vld [vmem:[#allocation15 + $0x690] ss:$24 sps:$4 sm:$0xff]  }
 0x845   :  { %10114 = vmatprep.subr.bf16.mxu1 %v14517_v36  ;;  %10379 = vmatprep.subr.bf16.mxu0 %v14520_v46  ;;  %v14578_v15 = vld [vmem:[#allocation15 + $0x698] ss:$24 sps:$4 sm:$0xff]   ;;  %v14583_v36 = vld [vmem:[#allocation15 + $0x6c4] ss:$24 sps:$4 sm:$0xff]  }
 0x846   :  { %v14586_v46 = vld [vmem:[#allocation15 + $0x6cc] ss:$24 sps:$4 sm:$0xff]  }
 0x848   :  { %10115 = vmatpush1.bf16.msra.mxu1 %v14515_v49  ;;  %10380 = vmatpush1.bf16.msra.mxu0 %v14518_v58  ;;  %v14581_v49 = vld [vmem:[#allocation15 + $0x6c0] ss:$24 sps:$4 sm:$0xff]  }
 0x849   :  { %10116 = vmatprep.subr.bf16.mxu1 %v14523_v31  ;;  %10381 = vmatprep.subr.bf16.mxu0 %v14526_v52  ;;  %v14584_v58 = vld [vmem:[#allocation15 + $0x6c8] ss:$24 sps:$4 sm:$0xff]   ;;  %v14589_v31 = vld [vmem:[#allocation15 + $0x6f4] ss:$24 sps:$4 sm:$0xff]  }
 0x84a   :  { %v14592_v52 = vld [vmem:[#allocation15 + $0x6fc] ss:$24 sps:$4 sm:$0xff]  }
 0x84c   :  { %10117 = vmatpush1.bf16.msra.mxu1 %v14521_v26  ;;  %10382 = vmatpush1.bf16.msra.mxu0 %v14524_v29  ;;  %v14587_v26 = vld [vmem:[#allocation15 + $0x6f0] ss:$24 sps:$4 sm:$0xff]  }
 0x84d   :  { %10118 = vmatprep.subr.bf16.mxu1 %v14529_v57  ;;  %10383 = vmatprep.subr.bf16.mxu0 %v14532_v59  ;;  %v14590_v29 = vld [vmem:[#allocation15 + $0x6f8] ss:$24 sps:$4 sm:$0xff]   ;;  %v14595_v57 = vld [vmem:[#allocation15 + $0x724] ss:$24 sps:$4 sm:$0xff]  }
 0x84e   :  { %v14598_v59 = vld [vmem:[#allocation15 + $0x72c] ss:$24 sps:$4 sm:$0xff]  }
 0x850   :  { %10119 = vmatpush1.bf16.msra.mxu1 %v14527_v24  ;;  %10384 = vmatpush1.bf16.msra.mxu0 %v14530_v55  ;;  %v14593_v24 = vld [vmem:[#allocation15 + $0x720] ss:$24 sps:$4 sm:$0xff]  }
 0x851   :  { %10120 = vmatprep.subr.bf16.mxu1 %v14535_v39  ;;  %10385 = vmatprep.subr.bf16.mxu0 %v14538_v38  ;;  %v14596_v55 = vld [vmem:[#allocation15 + $0x728] ss:$24 sps:$4 sm:$0xff]   ;;  %v14601_v39 = vld [vmem:[#allocation15 + $0x754] ss:$24 sps:$4 sm:$0xff]  }
 0x852   :  { %v14604_v38 = vld [vmem:[#allocation15 + $0x75c] ss:$24 sps:$4 sm:$0xff]  }
 0x854   :  { %10121 = vmatpush1.bf16.msra.mxu1 %v14533_v23  ;;  %10386 = vmatpush1.bf16.msra.mxu0 %v14536_v60  ;;  %v14599_v23 = vld [vmem:[#allocation15 + $0x750] ss:$24 sps:$4 sm:$0xff]  }
 0x855   :  { %10122 = vmatprep.subr.bf16.mxu1 %v14541_v0  ;;  %10387 = vmatprep.subr.bf16.mxu0 %v14544_v25  ;;  %v14602_v60 = vld [vmem:[#allocation15 + $0x758] ss:$24 sps:$4 sm:$0xff]   ;;  %v14607_v0 = vld [vmem:[#allocation15 + $0x784] ss:$24 sps:$4 sm:$0xff]  }
 0x856   :  { %v14610_v25 = vld [vmem:[#allocation15 + $0x78c] ss:$24 sps:$4 sm:$0xff]  }
 0x858   :  { %10123 = vmatpush1.bf16.msra.mxu1 %v14539_v18  ;;  %10388 = vmatpush1.bf16.msra.mxu0 %v14542_v63  ;;  %v14605_v18 = vld [vmem:[#allocation15 + $0x780] ss:$24 sps:$4 sm:$0xff]  }
 0x859   :  { %10124 = vmatprep.subr.bf16.mxu1 %v14547_v41  ;;  %10389 = vmatprep.subr.bf16.mxu0 %v14550_v34  ;;  %v14608_v63 = vld [vmem:[#allocation15 + $0x788] ss:$24 sps:$4 sm:$0xff]   ;;  %v14613_v41 = vld [vmem:[#allocation15 + $0x7b4] ss:$24 sps:$4 sm:$0xff]  }
 0x85a   :  { %v14616_v34 = vld [vmem:[#allocation15 + $0x7bc] ss:$24 sps:$4 sm:$0xff]  }
 0x85c   :  { %10125 = vmatpush1.bf16.msra.mxu1 %v14545_v33  ;;  %10390 = vmatpush1.bf16.msra.mxu0 %v14548_v17  ;;  %v14611_v33 = vld [vmem:[#allocation15 + $0x7b0] ss:$24 sps:$4 sm:$0xff]  }
 0x85d   :  { %10126 = vmatprep.subr.bf16.mxu1 %v14553_v53  ;;  %10391 = vmatprep.subr.bf16.mxu0 %v14556_v20  ;;  %v14614_v17 = vld [vmem:[#allocation15 + $0x7b8] ss:$24 sps:$4 sm:$0xff]   ;;  %v14619_v53 = vld [vmem:[#allocation15 + $0x7e4] ss:$24 sps:$4 sm:$0xff]  }
 0x85e   :  { %v14622_v20 = vld [vmem:[#allocation15 + $0x7ec] ss:$24 sps:$4 sm:$0xff]  }
 0x860   :  { %10127 = vmatpush1.bf16.msra.mxu1 %v14551_v61  ;;  %10392 = vmatpush1.bf16.msra.mxu0 %v14554_v4  ;;  %v14617_v61 = vld [vmem:[#allocation15 + $0x7e0] ss:$24 sps:$4 sm:$0xff]  }
 0x861   :  { %10149 = vmatprep.subr.bf16.mxu1 %v14559_v8  ;;  %10414 = vmatprep.subr.bf16.mxu0 %v14562_v32  ;;  %v14620_v4 = vld [vmem:[#allocation15 + $0x7e8] ss:$24 sps:$4 sm:$0xff]   ;;  %v14625_v8 = vld [vmem:[#allocation15 + $0x814] ss:$24 sps:$4 sm:$0xff]  }
 0x862   :  { %v14628_v32 = vld [vmem:[#allocation15 + $0x81c] ss:$24 sps:$4 sm:$0xff]  }
 0x863   :  { %10129 = vmatmul.mubr.bf16.vlgmr.msra.gmra.mrb[152].mxu1 %v17464_v16  ;;  %10394 = vmatmul.mubr.bf16.vlgmr.msra.gmra.mrb[176].mxu0 %v17464_v16 }
 0x864   :  { %10138 = vmatprep.mubr.bf16.mxu1 %v17457_v9  ;;  %10150 = vmatpush1.bf16.msra.mxu1 %v14557_v13  ;;  %v14623_v13 = vld [vmem:[#allocation15 + $0x810] ss:$24 sps:$4 sm:$0xff]  }
 0x865   :  { %10403 = vmatprep.mubr.bf16.mxu0 %v17457_v9  ;;  %10415 = vmatpush1.bf16.msra.mxu0 %v14560_v40  ;;  %v14626_v40 = vld [vmem:[#allocation15 + $0x818] ss:$24 sps:$4 sm:$0xff]  }
 0x866   :  { %10151 = vmatprep.subr.bf16.mxu1 %v14565_v42  ;;  %10416 = vmatprep.subr.bf16.mxu0 %v14568_v2  ;;  %v14631_v42 = vld [vmem:[#allocation15 + $0x844] ss:$24 sps:$4 sm:$0xff]  }
 0x867   :  { %v14634_v2 = vld [vmem:[#allocation15 + $0x84c] ss:$24 sps:$4 sm:$0xff]  }
 0x868   :  { %10152 = vmatpush1.bf16.msra.mxu1 %v14563_v27  ;;  %v14629_v27 = vld [vmem:[#allocation15 + $0x840] ss:$24 sps:$4 sm:$0xff]  }
 0x869   :  { %10417 = vmatpush1.bf16.msra.mxu0 %v14566_v5  ;;  %10153 = vmatprep.subr.bf16.mxu1 %v14571_v11  ;;  %v14632_v5 = vld [vmem:[#allocation15 + $0x848] ss:$24 sps:$4 sm:$0xff]   ;;  %v14637_v11 = vld [vmem:[#allocation15 + $0x874] ss:$24 sps:$4 sm:$0xff]  }
 0x86a   :  { %10418 = vmatprep.subr.bf16.mxu0 %v14574_v47  ;;  %v14640_v47 = vld [vmem:[#allocation15 + $0x87c] ss:$24 sps:$4 sm:$0xff]  }
 0x86b   :  { %10139 = vmatmul.mubr.bf16.gmra.mrb[156].mxu1 %v17399_v28  ;;  %10404 = vmatmul.mubr.bf16.gmra.mrb[180].mxu0 %v17399_v28 }
 0x86c   :  { %10154 = vmatpush1.bf16.msra.mxu1 %v14569_v35  ;;  %10181 = vmatprep.mubr.bf16.mxu1 %v17395_v6  ;;  %v14635_v35 = vld [vmem:[#allocation15 + $0x870] ss:$24 sps:$4 sm:$0xff]  }
 0x86d   :  { %10419 = vmatpush1.bf16.msra.mxu0 %v14572_v1  ;;  %10446 = vmatprep.mubr.bf16.mxu0 %v17395_v6  ;;  %v14638_v1 = vld [vmem:[#allocation15 + $0x878] ss:$24 sps:$4 sm:$0xff]  }
 0x86e   :  { %10155 = vmatprep.subr.bf16.mxu1 %v14577_v62  ;;  %10420 = vmatprep.subr.bf16.mxu0 %v14580_v44  ;;  %v14643_v62 = vld [vmem:[#allocation15 + $0x8a4] ss:$24 sps:$4 sm:$0xff]  }
 0x86f   :  { %v14646_v44 = vld [vmem:[#allocation15 + $0x8ac] ss:$24 sps:$4 sm:$0xff]  }
 0x870   :  { %10156 = vmatpush1.bf16.msra.mxu1 %v14575_v43  ;;  %v14641_v43 = vld [vmem:[#allocation15 + $0x8a0] ss:$24 sps:$4 sm:$0xff]  }
 0x871   :  { %10421 = vmatpush1.bf16.msra.mxu0 %v14578_v15  ;;  %10157 = vmatprep.subr.bf16.mxu1 %v14583_v36  ;;  %v14644_v15 = vld [vmem:[#allocation15 + $0x8a8] ss:$24 sps:$4 sm:$0xff]   ;;  %v14649_v36 = vld [vmem:[#allocation15 + $0x8d4] ss:$24 sps:$4 sm:$0xff]  }
 0x872   :  { %10422 = vmatprep.subr.bf16.mxu0 %v14586_v46  ;;  %v14652_v46 = vld [vmem:[#allocation15 + $0x8dc] ss:$24 sps:$4 sm:$0xff]  }
 0x874   :  { %10158 = vmatpush1.bf16.msra.mxu1 %v14581_v49  ;;  %v14647_v49 = vld [vmem:[#allocation15 + $0x8d0] ss:$24 sps:$4 sm:$0xff]  }
 0x875   :  { %10423 = vmatpush1.bf16.msra.mxu0 %v14584_v58  ;;  %10159 = vmatprep.subr.bf16.mxu1 %v14589_v31  ;;  %v14650_v58 = vld [vmem:[#allocation15 + $0x8d8] ss:$24 sps:$4 sm:$0xff]   ;;  %v14655_v31 = vld [vmem:[#allocation15 + $0x904] ss:$24 sps:$4 sm:$0xff]  }
 0x876   :  { %10424 = vmatprep.subr.bf16.mxu0 %v14592_v52  ;;  %v14658_v52 = vld [vmem:[#allocation15 + $0x90c] ss:$24 sps:$4 sm:$0xff]  }
 0x878   :  { %10160 = vmatpush1.bf16.msra.mxu1 %v14587_v26  ;;  %v14653_v26 = vld [vmem:[#allocation15 + $0x900] ss:$24 sps:$4 sm:$0xff]  }
 0x879   :  { %10425 = vmatpush1.bf16.msra.mxu0 %v14590_v29  ;;  %10161 = vmatprep.subr.bf16.mxu1 %v14595_v57  ;;  %v14656_v29 = vld [vmem:[#allocation15 + $0x908] ss:$24 sps:$4 sm:$0xff]   ;;  %v14661_v57 = vld [vmem:[#allocation15 + $0x934] ss:$24 sps:$4 sm:$0xff]  }
 0x87a   :  { %10426 = vmatprep.subr.bf16.mxu0 %v14598_v59  ;;  %v14664_v59 = vld [vmem:[#allocation15 + $0x93c] ss:$24 sps:$4 sm:$0xff]  }
 0x87c   :  { %10162 = vmatpush1.bf16.msra.mxu1 %v14593_v24  ;;  %v14659_v24 = vld [vmem:[#allocation15 + $0x930] ss:$24 sps:$4 sm:$0xff]  }
 0x87d   :  { %10427 = vmatpush1.bf16.msra.mxu0 %v14596_v55  ;;  %10163 = vmatprep.subr.bf16.mxu1 %v14601_v39  ;;  %v14662_v55 = vld [vmem:[#allocation15 + $0x938] ss:$24 sps:$4 sm:$0xff]   ;;  %v14667_v39 = vld [vmem:[#allocation15 + $0x964] ss:$24 sps:$4 sm:$0xff]  }
 0x87e   :  { %10428 = vmatprep.subr.bf16.mxu0 %v14604_v38  ;;  %v14670_v38 = vld [vmem:[#allocation15 + $0x96c] ss:$24 sps:$4 sm:$0xff]  }
 0x880   :  { %10164 = vmatpush1.bf16.msra.mxu1 %v14599_v23  ;;  %v14665_v23 = vld [vmem:[#allocation15 + $0x960] ss:$24 sps:$4 sm:$0xff]  }
 0x881   :  { %10429 = vmatpush1.bf16.msra.mxu0 %v14602_v60  ;;  %10165 = vmatprep.subr.bf16.mxu1 %v14607_v0  ;;  %v14668_v60 = vld [vmem:[#allocation15 + $0x968] ss:$24 sps:$4 sm:$0xff]   ;;  %v14673_v0 = vld [vmem:[#allocation15 + $0x994] ss:$24 sps:$4 sm:$0xff]  }
 0x882   :  { %10430 = vmatprep.subr.bf16.mxu0 %v14610_v25  ;;  %v14676_v25 = vld [vmem:[#allocation15 + $0x99c] ss:$24 sps:$4 sm:$0xff]  }
 0x884   :  { %10166 = vmatpush1.bf16.msra.mxu1 %v14605_v18  ;;  %v14671_v18 = vld [vmem:[#allocation15 + $0x990] ss:$24 sps:$4 sm:$0xff]  }
 0x885   :  { %10431 = vmatpush1.bf16.msra.mxu0 %v14608_v63  ;;  %10167 = vmatprep.subr.bf16.mxu1 %v14613_v41  ;;  %v14674_v63 = vld [vmem:[#allocation15 + $0x998] ss:$24 sps:$4 sm:$0xff]   ;;  %v14679_v41 = vld [vmem:[#allocation15 + $0x9c4] ss:$24 sps:$4 sm:$0xff]  }
 0x886   :  { %10432 = vmatprep.subr.bf16.mxu0 %v14616_v34  ;;  %v14682_v34 = vld [vmem:[#allocation15 + $0x9cc] ss:$24 sps:$4 sm:$0xff]  }
 0x888   :  { %10168 = vmatpush1.bf16.msra.mxu1 %v14611_v33  ;;  %v14677_v33 = vld [vmem:[#allocation15 + $0x9c0] ss:$24 sps:$4 sm:$0xff]  }
 0x889   :  { %10433 = vmatpush1.bf16.msra.mxu0 %v14614_v17  ;;  %10169 = vmatprep.subr.bf16.mxu1 %v14619_v53  ;;  %v14680_v17 = vld [vmem:[#allocation15 + $0x9c8] ss:$24 sps:$4 sm:$0xff]   ;;  %v14685_v53 = vld [vmem:[#allocation15 + $0x9f4] ss:$24 sps:$4 sm:$0xff]  }
 0x88a   :  { %10434 = vmatprep.subr.bf16.mxu0 %v14622_v20  ;;  %v14688_v20 = vld [vmem:[#allocation15 + $0x9fc] ss:$24 sps:$4 sm:$0xff]  }
 0x88c   :  { %10170 = vmatpush1.bf16.msra.mxu1 %v14617_v61  ;;  %v14683_v61 = vld [vmem:[#allocation15 + $0x9f0] ss:$24 sps:$4 sm:$0xff]  }
 0x88d   :  { %10435 = vmatpush1.bf16.msra.mxu0 %v14620_v4  ;;  %10171 = vmatprep.subr.bf16.mxu1 %v14625_v8  ;;  %v14686_v4 = vld [vmem:[#allocation15 + $0x9f8] ss:$24 sps:$4 sm:$0xff]   ;;  %v14691_v8 = vld [vmem:[#allocation15 + $0xa24] ss:$24 sps:$4 sm:$0xff]  }
 0x88e   :  { %10436 = vmatprep.subr.bf16.mxu0 %v14628_v32  ;;  %v14694_v32 = vld [vmem:[#allocation15 + $0xa2c] ss:$24 sps:$4 sm:$0xff]  }
 0x890   :  { %10172 = vmatpush1.bf16.msra.mxu1 %v14623_v13  ;;  %v14689_v13 = vld [vmem:[#allocation15 + $0xa20] ss:$24 sps:$4 sm:$0xff]  }
 0x891   :  { %10437 = vmatpush1.bf16.msra.mxu0 %v14626_v40  ;;  %10173 = vmatprep.subr.bf16.mxu1 %v14631_v42  ;;  %v14692_v40 = vld [vmem:[#allocation15 + $0xa28] ss:$24 sps:$4 sm:$0xff]   ;;  %v14697_v42 = vld [vmem:[#allocation15 + $0xa54] ss:$24 sps:$4 sm:$0xff]  }
 0x892   :  { %10438 = vmatprep.subr.bf16.mxu0 %v14634_v2  ;;  %v14700_v2 = vld [vmem:[#allocation15 + $0xa5c] ss:$24 sps:$4 sm:$0xff]  }
 0x894   :  { %10174 = vmatpush1.bf16.msra.mxu1 %v14629_v27  ;;  %v14695_v27 = vld [vmem:[#allocation15 + $0xa50] ss:$24 sps:$4 sm:$0xff]  }
 0x895   :  { %10439 = vmatpush1.bf16.msra.mxu0 %v14632_v5  ;;  %10175 = vmatprep.subr.bf16.mxu1 %v14637_v11  ;;  %v14698_v5 = vld [vmem:[#allocation15 + $0xa58] ss:$24 sps:$4 sm:$0xff]   ;;  %v14703_v11 = vld [vmem:[#allocation15 + $0xa84] ss:$24 sps:$4 sm:$0xff]  }
 0x896   :  { %10440 = vmatprep.subr.bf16.mxu0 %v14640_v47  ;;  %v14706_v47 = vld [vmem:[#allocation15 + $0xa8c] ss:$24 sps:$4 sm:$0xff]  }
 0x898   :  { %10176 = vmatpush1.bf16.msra.mxu1 %v14635_v35  ;;  %v14701_v35 = vld [vmem:[#allocation15 + $0xa80] ss:$24 sps:$4 sm:$0xff]  }
 0x899   :  { %10441 = vmatpush1.bf16.msra.mxu0 %v14638_v1  ;;  %10177 = vmatprep.subr.bf16.mxu1 %v14643_v62  ;;  %v14704_v1 = vld [vmem:[#allocation15 + $0xa88] ss:$24 sps:$4 sm:$0xff]   ;;  %v14709_v62 = vld [vmem:[#allocation15 + $0xab4] ss:$24 sps:$4 sm:$0xff]  }
 0x89a   :  { %10442 = vmatprep.subr.bf16.mxu0 %v14646_v44  ;;  %v14712_v44 = vld [vmem:[#allocation15 + $0xabc] ss:$24 sps:$4 sm:$0xff]  }
 0x89c   :  { %10178 = vmatpush1.bf16.msra.mxu1 %v14641_v43  ;;  %v14707_v43 = vld [vmem:[#allocation15 + $0xab0] ss:$24 sps:$4 sm:$0xff]  }
 0x89d   :  { %10443 = vmatpush1.bf16.msra.mxu0 %v14644_v15  ;;  %10179 = vmatprep.subr.bf16.mxu1 %v14649_v36  ;;  %v14710_v15 = vld [vmem:[#allocation15 + $0xab8] ss:$24 sps:$4 sm:$0xff]   ;;  %v14715_v36 = vld [vmem:[#allocation15 + $0xae4] ss:$24 sps:$4 sm:$0xff]  }
 0x89e   :  { %10444 = vmatprep.subr.bf16.mxu0 %v14652_v46  ;;  %v14718_v46 = vld [vmem:[#allocation15 + $0xaec] ss:$24 sps:$4 sm:$0xff]  }
 0x8a0   :  { %10180 = vmatpush1.bf16.msra.mxu1 %v14647_v49  ;;  %v14713_v49 = vld [vmem:[#allocation15 + $0xae0] ss:$24 sps:$4 sm:$0xff]  }
 0x8a1   :  { %10445 = vmatpush1.bf16.msra.mxu0 %v14650_v58  ;;  %10202 = vmatprep.subr.bf16.mxu1 %v14655_v31  ;;  %v14716_v58 = vld [vmem:[#allocation15 + $0xae8] ss:$24 sps:$4 sm:$0xff]   ;;  %v14721_v31 = vld [vmem:[#allocation15 + $0xb14] ss:$24 sps:$4 sm:$0xff]  }
 0x8a2   :  { %10467 = vmatprep.subr.bf16.mxu0 %v14658_v52  ;;  %v14724_v52 = vld [vmem:[#allocation15 + $0xb1c] ss:$24 sps:$4 sm:$0xff]  }
 0x8a3   :  { %10182 = vmatmul.mubr.bf16.vlgmr.msra.gmra.mrb[152].mxu1 %v17433_v48 }
 0x8a4   :  { %10447 = vmatmul.mubr.bf16.vlgmr.msra.gmra.mrb[176].mxu0 %v17433_v48  ;;  %10191 = vmatprep.mubr.bf16.mxu1 %v17402_v50 }
 0x8a5   :  { %10203 = vmatpush1.bf16.msra.mxu1 %v14653_v26  ;;  %10456 = vmatprep.mubr.bf16.mxu0 %v17402_v50  ;;  %v14719_v26 = vld [vmem:[#allocation15 + $0xb10] ss:$24 sps:$4 sm:$0xff]  }
 0x8a6   :  { %10468 = vmatpush1.bf16.msra.mxu0 %v14656_v29  ;;  %10204 = vmatprep.subr.bf16.mxu1 %v14661_v57  ;;  %v14722_v29 = vld [vmem:[#allocation15 + $0xb18] ss:$24 sps:$4 sm:$0xff]   ;;  %v14727_v57 = vld [vmem:[#allocation15 + $0xb44] ss:$24 sps:$4 sm:$0xff]  }
 0x8a7   :  { %10469 = vmatprep.subr.bf16.mxu0 %v14664_v59  ;;  %v14730_v59 = vld [vmem:[#allocation15 + $0xb4c] ss:$24 sps:$4 sm:$0xff]  }
 0x8a9   :  { %10205 = vmatpush1.bf16.msra.mxu1 %v14659_v24  ;;  %v14725_v24 = vld [vmem:[#allocation15 + $0xb40] ss:$24 sps:$4 sm:$0xff]  }
 0x8aa   :  { %10470 = vmatpush1.bf16.msra.mxu0 %v14662_v55  ;;  %10206 = vmatprep.subr.bf16.mxu1 %v14667_v39  ;;  %v14728_v55 = vld [vmem:[#allocation15 + $0xb48] ss:$24 sps:$4 sm:$0xff]   ;;  %v14733_v39 = vld [vmem:[#allocation15 + $0xb74] ss:$24 sps:$4 sm:$0xff]  }
 0x8ab   :  { %10192 = vmatmul.mubr.bf16.gmra.mrb[156].mxu1 %v17460_v10  ;;  %10471 = vmatprep.subr.bf16.mxu0 %v14670_v38  ;;  %v14736_v38 = vld [vmem:[#allocation15 + $0xb7c] ss:$24 sps:$4 sm:$0xff]  }
 0x8ac   :  { %10457 = vmatmul.mubr.bf16.gmra.mrb[180].mxu0 %v17460_v10  ;;  %10234 = vmatprep.mubr.bf16.mxu1 %v17441_v12 }
 0x8ad   :  { %10207 = vmatpush1.bf16.msra.mxu1 %v14665_v23  ;;  %10499 = vmatprep.mubr.bf16.mxu0 %v17441_v12  ;;  %v14731_v23 = vld [vmem:[#allocation15 + $0xb70] ss:$24 sps:$4 sm:$0xff]  }
 0x8ae   :  { %10472 = vmatpush1.bf16.msra.mxu0 %v14668_v60  ;;  %10208 = vmatprep.subr.bf16.mxu1 %v14673_v0  ;;  %v14734_v60 = vld [vmem:[#allocation15 + $0xb78] ss:$24 sps:$4 sm:$0xff]   ;;  %v14739_v0 = vld [vmem:[#allocation15 + $0xba4] ss:$24 sps:$4 sm:$0xff]  }
 0x8af   :  { %10473 = vmatprep.subr.bf16.mxu0 %v14676_v25  ;;  %v14742_v25 = vld [vmem:[#allocation15 + $0xbac] ss:$24 sps:$4 sm:$0xff]  }
 0x8b1   :  { %10209 = vmatpush1.bf16.msra.mxu1 %v14671_v18  ;;  %v14737_v18 = vld [vmem:[#allocation15 + $0xba0] ss:$24 sps:$4 sm:$0xff]  }
 0x8b2   :  { %10474 = vmatpush1.bf16.msra.mxu0 %v14674_v63  ;;  %10210 = vmatprep.subr.bf16.mxu1 %v14679_v41  ;;  %v14740_v63 = vld [vmem:[#allocation15 + $0xba8] ss:$24 sps:$4 sm:$0xff]   ;;  %v14745_v41 = vld [vmem:[#allocation15 + $0xbd4] ss:$24 sps:$4 sm:$0xff]  }
 0x8b3   :  { %10475 = vmatprep.subr.bf16.mxu0 %v14682_v34  ;;  %v14748_v34 = vld [vmem:[#allocation15 + $0xbdc] ss:$24 sps:$4 sm:$0xff]  }
 0x8b5   :  { %10211 = vmatpush1.bf16.msra.mxu1 %v14677_v33  ;;  %v14743_v33 = vld [vmem:[#allocation15 + $0xbd0] ss:$24 sps:$4 sm:$0xff]  }
 0x8b6   :  { %10476 = vmatpush1.bf16.msra.mxu0 %v14680_v17  ;;  %10212 = vmatprep.subr.bf16.mxu1 %v14685_v53  ;;  %v14746_v17 = vld [vmem:[#allocation15 + $0xbd8] ss:$24 sps:$4 sm:$0xff]   ;;  %v14751_v53 = vld [vmem:[#allocation15 + $0xc04] ss:$24 sps:$4 sm:$0xff]  }
 0x8b7   :  { %10477 = vmatprep.subr.bf16.mxu0 %v14688_v20  ;;  %v14754_v20 = vld [vmem:[#allocation15 + $0xc0c] ss:$24 sps:$4 sm:$0xff]  }
 0x8b9   :  { %10213 = vmatpush1.bf16.msra.mxu1 %v14683_v61  ;;  %v14749_v61 = vld [vmem:[#allocation15 + $0xc00] ss:$24 sps:$4 sm:$0xff]  }
 0x8ba   :  { %10478 = vmatpush1.bf16.msra.mxu0 %v14686_v4  ;;  %10214 = vmatprep.subr.bf16.mxu1 %v14691_v8  ;;  %v14752_v4 = vld [vmem:[#allocation15 + $0xc08] ss:$24 sps:$4 sm:$0xff]   ;;  %v17484_v8 = vpack.c.bf16 %v17734_v45, %v17454_v19  ;;  %v17492_v19 = vpack.c.bf16 %v17734_v45, %v17450_v22  ;;  %v14770_v22 = vld [vmem:[#allocation15 + $0xc98] ss:$24 sps:$4 sm:$0xff]  }
 0x8bb   :  { %10479 = vmatprep.subr.bf16.mxu0 %v14694_v32  ;;  %v14757_v32 = vld [vmem:[#allocation15 + $0xc34] ss:$24 sps:$4 sm:$0xff]  }
 0x8bd   :  { %10215 = vmatpush1.bf16.msra.mxu1 %v14689_v13  ;;  %v14760_v13 = vld [vmem:[#allocation15 + $0xc3c] ss:$24 sps:$4 sm:$0xff]  }
 0x8be   :  { %10480 = vmatpush1.bf16.msra.mxu0 %v14692_v40  ;;  %10216 = vmatprep.subr.bf16.mxu1 %v14697_v42  ;;  %v14755_v40 = vld [vmem:[#allocation15 + $0xc30] ss:$24 sps:$4 sm:$0xff]  }
 0x8bf   :  { %10481 = vmatprep.subr.bf16.mxu0 %v14700_v2  ;;  %v14758_v42 = vld [vmem:[#allocation15 + $0xc38] ss:$24 sps:$4 sm:$0xff]   ;;  %v14763_v2 = vld [vmem:[#allocation15 + $0xc64] ss:$24 sps:$4 sm:$0xff]  }
 0x8c1   :  { %10217 = vmatpush1.bf16.msra.mxu1 %v14695_v27  ;;  %v14766_v27 = vld [vmem:[#allocation15 + $0xc6c] ss:$24 sps:$4 sm:$0xff]  }
 0x8c2   :  { %10482 = vmatpush1.bf16.msra.mxu0 %v14698_v5  ;;  %10218 = vmatprep.subr.bf16.mxu1 %v14703_v11  ;;  %v14761_v5 = vld [vmem:[#allocation15 + $0xc60] ss:$24 sps:$4 sm:$0xff]  }
 0x8c3   :  { %10483 = vmatprep.subr.bf16.mxu0 %v14706_v47  ;;  %v14764_v11 = vld [vmem:[#allocation15 + $0xc68] ss:$24 sps:$4 sm:$0xff]   ;;  %v14769_v47 = vld [vmem:[#allocation15 + $0xc94] ss:$24 sps:$4 sm:$0xff]  }
 0x8c5   :  { %10219 = vmatpush1.bf16.msra.mxu1 %v14701_v35  ;;  %v14772_v35 = vld [vmem:[#allocation15 + $0xc9c] ss:$24 sps:$4 sm:$0xff]  }
 0x8c6   :  { %10484 = vmatpush1.bf16.msra.mxu0 %v14704_v1  ;;  %10220 = vmatprep.subr.bf16.mxu1 %v14709_v62  ;;  %v14767_v1 = vld [vmem:[#allocation15 + $0xc90] ss:$24 sps:$4 sm:$0xff]   ;;  %v14775_v62 = vld [vmem:[#allocation15 + $0xcc4] ss:$24 sps:$4 sm:$0xff]  }
 0x8c7   :  { %10485 = vmatprep.subr.bf16.mxu0 %v14712_v44  ;;  %v14778_v44 = vld [vmem:[#allocation15 + $0xccc] ss:$24 sps:$4 sm:$0xff]  }
 0x8c9   :  { %10221 = vmatpush1.bf16.msra.mxu1 %v14707_v43  ;;  %v14773_v43 = vld [vmem:[#allocation15 + $0xcc0] ss:$24 sps:$4 sm:$0xff]  }
 0x8ca   :  { %10486 = vmatpush1.bf16.msra.mxu0 %v14710_v15  ;;  %10222 = vmatprep.subr.bf16.mxu1 %v14715_v36  ;;  %v14776_v15 = vld [vmem:[#allocation15 + $0xcc8] ss:$24 sps:$4 sm:$0xff]   ;;  %v14781_v36 = vld [vmem:[#allocation15 + $0xcf4] ss:$24 sps:$4 sm:$0xff]  }
 0x8cb   :  { %10487 = vmatprep.subr.bf16.mxu0 %v14718_v46  ;;  %v14784_v46 = vld [vmem:[#allocation15 + $0xcfc] ss:$24 sps:$4 sm:$0xff]  }
 0x8cd   :  { %10223 = vmatpush1.bf16.msra.mxu1 %v14713_v49  ;;  %v14779_v49 = vld [vmem:[#allocation15 + $0xcf0] ss:$24 sps:$4 sm:$0xff]  }
 0x8ce   :  { %10488 = vmatpush1.bf16.msra.mxu0 %v14716_v58  ;;  %10224 = vmatprep.subr.bf16.mxu1 %v14721_v31  ;;  %v14782_v58 = vld [vmem:[#allocation15 + $0xcf8] ss:$24 sps:$4 sm:$0xff]   ;;  %v14787_v31 = vld [vmem:[#allocation15 + $0xd24] ss:$24 sps:$4 sm:$0xff]  }
 0x8cf   :  { %10489 = vmatprep.subr.bf16.mxu0 %v14724_v52  ;;  %v14790_v52 = vld [vmem:[#allocation15 + $0xd2c] ss:$24 sps:$4 sm:$0xff]  }
 0x8d1   :  { %10225 = vmatpush1.bf16.msra.mxu1 %v14719_v26  ;;  %v14785_v26 = vld [vmem:[#allocation15 + $0xd20] ss:$24 sps:$4 sm:$0xff]  }
 0x8d2   :  { %10490 = vmatpush1.bf16.msra.mxu0 %v14722_v29  ;;  %10226 = vmatprep.subr.bf16.mxu1 %v14727_v57  ;;  %v14788_v29 = vld [vmem:[#allocation15 + $0xd28] ss:$24 sps:$4 sm:$0xff]   ;;  %v14793_v57 = vld [vmem:[#allocation15 + $0xd54] ss:$24 sps:$4 sm:$0xff]  }
 0x8d3   :  { %10491 = vmatprep.subr.bf16.mxu0 %v14730_v59  ;;  %v14796_v59 = vld [vmem:[#allocation15 + $0xd5c] ss:$24 sps:$4 sm:$0xff]  }
 0x8d5   :  { %10227 = vmatpush1.bf16.msra.mxu1 %v14725_v24  ;;  %v14791_v24 = vld [vmem:[#allocation15 + $0xd50] ss:$24 sps:$4 sm:$0xff]  }
 0x8d6   :  { %10492 = vmatpush1.bf16.msra.mxu0 %v14728_v55  ;;  %10228 = vmatprep.subr.bf16.mxu1 %v14733_v39  ;;  %v14794_v55 = vld [vmem:[#allocation15 + $0xd58] ss:$24 sps:$4 sm:$0xff]   ;;  %v14799_v39 = vld [vmem:[#allocation15 + $0x14] ss:$24 sps:$4 sm:$0xff]  }
 0x8d7   :  { %10493 = vmatprep.subr.bf16.mxu0 %v14736_v38  ;;  %v14797_v38 = vld [vmem:[#allocation15 + $0x10] ss:$24 sps:$4 sm:$0xff]  }
 0x8d9   :  { %10229 = vmatpush1.bf16.msra.mxu1 %v14731_v23  ;;  %v14802_v23 = vld [vmem:[#allocation15 + $0x44] ss:$24 sps:$4 sm:$0xff]  }
 0x8da   :  { %10494 = vmatpush1.bf16.msra.mxu0 %v14734_v60  ;;  %10230 = vmatprep.subr.bf16.mxu1 %v14739_v0  ;;  %v14800_v60 = vld [vmem:[#allocation15 + $0x40] ss:$24 sps:$4 sm:$0xff]   ;;  %v14805_v0 = vld [vmem:[#allocation15 + $0x74] ss:$24 sps:$4 sm:$0xff]  }
 0x8db   :  { %10495 = vmatprep.subr.bf16.mxu0 %v14742_v25  ;;  %v14803_v25 = vld [vmem:[#allocation15 + $0x70] ss:$24 sps:$4 sm:$0xff]  }
 0x8dd   :  { %10231 = vmatpush1.bf16.msra.mxu1 %v14737_v18  ;;  %v17504_v18 = vpack.c.bf16 %v17734_v45, %v17397_v37  ;;  %v14817_v45 = vld [vmem:[#allocation15 + $0x134] ss:$24 sps:$4 sm:$0xff]   ;;  %v14815_v37 = vld [vmem:[#allocation15 + $0x130] ss:$24 sps:$4 sm:$0xff]  }
 0x8de   :  { %10496 = vmatpush1.bf16.msra.mxu0 %v14740_v63  ;;  %10232 = vmatprep.subr.bf16.mxu1 %v14745_v41  ;;  %v14808_v63 = vld [vmem:[#allocation15 + $0xa4] ss:$24 sps:$4 sm:$0xff]   ;;  %v14806_v41 = vld [vmem:[#allocation15 + $0xa0] ss:$24 sps:$4 sm:$0xff]  }
 0x8df   :  { %10497 = vmatprep.subr.bf16.mxu0 %v14748_v34  ;;  %v14811_v34 = vld [vmem:[#allocation15 + $0xd4] ss:$24 sps:$4 sm:$0xff]  }
 0x8e1   :  { %10233 = vmatpush1.bf16.msra.mxu1 %v14743_v33  ;;  %v14809_v33 = vld [vmem:[#allocation15 + $0xd0] ss:$24 sps:$4 sm:$0xff]  }
 0x8e2   :  { %10498 = vmatpush1.bf16.msra.mxu0 %v14746_v17  ;;  %10255 = vmatprep.subr.bf16.mxu1 %v14751_v53  ;;  %v14814_v17 = vld [vmem:[#allocation15 + $0x104] ss:$24 sps:$4 sm:$0xff]   ;;  %v14812_v53 = vld [vmem:[#allocation15 + $0x100] ss:$24 sps:$4 sm:$0xff]  }
 0x8e3   :  { %10520 = vmatprep.subr.bf16.mxu0 %v14754_v20  ;;  %v14820_v20 = vld [vmem:[#allocation15 + $0x164] ss:$24 sps:$4 sm:$0xff]  }
 0x8e4   :  { %10235 = vmatmul.mubr.bf16.vlgmr.msra.gmra.mrb[152].mxu1 %v17438_v30 }
 0x8e5   :  { %10500 = vmatmul.mubr.bf16.vlgmr.msra.gmra.mrb[176].mxu0 %v17438_v30  ;;  %10244 = vmatprep.mubr.bf16.mxu1 %v17484_v8 }
 0x8e6   :  { %10256 = vmatpush1.bf16.msra.mxu1 %v14749_v61  ;;  %10509 = vmatprep.mubr.bf16.mxu0 %v17484_v8  ;;  %v14818_v61 = vld [vmem:[#allocation15 + $0x160] ss:$24 sps:$4 sm:$0xff]  }
 0x8e7   :  { %10521 = vmatpush1.bf16.msra.mxu0 %v14752_v4  ;;  %10257 = vmatprep.subr.bf16.mxu1 %v14757_v32  ;;  %v14823_v4 = vld [vmem:[#allocation15 + $0x194] ss:$24 sps:$4 sm:$0xff]   ;;  %v14826_v32 = vld [vmem:[#allocation15 + $0x1c4] ss:$24 sps:$4 sm:$0xff]  }
 0x8e8   :  { %10522 = vmatprep.subr.bf16.mxu0 %v14760_v13  ;;  %v14824_v13 = vld [vmem:[#allocation15 + $0x1c0] ss:$24 sps:$4 sm:$0xff]  }
 0x8ea   :  { %10258 = vmatpush1.bf16.msra.mxu1 %v14755_v40  ;;  %v14829_v40 = vld [vmem:[#allocation15 + $0x1f4] ss:$24 sps:$4 sm:$0xff]  }
 0x8eb   :  { %10523 = vmatpush1.bf16.msra.mxu0 %v14758_v42  ;;  %10259 = vmatprep.subr.bf16.mxu1 %v14763_v2  ;;  %v14827_v42 = vld [vmem:[#allocation15 + $0x1f0] ss:$24 sps:$4 sm:$0xff]   ;;  %v14832_v2 = vld [vmem:[#allocation15 + $0x224] ss:$24 sps:$4 sm:$0xff]  }
 0x8ec   :  { %10245 = vmatmul.mubr.bf16.gmra.mrb[156].mxu1 %v17492_v19  ;;  %10524 = vmatprep.subr.bf16.mxu0 %v14766_v27  ;;  %v14830_v27 = vld [vmem:[#allocation15 + $0x220] ss:$24 sps:$4 sm:$0xff]  }
 0x8ed   :  { %10510 = vmatmul.mubr.bf16.gmra.mrb[180].mxu0 %v17492_v19  ;;  %10287 = vmatprep.mubr.bf16.mxu1 %v17746_v7 }
 0x8ee   :  { %10260 = vmatpush1.bf16.msra.mxu1 %v14761_v5  ;;  %10552 = vmatprep.mubr.bf16.mxu0 %v17746_v7  ;;  %v14835_v5 = vld [vmem:[#allocation15 + $0x254] ss:$24 sps:$4 sm:$0xff]  }
 0x8ef   :  { %10525 = vmatpush1.bf16.msra.mxu0 %v14764_v11  ;;  %10261 = vmatprep.subr.bf16.mxu1 %v14769_v47  ;;  %v14833_v11 = vld [vmem:[#allocation15 + $0x250] ss:$24 sps:$4 sm:$0xff]   ;;  %v14838_v47 = vld [vmem:[#allocation15 + $0x284] ss:$24 sps:$4 sm:$0xff]  }
 0x8f0   :  { %10526 = vmatprep.subr.bf16.mxu0 %v14772_v35  ;;  %v14836_v35 = vld [vmem:[#allocation15 + $0x280] ss:$24 sps:$4 sm:$0xff]  }
 0x8f2   :  { %10262 = vmatpush1.bf16.msra.mxu1 %v14767_v1  ;;  %v14841_v1 = vld [vmem:[#allocation15 + $0x2b4] ss:$24 sps:$4 sm:$0xff]  }
 0x8f3   :  { %10527 = vmatpush1.bf16.msra.mxu0 %v14770_v22  ;;  %10263 = vmatprep.subr.bf16.mxu1 %v14775_v62  ;;  %v14839_v22 = vld [vmem:[#allocation15 + $0x2b0] ss:$24 sps:$4 sm:$0xff]   ;;  %v14844_v62 = vld [vmem:[#allocation15 + $0x2e4] ss:$24 sps:$4 sm:$0xff]  }
 0x8f4   :  { %10528 = vmatprep.subr.bf16.mxu0 %v14778_v44  ;;  %v14842_v44 = vld [vmem:[#allocation15 + $0x2e0] ss:$24 sps:$4 sm:$0xff]  }
 0x8f6   :  { %10264 = vmatpush1.bf16.msra.mxu1 %v14773_v43  ;;  %v14847_v43 = vld [vmem:[#allocation15 + $0x314] ss:$24 sps:$4 sm:$0xff]  }
 0x8f7   :  { %10529 = vmatpush1.bf16.msra.mxu0 %v14776_v15  ;;  %10265 = vmatprep.subr.bf16.mxu1 %v14781_v36  ;;  %v14845_v15 = vld [vmem:[#allocation15 + $0x310] ss:$24 sps:$4 sm:$0xff]   ;;  %v14850_v36 = vld [vmem:[#allocation15 + $0x344] ss:$24 sps:$4 sm:$0xff]  }
 0x8f8   :  { %10530 = vmatprep.subr.bf16.mxu0 %v14784_v46  ;;  %v14848_v46 = vld [vmem:[#allocation15 + $0x340] ss:$24 sps:$4 sm:$0xff]  }
 0x8fa   :  { %10266 = vmatpush1.bf16.msra.mxu1 %v14779_v49  ;;  %v14853_v49 = vld [vmem:[#allocation15 + $0x374] ss:$24 sps:$4 sm:$0xff]  }
 0x8fb   :  { %10531 = vmatpush1.bf16.msra.mxu0 %v14782_v58  ;;  %10267 = vmatprep.subr.bf16.mxu1 %v14787_v31  ;;  %v14851_v58 = vld [vmem:[#allocation15 + $0x370] ss:$24 sps:$4 sm:$0xff]   ;;  %v14856_v31 = vld [vmem:[#allocation15 + $0x3a4] ss:$24 sps:$4 sm:$0xff]  }
 0x8fc   :  { %10532 = vmatprep.subr.bf16.mxu0 %v14790_v52  ;;  %v14854_v52 = vld [vmem:[#allocation15 + $0x3a0] ss:$24 sps:$4 sm:$0xff]  }
 0x8fe   :  { %10268 = vmatpush1.bf16.msra.mxu1 %v14785_v26  ;;  %v14859_v26 = vld [vmem:[#allocation15 + $0x3d4] ss:$24 sps:$4 sm:$0xff]  }
 0x8ff   :  { %10533 = vmatpush1.bf16.msra.mxu0 %v14788_v29  ;;  %10269 = vmatprep.subr.bf16.mxu1 %v14793_v57  ;;  %v14954_v29 = vld [vmem:[%s17703_s11] sm:$0xff]   ;;  %v14857_v57 = vld [vmem:[#allocation15 + $0x3d0] ss:$24 sps:$4 sm:$0xff]  }
 0x900   :  { %10534 = vmatprep.subr.bf16.mxu0 %v14796_v59  ;;  %v14955_v59 = vld [vmem:[%s17703_s11 + $0x48] sm:$0xff]  }
 0x902   :  { %10270 = vmatpush1.bf16.msra.mxu1 %v14791_v24  ;;  %v14959_v24 = vld [vmem:[%s17703_s11 + $0x8] sm:$0xff]  }
 0x903   :  { %10535 = vmatpush1.bf16.msra.mxu0 %v14794_v55  ;;  %10573 = vmatprep.subr.bf16.mxu1 %v14799_v39  ;;  %v14860_v55 = vld [vmem:[#allocation15 + $0x400] ss:$24 sps:$4 sm:$0xff]   ;;  %v14865_v39 = vld [vmem:[#allocation15 + $0x434] ss:$24 sps:$4 sm:$0xff]  }
 0x905   :  { %10288 = vmatmul.mubr.bf16.vlgmr.msra.gmra.mrb[152].mxu1 %v17399_v28 }
 0x906   :  { %10553 = vmatmul.mubr.bf16.vlgmr.msra.gmra.mrb[176].mxu0 %v17399_v28  ;;  %10574 = vmatpush1.bf16.msra.mxu1 %v14797_v38  ;;  %v14960_v38 = vld [vmem:[%s17703_s11 + $0x50] sm:$0xff]  }
 0x907   :  { %10575 = vmatprep.subr.bf16.mxu1 %v14802_v23  ;;  %10297 = vmatprep.mubr.bf16.mxu1 %v17746_v7  ;;  %v14964_v23 = vld [vmem:[%s17703_s11 + $0x10] sm:$0xff]  }
 0x908   :  { %10562 = vmatprep.mubr.bf16.mxu0 %v17746_v7 }
 0x90a   :  { %10576 = vmatpush1.bf16.msra.mxu1 %v14800_v60  ;;  %v14863_v60 = vld [vmem:[#allocation15 + $0x430] ss:$24 sps:$4 sm:$0xff]  }
 0x90b   :  { %10577 = vmatprep.subr.bf16.mxu1 %v14805_v0  ;;  %v14868_v0 = vld [vmem:[#allocation15 + $0x464] ss:$24 sps:$4 sm:$0xff]  }
 0x90d   :  { %10298 = vmatmul.mubr.bf16.gmra.mrb[156].mxu1 %v17504_v18 }
 0x90e   :  { %10563 = vmatmul.mubr.bf16.gmra.mrb[180].mxu0 %v17504_v18  ;;  %10578 = vmatpush1.bf16.msra.mxu1 %v14803_v25  ;;  %v14965_v25 = vld [vmem:[%s17703_s11 + $0x58] sm:$0xff]  }
 0x90f   :  { %10605 = vmatprep.mubr.bf16.mxu1 %v17419_v54  ;;  %10579 = vmatprep.subr.bf16.mxu1 %v14808_v63  ;;  %v14821_v54 = vld [vmem:[#allocation15 + $0x190] ss:$24 sps:$4 sm:$0xff]   ;;  %v14969_v63 = vld [vmem:[%s17703_s11 + $0x18] sm:$0xff]  }
 0x912   :  { %10580 = vmatpush1.bf16.msra.mxu1 %v14806_v41  ;;  %v14866_v41 = vld [vmem:[#allocation15 + $0x460] ss:$24 sps:$4 sm:$0xff]  }
 0x913   :  { %10581 = vmatprep.subr.bf16.mxu1 %v14811_v34  ;;  %v14871_v34 = vld [vmem:[#allocation15 + $0x494] ss:$24 sps:$4 sm:$0xff]  }
 0x916   :  { %10582 = vmatpush1.bf16.msra.mxu1 %v14809_v33  ;;  %v14970_v33 = vld [vmem:[%s17703_s11 + $0x60] sm:$0xff]  }
 0x917   :  { %10583 = vmatprep.subr.bf16.mxu1 %v14814_v17  ;;  %v14974_v17 = vld [vmem:[%s17703_s11 + $0x20] sm:$0xff]  }
 0x91a   :  { %10584 = vmatpush1.bf16.msra.mxu1 %v14812_v53  ;;  %v14869_v53 = vld [vmem:[#allocation15 + $0x490] ss:$24 sps:$4 sm:$0xff]  }
 0x91b   :  { %10585 = vmatprep.subr.bf16.mxu1 %v14817_v45  ;;  %v14874_v45 = vld [vmem:[#allocation15 + $0x4c4] ss:$24 sps:$4 sm:$0xff]  }
 0x91e   :  { %10586 = vmatpush1.bf16.msra.mxu1 %v14815_v37  ;;  %v14975_v37 = vld [vmem:[%s17703_s11 + $0x68] sm:$0xff]  }
 0x91f   :  { %10587 = vmatprep.subr.bf16.mxu1 %v14820_v20  ;;  %v14979_v20 = vld [vmem:[%s17703_s11 + $0x28] sm:$0xff]  }
 0x922   :  { %10588 = vmatpush1.bf16.msra.mxu1 %v14818_v61  ;;  %v14872_v61 = vld [vmem:[#allocation15 + $0x4c0] ss:$24 sps:$4 sm:$0xff]  }
 0x923   :  { %10589 = vmatprep.subr.bf16.mxu1 %v14823_v4  ;;  %v14877_v4 = vld [vmem:[#allocation15 + $0x4f4] ss:$24 sps:$4 sm:$0xff]  }
 0x926   :  { %10590 = vmatpush1.bf16.msra.mxu1 %v14821_v54  ;;  %v14980_v54 = vld [vmem:[%s17703_s11 + $0x70] sm:$0xff]  }
 0x927   :  { %10591 = vmatprep.subr.bf16.mxu1 %v14826_v32  ;;  %v14984_v32 = vld [vmem:[%s17703_s11 + $0x30] sm:$0xff]  }
 0x92a   :  { %10592 = vmatpush1.bf16.msra.mxu1 %v14824_v13  ;;  %v14875_v13 = vld [vmem:[#allocation15 + $0x4f0] ss:$24 sps:$4 sm:$0xff]  }
 0x92b   :  { %10593 = vmatprep.subr.bf16.mxu1 %v14829_v40  ;;  %v14880_v40 = vld [vmem:[#allocation15 + $0x524] ss:$24 sps:$4 sm:$0xff]  }
 0x92e   :  { %10594 = vmatpush1.bf16.msra.mxu1 %v14827_v42  ;;  %v14985_v42 = vld [vmem:[%s17703_s11 + $0x78] sm:$0xff]  }
 0x92f   :  { %10595 = vmatprep.subr.bf16.mxu1 %v14832_v2  ;;  %v14989_v2 = vld [vmem:[%s17703_s11 + $0x38] sm:$0xff]  }
 0x932   :  { %10596 = vmatpush1.bf16.msra.mxu1 %v14830_v27  ;;  %v14878_v27 = vld [vmem:[#allocation15 + $0x520] ss:$24 sps:$4 sm:$0xff]  }
 0x933   :  { %10597 = vmatprep.subr.bf16.mxu1 %v14835_v5  ;;  %v14883_v5 = vld [vmem:[#allocation15 + $0x554] ss:$24 sps:$4 sm:$0xff]  }
 0x936   :  { %10598 = vmatpush1.bf16.msra.mxu1 %v14833_v11  ;;  %v14990_v11 = vld [vmem:[%s17703_s11 + $0xc0] sm:$0xff]  }
 0x937   :  { %10599 = vmatprep.subr.bf16.mxu1 %v14838_v47  ;;  %v14881_v47 = vld [vmem:[#allocation15 + $0x550] ss:$24 sps:$4 sm:$0xff]  }
 0x93a   :  { %10600 = vmatpush1.bf16.msra.mxu1 %v14836_v35  ;;  %v14886_v35 = vld [vmem:[#allocation15 + $0x584] ss:$24 sps:$4 sm:$0xff]  }
 0x93b   :  { %10601 = vmatprep.subr.bf16.mxu1 %v14841_v1  ;;  %v14884_v1 = vld [vmem:[#allocation15 + $0x580] ss:$24 sps:$4 sm:$0xff]  }
 0x93e   :  { %10602 = vmatpush1.bf16.msra.mxu1 %v14839_v22  ;;  %v14889_v22 = vld [vmem:[#allocation15 + $0x5b4] ss:$24 sps:$4 sm:$0xff]  }
 0x93f   :  { %10603 = vmatprep.subr.bf16.mxu1 %v14844_v62  ;;  %v14887_v62 = vld [vmem:[#allocation15 + $0x5b0] ss:$24 sps:$4 sm:$0xff]  }
 0x942   :  { %10604 = vmatpush1.bf16.msra.mxu1 %v14842_v44  ;;  %v14892_v44 = vld [vmem:[#allocation15 + $0x5e4] ss:$24 sps:$4 sm:$0xff]  }
 0x943   :  { %10626 = vmatprep.subr.bf16.mxu1 %v14847_v43  ;;  %v14890_v43 = vld [vmem:[#allocation15 + $0x5e0] ss:$24 sps:$4 sm:$0xff]  }
 0x945   :  { %10606 = vmatmul.mubr.bf16.vlgmr.msra.gmra.mrb[160].mxu1 %v17422_v51  ;;  %v14950_v51 = vld [vmem:[%s17703_s11 + $0x40] sm:$0xff]  }
 0x946   :  { %10615 = vmatprep.mubr.bf16.mxu1 %v17441_v12  ;;  %10627 = vmatpush1.bf16.msra.mxu1 %v14845_v15  ;;  %v14895_v15 = vld [vmem:[#allocation15 + $0x614] ss:$24 sps:$4 sm:$0xff]  }
 0x947   :  { %10628 = vmatprep.subr.bf16.mxu1 %v14850_v36  ;;  %12684 = vmatprep.subr.bf16.mxu0 %v14950_v51  ;;  %v14893_v36 = vld [vmem:[#allocation15 + $0x610] ss:$24 sps:$4 sm:$0xff]   ;;  %v14902_v51 = vld [vmem:[#allocation15 + $0x6a0] ss:$24 sps:$4 sm:$0xff]  }
 0x948   :  { %12685 = vmatpush3.bf16.msra.mxu0 %v14954_v29  ;;  %v14908_v29 = vld [vmem:[#allocation15 + $0x700] ss:$24 sps:$4 sm:$0xff]  }
 0x949   :  { %12686 = vmatprep.subr.bf16.mxu0 %v14955_v59  ;;  %v14911_v59 = vld [vmem:[#allocation15 + $0x730] ss:$24 sps:$4 sm:$0xff]  }
 0x94a   :  { %10629 = vmatpush1.bf16.msra.mxu1 %v14848_v46  ;;  %v14898_v46 = vld [vmem:[#allocation15 + $0x644] ss:$24 sps:$4 sm:$0xff]  }
 0x94b   :  { %10630 = vmatprep.subr.bf16.mxu1 %v14853_v49  ;;  %v14896_v49 = vld [vmem:[#allocation15 + $0x640] ss:$24 sps:$4 sm:$0xff]  }
 0x94c   :  { %12687 = vmatpush3.bf16.msra.mxu0 %v14959_v24  ;;  %v14914_v24 = vld [vmem:[#allocation15 + $0x760] ss:$24 sps:$4 sm:$0xff]  }
 0x94d   :  { %10616 = vmatmul.mubr.bf16.gmra.mrb[164].mxu1 %v17438_v30  ;;  %12688 = vmatprep.subr.bf16.mxu0 %v14960_v38  ;;  %v14920_v38 = vld [vmem:[#allocation15 + $0x7c0] ss:$24 sps:$4 sm:$0xff]  }
 0x94e   :  { %10631 = vmatpush1.bf16.msra.mxu1 %v14851_v58  ;;  %10658 = vmatprep.mubr.bf16.mxu1 %v17431_v21  ;;  %v14862_v21 = vld [vmem:[#allocation15 + $0x404] ss:$24 sps:$4 sm:$0xff]   ;;  %v14901_v58 = vld [vmem:[#allocation15 + $0x674] ss:$24 sps:$4 sm:$0xff]  }
 0x94f   :  { %10632 = vmatprep.subr.bf16.mxu1 %v14856_v31  ;;  %v14899_v31 = vld [vmem:[#allocation15 + $0x670] ss:$24 sps:$4 sm:$0xff]  }
 0x950   :  { %12689 = vmatpush3.bf16.msra.mxu0 %v14964_v23  ;;  %v14925_v23 = vld [vmem:[#allocation15 + $0x7f4] ss:$24 sps:$4 sm:$0xff]  }
 0x951   :  { %12690 = vmatprep.subr.bf16.mxu0 %v14965_v25  ;;  %v14926_v25 = vld [vmem:[#allocation15 + $0x820] ss:$24 sps:$4 sm:$0xff]  }
 0x952   :  { %10633 = vmatpush1.bf16.msra.mxu1 %v14854_v52  ;;  %v14904_v52 = vld [vmem:[#allocation15 + $0x6a4] ss:$24 sps:$4 sm:$0xff]  }
 0x953   :  { %10634 = vmatprep.subr.bf16.mxu1 %v14859_v26  ;;  %v14907_v26 = vld [vmem:[#allocation15 + $0x6d4] ss:$24 sps:$4 sm:$0xff]  }
 0x954   :  { %12691 = vmatpush3.bf16.msra.mxu0 %v14969_v63  ;;  %v14931_v63 = vld [vmem:[#allocation15 + $0x854] ss:$24 sps:$4 sm:$0xff]  }
 0x955   :  { %12692 = vmatprep.subr.bf16.mxu0 %v14970_v33  ;;  %v14932_v33 = vld [vmem:[#allocation15 + $0x880] ss:$24 sps:$4 sm:$0xff]  }
 0x956   :  { %10635 = vmatpush1.bf16.msra.mxu1 %v14857_v57  ;;  %v14913_v57 = vld [vmem:[#allocation15 + $0x734] ss:$24 sps:$4 sm:$0xff]  }
 0x957   :  { %10636 = vmatprep.subr.bf16.mxu1 %v14862_v21  ;;  %v14916_v21 = vld [vmem:[#allocation15 + $0x764] ss:$24 sps:$4 sm:$0xff]  }
 0x958   :  { %12693 = vmatpush3.bf16.msra.mxu0 %v14974_v17  ;;  %v14937_v17 = vld [vmem:[#allocation15 + $0x8b4] ss:$24 sps:$4 sm:$0xff]  }
 0x959   :  { %12694 = vmatprep.subr.bf16.mxu0 %v14975_v37  ;;  %v14938_v37 = vld [vmem:[#allocation15 + $0x8e0] ss:$24 sps:$4 sm:$0xff]  }
 0x95a   :  { %10637 = vmatpush1.bf16.msra.mxu1 %v14860_v55  ;;  %v14919_v55 = vld [vmem:[#allocation15 + $0x794] ss:$24 sps:$4 sm:$0xff]  }
 0x95b   :  { %10638 = vmatprep.subr.bf16.mxu1 %v14865_v39  ;;  %v14922_v39 = vld [vmem:[#allocation15 + $0x7c4] ss:$24 sps:$4 sm:$0xff]  }
 0x95c   :  { %12695 = vmatpush3.bf16.msra.mxu0 %v14979_v20  ;;  %v14943_v20 = vld [vmem:[#allocation15 + $0x914] ss:$24 sps:$4 sm:$0xff]  }
 0x95d   :  { %12696 = vmatprep.subr.bf16.mxu0 %v14980_v54  ;;  %v14944_v54 = vld [vmem:[#allocation15 + $0x940] ss:$24 sps:$4 sm:$0xff]  }
 0x95e   :  { %10639 = vmatpush1.bf16.msra.mxu1 %v14863_v60  ;;  %v14923_v60 = vld [vmem:[#allocation15 + $0x7f0] ss:$24 sps:$4 sm:$0xff]  }
 0x95f   :  { %10640 = vmatprep.subr.bf16.mxu1 %v14868_v0  ;;  %v14928_v0 = vld [vmem:[#allocation15 + $0x824] ss:$24 sps:$4 sm:$0xff]  }
 0x960   :  { %12697 = vmatpush3.bf16.msra.mxu0 %v14984_v32  ;;  %v14949_v32 = vld [vmem:[#allocation15 + $0x974] ss:$24 sps:$4 sm:$0xff]  }
 0x961   :  { %12698 = vmatprep.subr.bf16.mxu0 %v14985_v42  ;;  %v14951_v42 = vld [vmem:[#allocation15 + $0x9a0] ss:$24 sps:$4 sm:$0xff]  }
 0x962   :  { %10641 = vmatpush1.bf16.msra.mxu1 %v14866_v41  ;;  %v14929_v41 = vld [vmem:[#allocation15 + $0x850] ss:$24 sps:$4 sm:$0xff]  }
 0x963   :  { %10642 = vmatprep.subr.bf16.mxu1 %v14871_v34  ;;  %v14934_v34 = vld [vmem:[#allocation15 + $0x884] ss:$24 sps:$4 sm:$0xff]  }
 0x964   :  { %12699 = vmatpush3.bf16.msra.mxu0 %v14989_v2  ;;  %v14958_v2 = vld [vmem:[#allocation15 + $0x9d4] ss:$24 sps:$4 sm:$0xff]  }
 0x965   :  { %12706 = vmatprep.subr.bf16.mxu0 %v14990_v11  ;;  %v14963_v11 = vld [vmem:[#allocation15 + $0xa04] ss:$24 sps:$4 sm:$0xff]  }
 0x966   :  { %10643 = vmatpush1.bf16.msra.mxu1 %v14869_v53  ;;  %v14935_v53 = vld [vmem:[#allocation15 + $0x8b0] ss:$24 sps:$4 sm:$0xff]  }
 0x967   :  { %10644 = vmatprep.subr.bf16.mxu1 %v14874_v45  ;;  %v14940_v45 = vld [vmem:[#allocation15 + $0x8e4] ss:$24 sps:$4 sm:$0xff]  }
 0x96a   :  { %10645 = vmatpush1.bf16.msra.mxu1 %v14872_v61  ;;  %v14941_v61 = vld [vmem:[#allocation15 + $0x910] ss:$24 sps:$4 sm:$0xff]  }
 0x96b   :  { %10646 = vmatprep.subr.bf16.mxu1 %v14877_v4  ;;  %v14946_v4 = vld [vmem:[#allocation15 + $0x944] ss:$24 sps:$4 sm:$0xff]  }
 0x96e   :  { %10647 = vmatpush1.bf16.msra.mxu1 %v14875_v13  ;;  %v14947_v13 = vld [vmem:[#allocation15 + $0x970] ss:$24 sps:$4 sm:$0xff]  }
 0x96f   :  { %10648 = vmatprep.subr.bf16.mxu1 %v14880_v40  ;;  %v14953_v40 = vld [vmem:[#allocation15 + $0x9a4] ss:$24 sps:$4 sm:$0xff]  }
 0x972   :  { %10649 = vmatpush1.bf16.msra.mxu1 %v14878_v27  ;;  %v17572_v27 = vld [vmem:[#allocation16] sm:$0x3f] }
 0x973   :  { %10650 = vmatprep.subr.bf16.mxu1 %v14883_v5 }
 0x976   :  { %10651 = vmatpush1.bf16.msra.mxu1 %v14881_v47  ;;  %v7856_v47 = vrot.slane %v17572_v27, %v17747_v56 }
 0x977   :  { %10652 = vmatprep.subr.bf16.mxu1 %v14886_v35  ;;  %v14961_v35 = vld [vmem:[#allocation15 + $0xa00] ss:$24 sps:$4 sm:$0xff]  }
 0x97a   :  { %10653 = vmatpush1.bf16.msra.mxu1 %v14884_v1 }
 0x97b   :  { %10654 = vmatprep.subr.bf16.mxu1 %v14889_v22  ;;  %v14968_v22 = vld [vmem:[#allocation15 + $0xa34] ss:$24 sps:$4 sm:$0xff]  }
 0x97e   :  { %10655 = vmatpush1.bf16.msra.mxu1 %v14887_v62 }
 0x97f   :  { %10656 = vmatprep.subr.bf16.mxu1 %v14892_v44 }
 0x982   :  { %10657 = vmatpush1.bf16.msra.mxu1 %v14890_v43 }
 0x983   :  { %10679 = vmatprep.subr.bf16.mxu1 %v14895_v15 }
 0x985   :  { %10659 = vmatmul.mubr.bf16.vlgmr.msra.gmra.mrb[160].mxu1 %v17464_v16  ;;  %v14905_v16 = vld [vmem:[#allocation15 + $0x6d0] ss:$24 sps:$4 sm:$0xff]  }
 0x986   :  { %10668 = vmatprep.mubr.bf16.mxu1 %v17457_v9  ;;  %10680 = vmatpush1.bf16.msra.mxu1 %v14893_v36  ;;  %v14910_v9 = vld [vmem:[#allocation15 + $0x704] ss:$24 sps:$4 sm:$0xff]  }
 0x987   :  { %10681 = vmatprep.subr.bf16.mxu1 %v14898_v46 }
 0x98a   :  { %10682 = vmatpush1.bf16.msra.mxu1 %v14896_v49 }
 0x98b   :  { %10683 = vmatprep.subr.bf16.mxu1 %v14901_v58  ;;  %v14966_v58 = vld [vmem:[#allocation15 + $0xa30] ss:$24 sps:$4 sm:$0xff]  }
 0x98d   :  { %10669 = vmatmul.mubr.bf16.gmra.mrb[164].mxu1 %v17399_v28 }
 0x98e   :  { %10684 = vmatpush1.bf16.msra.mxu1 %v14899_v31  ;;  %10711 = vmatprep.mubr.bf16.mxu1 %v17395_v6  ;;  %v14917_v6 = vld [vmem:[#allocation15 + $0x790] ss:$24 sps:$4 sm:$0xff]  }
 0x98f   :  { %10685 = vmatprep.subr.bf16.mxu1 %v14904_v52 }
 0x992   :  { %10686 = vmatpush1.bf16.msra.mxu1 %v14902_v51 }
 0x993   :  { %10687 = vmatprep.subr.bf16.mxu1 %v14907_v26 }
 0x996   :  { %10688 = vmatpush1.bf16.msra.mxu1 %v14905_v16 }
 0x997   :  { %10689 = vmatprep.subr.bf16.mxu1 %v14910_v9 }
 0x99a   :  { %10690 = vmatpush1.bf16.msra.mxu1 %v14908_v29 }
 0x99b   :  { %10691 = vmatprep.subr.bf16.mxu1 %v14913_v57 }
 0x99e   :  { %10692 = vmatpush1.bf16.msra.mxu1 %v14911_v59 }
 0x99f   :  { %10693 = vmatprep.subr.bf16.mxu1 %v14916_v21 }
 0x9a2   :  { %10694 = vmatpush1.bf16.msra.mxu1 %v14914_v24 }
 0x9a3   :  { %10695 = vmatprep.subr.bf16.mxu1 %v14919_v55 }
 0x9a6   :  { %10696 = vmatpush1.bf16.msra.mxu1 %v14917_v6 }
 0x9a7   :  { %10697 = vmatprep.subr.bf16.mxu1 %v14922_v39  ;;  %v14971_v39 = vld [vmem:[#allocation15 + $0xa60] ss:$24 sps:$4 sm:$0xff]  }
 0x9aa   :  { %10698 = vmatpush1.bf16.msra.mxu1 %v14920_v38 }
 0x9ab   :  { %10699 = vmatprep.subr.bf16.mxu1 %v14925_v23 }
 0x9ae   :  { %10700 = vmatpush1.bf16.msra.mxu1 %v14923_v60 }
 0x9af   :  { %10701 = vmatprep.subr.bf16.mxu1 %v14928_v0  ;;  %v14978_v0 = vld [vmem:[#allocation15 + $0xa94] ss:$24 sps:$4 sm:$0xff]  }
 0x9b2   :  { %10702 = vmatpush1.bf16.msra.mxu1 %v14926_v25 }
 0x9b3   :  { %10703 = vmatprep.subr.bf16.mxu1 %v14931_v63 }
 0x9b6   :  { %10704 = vmatpush1.bf16.msra.mxu1 %v14929_v41 }
 0x9b7   :  { %10705 = vmatprep.subr.bf16.mxu1 %v14934_v34 }
 0x9ba   :  { %10706 = vmatpush1.bf16.msra.mxu1 %v14932_v33 }
 0x9bb   :  { %10707 = vmatprep.subr.bf16.mxu1 %v14937_v17 }
 0x9be   :  { %10708 = vmatpush1.bf16.msra.mxu1 %v14935_v53 }
 0x9bf   :  { %10709 = vmatprep.subr.bf16.mxu1 %v14940_v45 }
 0x9c2   :  { %10710 = vmatpush1.bf16.msra.mxu1 %v14938_v37 }
 0x9c3   :  { %10732 = vmatprep.subr.bf16.mxu1 %v14943_v20 }
 0x9c5   :  { %10712 = vmatmul.mubr.bf16.vlgmr.msra.gmra.mrb[160].mxu1 %v17433_v48  ;;  %v14956_v48 = vld [vmem:[#allocation15 + $0x9d0] ss:$24 sps:$4 sm:$0xff]  }
 0x9c6   :  { %10721 = vmatprep.mubr.bf16.mxu1 %v17402_v50  ;;  %10733 = vmatpush1.bf16.msra.mxu1 %v14941_v61  ;;  %v17749_v50 = vld [vmem:[#allocation25_spill] sm:$0xff] }
 0x9c7   :  { %10734 = vmatprep.subr.bf16.mxu1 %v14946_v4  ;;  %v7867_v5 = vsub.s32 3, %v17749_v50  ;;  %v14976_v4 = vld [vmem:[#allocation15 + $0xa90] ss:$24 sps:$4 sm:$0xff]  }
 0x9c9   :  { %v7868_v1 = vrot.slane %v17572_v27, %v7867_v5 }
 0x9ca   :  { %10735 = vmatpush1.bf16.msra.mxu1 %v14944_v54 }
 0x9cb   :  { %10736 = vmatprep.subr.bf16.mxu1 %v14949_v32 }
 0x9cd   :  { %10722 = vmatmul.mubr.bf16.gmra.mrb[164].mxu1 %v17460_v10  ;;  %v7864_v10 = vrot.slane %v17572_v27, %v17745_v14 }
 0x9ce   :  { %10737 = vmatpush1.bf16.msra.mxu1 %v14947_v13  ;;  %10764 = vmatprep.mubr.bf16.mxu1 %v17441_v12  ;;  %v7860_v12 = vrot.slane %v17572_v27, %v17748_v3  ;;  %v14973_v3 = vld [vmem:[#allocation15 + $0xa64] ss:$24 sps:$4 sm:$0xff]  }
 0x9cf   :  { %10738 = vmatprep.subr.bf16.mxu1 %v14953_v40 }
 0x9d2   :  { %10739 = vmatpush1.bf16.msra.mxu1 %v14951_v42  ;;  %v14983_v42 = vld [vmem:[#allocation15 + $0xac4] ss:$24 sps:$4 sm:$0xff]  }
 0x9d3   :  { %10740 = vmatprep.subr.bf16.mxu1 %v14958_v2 }
 0x9d6   :  { %10741 = vmatpush1.bf16.msra.mxu1 %v14956_v48 }
 0x9d7   :  { %10742 = vmatprep.subr.bf16.mxu1 %v14963_v11 }
 0x9d8   :  { %v10289_v62 = vpop.f32.mrb[152].mxu1 }
 0x9d9   :  { %v12980_v44 = vadd.f32 %v10289_v62, %v7856_v47  ;;  %v10554_v43 = vpop.f32.mrb[176].mxu0  ;;  %v10291_v15 = vpop.f32.mrb[153].mxu1 }
 0x9da   :  { %v12988_v36 = vadd.f32 %v10554_v43, %v7864_v10  ;;  %v12981_v46 = vadd.f32 %v10291_v15, %v7860_v12  ;;  %v10556_v49 = vpop.f32.mrb[177].mxu0  ;;  %v10293_v56 = vpop.f32.mrb[154].mxu1  ;;  %10743 = vmatpush1.bf16.msra.mxu1 %v14961_v35 }
 0x9db   :  { %v12989_v31 = vadd.f32 %v10556_v49, %v7868_v1  ;;  %v12982_v14 = vadd.f32 %v10293_v56, %v7856_v47  ;;  %v10558_v52 = vpop.f32.mrb[178].mxu0  ;;  %v10295_v51 = vpop.f32.mrb[155].mxu1  ;;  %10744 = vmatprep.subr.bf16.mxu1 %v14968_v22  ;;  %v10838_v29 = vmax.f32 %v12980_v44, 0.0 }
 0x9dc   :  { %v12990_v26 = vadd.f32 %v10558_v52, %v7864_v10  ;;  %v12983_v16 = vadd.f32 %v10295_v51, %v7860_v12  ;;  %v10560_v9 = vpop.f32.mrb[179].mxu0  ;;  %v10840_v21 = vmax.f32 %v12988_v36, 0.0  ;;  %v10839_v24 = vmax.f32 %v12981_v46, 0.0  ;;  %v14981_v36 = vld [vmem:[#allocation15 + $0xac0] ss:$24 sps:$4 sm:$0xff]  }
 0x9dd   :  { %v10844_v57 = vmax.f32 %v12982_v14, 0.0  ;;  %v12991_v59 = vadd.f32 %v10560_v9, %v7868_v1  ;;  %v10841_v38 = vmax.f32 %v12989_v31, 0.0  ;;  %v14986_v52 = vld [vmem:[#allocation15 + $0xaf0] ss:$24 sps:$4 sm:$0xff]  }
 0x9de   :  { %v10846_v55 = vmax.f32 %v12990_v26, 0.0  ;;  %v10845_v6 = vmax.f32 %v12983_v16, 0.0  ;;  %10745 = vmatpush1.bf16.msra.mxu1 %v14966_v58 }
 0x9df   :  { %v10862_v23 = vmax.f32 %v10838_v29, %v10844_v57  ;;  %v10847_v60 = vmax.f32 %v12991_v59, 0.0  ;;  %10746 = vmatprep.subr.bf16.mxu1 %v14973_v3  ;;  %v14993_v3 = vld [vmem:[#allocation15 + $0xb24] ss:$24 sps:$4 sm:$0xff]   ;;  %v14991_v57 = vld [vmem:[#allocation15 + $0xb20] ss:$24 sps:$4 sm:$0xff]  }
 0x9e0   :  { %v10864_v25 = vmax.f32 %v10840_v21, %v10846_v55  ;;  %v10863_v63 = vmax.f32 %v10839_v24, %v10845_v6  ;;  %v10299_v41 = vpop.f32.mrb[156].mxu1  ;;  %v14994_v59 = vld [vmem:[%s17703_s11 + $0x80] sm:$0xff]   ;;  %v14995_v24 = vld [vmem:[%s17703_s11 + $0xc8] sm:$0xff]  }
 0x9e1   :  { %v10865_v34 = vmax.f32 %v10841_v38, %v10847_v60  ;;  %v12984_v33 = vadd.f32 %v10299_v41, %v7856_v47  ;;  %v10564_v17 = vpop.f32.mrb[180].mxu0  ;;  %v10301_v53 = vpop.f32.mrb[157].mxu1  ;;  %v14998_v55 = vld [vmem:[#allocation15 + $0xb54] ss:$24 sps:$4 sm:$0xff]   ;;  %v15003_v60 = vld [vmem:[#allocation15 + $0xb84] ss:$24 sps:$4 sm:$0xff]  }
 0x9e2   :  { %v12992_v45 = vadd.f32 %v10564_v17, %v7864_v10  ;;  %v12985_v37 = vadd.f32 %v10301_v53, %v7860_v12  ;;  %v10566_v20 = vpop.f32.mrb[181].mxu0  ;;  %v10303_v61 = vpop.f32.mrb[158].mxu1  ;;  %10747 = vmatpush1.bf16.msra.mxu1 %v14971_v39  ;;  %v14996_v39 = vld [vmem:[#allocation15 + $0xb50] ss:$24 sps:$4 sm:$0xff]   ;;  %v15008_v41 = vld [vmem:[#allocation15 + $0xbb4] ss:$24 sps:$4 sm:$0xff]  }
 0x9e3   :  { %v12993_v54 = vadd.f32 %v10566_v20, %v7868_v1  ;;  %v12986_v32 = vadd.f32 %v10303_v61, %v7856_v47  ;;  %v10568_v13 = vpop.f32.mrb[182].mxu0  ;;  %v10305_v40 = vpop.f32.mrb[159].mxu1  ;;  %10748 = vmatprep.subr.bf16.mxu1 %v14978_v0  ;;  %v10850_v11 = vmax.f32 %v12984_v33, 0.0  ;;  %v14988_v47 = vld [vmem:[#allocation15 + $0xaf4] ss:$24 sps:$4 sm:$0xff]   ;;  %v15009_v33 = vld [vmem:[%s17703_s11 + $0x98] sm:$0xff]  }
 0x9e4   :  { %v12994_v2 = vadd.f32 %v10568_v13, %v7864_v10  ;;  %v12987_v48 = vadd.f32 %v10305_v40, %v7860_v12  ;;  %v10570_v5 = vpop.f32.mrb[183].mxu0  ;;  %v10852_v62 = vmax.f32 %v12992_v45, 0.0  ;;  %v10851_v44 = vmax.f32 %v12985_v37, 0.0  ;;  %v14999_v38 = vld [vmem:[%s17703_s11 + $0x88] sm:$0xff]   ;;  %v15001_v0 = vld [vmem:[#allocation15 + $0xb80] ss:$24 sps:$4 sm:$0xff]  }
 0x9e5   :  { %v10856_v35 = vmax.f32 %v12986_v32, 0.0  ;;  %v12995_v22 = vadd.f32 %v10570_v5, %v7868_v1  ;;  %v10853_v46 = vmax.f32 %v12993_v54, 0.0  ;;  %v15010_v17 = vld [vmem:[%s17703_s11 + $0xe0] sm:$0xff]   ;;  %v15015_v20 = vld [vmem:[%s17703_s11 + $0xe8] sm:$0xff]   ;;  %v15020_v32 = vld [vmem:[%s17703_s11 + $0xf0] sm:$0xff]  }
 0x9e6   :  { %v10858_v43 = vmax.f32 %v12994_v2, 0.0  ;;  %v10857_v15 = vmax.f32 %v12987_v48, 0.0  ;;  %10749 = vmatpush1.bf16.msra.mxu1 %v14976_v4  ;;  %v15013_v53 = vld [vmem:[#allocation15 + $0xbe4] ss:$24 sps:$4 sm:$0xff]   ;;  %v15011_v45 = vld [vmem:[#allocation15 + $0xbe0] ss:$24 sps:$4 sm:$0xff]  }
 0x9e7   :  { %v10868_v49 = vmax.f32 %v10850_v11, %v10856_v35  ;;  %v10859_v56 = vmax.f32 %v12995_v22, 0.0  ;;  %10750 = vmatprep.subr.bf16.mxu1 %v14983_v42  ;;  %v15014_v37 = vld [vmem:[%s17703_s11 + $0xa0] sm:$0xff]   ;;  %v15018_v61 = vld [vmem:[#allocation15 + $0xc14] ss:$24 sps:$4 sm:$0xff]   ;;  %v15016_v54 = vld [vmem:[#allocation15 + $0xc10] ss:$24 sps:$4 sm:$0xff]  }
 0x9e8   :  { %v10870_v58 = vmax.f32 %v10852_v62, %v10858_v43  ;;  %v10869_v31 = vmax.f32 %v10851_v44, %v10857_v15  ;;  %v15019_v4 = vld [vmem:[%s17703_s11 + $0xa8] sm:$0xff]   ;;  %v15023_v13 = vld [vmem:[#allocation15 + $0xc44] ss:$24 sps:$4 sm:$0xff]   ;;  %v15024_v40 = vld [vmem:[%s17703_s11 + $0xb0] sm:$0xff]  }
 0x9e9   :  { %v10874_v14 = vadd.f32 %v10868_v49, %v10862_v23  ;;  %v10871_v10 = vmax.f32 %v10853_v46, %v10859_v56  ;;  %v15000_v23 = vld [vmem:[%s17703_s11 + $0xd0] sm:$0xff]   ;;  %v15021_v42 = vld [vmem:[#allocation15 + $0xc40] ss:$24 sps:$4 sm:$0xff]   ;;  %v15032_v11 = vld [vmem:[#allocation15 + $0xca4] ss:$24 sps:$4 sm:$0xff]  }
 0x9ea   :  { %v17582_v12 = vadd.f32 %v10870_v58, %v10864_v25  ;;  %10751 = vmatpush1.bf16.msra.mxu1 %v14981_v36  ;;  %v10875_v1 = vadd.f32 %v10869_v31, %v10863_v63  ;;  %v15004_v25 = vld [vmem:[%s17703_s11 + $0x90] sm:$0xff]   ;;  %v15005_v63 = vld [vmem:[%s17703_s11 + $0xd8] sm:$0xff]   ;;  %v15045_v56 = vld [vmem:[%s17703_s11 + $0x140] sm:$0xff]  }
 0x9eb   :  { %v10881_v51 = vmul.f32 0.5, %v10874_v14  ;;  %10752 = vmatprep.subr.bf16.mxu1 %v14988_v47  ;;  %v10877_v26 = vadd.f32 %v10871_v10, %v10865_v34  ;;  %v15006_v34 = vld [vmem:[#allocation15 + $0xbb0] ss:$24 sps:$4 sm:$0xff]   ;;  %v15025_v2 = vld [vmem:[%s17703_s11 + $0xf8] sm:$0xff]   ;;  %v15028_v48 = vld [vmem:[#allocation15 + $0xc74] ss:$24 sps:$4 sm:$0xff]  }
 0x9ec   :  { %v10882_v16 = vmul.f32 0.5, %v10875_v1  ;;  %v15026_v5 = vld [vmem:[#allocation15 + $0xc70] ss:$24 sps:$4 sm:$0xff]   ;;  %v15030_v22 = vld [vmem:[#allocation15 + $0xca0] ss:$24 sps:$4 sm:$0xff]  }
 0x9ed   :  { %v10884_v9 = vmul.f32 0.5, %v10877_v26  ;;  %v10887_v21 = vpack.c.bf16 %v10881_v51, %v10881_v51  ;;  %v15035_v62 = vld [vmem:[#allocation15 + $0xcd4] ss:$24 sps:$4 sm:$0xff]   ;;  %v15033_v44 = vld [vmem:[#allocation15 + $0xcd0] ss:$24 sps:$4 sm:$0xff]   ;;  %v15046_v47 = vld [vmem:[%s17703_s11 + $0x100] sm:$0xff]  }
 0x9ee   :  { %10753 = vmatpush1.bf16.msra.mxu1 %v14986_v52  ;;  %v10888_v29 = vpack.c.bf16 %v10882_v16, %v10882_v16  ;;  %v15038_v43 = vld [vmem:[#allocation15 + $0xd04] ss:$24 sps:$4 sm:$0xff]   ;;  %v15036_v15 = vld [vmem:[#allocation15 + $0xd00] ss:$24 sps:$4 sm:$0xff]   ;;  %v15041_v36 = vld [vmem:[#allocation15 + $0xd34] ss:$24 sps:$4 sm:$0xff]  }
 0x9ef   :  { %10754 = vmatprep.subr.bf16.mxu1 %v14993_v3  ;;  %v10890_v6 = vpack.c.bf16 %v10884_v9, %v10884_v9  ;;  %v15039_v46 = vld [vmem:[#allocation15 + $0xd30] ss:$24 sps:$4 sm:$0xff]   ;;  %v15042_v49 = vld [vmem:[#allocation15 + $0xd60] ss:$24 sps:$4 sm:$0xff]  }
 0x9f0   :  { %11316 = vmatprep.mubr.bf16.mxu0 %v10888_v29  ;;  %v15047_v58 = vld [vmem:[%s17703_s11 + $0x148] sm:$0xff]   ;;  %v15051_v31 = vld [vmem:[%s17703_s11 + $0x158] sm:$0xff]   ;;  %v15053_v10 = vld [vmem:[%s17703_s11 + $0x160] sm:$0xff]  }
 0x9f1   :  { %11317 = vmatmul.mubr.bf16.vlgmr.msra.gmra.mrb[184].mxu0 %v10887_v21  ;;  %v15052_v14 = vld [vmem:[%s17703_s11 + $0x118] sm:$0xff]   ;;  %v15055_v52 = vld [vmem:[%s17703_s11 + $0x168] sm:$0xff]   ;;  %v15057_v51 = vld [vmem:[%s17703_s11 + $0x170] sm:$0xff]  }
 0x9f2   :  { %12707 = vmatpush3.bf16.msra.mxu0 %v14994_v59  ;;  %10755 = vmatpush1.bf16.msra.mxu1 %v14991_v57  ;;  %v15056_v1 = vld [vmem:[%s17703_s11 + $0x128] sm:$0xff]   ;;  %v15058_v3 = vld [vmem:[%s17703_s11 + $0x130] sm:$0xff]   ;;  %v15059_v26 = vld [vmem:[%s17703_s11 + $0x178] sm:$0xff]  }
 0x9f3   :  { %11356 = vmatprep.mubr.bf16.mxu0 %v10890_v6  ;;  %12708 = vmatprep.subr.bf16.mxu0 %v14995_v24  ;;  %v15060_v16 = vld [vmem:[%s17703_s11 + $0x138] sm:$0xff]   ;;  %v12288_v24 = vld [vmem:[#allocation18] ss:$0 sm:$0xff] }
 0x9f4   :  { %10756 = vmatprep.subr.bf16.mxu1 %v14998_v55 }
 0x9f6   :  { %12709 = vmatpush3.bf16.msra.mxu0 %v14999_v38  ;;  %10757 = vmatpush1.bf16.msra.mxu1 %v14996_v39 }
 0x9f7   :  { %12710 = vmatprep.subr.bf16.mxu0 %v15000_v23  ;;  %10758 = vmatprep.subr.bf16.mxu1 %v15003_v60 }
 0x9fa   :  { %12711 = vmatpush3.bf16.msra.mxu0 %v15004_v25  ;;  %10759 = vmatpush1.bf16.msra.mxu1 %v15001_v0  ;;  %v7871_v25 = vsub.s32 4, %v17749_v50 }
 0x9fb   :  { %12712 = vmatprep.subr.bf16.mxu0 %v15005_v63  ;;  %10760 = vmatprep.subr.bf16.mxu1 %v15008_v41  ;;  %v7875_v63 = vsub.s32 5, %v17749_v50 }
 0x9fc   :  { %v7872_v41 = vrot.slane %v17572_v27, %v7871_v25 }
 0x9fe   :  { %12713 = vmatpush3.bf16.msra.mxu0 %v15009_v33  ;;  %10761 = vmatpush1.bf16.msra.mxu1 %v15006_v34  ;;  %v7876_v34 = vrot.slane %v17572_v27, %v7875_v63 }
 0x9ff   :  { %12714 = vmatprep.subr.bf16.mxu0 %v15010_v17  ;;  %10762 = vmatprep.subr.bf16.mxu1 %v15013_v53 }
 0xa02   :  { %12715 = vmatpush3.bf16.msra.mxu0 %v15014_v37  ;;  %10763 = vmatpush1.bf16.msra.mxu1 %v15011_v45 }
 0xa03   :  { %12716 = vmatprep.subr.bf16.mxu0 %v15015_v20  ;;  %10785 = vmatprep.subr.bf16.mxu1 %v15018_v61 }
 0xa05   :  { %10765 = vmatmul.mubr.bf16.vlgmr.msra.gmra.mrb[160].mxu1 %v17438_v30  ;;  %v15029_v30 = vld [vmem:[%s17703_s11 + $0xb8] sm:$0xff]  }
 0xa06   :  { %12717 = vmatpush3.bf16.msra.mxu0 %v15019_v4  ;;  %10774 = vmatprep.mubr.bf16.mxu1 %v17484_v8  ;;  %v10883_v8 = vmul.f32 0.5, %v17582_v12  ;;  %v15054_v12 = vld [vmem:[%s17703_s11 + $0x120] sm:$0xff]  }
 0xa07   :  { %10786 = vmatpush1.bf16.msra.mxu1 %v15016_v54  ;;  %12718 = vmatprep.subr.bf16.mxu0 %v15020_v32 }
 0xa08   :  { %10787 = vmatprep.subr.bf16.mxu1 %v15023_v13  ;;  %v10889_v35 = vpack.c.bf16 %v10883_v8, %v10883_v8 }
 0xa0a   :  { %12719 = vmatpush3.bf16.msra.mxu0 %v15024_v40 }
 0xa0b   :  { %10788 = vmatpush1.bf16.msra.mxu1 %v15021_v42  ;;  %12720 = vmatprep.subr.bf16.mxu0 %v15025_v2 }
 0xa0c   :  { %10789 = vmatprep.subr.bf16.mxu1 %v15028_v48 }
 0xa0d   :  { %10775 = vmatmul.mubr.bf16.gmra.mrb[164].mxu1 %v17492_v19  ;;  %v15044_v19 = vld [vmem:[#allocation15 + $0xd64] ss:$24 sps:$4 sm:$0xff]  }
 0xa0e   :  { %12721 = vmatpush3.bf16.msra.mxu0 %v15029_v30  ;;  %10817 = vmatprep.mubr.bf16.mxu1 %v17746_v7 }
 0xa0f   :  { %10790 = vmatpush1.bf16.msra.mxu1 %v15026_v5  ;;  %12728 = vmatprep.subr.bf16.mxu0 %v15045_v56 }
 0xa10   :  { %10791 = vmatprep.subr.bf16.mxu1 %v15032_v11 }
 0xa11   :  { %11357 = vmatmul.mubr.bf16.vlgmr.msra.gmra.mrb[188].mxu0 %v10889_v35 }
 0xa12   :  { %12729 = vmatpush3.bf16.msra.mxu0 %v15046_v47 }
 0xa13   :  { %10792 = vmatpush1.bf16.msra.mxu1 %v15030_v22  ;;  %12730 = vmatprep.subr.bf16.mxu0 %v15047_v58 }
 0xa14   :  { %10793 = vmatprep.subr.bf16.mxu1 %v15035_v62 }
 0xa17   :  { %10794 = vmatpush1.bf16.msra.mxu1 %v15033_v44 }
 0xa18   :  { %10795 = vmatprep.subr.bf16.mxu1 %v15038_v43 }
 0xa1b   :  { %10796 = vmatpush1.bf16.msra.mxu1 %v15036_v15 }
 0xa1c   :  { %10797 = vmatprep.subr.bf16.mxu1 %v15041_v36 }
 0xa1f   :  { %10798 = vmatpush1.bf16.msra.mxu1 %v15039_v46 }
 0xa20   :  { %10799 = vmatprep.subr.bf16.mxu1 %v15044_v19 }
 0xa23   :  { %10800 = vmatpush1.bf16.msra.mxu1 %v15042_v49 }
 0xa26   :  { %10818 = vmatmul.mubr.bf16.vlgmr.msra.gmra.mrb[160].mxu1 %v17399_v28  ;;  %v15049_v28 = vld [vmem:[%s17703_s11 + $0x150] sm:$0xff]  }
 0xa27   :  { %10827 = vmatprep.mubr.bf16.mxu1 %v17746_v7  ;;  %v15048_v7 = vld [vmem:[%s17703_s11 + $0x108] sm:$0xff]  }
 0xa28   :  { %12731 = vmatpush3.bf16.msra.mxu0 %v15048_v7 }
 0xa29   :  { %12732 = vmatprep.subr.bf16.mxu0 %v15049_v28 }
 0xa2e   :  { %10828 = vmatmul.mubr.bf16.gmra.mrb[164].mxu1 %v17504_v18  ;;  %v15050_v18 = vld [vmem:[%s17703_s11 + $0x110] sm:$0xff]  }
 0xa2f   :  { %12733 = vmatpush3.bf16.msra.mxu0 %v15050_v18 }
 0xa30   :  { %12734 = vmatprep.subr.bf16.mxu0 %v15051_v31 }
 0xa33   :  { %12735 = vmatpush3.bf16.msra.mxu0 %v15052_v14 }
 0xa34   :  { %12736 = vmatprep.subr.bf16.mxu0 %v15053_v10 }
 0xa37   :  { %12737 = vmatpush3.bf16.msra.mxu0 %v15054_v12 }
 0xa38   :  { %12738 = vmatprep.subr.bf16.mxu0 %v15055_v52 }
 0xa3b   :  { %12739 = vmatpush3.bf16.msra.mxu0 %v15056_v1 }
 0xa3c   :  { %12740 = vmatprep.subr.bf16.mxu0 %v15057_v51 }
 0xa3f   :  { %12741 = vmatpush3.bf16.msra.mxu0 %v15058_v3 }
 0xa40   :  { %12742 = vmatprep.subr.bf16.mxu0 %v15059_v26 }
 0xa43   :  { %12743 = vmatpush3.bf16.msra.mxu0 %v15060_v16 }
 0xac4   :  { %v12700_v9 = vpop.f32.mrb[184].mxu0 }
 0xac5   :  { %v12701_v29 = vpop.f32.mrb[185].mxu0 }
 0xac6   :  { %v12702_v57 = vadd.f32 %v12701_v29, %v12700_v9  ;;  %v12703_v59 = vpop.f32.mrb[186].mxu0 }
 0xac7   :  { %v12704_v21 = vpop.f32.mrb[187].mxu0 }
 0xac8   :  { %v11319_v39 = vadd.f32 %v12702_v57, %v12288_v24 }
 0xae4   :  { %v12722_v55 = vpop.f32.mrb[188].mxu0 }
 0xae5   :  { %v12723_v6 = vpop.f32.mrb[189].mxu0 }
 0xae6   :  { %v12724_v38 = vadd.f32 %v12723_v6, %v12722_v55  ;;  %v12725_v23 = vpop.f32.mrb[190].mxu0 }
 0xae7   :  { %v12726_v60 = vpop.f32.mrb[191].mxu0 }
 0xae8   :  { %v11359_v0 = vadd.f32 %v12724_v38, %v11319_v39 }
 0xaf9   :  { %v10819_v33 = vpop.f32.mrb[160].mxu1 }
 0xafa   :  { %v12996_v17 = vadd.f32 %v10819_v33, %v7872_v41  ;;  %v10821_v53 = vpop.f32.mrb[161].mxu1 }
 0xafb   :  { %v12997_v45 = vadd.f32 %v10821_v53, %v7876_v34  ;;  %v10823_v37 = vpop.f32.mrb[162].mxu1 }
 0xafc   :  { %v12998_v20 = vadd.f32 %v10823_v37, %v7872_v41  ;;  %v10825_v61 = vpop.f32.mrb[163].mxu1  ;;  %v10842_v54 = vmax.f32 %v12996_v17, 0.0 }
 0xafd   :  { %v12999_v4 = vadd.f32 %v10825_v61, %v7876_v34  ;;  %v10843_v13 = vmax.f32 %v12997_v45, 0.0 }
 0xafe   :  { %v10848_v32 = vmax.f32 %v12998_v20, 0.0 }
 0xaff   :  { %v10849_v40 = vmax.f32 %v12999_v4, 0.0 }
 0xb00   :  { %v10866_v42 = vmax.f32 %v10842_v54, %v10848_v32 }
 0xb01   :  { %v10867_v2 = vmax.f32 %v10843_v13, %v10849_v40  ;;  %v10829_v48 = vpop.f32.mrb[164].mxu1 }
 0xb02   :  { %v13000_v50 = vadd.f32 %v10829_v48, %v7872_v41  ;;  %v10831_v30 = vpop.f32.mrb[165].mxu1 }
 0xb03   :  { %v13001_v8 = vadd.f32 %v10831_v30, %v7876_v34  ;;  %v10833_v5 = vpop.f32.mrb[166].mxu1 }
 0xb04   :  { %v13002_v27 = vadd.f32 %v10833_v5, %v7872_v41  ;;  %v10835_v11 = vpop.f32.mrb[167].mxu1  ;;  %v10854_v22 = vmax.f32 %v13000_v50, 0.0 }
 0xb05   :  { %v13003_v35 = vadd.f32 %v10835_v11, %v7876_v34  ;;  %v10855_v44 = vmax.f32 %v13001_v8, 0.0 }
 0xb06   :  { %v10860_v62 = vmax.f32 %v13002_v27, 0.0 }
 0xb07   :  { %v10861_v43 = vmax.f32 %v13003_v35, 0.0 }
 0xb08   :  { %v10872_v15 = vmax.f32 %v10854_v22, %v10860_v62 }
 0xb09   :  { %v10873_v36 = vmax.f32 %v10855_v44, %v10861_v43 }
 0xb0a   :  { %v10878_v46 = vadd.f32 %v10872_v15, %v10866_v42 }
 0xb0b   :  { %v10879_v19 = vadd.f32 %v10873_v36, %v10867_v2 }
 0xb0c   :  { %v10885_v49 = vmul.f32 0.5, %v10878_v46 }
 0xb0d   :  { %v10886_v56 = vmul.f32 0.5, %v10879_v19 }
 0xb0e   :  { %v10891_v58 = vpack.c.bf16 %v10885_v49, %v10885_v49 }
 0xb0f   :  { %v10892_v47 = vpack.c.bf16 %v10886_v56, %v10886_v56 }
 0xb11   :  { %11396 = vmatprep.mubr.bf16.mxu0 %v10892_v47 }
 0xb12   :  { %11397 = vmatmul.mubr.bf16.vlgmr.msra.gmra.mrb[192].mxu0 %v10891_v58 }
 0xbe5   :  { %v12744_v7 = vpop.f32.mrb[192].mxu0 }
 0xbe6   :  { %v12745_v28 = vpop.f32.mrb[193].mxu0 }
 0xbe7   :  { %v12746_v18 = vadd.f32 %v12745_v28, %v12744_v7  ;;  %v12747_v31 = vpop.f32.mrb[194].mxu0 }
 0xbe8   :  { %v12748_v14 = vpop.f32.mrb[195].mxu0 }
 0xbe9   :  { %v11399_v10 = vadd.f32 %v12746_v18, %v11359_v0 }
 0xbeb   :  { %11405 = vst.msk [vmem:[%s17705_s13] sm:$0xff] %vm11404_vm12, %v11399_v10 }
 0xbec   :  { %11410 = vsyncpa [#allocation3], 1 }
 0xbed   :  { %11411 = vsyncpa [#allocation5], 1 }
 0xbee   :  { %11412 = vsyncpa [#allocation8], 1 }
 0xbef   :  { %11413 = vsyncpa [#allocation11], 1 }
 0xbf0   :  { %11414 = vsyncpa [#allocation14], 1 }
 0xbf1   :  { %11415 = vsyncpa [#allocation17], 1 }

</bundles_post_ra>
